<compile_context>
chip_gen: v7x
topology: tpu7x:2x2x1
jax: 0.10.0
libtpu: 0.0.40
codegen_flags: <defaults>
</compile_context>

<pallas_src>
import functools

import numpy as np

import jax
import jax.numpy as jnp
from jax.experimental import pallas as pl
from jax.experimental.pallas import tpu as pltpu


def _ceil_to(x, m):
    return ((x + m - 1) // m) * m


def _pad_last(a, target):
    pad = target - a.shape[-1]
    if pad == 0:
        return a
    return jnp.pad(a, [(0, 0)] * (a.ndim - 1) + [(0, pad)])


# ----------------------------------------------------------------------------
# Fused DBlock kernel.
#
# Activation layout: a flat, zero-padded spatial grid
#     row r = hp * Wp + wp,   hp in [0, H+4),   wp in [0, Wp)
# with the H x W interior at hp in [2, H+2), wp in [1, W+1).  A 3x3 "same"
# conv then becomes 9 MXU GEMMs whose LHS are contiguous row windows of the
# VMEM-resident block:
#     raw[q] = sum_{dy,dx} A[q + (dy+1)*Wp + (dx-1)] @ W[dy,dx],  q in [0, H*Wp)
# (raw row q <-> padded row hp = q//Wp + 2).  Columns outside the interior are
# garbage and are either masked (before feeding conv #2) or simply never
# selected by the pooling matrix.
# ----------------------------------------------------------------------------
def _dblock_kernel(x_ref, w1_ref, b1_ref, w2_ref, b2_ref, wsc_ref, bsc_ref,
                   mask_ref, pool_ref, o_ref, xact_ref, h1_ref, *,
                   H, W, Wp, pre_activation, conv_shortcut):
    f32 = jnp.float32
    HWp = H * Wp
    base = 2 * Wp            # first conv-output row inside the flat layout

    # ---- stage the conv input once: pre-activation ReLU (f32) + bf16 cast ----
    xb = x_ref[0]
    if pre_activation:
        xb = jnp.maximum(xb, 0.0)
    xact_ref[...] = xb.astype(xact_ref.dtype)

    def conv3x3(src_ref, w_ref):
        """Implicit-GEMM 3x3 conv: 9 shifted row-window GEMMs, f32 accumulation."""
        acc = None
        for t in range(9):
            dy, dx = divmod(t, 3)
            off = (dy + 1) * Wp + (dx - 1)
            part = jnp.dot(src_ref[pl.ds(off, HWp), :], w_ref[t],
                           preferred_element_type=f32)
            acc = part if acc is None else acc + part
        return acc                                         # [HWp, cp_out] f32

    def pool_dot(data_f32):
        """(avg-pool | interior-select) @ data as bf16 hi/lo split GEMMs.

        Pool entries are 0 / 0.25 / 1.0 (exact in bf16); splitting the f32
        data into bf16 hi+lo keeps ~f32 accuracy without relying on f32-MXU
        matmul precision."""
        hi = data_f32.astype(jnp.bfloat16)
        lo = (data_f32 - hi.astype(f32)).astype(jnp.bfloat16)
        p = pool_ref[...]
        return (jnp.dot(p, hi, preferred_element_type=f32)
                + jnp.dot(p, lo, preferred_element_type=f32))

    # ---- conv #1 + bias + ReLU, repacked into the zero-padded flat layout ----
    h1 = jnp.maximum(conv3x3(xact_ref, w1_ref) + b1_ref[...], 0.0) * mask_ref[...]
    zeros_halo = jnp.zeros((2 * Wp, h1_ref.shape[1]), h1_ref.dtype)
    h1_ref[pl.ds(0, 2 * Wp), :] = zeros_halo               # top halo rows
    h1_ref[pl.ds((H + 2) * Wp, 2 * Wp), :] = zeros_halo    # bottom halo rows
    h1_ref[pl.ds(base, HWp), :] = h1.astype(h1_ref.dtype)  # interior (cols masked)

    # ---- conv #2 (its bias is added after pooling; pooling is linear) --------
    h2 = conv3x3(h1_ref, w2_ref)
    main = pool_dot(h2) + b2_ref[...]

    # ---- shortcut branch (uses the *non* pre-activated input) ----------------
    x_rows = x_ref[0, pl.ds(base, HWp), :]                 # f32, exact input
    if conv_shortcut:
        sc_full = jnp.dot(x_rows.astype(jnp.bfloat16), wsc_ref[...],
                          preferred_element_type=f32)
        sc = pool_dot(sc_full) + bsc_ref[...]
    else:
        sc = pool_dot(x_rows)                              # identity shortcut

    # ---- residual add; lane-dense store (Cout padded to a multiple of 128) ---
    o_ref[0] = (main + sc).astype(o_ref.dtype)


def dblock_pallas(x_nhwc, params, *, output_channels, downsample=True,
                  pre_activation=True):
    """Fused DBlock forward.

    x_nhwc : [N, H, W, C] float32, NHWC.  C may already be zero-padded past the
             logical input-channel count (the extra channels must be zero).
    Returns  [N, Ho, Wo, Cp] float32 NHWC with Cp = output_channels rounded up
             to a multiple of 128 (pad channels are exactly zero), so stacked
             DBlocks chain without re-padding / slicing.
    """
    N, H, W, C = x_nhwc.shape
    kh, kw, cin, cout = params["first"]["w"].shape
    assert (kh, kw) == (3, 3), "only the default kernel_size=3 path is implemented"
    assert cout == output_channels

    cp_in = _ceil_to(max(C, cin), 128)
    cp_out = _ceil_to(cout, 128)

    Wp = _ceil_to(W + 2, 8)      # padded width; keeps the h1 store 8-row aligned
    Rp = (H + 4) * Wp            # flat padded rows (one extra halo row top/bottom)
    HWp = H * Wp
    conv_shortcut = (cin != output_channels) or downsample

    if downsample:
        assert H % 2 == 0 and W % 2 == 0
        Ho, Wo = H // 2, W // 2
    else:
        Ho, Wo = H, W
    R_out = Ho * Wo

    # ---- input: channel pad + flat zero-padded spatial layout (f32) ----------
    xp = _pad_last(x_nhwc.astype(jnp.float32), cp_in)
    xp = jnp.pad(xp, ((0, 0), (2, 2), (1, Wp - W - 1), (0, 0)))
    x_flat = xp.reshape(N, Rp, cp_in)

    # ---- parameters: channel-padded, 9 weight slabs, bf16 MXU operands -------
    def prep3x3(w, ci_pad):
        ci, co = w.shape[2], w.shape[3]
        w = jnp.pad(w, ((0, 0), (0, 0), (0, ci_pad - ci), (0, cp_out - co)))
        return w.reshape(9, ci_pad, cp_out).astype(jnp.bfloat16)

    w1 = prep3x3(params["first"]["w"], cp_in)
    w2 = prep3x3(params["last"]["w"], cp_out)
    wsc = jnp.pad(params["c1x1"]["w"][0, 0],
                  ((0, cp_in - cin), (0, cp_out - cout))).astype(jnp.bfloat16)
    b1 = _pad_last(params["first"]["b"], cp_out).reshape(1, cp_out).astype(jnp.float32)
    b2 = _pad_last(params["last"]["b"], cp_out).reshape(1, cp_out).astype(jnp.float32)
    bsc = _pad_last(params["c1x1"]["b"], cp_out).reshape(1, cp_out).astype(jnp.float32)

    # interior-column mask (raw conv-output pad columns must be zeroed before
    # feeding conv #2) and the pooling / interior-selection matrix.
    col = np.arange(HWp) % Wp
    mask = jnp.asarray(((col >= 1) & (col <= W)).astype(np.float32).reshape(HWp, 1))

    pmat = np.zeros((R_out, HWp), np.float32)
    if downsample:               # 2x2 average pooling, stride 2
        for i in range(Ho):
            for j in range(Wo):
                for dh in range(2):
                    for dw in range(2):
                        pmat[i * Wo + j, (2 * i + dh) * Wp + (2 * j + dw) + 1] = 0.25
    else:                        # plain interior selection (no downsampling)
        for h in range(H):
            for w in range(W):
                pmat[h * W + w, h * Wp + w + 1] = 1.0
    pool = jnp.asarray(pmat, dtype=jnp.bfloat16)   # 0 / 0.25 / 1.0: exact in bf16

    kernel = functools.partial(_dblock_kernel, H=H, W=W, Wp=Wp,
                               pre_activation=pre_activation,
                               conv_shortcut=conv_shortcut)

    # NOTE: the weight / bias / mask / pool specs use constant index_maps, so
    # Pallas DMAs them once and keeps them resident across the batch grid.
    out = pl.pallas_call(
        kernel,
        out_shape=jax.ShapeDtypeStruct((N, R_out, cp_out), jnp.float32),
        grid=(N,),
        in_specs=[
            pl.BlockSpec((1, Rp, cp_in), lambda n: (n, 0, 0)),       # x (f32)
            pl.BlockSpec((9, cp_in, cp_out), lambda n: (0, 0, 0)),   # first conv w
            pl.BlockSpec((1, cp_out), lambda n: (0, 0)),             # first conv b
            pl.BlockSpec((9, cp_out, cp_out), lambda n: (0, 0, 0)),  # last conv w
            pl.BlockSpec((1, cp_out), lambda n: (0, 0)),             # last conv b
            pl.BlockSpec((cp_in, cp_out), lambda n: (0, 0)),         # 1x1 shortcut w
            pl.BlockSpec((1, cp_out), lambda n: (0, 0)),             # 1x1 shortcut b
            pl.BlockSpec((HWp, 1), lambda n: (0, 0)),                # interior mask
            pl.BlockSpec((R_out, HWp), lambda n: (0, 0)),            # pool / select
        ],
        out_specs=pl.BlockSpec((1, R_out, cp_out), lambda n: (n, 0, 0)),
        scratch_shapes=[
            pltpu.VMEM((Rp, cp_in), jnp.bfloat16),    # pre-activated bf16 input
            pltpu.VMEM((Rp, cp_out), jnp.bfloat16),   # h1 in the flat padded layout
        ],
        compiler_params=pltpu.CompilerParams(
            dimension_semantics=("parallel",)),
    )(x_flat, w1, b1, w2, b2, wsc, bsc, mask, pool)

    return out.reshape(N, Ho, Wo, cp_out)


# ----------------------------------------------------------------------------
# Pure-JAX reference (same bf16 operand rounding, f32 accumulation)
# ----------------------------------------------------------------------------
def avg_pool2d(x):  # 2x2, stride 2; NHWC, even H/W
    N, H, W, C = x.shape
    return x.reshape(N, H // 2, 2, W // 2, 2, C).mean(axis=(2, 4))


def _conv2d_ref(x, w, b, relu_in=False, relu_out=False):
    xb = x.astype(jnp.bfloat16).astype(jnp.float32)
    if relu_in:
        xb = jnp.maximum(xb, 0.0)
    wb = w.astype(jnp.bfloat16).astype(jnp.float32)
    ph, pw = w.shape[0] // 2, w.shape[1] // 2
    y = jax.lax.conv_general_dilated(
        xb, wb, window_strides=(1, 1), padding=[(ph, ph), (pw, pw)],
        dimension_numbers=("NHWC", "HWIO", "NHWC"),
        precision=jax.lax.Precision.HIGHEST)
    y = y + b.astype(jnp.float32)
    if relu_out:
        y = jnp.maximum(y, 0.0)
    return y


def dblock_ref(x_nchw, params, *, output_channels, downsample=True,
               pre_activation=True):
    x = jnp.transpose(x_nchw, (0, 2, 3, 1))
    cin = x.shape[-1]
    h1 = _conv2d_ref(x, params["first"]["w"], params["first"]["b"],
                     relu_in=pre_activation, relu_out=True)
    h2 = _conv2d_ref(h1, params["last"]["w"], params["last"]["b"])
    if downsample:
        h2 = avg_pool2d(h2)
    if cin != output_channels or downsample:
        sc = _conv2d_ref(x, params["c1x1"]["w"], params["c1x1"]["b"])
        if downsample:
            sc = avg_pool2d(sc)
    else:
        sc = x
    return jnp.transpose(h2 + sc, (0, 3, 1, 2))


# ----------------------------------------------------------------------------
# Deterministic synthetic parameters
# ----------------------------------------------------------------------------
def _init_conv(key, kh, kw, cin, cout):
    k_w, k_b = jax.random.split(key)
    fan_in = float(kh * kw * cin)
    w = jax.random.normal(k_w, (kh, kw, cin, cout), jnp.float32) / jnp.sqrt(fan_in)
    b = jax.random.normal(k_b, (cout,), jnp.float32) * 0.01
    return {"w": w, "b": b}


def init_dblock(key, cin, cout, k=3):
    k1, k2, k3 = jax.random.split(key, 3)
    return {"c1x1": _init_conv(k1, 1, 1, cin, cout),
            "first": _init_conv(k2, k, k, cin, cout),
            "last": _init_conv(k3, k, k, cout, cout)}


# ----------------------------------------------------------------------------
# Main
# ----------------------------------------------------------------------------
if __name__ == "__main__":
    key = jax.random.PRNGKey(0)
    kp1, kp2, kx = jax.random.split(key, 3)

    B, Cin, H, W = 2, 4, 16, 16
    Cout = 48
    x = jax.random.normal(kx, (B, Cin, H, W), jnp.float32)

    p1 = init_dblock(kp1, Cin, Cout)     # DBlock(4 -> 48): downsample, conv shortcut
    p2 = init_dblock(kp2, Cout, Cout)    # DBlock(48 -> 48): no downsample, identity shortcut

    @jax.jit
    def network(x_nchw, p1, p2):
        # NCHW -> NHWC once at the network boundary; activations stay NHWC and
        # channel-padded (lane-dense) between the two DBlocks.
        x_nhwc = jnp.transpose(x_nchw, (0, 2, 3, 1))
        y1p = dblock_pallas(x_nhwc, p1, output_channels=Cout,
                            downsample=True, pre_activation=True)
        y2p = dblock_pallas(y1p, p2, output_channels=Cout,
                            downsample=False, pre_activation=True)
        to_nchw = lambda a: jnp.transpose(a[..., :Cout], (0, 3, 1, 2))
        return to_nchw(y1p), to_nchw(y2p)

    y1, y2 = jax.block_until_ready(network(x, p1, p2))

    assert y1.shape == (B, Cout, H // 2, W // 2), y1.shape
    assert y2.shape == (B, Cout, H // 2, W // 2), y2.shape
    assert bool(jnp.all(jnp.isfinite(y1))) and bool(jnp.all(jnp.isfinite(y2)))

    # Validate each block independently against the pure-JAX reference.
    r1 = dblock_ref(x, p1, output_channels=Cout, downsample=True,
                    pre_activation=True)
    r2 = dblock_ref(y1, p2, output_channels=Cout, downsample=False,
                    pre_activation=True)
    err1 = float(jnp.max(jnp.abs(y1 - r1)))
    err2 = float(jnp.max(jnp.abs(y2 - r2)))
    assert err1 < 1e-2 and err2 < 1e-2, (err1, err2)

    print("KERNEL_OK")
</pallas_src>

<mosaic_0001>
module attributes {stable_mosaic.version = 11 : i64} {
  func.func @_dblock_kernel(%arg0: i32, %arg1: memref<1x480x128xf32, #tpu.memory_space<vmem>>, %arg2: memref<9x128x128xbf16, #tpu.memory_space<vmem>>, %arg3: memref<1x128xf32, #tpu.memory_space<vmem>>, %arg4: memref<9x128x128xbf16, #tpu.memory_space<vmem>>, %arg5: memref<1x128xf32, #tpu.memory_space<vmem>>, %arg6: memref<128x128xbf16, #tpu.memory_space<vmem>>, %arg7: memref<1x128xf32, #tpu.memory_space<vmem>>, %arg8: memref<384x1xf32, #tpu.memory_space<vmem>>, %arg9: memref<64x384xbf16, #tpu.memory_space<vmem>>, %arg10: memref<1x64x128xf32, #tpu.memory_space<vmem>>, %arg11: memref<480x128xbf16, #tpu.memory_space<vmem>>, %arg12: memref<480x128xbf16, #tpu.memory_space<vmem>>) attributes {dimension_semantics = [#tpu.dimension_semantics<parallel>], iteration_bounds = array<i64: 2>, scalar_prefetch = 0 : i64, scratch_operands = 2 : i64, tpu.core_type = #tpu.core_type<tc>, window_params = [{transform_indices = @transform_0, window_bounds = array<i64: 1, 480, 128>}, {pipeline_mode = #tpu.pipeline_mode<synchronous>, transform_indices = @transform_1, window_bounds = array<i64: 9, 128, 128>}, {pipeline_mode = #tpu.pipeline_mode<synchronous>, transform_indices = @transform_2, window_bounds = array<i64: 1, 128>}, {pipeline_mode = #tpu.pipeline_mode<synchronous>, transform_indices = @transform_3, window_bounds = array<i64: 9, 128, 128>}, {pipeline_mode = #tpu.pipeline_mode<synchronous>, transform_indices = @transform_4, window_bounds = array<i64: 1, 128>}, {pipeline_mode = #tpu.pipeline_mode<synchronous>, transform_indices = @transform_5, window_bounds = array<i64: 128, 128>}, {pipeline_mode = #tpu.pipeline_mode<synchronous>, transform_indices = @transform_6, window_bounds = array<i64: 1, 128>}, {pipeline_mode = #tpu.pipeline_mode<synchronous>, transform_indices = @transform_7, window_bounds = array<i64: 384, 1>}, {pipeline_mode = #tpu.pipeline_mode<synchronous>, transform_indices = @transform_8, window_bounds = array<i64: 64, 384>}, {transform_indices = @transform_9, window_bounds = array<i64: 1, 64, 128>}]} {
    %c0 = arith.constant 0 : index
    %c0_0 = arith.constant 0 : index
    %c0_1 = arith.constant 0 : index
    %0 = vector.load %arg1[%c0, %c0_0, %c0_1] : memref<1x480x128xf32, #tpu.memory_space<vmem>>, vector<1x480x128xf32>
    %1 = vector.shape_cast %0 : vector<1x480x128xf32> to vector<480x128xf32>
    %cst = arith.constant 0.000000e+00 : f32
    %2 = vector.broadcast %cst : f32 to vector<480x128xf32>
    %3 = arith.maximumf %1, %2 : vector<480x128xf32>
    %4 = arith.truncf %3 : vector<480x128xf32> to vector<480x128xbf16>
    %c0_2 = arith.constant 0 : index
    %c0_3 = arith.constant 0 : index
    %5 = vector.load %arg11[%c0_2, %c0_3] : memref<480x128xbf16, #tpu.memory_space<vmem>>, vector<480x128xbf16>
    tpu.vector_store %arg11[%c0_2, %c0_3], %4 {strides = array<i32>} : memref<480x128xbf16, #tpu.memory_space<vmem>>, vector<480x128xbf16>,
    %c23 = arith.constant 23 : index
    %c0_4 = arith.constant 0 : index
    %6 = vector.load %arg11[%c23, %c0_4] : memref<480x128xbf16, #tpu.memory_space<vmem>>, vector<384x128xbf16>
    %c0_5 = arith.constant 0 : index
    %c0_6 = arith.constant 0 : index
    %c0_7 = arith.constant 0 : index
    %7 = vector.load %arg2[%c0_5, %c0_6, %c0_7] : memref<9x128x128xbf16, #tpu.memory_space<vmem>>, vector<1x128x128xbf16>
    %8 = vector.shape_cast %7 : vector<1x128x128xbf16> to vector<128x128xbf16>
    %cst_8 = arith.constant dense<0.000000e+00> : vector<384x128xf32>
    %9 = tpu.matmul %6, %8, %cst_8 {dimension_numbers = #tpu.dot_dimension_numbers<[1], [0], [0], [1], [0, 0, 1, 1], [], []>} : vector<384x128xbf16>, vector<128x128xbf16>, vector<384x128xf32> -> vector<384x128xf32>
    %c24 = arith.constant 24 : index
    %c0_9 = arith.constant 0 : index
    %10 = vector.load %arg11[%c24, %c0_9] : memref<480x128xbf16, #tpu.memory_space<vmem>>, vector<384x128xbf16>
    %c1 = arith.constant 1 : index
    %c0_10 = arith.constant 0 : index
    %c0_11 = arith.constant 0 : index
    %11 = vector.load %arg2[%c1, %c0_10, %c0_11] : memref<9x128x128xbf16, #tpu.memory_space<vmem>>, vector<1x128x128xbf16>
    %12 = vector.shape_cast %11 : vector<1x128x128xbf16> to vector<128x128xbf16>
    %cst_12 = arith.constant dense<0.000000e+00> : vector<384x128xf32>
    %13 = tpu.matmul %10, %12, %cst_12 {dimension_numbers = #tpu.dot_dimension_numbers<[1], [0], [0], [1], [0, 0, 1, 1], [], []>} : vector<384x128xbf16>, vector<128x128xbf16>, vector<384x128xf32> -> vector<384x128xf32>
    %14 = arith.addf %9, %13 : vector<384x128xf32>
    %c25 = arith.constant 25 : index
    %c0_13 = arith.constant 0 : index
    %15 = vector.load %arg11[%c25, %c0_13] : memref<480x128xbf16, #tpu.memory_space<vmem>>, vector<384x128xbf16>
    %c2 = arith.constant 2 : index
    %c0_14 = arith.constant 0 : index
    %c0_15 = arith.constant 0 : index
    %16 = vector.load %arg2[%c2, %c0_14, %c0_15] : memref<9x128x128xbf16, #tpu.memory_space<vmem>>, vector<1x128x128xbf16>
    %17 = vector.shape_cast %16 : vector<1x128x128xbf16> to vector<128x128xbf16>
    %cst_16 = arith.constant dense<0.000000e+00> : vector<384x128xf32>
    %18 = tpu.matmul %15, %17, %cst_16 {dimension_numbers = #tpu.dot_dimension_numbers<[1], [0], [0], [1], [0, 0, 1, 1], [], []>} : vector<384x128xbf16>, vector<128x128xbf16>, vector<384x128xf32> -> vector<384x128xf32>
    %19 = arith.addf %14, %18 : vector<384x128xf32>
    %c47 = arith.constant 47 : index
    %c0_17 = arith.constant 0 : index
    %20 = vector.load %arg11[%c47, %c0_17] : memref<480x128xbf16, #tpu.memory_space<vmem>>, vector<384x128xbf16>
    %c3 = arith.constant 3 : index
    %c0_18 = arith.constant 0 : index
    %c0_19 = arith.constant 0 : index
    %21 = vector.load %arg2[%c3, %c0_18, %c0_19] : memref<9x128x128xbf16, #tpu.memory_space<vmem>>, vector<1x128x128xbf16>
    %22 = vector.shape_cast %21 : vector<1x128x128xbf16> to vector<128x128xbf16>
    %cst_20 = arith.constant dense<0.000000e+00> : vector<384x128xf32>
    %23 = tpu.matmul %20, %22, %cst_20 {dimension_numbers = #tpu.dot_dimension_numbers<[1], [0], [0], [1], [0, 0, 1, 1], [], []>} : vector<384x128xbf16>, vector<128x128xbf16>, vector<384x128xf32> -> vector<384x128xf32>
    %24 = arith.addf %19, %23 : vector<384x128xf32>
    %c48 = arith.constant 48 : index
    %c0_21 = arith.constant 0 : index
    %25 = vector.load %arg11[%c48, %c0_21] : memref<480x128xbf16, #tpu.memory_space<vmem>>, vector<384x128xbf16>
    %c4 = arith.constant 4 : index
    %c0_22 = arith.constant 0 : index
    %c0_23 = arith.constant 0 : index
    %26 = vector.load %arg2[%c4, %c0_22, %c0_23] : memref<9x128x128xbf16, #tpu.memory_space<vmem>>, vector<1x128x128xbf16>
    %27 = vector.shape_cast %26 : vector<1x128x128xbf16> to vector<128x128xbf16>
    %cst_24 = arith.constant dense<0.000000e+00> : vector<384x128xf32>
    %28 = tpu.matmul %25, %27, %cst_24 {dimension_numbers = #tpu.dot_dimension_numbers<[1], [0], [0], [1], [0, 0, 1, 1], [], []>} : vector<384x128xbf16>, vector<128x128xbf16>, vector<384x128xf32> -> vector<384x128xf32>
    %29 = arith.addf %24, %28 : vector<384x128xf32>
    %c49 = arith.constant 49 : index
    %c0_25 = arith.constant 0 : index
    %30 = vector.load %arg11[%c49, %c0_25] : memref<480x128xbf16, #tpu.memory_space<vmem>>, vector<384x128xbf16>
    %c5 = arith.constant 5 : index
    %c0_26 = arith.constant 0 : index
    %c0_27 = arith.constant 0 : index
    %31 = vector.load %arg2[%c5, %c0_26, %c0_27] : memref<9x128x128xbf16, #tpu.memory_space<vmem>>, vector<1x128x128xbf16>
    %32 = vector.shape_cast %31 : vector<1x128x128xbf16> to vector<128x128xbf16>
    %cst_28 = arith.constant dense<0.000000e+00> : vector<384x128xf32>
    %33 = tpu.matmul %30, %32, %cst_28 {dimension_numbers = #tpu.dot_dimension_numbers<[1], [0], [0], [1], [0, 0, 1, 1], [], []>} : vector<384x128xbf16>, vector<128x128xbf16>, vector<384x128xf32> -> vector<384x128xf32>
    %34 = arith.addf %29, %33 : vector<384x128xf32>
    %c71 = arith.constant 71 : index
    %c0_29 = arith.constant 0 : index
    %35 = vector.load %arg11[%c71, %c0_29] : memref<480x128xbf16, #tpu.memory_space<vmem>>, vector<384x128xbf16>
    %c6 = arith.constant 6 : index
    %c0_30 = arith.constant 0 : index
    %c0_31 = arith.constant 0 : index
    %36 = vector.load %arg2[%c6, %c0_30, %c0_31] : memref<9x128x128xbf16, #tpu.memory_space<vmem>>, vector<1x128x128xbf16>
    %37 = vector.shape_cast %36 : vector<1x128x128xbf16> to vector<128x128xbf16>
    %cst_32 = arith.constant dense<0.000000e+00> : vector<384x128xf32>
    %38 = tpu.matmul %35, %37, %cst_32 {dimension_numbers = #tpu.dot_dimension_numbers<[1], [0], [0], [1], [0, 0, 1, 1], [], []>} : vector<384x128xbf16>, vector<128x128xbf16>, vector<384x128xf32> -> vector<384x128xf32>
    %39 = arith.addf %34, %38 : vector<384x128xf32>
    %c72 = arith.constant 72 : index
    %c0_33 = arith.constant 0 : index
    %40 = vector.load %arg11[%c72, %c0_33] : memref<480x128xbf16, #tpu.memory_space<vmem>>, vector<384x128xbf16>
    %c7 = arith.constant 7 : index
    %c0_34 = arith.constant 0 : index
    %c0_35 = arith.constant 0 : index
    %41 = vector.load %arg2[%c7, %c0_34, %c0_35] : memref<9x128x128xbf16, #tpu.memory_space<vmem>>, vector<1x128x128xbf16>
    %42 = vector.shape_cast %41 : vector<1x128x128xbf16> to vector<128x128xbf16>
    %cst_36 = arith.constant dense<0.000000e+00> : vector<384x128xf32>
    %43 = tpu.matmul %40, %42, %cst_36 {dimension_numbers = #tpu.dot_dimension_numbers<[1], [0], [0], [1], [0, 0, 1, 1], [], []>} : vector<384x128xbf16>, vector<128x128xbf16>, vector<384x128xf32> -> vector<384x128xf32>
    %44 = arith.addf %39, %43 : vector<384x128xf32>
    %c73 = arith.constant 73 : index
    %c0_37 = arith.constant 0 : index
    %45 = vector.load %arg11[%c73, %c0_37] : memref<480x128xbf16, #tpu.memory_space<vmem>>, vector<384x128xbf16>
    %c8 = arith.constant 8 : index
    %c0_38 = arith.constant 0 : index
    %c0_39 = arith.constant 0 : index
    %46 = vector.load %arg2[%c8, %c0_38, %c0_39] : memref<9x128x128xbf16, #tpu.memory_space<vmem>>, vector<1x128x128xbf16>
    %47 = vector.shape_cast %46 : vector<1x128x128xbf16> to vector<128x128xbf16>
    %cst_40 = arith.constant dense<0.000000e+00> : vector<384x128xf32>
    %48 = tpu.matmul %45, %47, %cst_40 {dimension_numbers = #tpu.dot_dimension_numbers<[1], [0], [0], [1], [0, 0, 1, 1], [], []>} : vector<384x128xbf16>, vector<128x128xbf16>, vector<384x128xf32> -> vector<384x128xf32>
    %49 = arith.addf %44, %48 : vector<384x128xf32>
    %c0_41 = arith.constant 0 : index
    %c0_42 = arith.constant 0 : index
    %50 = vector.load %arg3[%c0_41, %c0_42] : memref<1x128xf32, #tpu.memory_space<vmem>>, vector<1x128xf32>
    %51 = vector.broadcast %50 : vector<1x128xf32> to vector<384x128xf32>
    %52 = arith.addf %49, %51 : vector<384x128xf32>
    %cst_43 = arith.constant 0.000000e+00 : f32
    %53 = vector.broadcast %cst_43 : f32 to vector<384x128xf32>
    %54 = arith.maximumf %52, %53 : vector<384x128xf32>
    %c0_44 = arith.constant 0 : index
    %c0_45 = arith.constant 0 : index
    %55 = vector.load %arg8[%c0_44, %c0_45] : memref<384x1xf32, #tpu.memory_space<vmem>>, vector<384x1xf32>
    %56 = vector.broadcast %55 : vector<384x1xf32> to vector<384x128xf32>
    %57 = arith.mulf %54, %56 : vector<384x128xf32>
    %cst_46 = arith.constant 0.000000e+00 : bf16
    %58 = vector.broadcast %cst_46 : bf16 to vector<48x128xbf16>
    %c0_47 = arith.constant 0 : index
    %c0_48 = arith.constant 0 : index
    %59 = vector.load %arg12[%c0_47, %c0_48] : memref<480x128xbf16, #tpu.memory_space<vmem>>, vector<48x128xbf16>
    tpu.vector_store %arg12[%c0_47, %c0_48], %58 {strides = array<i32>} : memref<480x128xbf16, #tpu.memory_space<vmem>>, vector<48x128xbf16>,
    %c432 = arith.constant 432 : index
    %c0_49 = arith.constant 0 : index
    %60 = vector.load %arg12[%c432, %c0_49] : memref<480x128xbf16, #tpu.memory_space<vmem>>, vector<48x128xbf16>
    tpu.vector_store %arg12[%c432, %c0_49], %58 {strides = array<i32>} : memref<480x128xbf16, #tpu.memory_space<vmem>>, vector<48x128xbf16>,
    %61 = arith.truncf %57 : vector<384x128xf32> to vector<384x128xbf16>
    %c48_50 = arith.constant 48 : index
    %c0_51 = arith.constant 0 : index
    %62 = vector.load %arg12[%c48_50, %c0_51] : memref<480x128xbf16, #tpu.memory_space<vmem>>, vector<384x128xbf16>
    tpu.vector_store %arg12[%c48_50, %c0_51], %61 {strides = array<i32>} : memref<480x128xbf16, #tpu.memory_space<vmem>>, vector<384x128xbf16>,
    %c23_52 = arith.constant 23 : index
    %c0_53 = arith.constant 0 : index
    %63 = vector.load %arg12[%c23_52, %c0_53] : memref<480x128xbf16, #tpu.memory_space<vmem>>, vector<384x128xbf16>
    %c0_54 = arith.constant 0 : index
    %c0_55 = arith.constant 0 : index
    %c0_56 = arith.constant 0 : index
    %64 = vector.load %arg4[%c0_54, %c0_55, %c0_56] : memref<9x128x128xbf16, #tpu.memory_space<vmem>>, vector<1x128x128xbf16>
    %65 = vector.shape_cast %64 : vector<1x128x128xbf16> to vector<128x128xbf16>
    %cst_57 = arith.constant dense<0.000000e+00> : vector<384x128xf32>
    %66 = tpu.matmul %63, %65, %cst_57 {dimension_numbers = #tpu.dot_dimension_numbers<[1], [0], [0], [1], [0, 0, 1, 1], [], []>} : vector<384x128xbf16>, vector<128x128xbf16>, vector<384x128xf32> -> vector<384x128xf32>
    %c24_58 = arith.constant 24 : index
    %c0_59 = arith.constant 0 : index
    %67 = vector.load %arg12[%c24_58, %c0_59] : memref<480x128xbf16, #tpu.memory_space<vmem>>, vector<384x128xbf16>
    %c1_60 = arith.constant 1 : index
    %c0_61 = arith.constant 0 : index
    %c0_62 = arith.constant 0 : index
    %68 = vector.load %arg4[%c1_60, %c0_61, %c0_62] : memref<9x128x128xbf16, #tpu.memory_space<vmem>>, vector<1x128x128xbf16>
    %69 = vector.shape_cast %68 : vector<1x128x128xbf16> to vector<128x128xbf16>
    %cst_63 = arith.constant dense<0.000000e+00> : vector<384x128xf32>
    %70 = tpu.matmul %67, %69, %cst_63 {dimension_numbers = #tpu.dot_dimension_numbers<[1], [0], [0], [1], [0, 0, 1, 1], [], []>} : vector<384x128xbf16>, vector<128x128xbf16>, vector<384x128xf32> -> vector<384x128xf32>
    %71 = arith.addf %66, %70 : vector<384x128xf32>
    %c25_64 = arith.constant 25 : index
    %c0_65 = arith.constant 0 : index
    %72 = vector.load %arg12[%c25_64, %c0_65] : memref<480x128xbf16, #tpu.memory_space<vmem>>, vector<384x128xbf16>
    %c2_66 = arith.constant 2 : index
    %c0_67 = arith.constant 0 : index
    %c0_68 = arith.constant 0 : index
    %73 = vector.load %arg4[%c2_66, %c0_67, %c0_68] : memref<9x128x128xbf16, #tpu.memory_space<vmem>>, vector<1x128x128xbf16>
    %74 = vector.shape_cast %73 : vector<1x128x128xbf16> to vector<128x128xbf16>
    %cst_69 = arith.constant dense<0.000000e+00> : vector<384x128xf32>
    %75 = tpu.matmul %72, %74, %cst_69 {dimension_numbers = #tpu.dot_dimension_numbers<[1], [0], [0], [1], [0, 0, 1, 1], [], []>} : vector<384x128xbf16>, vector<128x128xbf16>, vector<384x128xf32> -> vector<384x128xf32>
    %76 = arith.addf %71, %75 : vector<384x128xf32>
    %c47_70 = arith.constant 47 : index
    %c0_71 = arith.constant 0 : index
    %77 = vector.load %arg12[%c47_70, %c0_71] : memref<480x128xbf16, #tpu.memory_space<vmem>>, vector<384x128xbf16>
    %c3_72 = arith.constant 3 : index
    %c0_73 = arith.constant 0 : index
    %c0_74 = arith.constant 0 : index
    %78 = vector.load %arg4[%c3_72, %c0_73, %c0_74] : memref<9x128x128xbf16, #tpu.memory_space<vmem>>, vector<1x128x128xbf16>
    %79 = vector.shape_cast %78 : vector<1x128x128xbf16> to vector<128x128xbf16>
    %cst_75 = arith.constant dense<0.000000e+00> : vector<384x128xf32>
    %80 = tpu.matmul %77, %79, %cst_75 {dimension_numbers = #tpu.dot_dimension_numbers<[1], [0], [0], [1], [0, 0, 1, 1], [], []>} : vector<384x128xbf16>, vector<128x128xbf16>, vector<384x128xf32> -> vector<384x128xf32>
    %81 = arith.addf %76, %80 : vector<384x128xf32>
    %c48_76 = arith.constant 48 : index
    %c0_77 = arith.constant 0 : index
    %82 = vector.load %arg12[%c48_76, %c0_77] : memref<480x128xbf16, #tpu.memory_space<vmem>>, vector<384x128xbf16>
    %c4_78 = arith.constant 4 : index
    %c0_79 = arith.constant 0 : index
    %c0_80 = arith.constant 0 : index
    %83 = vector.load %arg4[%c4_78, %c0_79, %c0_80] : memref<9x128x128xbf16, #tpu.memory_space<vmem>>, vector<1x128x128xbf16>
    %84 = vector.shape_cast %83 : vector<1x128x128xbf16> to vector<128x128xbf16>
    %cst_81 = arith.constant dense<0.000000e+00> : vector<384x128xf32>
    %85 = tpu.matmul %82, %84, %cst_81 {dimension_numbers = #tpu.dot_dimension_numbers<[1], [0], [0], [1], [0, 0, 1, 1], [], []>} : vector<384x128xbf16>, vector<128x128xbf16>, vector<384x128xf32> -> vector<384x128xf32>
    %86 = arith.addf %81, %85 : vector<384x128xf32>
    %c49_82 = arith.constant 49 : index
    %c0_83 = arith.constant 0 : index
    %87 = vector.load %arg12[%c49_82, %c0_83] : memref<480x128xbf16, #tpu.memory_space<vmem>>, vector<384x128xbf16>
    %c5_84 = arith.constant 5 : index
    %c0_85 = arith.constant 0 : index
    %c0_86 = arith.constant 0 : index
    %88 = vector.load %arg4[%c5_84, %c0_85, %c0_86] : memref<9x128x128xbf16, #tpu.memory_space<vmem>>, vector<1x128x128xbf16>
    %89 = vector.shape_cast %88 : vector<1x128x128xbf16> to vector<128x128xbf16>
    %cst_87 = arith.constant dense<0.000000e+00> : vector<384x128xf32>
    %90 = tpu.matmul %87, %89, %cst_87 {dimension_numbers = #tpu.dot_dimension_numbers<[1], [0], [0], [1], [0, 0, 1, 1], [], []>} : vector<384x128xbf16>, vector<128x128xbf16>, vector<384x128xf32> -> vector<384x128xf32>
    %91 = arith.addf %86, %90 : vector<384x128xf32>
    %c71_88 = arith.constant 71 : index
    %c0_89 = arith.constant 0 : index
    %92 = vector.load %arg12[%c71_88, %c0_89] : memref<480x128xbf16, #tpu.memory_space<vmem>>, vector<384x128xbf16>
    %c6_90 = arith.constant 6 : index
    %c0_91 = arith.constant 0 : index
    %c0_92 = arith.constant 0 : index
    %93 = vector.load %arg4[%c6_90, %c0_91, %c0_92] : memref<9x128x128xbf16, #tpu.memory_space<vmem>>, vector<1x128x128xbf16>
    %94 = vector.shape_cast %93 : vector<1x128x128xbf16> to vector<128x128xbf16>
    %cst_93 = arith.constant dense<0.000000e+00> : vector<384x128xf32>
    %95 = tpu.matmul %92, %94, %cst_93 {dimension_numbers = #tpu.dot_dimension_numbers<[1], [0], [0], [1], [0, 0, 1, 1], [], []>} : vector<384x128xbf16>, vector<128x128xbf16>, vector<384x128xf32> -> vector<384x128xf32>
    %96 = arith.addf %91, %95 : vector<384x128xf32>
    %c72_94 = arith.constant 72 : index
    %c0_95 = arith.constant 0 : index
    %97 = vector.load %arg12[%c72_94, %c0_95] : memref<480x128xbf16, #tpu.memory_space<vmem>>, vector<384x128xbf16>
    %c7_96 = arith.constant 7 : index
    %c0_97 = arith.constant 0 : index
    %c0_98 = arith.constant 0 : index
    %98 = vector.load %arg4[%c7_96, %c0_97, %c0_98] : memref<9x128x128xbf16, #tpu.memory_space<vmem>>, vector<1x128x128xbf16>
    %99 = vector.shape_cast %98 : vector<1x128x128xbf16> to vector<128x128xbf16>
    %cst_99 = arith.constant dense<0.000000e+00> : vector<384x128xf32>
    %100 = tpu.matmul %97, %99, %cst_99 {dimension_numbers = #tpu.dot_dimension_numbers<[1], [0], [0], [1], [0, 0, 1, 1], [], []>} : vector<384x128xbf16>, vector<128x128xbf16>, vector<384x128xf32> -> vector<384x128xf32>
    %101 = arith.addf %96, %100 : vector<384x128xf32>
    %c73_100 = arith.constant 73 : index
    %c0_101 = arith.constant 0 : index
    %102 = vector.load %arg12[%c73_100, %c0_101] : memref<480x128xbf16, #tpu.memory_space<vmem>>, vector<384x128xbf16>
    %c8_102 = arith.constant 8 : index
    %c0_103 = arith.constant 0 : index
    %c0_104 = arith.constant 0 : index
    %103 = vector.load %arg4[%c8_102, %c0_103, %c0_104] : memref<9x128x128xbf16, #tpu.memory_space<vmem>>, vector<1x128x128xbf16>
    %104 = vector.shape_cast %103 : vector<1x128x128xbf16> to vector<128x128xbf16>
    %cst_105 = arith.constant dense<0.000000e+00> : vector<384x128xf32>
    %105 = tpu.matmul %102, %104, %cst_105 {dimension_numbers = #tpu.dot_dimension_numbers<[1], [0], [0], [1], [0, 0, 1, 1], [], []>} : vector<384x128xbf16>, vector<128x128xbf16>, vector<384x128xf32> -> vector<384x128xf32>
    %106 = arith.addf %101, %105 : vector<384x128xf32>
    %107 = arith.truncf %106 : vector<384x128xf32> to vector<384x128xbf16>
    %108 = arith.extf %107 : vector<384x128xbf16> to vector<384x128xf32>
    %109 = arith.subf %106, %108 : vector<384x128xf32>
    %110 = arith.truncf %109 : vector<384x128xf32> to vector<384x128xbf16>
    %c0_106 = arith.constant 0 : index
    %c0_107 = arith.constant 0 : index
    %111 = vector.load %arg9[%c0_106, %c0_107] : memref<64x384xbf16, #tpu.memory_space<vmem>>, vector<64x384xbf16>
    %cst_108 = arith.constant dense<0.000000e+00> : vector<64x128xf32>
    %112 = tpu.matmul %111, %107, %cst_108 {dimension_numbers = #tpu.dot_dimension_numbers<[1], [0], [0], [1], [0, 0, 1, 1], [], []>} : vector<64x384xbf16>, vector<384x128xbf16>, vector<64x128xf32> -> vector<64x128xf32>
    %cst_109 = arith.constant dense<0.000000e+00> : vector<64x128xf32>
    %113 = tpu.matmul %111, %110, %cst_109 {dimension_numbers = #tpu.dot_dimension_numbers<[1], [0], [0], [1], [0, 0, 1, 1], [], []>} : vector<64x384xbf16>, vector<384x128xbf16>, vector<64x128xf32> -> vector<64x128xf32>
    %114 = arith.addf %112, %113 : vector<64x128xf32>
    %c0_110 = arith.constant 0 : index
    %c0_111 = arith.constant 0 : index
    %115 = vector.load %arg5[%c0_110, %c0_111] : memref<1x128xf32, #tpu.memory_space<vmem>>, vector<1x128xf32>
    %116 = vector.broadcast %115 : vector<1x128xf32> to vector<64x128xf32>
    %117 = arith.addf %114, %116 : vector<64x128xf32>
    %c0_112 = arith.constant 0 : index
    %c48_113 = arith.constant 48 : index
    %c0_114 = arith.constant 0 : index
    %118 = vector.load %arg1[%c0_112, %c48_113, %c0_114] : memref<1x480x128xf32, #tpu.memory_space<vmem>>, vector<1x384x128xf32>
    %119 = vector.shape_cast %118 : vector<1x384x128xf32> to vector<384x128xf32>
    %120 = arith.truncf %119 : vector<384x128xf32> to vector<384x128xbf16>
    %c0_115 = arith.constant 0 : index
    %c0_116 = arith.constant 0 : index
    %121 = vector.load %arg6[%c0_115, %c0_116] : memref<128x128xbf16, #tpu.memory_space<vmem>>, vector<128x128xbf16>
    %cst_117 = arith.constant dense<0.000000e+00> : vector<384x128xf32>
    %122 = tpu.matmul %120, %121, %cst_117 {dimension_numbers = #tpu.dot_dimension_numbers<[1], [0], [0], [1], [0, 0, 1, 1], [], []>} : vector<384x128xbf16>, vector<128x128xbf16>, vector<384x128xf32> -> vector<384x128xf32>
    %123 = arith.truncf %122 : vector<384x128xf32> to vector<384x128xbf16>
    %124 = arith.extf %123 : vector<384x128xbf16> to vector<384x128xf32>
    %125 = arith.subf %122, %124 : vector<384x128xf32>
    %126 = arith.truncf %125 : vector<384x128xf32> to vector<384x128xbf16>
    %c0_118 = arith.constant 0 : index
    %c0_119 = arith.constant 0 : index
    %127 = vector.load %arg9[%c0_118, %c0_119] : memref<64x384xbf16, #tpu.memory_space<vmem>>, vector<64x384xbf16>
    %cst_120 = arith.constant dense<0.000000e+00> : vector<64x128xf32>
    %128 = tpu.matmul %127, %123, %cst_120 {dimension_numbers = #tpu.dot_dimension_numbers<[1], [0], [0], [1], [0, 0, 1, 1], [], []>} : vector<64x384xbf16>, vector<384x128xbf16>, vector<64x128xf32> -> vector<64x128xf32>
    %cst_121 = arith.constant dense<0.000000e+00> : vector<64x128xf32>
    %129 = tpu.matmul %127, %126, %cst_121 {dimension_numbers = #tpu.dot_dimension_numbers<[1], [0], [0], [1], [0, 0, 1, 1], [], []>} : vector<64x384xbf16>, vector<384x128xbf16>, vector<64x128xf32> -> vector<64x128xf32>
    %130 = arith.addf %128, %129 : vector<64x128xf32>
    %c0_122 = arith.constant 0 : index
    %c0_123 = arith.constant 0 : index
    %131 = vector.load %arg7[%c0_122, %c0_123] : memref<1x128xf32, #tpu.memory_space<vmem>>, vector<1x128xf32>
    %132 = vector.broadcast %131 : vector<1x128xf32> to vector<64x128xf32>
    %133 = arith.addf %130, %132 : vector<64x128xf32>
    %134 = arith.addf %117, %133 : vector<64x128xf32>
    %c0_124 = arith.constant 0 : index
    %c0_125 = arith.constant 0 : index
    %c0_126 = arith.constant 0 : index
    %135 = vector.load %arg10[%c0_124, %c0_125, %c0_126] : memref<1x64x128xf32, #tpu.memory_space<vmem>>, vector<1x64x128xf32>
    %136 = vector.shape_cast %135 : vector<1x64x128xf32> to vector<64x128xf32>
    %137 = vector.shape_cast %134 : vector<64x128xf32> to vector<1x64x128xf32>
    tpu.vector_store %arg10[%c0_124, %c0_125, %c0_126], %137 {strides = array<i32>} : memref<1x64x128xf32, #tpu.memory_space<vmem>>, vector<1x64x128xf32>,
    return
  }
  func.func @transform_0(%arg0: i32) -> (i32, i32, i32) {
    %c0_i32 = arith.constant 0 : i32
    %c0_i32_0 = arith.constant 0 : i32
    %c0_i32_1 = arith.constant 0 : i32
    return %arg0, %c0_i32, %c0_i32_0 : i32, i32, i32
  }
  func.func @transform_1(%arg0: i32) -> (i32, i32, i32) {
    %c0_i32 = arith.constant 0 : i32
    %c0_i32_0 = arith.constant 0 : i32
    %c0_i32_1 = arith.constant 0 : i32
    %c0_i32_2 = arith.constant 0 : i32
    return %c0_i32, %c0_i32_0, %c0_i32_1 : i32, i32, i32
  }
  func.func @transform_2(%arg0: i32) -> (i32, i32) {
    %c0_i32 = arith.constant 0 : i32
    %c0_i32_0 = arith.constant 0 : i32
    %c0_i32_1 = arith.constant 0 : i32
    return %c0_i32, %c0_i32_0 : i32, i32
  }
  func.func @transform_3(%arg0: i32) -> (i32, i32, i32) {
    %c0_i32 = arith.constant 0 : i32
    %c0_i32_0 = arith.constant 0 : i32
    %c0_i32_1 = arith.constant 0 : i32
    %c0_i32_2 = arith.constant 0 : i32
    return %c0_i32, %c0_i32_0, %c0_i32_1 : i32, i32, i32
  }
  func.func @transform_4(%arg0: i32) -> (i32, i32) {
    %c0_i32 = arith.constant 0 : i32
    %c0_i32_0 = arith.constant 0 : i32
    %c0_i32_1 = arith.constant 0 : i32
    return %c0_i32, %c0_i32_0 : i32, i32
  }
  func.func @transform_5(%arg0: i32) -> (i32, i32) {
    %c0_i32 = arith.constant 0 : i32
    %c0_i32_0 = arith.constant 0 : i32
    %c0_i32_1 = arith.constant 0 : i32
    return %c0_i32, %c0_i32_0 : i32, i32
  }
  func.func @transform_6(%arg0: i32) -> (i32, i32) {
    %c0_i32 = arith.constant 0 : i32
    %c0_i32_0 = arith.constant 0 : i32
    %c0_i32_1 = arith.constant 0 : i32
    return %c0_i32, %c0_i32_0 : i32, i32
  }
  func.func @transform_7(%arg0: i32) -> (i32, i32) {
    %c0_i32 = arith.constant 0 : i32
    %c0_i32_0 = arith.constant 0 : i32
    %c0_i32_1 = arith.constant 0 : i32
    return %c0_i32, %c0_i32_0 : i32, i32
  }
  func.func @transform_8(%arg0: i32) -> (i32, i32) {
    %c0_i32 = arith.constant 0 : i32
    %c0_i32_0 = arith.constant 0 : i32
    %c0_i32_1 = arith.constant 0 : i32
    return %c0_i32, %c0_i32_0 : i32, i32
  }
  func.func @transform_9(%arg0: i32) -> (i32, i32, i32) {
    %c0_i32 = arith.constant 0 : i32
    %c0_i32_0 = arith.constant 0 : i32
    %c0_i32_1 = arith.constant 0 : i32
    return %arg0, %c0_i32, %c0_i32_0 : i32, i32, i32
  }
}

module attributes {stable_mosaic.version = 11 : i64} {
  func.func @_dblock_kernel(%arg0: i32, %arg1: memref<1x192x128xf32, #tpu.memory_space<vmem>>, %arg2: memref<9x128x128xbf16, #tpu.memory_space<vmem>>, %arg3: memref<1x128xf32, #tpu.memory_space<vmem>>, %arg4: memref<9x128x128xbf16, #tpu.memory_space<vmem>>, %arg5: memref<1x128xf32, #tpu.memory_space<vmem>>, %arg6: memref<128x128xbf16, #tpu.memory_space<vmem>>, %arg7: memref<1x128xf32, #tpu.memory_space<vmem>>, %arg8: memref<128x1xf32, #tpu.memory_space<vmem>>, %arg9: memref<64x128xbf16, #tpu.memory_space<vmem>>, %arg10: memref<1x64x128xf32, #tpu.memory_space<vmem>>, %arg11: memref<192x128xbf16, #tpu.memory_space<vmem>>, %arg12: memref<192x128xbf16, #tpu.memory_space<vmem>>) attributes {dimension_semantics = [#tpu.dimension_semantics<parallel>], iteration_bounds = array<i64: 2>, scalar_prefetch = 0 : i64, scratch_operands = 2 : i64, tpu.core_type = #tpu.core_type<tc>, window_params = [{transform_indices = @transform_0, window_bounds = array<i64: 1, 192, 128>}, {pipeline_mode = #tpu.pipeline_mode<synchronous>, transform_indices = @transform_1, window_bounds = array<i64: 9, 128, 128>}, {pipeline_mode = #tpu.pipeline_mode<synchronous>, transform_indices = @transform_2, window_bounds = array<i64: 1, 128>}, {pipeline_mode = #tpu.pipeline_mode<synchronous>, transform_indices = @transform_3, window_bounds = array<i64: 9, 128, 128>}, {pipeline_mode = #tpu.pipeline_mode<synchronous>, transform_indices = @transform_4, window_bounds = array<i64: 1, 128>}, {pipeline_mode = #tpu.pipeline_mode<synchronous>, transform_indices = @transform_5, window_bounds = array<i64: 128, 128>}, {pipeline_mode = #tpu.pipeline_mode<synchronous>, transform_indices = @transform_6, window_bounds = array<i64: 1, 128>}, {pipeline_mode = #tpu.pipeline_mode<synchronous>, transform_indices = @transform_7, window_bounds = array<i64: 128, 1>}, {pipeline_mode = #tpu.pipeline_mode<synchronous>, transform_indices = @transform_8, window_bounds = array<i64: 64, 128>}, {transform_indices = @transform_9, window_bounds = array<i64: 1, 64, 128>}]} {
    %c0 = arith.constant 0 : index
    %c0_0 = arith.constant 0 : index
    %c0_1 = arith.constant 0 : index
    %0 = vector.load %arg1[%c0, %c0_0, %c0_1] : memref<1x192x128xf32, #tpu.memory_space<vmem>>, vector<1x192x128xf32>
    %1 = vector.shape_cast %0 : vector<1x192x128xf32> to vector<192x128xf32>
    %cst = arith.constant 0.000000e+00 : f32
    %2 = vector.broadcast %cst : f32 to vector<192x128xf32>
    %3 = arith.maximumf %1, %2 : vector<192x128xf32>
    %4 = arith.truncf %3 : vector<192x128xf32> to vector<192x128xbf16>
    %c0_2 = arith.constant 0 : index
    %c0_3 = arith.constant 0 : index
    %5 = vector.load %arg11[%c0_2, %c0_3] : memref<192x128xbf16, #tpu.memory_space<vmem>>, vector<192x128xbf16>
    tpu.vector_store %arg11[%c0_2, %c0_3], %4 {strides = array<i32>} : memref<192x128xbf16, #tpu.memory_space<vmem>>, vector<192x128xbf16>,
    %c15 = arith.constant 15 : index
    %c0_4 = arith.constant 0 : index
    %6 = vector.load %arg11[%c15, %c0_4] : memref<192x128xbf16, #tpu.memory_space<vmem>>, vector<128x128xbf16>
    %c0_5 = arith.constant 0 : index
    %c0_6 = arith.constant 0 : index
    %c0_7 = arith.constant 0 : index
    %7 = vector.load %arg2[%c0_5, %c0_6, %c0_7] : memref<9x128x128xbf16, #tpu.memory_space<vmem>>, vector<1x128x128xbf16>
    %8 = vector.shape_cast %7 : vector<1x128x128xbf16> to vector<128x128xbf16>
    %cst_8 = arith.constant dense<0.000000e+00> : vector<128x128xf32>
    %9 = tpu.matmul %6, %8, %cst_8 {dimension_numbers = #tpu.dot_dimension_numbers<[1], [0], [0], [1], [0, 0, 1, 1], [], []>} : vector<128x128xbf16>, vector<128x128xbf16>, vector<128x128xf32> -> vector<128x128xf32>
    %c16 = arith.constant 16 : index
    %c0_9 = arith.constant 0 : index
    %10 = vector.load %arg11[%c16, %c0_9] : memref<192x128xbf16, #tpu.memory_space<vmem>>, vector<128x128xbf16>
    %c1 = arith.constant 1 : index
    %c0_10 = arith.constant 0 : index
    %c0_11 = arith.constant 0 : index
    %11 = vector.load %arg2[%c1, %c0_10, %c0_11] : memref<9x128x128xbf16, #tpu.memory_space<vmem>>, vector<1x128x128xbf16>
    %12 = vector.shape_cast %11 : vector<1x128x128xbf16> to vector<128x128xbf16>
    %cst_12 = arith.constant dense<0.000000e+00> : vector<128x128xf32>
    %13 = tpu.matmul %10, %12, %cst_12 {dimension_numbers = #tpu.dot_dimension_numbers<[1], [0], [0], [1], [0, 0, 1, 1], [], []>} : vector<128x128xbf16>, vector<128x128xbf16>, vector<128x128xf32> -> vector<128x128xf32>
    %14 = arith.addf %9, %13 : vector<128x128xf32>
    %c17 = arith.constant 17 : index
    %c0_13 = arith.constant 0 : index
    %15 = vector.load %arg11[%c17, %c0_13] : memref<192x128xbf16, #tpu.memory_space<vmem>>, vector<128x128xbf16>
    %c2 = arith.constant 2 : index
    %c0_14 = arith.constant 0 : index
    %c0_15 = arith.constant 0 : index
    %16 = vector.load %arg2[%c2, %c0_14, %c0_15] : memref<9x128x128xbf16, #tpu.memory_space<vmem>>, vector<1x128x128xbf16>
    %17 = vector.shape_cast %16 : vector<1x128x128xbf16> to vector<128x128xbf16>
    %cst_16 = arith.constant dense<0.000000e+00> : vector<128x128xf32>
    %18 = tpu.matmul %15, %17, %cst_16 {dimension_numbers = #tpu.dot_dimension_numbers<[1], [0], [0], [1], [0, 0, 1, 1], [], []>} : vector<128x128xbf16>, vector<128x128xbf16>, vector<128x128xf32> -> vector<128x128xf32>
    %19 = arith.addf %14, %18 : vector<128x128xf32>
    %c31 = arith.constant 31 : index
    %c0_17 = arith.constant 0 : index
    %20 = vector.load %arg11[%c31, %c0_17] : memref<192x128xbf16, #tpu.memory_space<vmem>>, vector<128x128xbf16>
    %c3 = arith.constant 3 : index
    %c0_18 = arith.constant 0 : index
    %c0_19 = arith.constant 0 : index
    %21 = vector.load %arg2[%c3, %c0_18, %c0_19] : memref<9x128x128xbf16, #tpu.memory_space<vmem>>, vector<1x128x128xbf16>
    %22 = vector.shape_cast %21 : vector<1x128x128xbf16> to vector<128x128xbf16>
    %cst_20 = arith.constant dense<0.000000e+00> : vector<128x128xf32>
    %23 = tpu.matmul %20, %22, %cst_20 {dimension_numbers = #tpu.dot_dimension_numbers<[1], [0], [0], [1], [0, 0, 1, 1], [], []>} : vector<128x128xbf16>, vector<128x128xbf16>, vector<128x128xf32> -> vector<128x128xf32>
    %24 = arith.addf %19, %23 : vector<128x128xf32>
    %c32 = arith.constant 32 : index
    %c0_21 = arith.constant 0 : index
    %25 = vector.load %arg11[%c32, %c0_21] : memref<192x128xbf16, #tpu.memory_space<vmem>>, vector<128x128xbf16>
    %c4 = arith.constant 4 : index
    %c0_22 = arith.constant 0 : index
    %c0_23 = arith.constant 0 : index
    %26 = vector.load %arg2[%c4, %c0_22, %c0_23] : memref<9x128x128xbf16, #tpu.memory_space<vmem>>, vector<1x128x128xbf16>
    %27 = vector.shape_cast %26 : vector<1x128x128xbf16> to vector<128x128xbf16>
    %cst_24 = arith.constant dense<0.000000e+00> : vector<128x128xf32>
    %28 = tpu.matmul %25, %27, %cst_24 {dimension_numbers = #tpu.dot_dimension_numbers<[1], [0], [0], [1], [0, 0, 1, 1], [], []>} : vector<128x128xbf16>, vector<128x128xbf16>, vector<128x128xf32> -> vector<128x128xf32>
    %29 = arith.addf %24, %28 : vector<128x128xf32>
    %c33 = arith.constant 33 : index
    %c0_25 = arith.constant 0 : index
    %30 = vector.load %arg11[%c33, %c0_25] : memref<192x128xbf16, #tpu.memory_space<vmem>>, vector<128x128xbf16>
    %c5 = arith.constant 5 : index
    %c0_26 = arith.constant 0 : index
    %c0_27 = arith.constant 0 : index
    %31 = vector.load %arg2[%c5, %c0_26, %c0_27] : memref<9x128x128xbf16, #tpu.memory_space<vmem>>, vector<1x128x128xbf16>
    %32 = vector.shape_cast %31 : vector<1x128x128xbf16> to vector<128x128xbf16>
    %cst_28 = arith.constant dense<0.000000e+00> : vector<128x128xf32>
    %33 = tpu.matmul %30, %32, %cst_28 {dimension_numbers = #tpu.dot_dimension_numbers<[1], [0], [0], [1], [0, 0, 1, 1], [], []>} : vector<128x128xbf16>, vector<128x128xbf16>, vector<128x128xf32> -> vector<128x128xf32>
    %34 = arith.addf %29, %33 : vector<128x128xf32>
    %c47 = arith.constant 47 : index
    %c0_29 = arith.constant 0 : index
    %35 = vector.load %arg11[%c47, %c0_29] : memref<192x128xbf16, #tpu.memory_space<vmem>>, vector<128x128xbf16>
    %c6 = arith.constant 6 : index
    %c0_30 = arith.constant 0 : index
    %c0_31 = arith.constant 0 : index
    %36 = vector.load %arg2[%c6, %c0_30, %c0_31] : memref<9x128x128xbf16, #tpu.memory_space<vmem>>, vector<1x128x128xbf16>
    %37 = vector.shape_cast %36 : vector<1x128x128xbf16> to vector<128x128xbf16>
    %cst_32 = arith.constant dense<0.000000e+00> : vector<128x128xf32>
    %38 = tpu.matmul %35, %37, %cst_32 {dimension_numbers = #tpu.dot_dimension_numbers<[1], [0], [0], [1], [0, 0, 1, 1], [], []>} : vector<128x128xbf16>, vector<128x128xbf16>, vector<128x128xf32> -> vector<128x128xf32>
    %39 = arith.addf %34, %38 : vector<128x128xf32>
    %c48 = arith.constant 48 : index
    %c0_33 = arith.constant 0 : index
    %40 = vector.load %arg11[%c48, %c0_33] : memref<192x128xbf16, #tpu.memory_space<vmem>>, vector<128x128xbf16>
    %c7 = arith.constant 7 : index
    %c0_34 = arith.constant 0 : index
    %c0_35 = arith.constant 0 : index
    %41 = vector.load %arg2[%c7, %c0_34, %c0_35] : memref<9x128x128xbf16, #tpu.memory_space<vmem>>, vector<1x128x128xbf16>
    %42 = vector.shape_cast %41 : vector<1x128x128xbf16> to vector<128x128xbf16>
    %cst_36 = arith.constant dense<0.000000e+00> : vector<128x128xf32>
    %43 = tpu.matmul %40, %42, %cst_36 {dimension_numbers = #tpu.dot_dimension_numbers<[1], [0], [0], [1], [0, 0, 1, 1], [], []>} : vector<128x128xbf16>, vector<128x128xbf16>, vector<128x128xf32> -> vector<128x128xf32>
    %44 = arith.addf %39, %43 : vector<128x128xf32>
    %c49 = arith.constant 49 : index
    %c0_37 = arith.constant 0 : index
    %45 = vector.load %arg11[%c49, %c0_37] : memref<192x128xbf16, #tpu.memory_space<vmem>>, vector<128x128xbf16>
    %c8 = arith.constant 8 : index
    %c0_38 = arith.constant 0 : index
    %c0_39 = arith.constant 0 : index
    %46 = vector.load %arg2[%c8, %c0_38, %c0_39] : memref<9x128x128xbf16, #tpu.memory_space<vmem>>, vector<1x128x128xbf16>
    %47 = vector.shape_cast %46 : vector<1x128x128xbf16> to vector<128x128xbf16>
    %cst_40 = arith.constant dense<0.000000e+00> : vector<128x128xf32>
    %48 = tpu.matmul %45, %47, %cst_40 {dimension_numbers = #tpu.dot_dimension_numbers<[1], [0], [0], [1], [0, 0, 1, 1], [], []>} : vector<128x128xbf16>, vector<128x128xbf16>, vector<128x128xf32> -> vector<128x128xf32>
    %49 = arith.addf %44, %48 : vector<128x128xf32>
    %c0_41 = arith.constant 0 : index
    %c0_42 = arith.constant 0 : index
    %50 = vector.load %arg3[%c0_41, %c0_42] : memref<1x128xf32, #tpu.memory_space<vmem>>, vector<1x128xf32>
    %51 = vector.broadcast %50 : vector<1x128xf32> to vector<128x128xf32>
    %52 = arith.addf %49, %51 : vector<128x128xf32>
    %cst_43 = arith.constant 0.000000e+00 : f32
    %53 = vector.broadcast %cst_43 : f32 to vector<128x128xf32>
    %54 = arith.maximumf %52, %53 : vector<128x128xf32>
    %c0_44 = arith.constant 0 : index
    %c0_45 = arith.constant 0 : index
    %55 = vector.load %arg8[%c0_44, %c0_45] : memref<128x1xf32, #tpu.memory_space<vmem>>, vector<128x1xf32>
    %56 = vector.broadcast %55 : vector<128x1xf32> to vector<128x128xf32>
    %57 = arith.mulf %54, %56 : vector<128x128xf32>
    %cst_46 = arith.constant 0.000000e+00 : bf16
    %58 = vector.broadcast %cst_46 : bf16 to vector<32x128xbf16>
    %c0_47 = arith.constant 0 : index
    %c0_48 = arith.constant 0 : index
    %59 = vector.load %arg12[%c0_47, %c0_48] : memref<192x128xbf16, #tpu.memory_space<vmem>>, vector<32x128xbf16>
    tpu.vector_store %arg12[%c0_47, %c0_48], %58 {strides = array<i32>} : memref<192x128xbf16, #tpu.memory_space<vmem>>, vector<32x128xbf16>,
    %c160 = arith.constant 160 : index
    %c0_49 = arith.constant 0 : index
    %60 = vector.load %arg12[%c160, %c0_49] : memref<192x128xbf16, #tpu.memory_space<vmem>>, vector<32x128xbf16>
    tpu.vector_store %arg12[%c160, %c0_49], %58 {strides = array<i32>} : memref<192x128xbf16, #tpu.memory_space<vmem>>, vector<32x128xbf16>,
    %61 = arith.truncf %57 : vector<128x128xf32> to vector<128x128xbf16>
    %c32_50 = arith.constant 32 : index
    %c0_51 = arith.constant 0 : index
    %62 = vector.load %arg12[%c32_50, %c0_51] : memref<192x128xbf16, #tpu.memory_space<vmem>>, vector<128x128xbf16>
    tpu.vector_store %arg12[%c32_50, %c0_51], %61 {strides = array<i32>} : memref<192x128xbf16, #tpu.memory_space<vmem>>, vector<128x128xbf16>,
    %c15_52 = arith.constant 15 : index
    %c0_53 = arith.constant 0 : index
    %63 = vector.load %arg12[%c15_52, %c0_53] : memref<192x128xbf16, #tpu.memory_space<vmem>>, vector<128x128xbf16>
    %c0_54 = arith.constant 0 : index
    %c0_55 = arith.constant 0 : index
    %c0_56 = arith.constant 0 : index
    %64 = vector.load %arg4[%c0_54, %c0_55, %c0_56] : memref<9x128x128xbf16, #tpu.memory_space<vmem>>, vector<1x128x128xbf16>
    %65 = vector.shape_cast %64 : vector<1x128x128xbf16> to vector<128x128xbf16>
    %cst_57 = arith.constant dense<0.000000e+00> : vector<128x128xf32>
    %66 = tpu.matmul %63, %65, %cst_57 {dimension_numbers = #tpu.dot_dimension_numbers<[1], [0], [0], [1], [0, 0, 1, 1], [], []>} : vector<128x128xbf16>, vector<128x128xbf16>, vector<128x128xf32> -> vector<128x128xf32>
    %c16_58 = arith.constant 16 : index
    %c0_59 = arith.constant 0 : index
    %67 = vector.load %arg12[%c16_58, %c0_59] : memref<192x128xbf16, #tpu.memory_space<vmem>>, vector<128x128xbf16>
    %c1_60 = arith.constant 1 : index
    %c0_61 = arith.constant 0 : index
    %c0_62 = arith.constant 0 : index
    %68 = vector.load %arg4[%c1_60, %c0_61, %c0_62] : memref<9x128x128xbf16, #tpu.memory_space<vmem>>, vector<1x128x128xbf16>
    %69 = vector.shape_cast %68 : vector<1x128x128xbf16> to vector<128x128xbf16>
    %cst_63 = arith.constant dense<0.000000e+00> : vector<128x128xf32>
    %70 = tpu.matmul %67, %69, %cst_63 {dimension_numbers = #tpu.dot_dimension_numbers<[1], [0], [0], [1], [0, 0, 1, 1], [], []>} : vector<128x128xbf16>, vector<128x128xbf16>, vector<128x128xf32> -> vector<128x128xf32>
    %71 = arith.addf %66, %70 : vector<128x128xf32>
    %c17_64 = arith.constant 17 : index
    %c0_65 = arith.constant 0 : index
    %72 = vector.load %arg12[%c17_64, %c0_65] : memref<192x128xbf16, #tpu.memory_space<vmem>>, vector<128x128xbf16>
    %c2_66 = arith.constant 2 : index
    %c0_67 = arith.constant 0 : index
    %c0_68 = arith.constant 0 : index
    %73 = vector.load %arg4[%c2_66, %c0_67, %c0_68] : memref<9x128x128xbf16, #tpu.memory_space<vmem>>, vector<1x128x128xbf16>
    %74 = vector.shape_cast %73 : vector<1x128x128xbf16> to vector<128x128xbf16>
    %cst_69 = arith.constant dense<0.000000e+00> : vector<128x128xf32>
    %75 = tpu.matmul %72, %74, %cst_69 {dimension_numbers = #tpu.dot_dimension_numbers<[1], [0], [0], [1], [0, 0, 1, 1], [], []>} : vector<128x128xbf16>, vector<128x128xbf16>, vector<128x128xf32> -> vector<128x128xf32>
    %76 = arith.addf %71, %75 : vector<128x128xf32>
    %c31_70 = arith.constant 31 : index
    %c0_71 = arith.constant 0 : index
    %77 = vector.load %arg12[%c31_70, %c0_71] : memref<192x128xbf16, #tpu.memory_space<vmem>>, vector<128x128xbf16>
    %c3_72 = arith.constant 3 : index
    %c0_73 = arith.constant 0 : index
    %c0_74 = arith.constant 0 : index
    %78 = vector.load %arg4[%c3_72, %c0_73, %c0_74] : memref<9x128x128xbf16, #tpu.memory_space<vmem>>, vector<1x128x128xbf16>
    %79 = vector.shape_cast %78 : vector<1x128x128xbf16> to vector<128x128xbf16>
    %cst_75 = arith.constant dense<0.000000e+00> : vector<128x128xf32>
    %80 = tpu.matmul %77, %79, %cst_75 {dimension_numbers = #tpu.dot_dimension_numbers<[1], [0], [0], [1], [0, 0, 1, 1], [], []>} : vector<128x128xbf16>, vector<128x128xbf16>, vector<128x128xf32> -> vector<128x128xf32>
    %81 = arith.addf %76, %80 : vector<128x128xf32>
    %c32_76 = arith.constant 32 : index
    %c0_77 = arith.constant 0 : index
    %82 = vector.load %arg12[%c32_76, %c0_77] : memref<192x128xbf16, #tpu.memory_space<vmem>>, vector<128x128xbf16>
    %c4_78 = arith.constant 4 : index
    %c0_79 = arith.constant 0 : index
    %c0_80 = arith.constant 0 : index
    %83 = vector.load %arg4[%c4_78, %c0_79, %c0_80] : memref<9x128x128xbf16, #tpu.memory_space<vmem>>, vector<1x128x128xbf16>
    %84 = vector.shape_cast %83 : vector<1x128x128xbf16> to vector<128x128xbf16>
    %cst_81 = arith.constant dense<0.000000e+00> : vector<128x128xf32>
    %85 = tpu.matmul %82, %84, %cst_81 {dimension_numbers = #tpu.dot_dimension_numbers<[1], [0], [0], [1], [0, 0, 1, 1], [], []>} : vector<128x128xbf16>, vector<128x128xbf16>, vector<128x128xf32> -> vector<128x128xf32>
    %86 = arith.addf %81, %85 : vector<128x128xf32>
    %c33_82 = arith.constant 33 : index
    %c0_83 = arith.constant 0 : index
    %87 = vector.load %arg12[%c33_82, %c0_83] : memref<192x128xbf16, #tpu.memory_space<vmem>>, vector<128x128xbf16>
    %c5_84 = arith.constant 5 : index
    %c0_85 = arith.constant 0 : index
    %c0_86 = arith.constant 0 : index
    %88 = vector.load %arg4[%c5_84, %c0_85, %c0_86] : memref<9x128x128xbf16, #tpu.memory_space<vmem>>, vector<1x128x128xbf16>
    %89 = vector.shape_cast %88 : vector<1x128x128xbf16> to vector<128x128xbf16>
    %cst_87 = arith.constant dense<0.000000e+00> : vector<128x128xf32>
    %90 = tpu.matmul %87, %89, %cst_87 {dimension_numbers = #tpu.dot_dimension_numbers<[1], [0], [0], [1], [0, 0, 1, 1], [], []>} : vector<128x128xbf16>, vector<128x128xbf16>, vector<128x128xf32> -> vector<128x128xf32>
    %91 = arith.addf %86, %90 : vector<128x128xf32>
    %c47_88 = arith.constant 47 : index
    %c0_89 = arith.constant 0 : index
    %92 = vector.load %arg12[%c47_88, %c0_89] : memref<192x128xbf16, #tpu.memory_space<vmem>>, vector<128x128xbf16>
    %c6_90 = arith.constant 6 : index
    %c0_91 = arith.constant 0 : index
    %c0_92 = arith.constant 0 : index
    %93 = vector.load %arg4[%c6_90, %c0_91, %c0_92] : memref<9x128x128xbf16, #tpu.memory_space<vmem>>, vector<1x128x128xbf16>
    %94 = vector.shape_cast %93 : vector<1x128x128xbf16> to vector<128x128xbf16>
    %cst_93 = arith.constant dense<0.000000e+00> : vector<128x128xf32>
    %95 = tpu.matmul %92, %94, %cst_93 {dimension_numbers = #tpu.dot_dimension_numbers<[1], [0], [0], [1], [0, 0, 1, 1], [], []>} : vector<128x128xbf16>, vector<128x128xbf16>, vector<128x128xf32> -> vector<128x128xf32>
    %96 = arith.addf %91, %95 : vector<128x128xf32>
    %c48_94 = arith.constant 48 : index
    %c0_95 = arith.constant 0 : index
    %97 = vector.load %arg12[%c48_94, %c0_95] : memref<192x128xbf16, #tpu.memory_space<vmem>>, vector<128x128xbf16>
    %c7_96 = arith.constant 7 : index
    %c0_97 = arith.constant 0 : index
    %c0_98 = arith.constant 0 : index
    %98 = vector.load %arg4[%c7_96, %c0_97, %c0_98] : memref<9x128x128xbf16, #tpu.memory_space<vmem>>, vector<1x128x128xbf16>
    %99 = vector.shape_cast %98 : vector<1x128x128xbf16> to vector<128x128xbf16>
    %cst_99 = arith.constant dense<0.000000e+00> : vector<128x128xf32>
    %100 = tpu.matmul %97, %99, %cst_99 {dimension_numbers = #tpu.dot_dimension_numbers<[1], [0], [0], [1], [0, 0, 1, 1], [], []>} : vector<128x128xbf16>, vector<128x128xbf16>, vector<128x128xf32> -> vector<128x128xf32>
    %101 = arith.addf %96, %100 : vector<128x128xf32>
    %c49_100 = arith.constant 49 : index
    %c0_101 = arith.constant 0 : index
    %102 = vector.load %arg12[%c49_100, %c0_101] : memref<192x128xbf16, #tpu.memory_space<vmem>>, vector<128x128xbf16>
    %c8_102 = arith.constant 8 : index
    %c0_103 = arith.constant 0 : index
    %c0_104 = arith.constant 0 : index
    %103 = vector.load %arg4[%c8_102, %c0_103, %c0_104] : memref<9x128x128xbf16, #tpu.memory_space<vmem>>, vector<1x128x128xbf16>
    %104 = vector.shape_cast %103 : vector<1x128x128xbf16> to vector<128x128xbf16>
    %cst_105 = arith.constant dense<0.000000e+00> : vector<128x128xf32>
    %105 = tpu.matmul %102, %104, %cst_105 {dimension_numbers = #tpu.dot_dimension_numbers<[1], [0], [0], [1], [0, 0, 1, 1], [], []>} : vector<128x128xbf16>, vector<128x128xbf16>, vector<128x128xf32> -> vector<128x128xf32>
    %106 = arith.addf %101, %105 : vector<128x128xf32>
    %107 = arith.truncf %106 : vector<128x128xf32> to vector<128x128xbf16>
    %108 = arith.extf %107 : vector<128x128xbf16> to vector<128x128xf32>
    %109 = arith.subf %106, %108 : vector<128x128xf32>
    %110 = arith.truncf %109 : vector<128x128xf32> to vector<128x128xbf16>
    %c0_106 = arith.constant 0 : index
    %c0_107 = arith.constant 0 : index
    %111 = vector.load %arg9[%c0_106, %c0_107] : memref<64x128xbf16, #tpu.memory_space<vmem>>, vector<64x128xbf16>
    %cst_108 = arith.constant dense<0.000000e+00> : vector<64x128xf32>
    %112 = tpu.matmul %111, %107, %cst_108 {dimension_numbers = #tpu.dot_dimension_numbers<[1], [0], [0], [1], [0, 0, 1, 1], [], []>} : vector<64x128xbf16>, vector<128x128xbf16>, vector<64x128xf32> -> vector<64x128xf32>
    %cst_109 = arith.constant dense<0.000000e+00> : vector<64x128xf32>
    %113 = tpu.matmul %111, %110, %cst_109 {dimension_numbers = #tpu.dot_dimension_numbers<[1], [0], [0], [1], [0, 0, 1, 1], [], []>} : vector<64x128xbf16>, vector<128x128xbf16>, vector<64x128xf32> -> vector<64x128xf32>
    %114 = arith.addf %112, %113 : vector<64x128xf32>
    %c0_110 = arith.constant 0 : index
    %c0_111 = arith.constant 0 : index
    %115 = vector.load %arg5[%c0_110, %c0_111] : memref<1x128xf32, #tpu.memory_space<vmem>>, vector<1x128xf32>
    %116 = vector.broadcast %115 : vector<1x128xf32> to vector<64x128xf32>
    %117 = arith.addf %114, %116 : vector<64x128xf32>
    %c0_112 = arith.constant 0 : index
    %c32_113 = arith.constant 32 : index
    %c0_114 = arith.constant 0 : index
    %118 = vector.load %arg1[%c0_112, %c32_113, %c0_114] : memref<1x192x128xf32, #tpu.memory_space<vmem>>, vector<1x128x128xf32>
    %119 = vector.shape_cast %118 : vector<1x128x128xf32> to vector<128x128xf32>
    %120 = arith.truncf %119 : vector<128x128xf32> to vector<128x128xbf16>
    %121 = arith.extf %120 : vector<128x128xbf16> to vector<128x128xf32>
    %122 = arith.subf %119, %121 : vector<128x128xf32>
    %123 = arith.truncf %122 : vector<128x128xf32> to vector<128x128xbf16>
    %c0_115 = arith.constant 0 : index
    %c0_116 = arith.constant 0 : index
    %124 = vector.load %arg9[%c0_115, %c0_116] : memref<64x128xbf16, #tpu.memory_space<vmem>>, vector<64x128xbf16>
    %cst_117 = arith.constant dense<0.000000e+00> : vector<64x128xf32>
    %125 = tpu.matmul %124, %120, %cst_117 {dimension_numbers = #tpu.dot_dimension_numbers<[1], [0], [0], [1], [0, 0, 1, 1], [], []>} : vector<64x128xbf16>, vector<128x128xbf16>, vector<64x128xf32> -> vector<64x128xf32>
    %cst_118 = arith.constant dense<0.000000e+00> : vector<64x128xf32>
    %126 = tpu.matmul %124, %123, %cst_118 {dimension_numbers = #tpu.dot_dimension_numbers<[1], [0], [0], [1], [0, 0, 1, 1], [], []>} : vector<64x128xbf16>, vector<128x128xbf16>, vector<64x128xf32> -> vector<64x128xf32>
    %127 = arith.addf %125, %126 : vector<64x128xf32>
    %128 = arith.addf %117, %127 : vector<64x128xf32>
    %c0_119 = arith.constant 0 : index
    %c0_120 = arith.constant 0 : index
    %c0_121 = arith.constant 0 : index
    %129 = vector.load %arg10[%c0_119, %c0_120, %c0_121] : memref<1x64x128xf32, #tpu.memory_space<vmem>>, vector<1x64x128xf32>
    %130 = vector.shape_cast %129 : vector<1x64x128xf32> to vector<64x128xf32>
    %131 = vector.shape_cast %128 : vector<64x128xf32> to vector<1x64x128xf32>
    tpu.vector_store %arg10[%c0_119, %c0_120, %c0_121], %131 {strides = array<i32>} : memref<1x64x128xf32, #tpu.memory_space<vmem>>, vector<1x64x128xf32>,
    return
  }
  func.func @transform_0(%arg0: i32) -> (i32, i32, i32) {
    %c0_i32 = arith.constant 0 : i32
    %c0_i32_0 = arith.constant 0 : i32
    %c0_i32_1 = arith.constant 0 : i32
    return %arg0, %c0_i32, %c0_i32_0 : i32, i32, i32
  }
  func.func @transform_1(%arg0: i32) -> (i32, i32, i32) {
    %c0_i32 = arith.constant 0 : i32
    %c0_i32_0 = arith.constant 0 : i32
    %c0_i32_1 = arith.constant 0 : i32
    %c0_i32_2 = arith.constant 0 : i32
    return %c0_i32, %c0_i32_0, %c0_i32_1 : i32, i32, i32
  }
  func.func @transform_2(%arg0: i32) -> (i32, i32) {
    %c0_i32 = arith.constant 0 : i32
    %c0_i32_0 = arith.constant 0 : i32
    %c0_i32_1 = arith.constant 0 : i32
    return %c0_i32, %c0_i32_0 : i32, i32
  }
  func.func @transform_3(%arg0: i32) -> (i32, i32, i32) {
    %c0_i32 = arith.constant 0 : i32
    %c0_i32_0 = arith.constant 0 : i32
    %c0_i32_1 = arith.constant 0 : i32
    %c0_i32_2 = arith.constant 0 : i32
    return %c0_i32, %c0_i32_0, %c0_i32_1 : i32, i32, i32
  }
  func.func @transform_4(%arg0: i32) -> (i32, i32) {
    %c0_i32 = arith.constant 0 : i32
    %c0_i32_0 = arith.constant 0 : i32
    %c0_i32_1 = arith.constant 0 : i32
    return %c0_i32, %c0_i32_0 : i32, i32
  }
  func.func @transform_5(%arg0: i32) -> (i32, i32) {
    %c0_i32 = arith.constant 0 : i32
    %c0_i32_0 = arith.constant 0 : i32
    %c0_i32_1 = arith.constant 0 : i32
    return %c0_i32, %c0_i32_0 : i32, i32
  }
  func.func @transform_6(%arg0: i32) -> (i32, i32) {
    %c0_i32 = arith.constant 0 : i32
    %c0_i32_0 = arith.constant 0 : i32
    %c0_i32_1 = arith.constant 0 : i32
    return %c0_i32, %c0_i32_0 : i32, i32
  }
  func.func @transform_7(%arg0: i32) -> (i32, i32) {
    %c0_i32 = arith.constant 0 : i32
    %c0_i32_0 = arith.constant 0 : i32
    %c0_i32_1 = arith.constant 0 : i32
    return %c0_i32, %c0_i32_0 : i32, i32
  }
  func.func @transform_8(%arg0: i32) -> (i32, i32) {
    %c0_i32 = arith.constant 0 : i32
    %c0_i32_0 = arith.constant 0 : i32
    %c0_i32_1 = arith.constant 0 : i32
    return %c0_i32, %c0_i32_0 : i32, i32
  }
  func.func @transform_9(%arg0: i32) -> (i32, i32, i32) {
    %c0_i32 = arith.constant 0 : i32
    %c0_i32_0 = arith.constant 0 : i32
    %c0_i32_1 = arith.constant 0 : i32
    return %arg0, %c0_i32, %c0_i32_0 : i32, i32, i32
  }
}

</mosaic_0001>

<bundles_post_ra>
// kernel: network.3
= control target key start
LH: loop header
LB: loop body
LE: loop exit
PB: predicated region body
PF: predicated region fallthrough
CT: control target
= control target key end

     0   :  { %s7001_s30 = smov 0   ;;  %s8125_s0 = inlined_call_operand.vmem [shape: f32[2,192,128], index: 0, kind: input, shape index: {}]   ;;  %s8126_s1 = inlined_call_operand.vmem [shape: bf16[9,128,128], index: 1, kind: input, shape index: {}]   ;;  %s8127_s2 = inlined_call_operand.vmem [shape: f32[1,128], index: 2, kind: input, shape index: {}]   ;;  %s8128_s3 = inlined_call_operand.vmem [shape: bf16[9,128,128], index: 3, kind: input, shape index: {}]   ;;  %s8129_s4 = inlined_call_operand.vmem [shape: f32[1,128], index: 4, kind: input, shape index: {}]   ;;  %s8130_s5 = inlined_call_operand.vmem [shape: bf16[128,128], index: 5, kind: input, shape index: {}]   ;;  %s8131_s6 = inlined_call_operand.vmem [shape: f32[1,128], index: 6, kind: input, shape index: {}]   ;;  %s8132_s7 = inlined_call_operand.vmem [shape: f32[128,1], index: 7, kind: input, shape index: {}]   ;;  %s8133_s8 = inlined_call_operand.vmem [shape: bf16[64,128], index: 8, kind: input, shape index: {}]   ;;  %s8134_s9 = inlined_call_operand.vmem [shape: f32[2,64,128], index: 9, kind: output, shape index: {}]  }
   0x1 LB: > { %s5059_s5 = sadd.s32 4294967295, %s6948_s30   ;;  %p5063_p0 = scmp.ge.s32.totalorder %s6948_s30, 1  ;;  %s6948_s30 = sphi %s7001_s30, %s19_s30  }
   0x2   : > { %p287_p1 = scmp.lt.s32.totalorder %s6948_s30, 3 }
   0x4   : > { %p288_p2 = pnand %p5063_p0, %p287_p1 }
   0x5   : > { %v6784_v0 = vld [vmem:[%s8126_s1] sm:$0xff] (!%p288_p2)   ;;  %p323_p3 = scmp.lt.s32.totalorder (!%p288_p2), %s5059_s5, 1  ;;  %v6785_v1 = vld [vmem:[%s8126_s1 + $0x8] sm:$0xff] (!%p288_p2)   ;;  %v6786_v2 = vld [vmem:[%s8126_s1 + $0x10] sm:$0xff] (!%p288_p2)   ;;  %vm593_vm0 = vsmask.f32 (!%p288_p2), 256 }
   0x6   : > { %291 = sbr.rel (%p288_p2) target bundleno = 1282 (0x502), region = 56  ;;  %5844 = vmatprep.subr.bf16.mxu0 (!%p288_p2), %v6784_v0  ;;  %v6787_v3 = vld [vmem:[%s8126_s1 + $0x18] sm:$0xff] (!%p288_p2)   ;;  %v6788_v17 = vld [vmem:[%s8126_s1 + $0x20] sm:$0xff] (!%p288_p2)   ;;  %v6789_v27 = vld [vmem:[%s8126_s1 + $0x28] sm:$0xff] (!%p288_p2)   ;;  %vm841_vm1 = vsmask.f32 (!%p288_p2), 7424 }
   0x7   : > { %5845 = vmatpush3.bf16.msra.mxu0 (!%p288_p2), %v6784_v0  ;;  %v6790_v43 = vld [vmem:[%s8126_s1 + $0x30] sm:$0xff] (!%p288_p2)   ;;  %v6791_v59 = vld [vmem:[%s8126_s1 + $0x38] sm:$0xff] (!%p288_p2)  }
   0x8   : > { %5846 = vmatprep.subr.bf16.mxu0 (!%p288_p2), %v6785_v1 }
   0xb   : > { %5847 = vmatpush3.bf16.msra.mxu0 (!%p288_p2), %v6785_v1 }
   0xc   : > { %5848 = vmatprep.subr.bf16.mxu0 (!%p288_p2), %v6786_v2 }
   0xd   : > { %s8136_s5 = smov (!%p323_p3, %s5059_s5), 1 }
   0xe   : > { %s6772_s15 = smul.u32 192, %s8136_s5  ;;  %s5475_s24 = sshll.u32 %s8136_s5, 6 }
   0xf   : > { %5849 = vmatpush3.bf16.msra.mxu0 %v6786_v2  ;;  %s332_s27 = scalar_lea.vmem %s8134_s9, %s5475_s24 }
  0x10   : > { %s7024_s18 = scalar_lea.vmem %s8125_s0, %s6772_s15  ;;  %5850 = vmatprep.subr.bf16.mxu0 %v6787_v3 }
  0x11   : > { %v334_v4 = vld [vmem:[%s7024_s18] sm:$0xff]  ;;  %v335_v5 = vld [vmem:[%s7024_s18 + $0x8] sm:$0xff]  ;;  %v336_v6 = vld [vmem:[%s7024_s18 + $0x10] sm:$0xff] }
  0x12   : > { %v337_v7 = vld [vmem:[%s7024_s18 + $0x18] sm:$0xff]  ;;  %v358_v8 = vmax.f32 %v334_v4, 0.0  ;;  %v359_v9 = vmax.f32 %v335_v5, 0.0  ;;  %v360_v10 = vmax.f32 %v336_v6, 0.0  ;;  %v338_v11 = vld [vmem:[%s7024_s18 + $0x20] sm:$0xff]  ;;  %v339_v12 = vld [vmem:[%s7024_s18 + $0x28] sm:$0xff] }
  0x13   : > { %v361_v13 = vmax.f32 %v337_v7, 0.0  ;;  %v362_v14 = vmax.f32 %v338_v11, 0.0  ;;  %v363_v15 = vmax.f32 %v339_v12, 0.0  ;;  %v340_v20 = vld [vmem:[%s7024_s18 + $0x30] sm:$0xff]  ;;  %v341_v21 = vld [vmem:[%s7024_s18 + $0x38] sm:$0xff]  ;;  %v342_v24 = vld [vmem:[%s7024_s18 + $0x40] sm:$0xff]  ;;  %5851 = vmatpush3.bf16.msra.mxu0 %v6787_v3 }
  0x14   : > { %v382_v16 = vpack.c.bf16 %v359_v9, %v358_v8  ;;  %v364_v22 = vmax.f32 %v340_v20, 0.0  ;;  %v365_v23 = vmax.f32 %v341_v21, 0.0  ;;  %v343_v25 = vld [vmem:[%s7024_s18 + $0x48] sm:$0xff]  ;;  %v366_v29 = vmax.f32 %v342_v24, 0.0  ;;  %5852 = vmatprep.subr.bf16.mxu0 %v6788_v17  ;;  %v344_v31 = vld [vmem:[%s7024_s18 + $0x50] sm:$0xff]  ;;  %v345_v32 = vld [vmem:[%s7024_s18 + $0x58] sm:$0xff] }
  0x15   : > { %v7038_v18 = vpack.c.bf16 %v361_v13, %v360_v10  ;;  %v7040_v19 = vpack.c.bf16 %v363_v15, %v362_v14  ;;  %v367_v30 = vmax.f32 %v343_v25, 0.0  ;;  %v368_v36 = vmax.f32 %v344_v31, 0.0  ;;  %v346_v37 = vld [vmem:[%s7024_s18 + $0x60] sm:$0xff]  ;;  %v347_v38 = vld [vmem:[%s7024_s18 + $0x68] sm:$0xff]  ;;  %v348_v50 = vld [vmem:[%s7024_s18 + $0x70] sm:$0xff] }
  0x16   : > { %394 = vst [vmem:[#allocation2] sm:$0xff] %v382_v16  ;;  %v7053_v28 = vpack.c.bf16 %v365_v23, %v364_v22  ;;  %v369_v39 = vmax.f32 %v345_v32, 0.0  ;;  %v370_v40 = vmax.f32 %v346_v37, 0.0  ;;  %v371_v42 = vmax.f32 %v347_v38, 0.0  ;;  %v349_v51 = vld [vmem:[%s7024_s18 + $0x78] sm:$0xff]  ;;  %v350_v52 = vld [vmem:[%s7024_s18 + $0x80] sm:$0xff] }
  0x17   : > { %395 = vst [vmem:[#allocation2 + $0x8] sm:$0xff] %v7038_v18  ;;  %v599_v26 = vshrl.u32 %v7038_v18, 16  ;;  %396 = vst [vmem:[#allocation2 + $0x10] sm:$0xff] %v7040_v19  ;;  %5828 = vmatprep.mubr.bf16.mxu1 %v7038_v18  ;;  %v602_v34 = vshll.u32 %v7038_v18, 16  ;;  %v7061_v35 = vpack.c.bf16 %v367_v30, %v366_v29  ;;  %5853 = vmatpush3.bf16.msra.mxu0 %v6788_v17  ;;  %v607_v41 = vshrl.u32 %v7040_v19, 16  ;;  %v351_v56 = vld [vmem:[%s7024_s18 + $0x88] sm:$0xff] }
  0x18   : > { %397 = vst [vmem:[#allocation2 + $0x18] sm:$0xff] %v7053_v28  ;;  %5854 = vmatprep.subr.bf16.mxu0 %v6789_v27  ;;  %v615_v45 = vshrl.u32 %v7053_v28, 16  ;;  %v7071_v46 = vpack.c.bf16 %v369_v39, %v368_v36  ;;  %v7075_v49 = vpack.c.bf16 %v371_v42, %v370_v40  ;;  %v610_v53 = vshll.u32 %v7040_v19, 16  ;;  %v6792_v6 = vld [vmem:[%s8126_s1 + $0x80] sm:$0xff]   ;;  %v6793_v13 = vld [vmem:[%s8126_s1 + $0x88] sm:$0xff]   ;;  %v352_v16 = vld [vmem:[%s7024_s18 + $0x90] sm:$0xff] }
  0x19   : > { %v601_v33 = vrot.slane %v599_v26, 7  ;;  %398 = vst [vmem:[#allocation2 + $0x20] sm:$0xff] %v7061_v35  ;;  %v372_v54 = vmax.f32 %v348_v50, 0.0  ;;  %v373_v55 = vmax.f32 %v349_v51, 0.0  ;;  %v609_v58 = vrot.slane %v607_v41, 7  ;;  %v353_v17 = vld [vmem:[%s7024_s18 + $0x98] sm:$0xff] }
  0x1a   : > { %399 = vst [vmem:[#allocation2 + $0x28] sm:$0xff] %v7071_v46  ;;  %400 = vst [vmem:[#allocation2 + $0x30] sm:$0xff] %v7075_v49  ;;  %v617_v60 = vrot.slane %v615_v45, 7  ;;  %v618_v61 = vshll.u32 %v7053_v28, 16  ;;  %v374_v63 = vmax.f32 %v350_v52, 0.0  ;;  %v375_v1 = vmax.f32 %v351_v56, 0.0 }
  0x1b   : > { %v604_v48 = vor.u32 %v602_v34, %v601_v33  ;;  %5855 = vmatpush3.bf16.msra.mxu0 %v6789_v27  ;;  %v7092_v62 = vpack.c.bf16 %v373_v55, %v372_v54  ;;  %v7096_v2 = vor.u32 %v610_v53, %v609_v58  ;;  %v623_v3 = vshrl.u32 %v7061_v35, 16  ;;  %v6794_v24 = vld [vmem:[%s8126_s1 + $0x90] sm:$0xff]   ;;  %v6795_v39 = vld [vmem:[%s8126_s1 + $0x98] sm:$0xff]   ;;  %v6800_v18 = vld [vmem:[%s8126_s1 + $0xc0] sm:$0xff]  }
  0x1c   : > { %5856 = vmatprep.subr.bf16.mxu0 %v6790_v43  ;;  %v631_v4 = vshrl.u32 %v7071_v46, 16  ;;  %v7100_v5 = vpack.c.bf16 %v375_v1, %v374_v63  ;;  %v7105_v7 = vor.u32 %v618_v61, %v617_v60  ;;  %v626_v8 = vshll.u32 %v7061_v35, 16 }
  0x1d   : > { %v406_v44 = vld [vmem:[#allocation2] sm:$0x80]  ;;  %401 = vst [vmem:[#allocation2 + $0x38] sm:$0xff] %v7092_v62  ;;  %v613_v9 = vsel %vm593_vm0, %v601_v33, %v7096_v2  ;;  %v625_v10 = vrot.slane %v623_v3, 7  ;;  %v634_v12 = vshll.u32 %v7071_v46, 16  ;;  %v647_v15 = vshrl.u32 %v7092_v62, 16 }
  0x1e   : > { %v595_v47 = vshrl.u32 %v406_v44, 16  ;;  %402 = vst [vmem:[#allocation2 + $0x40] sm:$0xff] %v7100_v5  ;;  %v633_v11 = vrot.slane %v631_v4, 7  ;;  %v7117_v14 = vsel %vm593_vm0, %v609_v58, %v7105_v7  ;;  %v639_v20 = vshrl.u32 %v7075_v49, 16  ;;  %v6796_v44 = vld [vmem:[%s8126_s1 + $0xa0] sm:$0xff]  }
  0x1f   : > { %5857 = vmatpush3.bf16.msra.mxu0 %v6790_v43  ;;  %v376_v21 = vmax.f32 %v352_v16, 0.0  ;;  %v377_v22 = vmax.f32 %v353_v17, 0.0  ;;  %v628_v23 = vor.u32 %v626_v8, %v625_v10  ;;  %v1509_v27 = vrot.slane %v610_v53, 1  ;;  %v1079_v16 = vld [vmem:[#allocation2 + $0x8] sm:$0x80] }
  0x20   : > { %v597_v57 = vrot.slane %v595_v47, 7  ;;  %5858 = vmatprep.subr.bf16.mxu0 %v6791_v59  ;;  %v636_v25 = vor.u32 %v634_v12, %v633_v11  ;;  %v649_v29 = vrot.slane %v647_v15, 7  ;;  %v650_v30 = vshll.u32 %v7092_v62, 16 }
  0x21   : > { %v7128_v31 = vpack.c.bf16 %v377_v22, %v376_v21  ;;  %v641_v32 = vrot.slane %v639_v20, 7  ;;  %v642_v33 = vshll.u32 %v7075_v49, 16  ;;  %v1510_v36 = vor.u32 %v1509_v27, %v607_v41 }
  0x22   : > { %v605_v0 = vsel %vm593_vm0, %v597_v57, %v604_v48  ;;  %v1118_v35 = vor.u32 %v650_v30, %v649_v29  ;;  %v7135_v37 = vsel %vm593_vm0, %v617_v60, %v628_v23  ;;  %v7138_v38 = vsel %vm593_vm0, %v625_v10, %v636_v25  ;;  %v6797_v57 = vld [vmem:[%s8126_s1 + $0xa8] sm:$0xff]  }
  0x23   : > { %5860 = vmatprep.mubr.bf16.mxu0 %v605_v0  ;;  %5859 = vmatpush3.bf16.msra.mxu0 %v6791_v59  ;;  %403 = vst [vmem:[#allocation2 + $0x48] sm:$0xff] %v7128_v31  ;;  %v644_v19 = vor.u32 %v642_v33, %v641_v32  ;;  %v1514_v41 = vrot.slane %v618_v61, 1  ;;  %v655_v42 = vshrl.u32 %v7100_v5, 16  ;;  %v1522_v43 = vrot.slane %v626_v8, 1  ;;  %v355_v8 = vld [vmem:[%s7024_s18 + $0xa8] sm:$0xff] }
  0x24   : > { %5876 = vmatprep.subr.bf16.mxu0 %v6792_v6  ;;  %v7144_v40 = vsel %vm593_vm0, %v641_v32, %v1118_v35  ;;  %v1530_v48 = vrot.slane %v634_v12, 1  ;;  %v1538_v50 = vrot.slane %v642_v33, 1  ;;  %v658_v52 = vshll.u32 %v7100_v5, 16  ;;  %v6799_v5 = vld [vmem:[%s8126_s1 + $0xb8] sm:$0xff]   ;;  %v6801_v12 = vld [vmem:[%s8126_s1 + $0xc8] sm:$0xff]  }
  0x25   : > { %v7153_v46 = vsel %vm841_vm1, %v1510_v36, %v1514_v41  ;;  %v1518_v47 = vor.u32 %v1514_v41, %v615_v45  ;;  %v1526_v49 = vor.u32 %v1522_v43, %v623_v3  ;;  %v7158_v51 = vsel %vm593_vm0, %v633_v11, %v644_v19  ;;  %v6807_v36 = vld [vmem:[%s8126_s1 + $0xf8] sm:$0xff]   ;;  %v6808_v41 = vld [vmem:[%s8126_s1 + $0x100] sm:$0xff]  }
  0x26   : > { %5861 = vmatmul.mubr.bf16.vlgmr.msra.gmra.mrb[0].mxu0 %v613_v9  ;;  %v1534_v54 = vor.u32 %v1530_v48, %v631_v4  ;;  %v7164_v55 = vrot.slane %v655_v42, 7  ;;  %v1542_v28 = vor.u32 %v1538_v50, %v639_v20  ;;  %v1546_v45 = vrot.slane %v650_v30, 1  ;;  %v6804_v20 = vld [vmem:[%s8126_s1 + $0xe0] sm:$0xff]  }
  0x27   : > { %5877 = vmatpush3.bf16.msra.mxu0 %v6792_v6  ;;  %5864 = vmatprep.mubr.bf16.mxu0 %v7117_v14  ;;  %v7162_v53 = vsel %vm841_vm1, %v1518_v47, %v1522_v43  ;;  %v7167_v56 = vsel %vm841_vm1, %v1526_v49, %v1530_v48  ;;  %v847_v58 = vrot.slane %v602_v34, 1  ;;  %v1554_v62 = vrot.slane %v658_v52, 1  ;;  %v6798_v34 = vld [vmem:[%s8126_s1 + $0xb0] sm:$0xff]   ;;  %v6842_v43 = vld [vmem:[%s8126_s1 + $0x48] sm:$0xff]   ;;  %v6846_v48 = vld [vmem:[%s8126_s1 + $0x58] sm:$0xff]  }
  0x28   : > { %5878 = vmatprep.subr.bf16.mxu0 %v6793_v13  ;;  %v7175_v59 = vsel %vm841_vm1, %v1534_v54, %v1538_v50  ;;  %v7178_v60 = vsel %vm841_vm1, %v1542_v28, %v1546_v45  ;;  %v1550_v61 = vor.u32 %v1546_v45, %v647_v15  ;;  %v660_v63 = vor.u32 %v658_v52, %v7164_v55  ;;  %v6803_v15 = vld [vmem:[%s8126_s1 + $0xd8] sm:$0xff]   ;;  %v6844_v47 = vld [vmem:[%s8126_s1 + $0x50] sm:$0xff]   ;;  %v6812_v49 = vld [vmem:[%s8126_s1 + $0x120] sm:$0xff]  }
  0x29   : > { %v848_v1 = vor.u32 %v847_v58, %v599_v26  ;;  %v7191_v3 = vor.u32 %v1554_v62, %v655_v42  ;;  %v354_v26 = vld [vmem:[%s7024_s18 + $0xa0] sm:$0xff]  ;;  %v379_v10 = vmax.f32 %v355_v8, 0.0  ;;  %v1099_v21 = vshrl.u32 %v1079_v16, 16  ;;  %v6813_v52 = vld [vmem:[%s8126_s1 + $0x128] sm:$0xff]   ;;  %v6852_v28 = vld [vmem:[%s8126_s1 + $0x70] sm:$0xff]  }
  0x2a   : > { %v7184_v0 = vsel %vm841_vm1, %v1550_v61, %v1554_v62  ;;  %v7194_v4 = vsel %vm593_vm0, %v649_v29, %v660_v63  ;;  %v378_v9 = vmax.f32 %v354_v26, 0.0  ;;  %v823_v17 = vld [vmem:[#allocation2 + $0x48] sm:$0x1]  ;;  %v1124_v23 = vshrl.u32 %v7128_v31, 16  ;;  %v6806_v29 = vld [vmem:[%s8126_s1 + $0xf0] sm:$0xff]   ;;  %v6840_v42 = vld [vmem:[%s8126_s1 + $0x40] sm:$0xff]  }
  0x2b   : > { %5879 = vmatpush3.bf16.msra.mxu0 %v6793_v13  ;;  %v853_v6 = vsel %vm841_vm1, %v848_v1, %v1509_v27  ;;  %v6802_v13 = vld [vmem:[%s8126_s1 + $0xd0] sm:$0xff]   ;;  %v906_v22 = vshll.u32 %v823_v17, 16  ;;  %v1101_v25 = vrot.slane %v1099_v21, 7  ;;  %v1127_v32 = vshll.u32 %v7128_v31, 16  ;;  %5812 = vmatprep.subr.bf16.mxu1 %v6840_v42  ;;  %v6848_v50 = vld [vmem:[%s8126_s1 + $0x60] sm:$0xff]   ;;  %v6850_v54 = vld [vmem:[%s8126_s1 + $0x68] sm:$0xff]  }
  0x2c   : > { %5880 = vmatprep.subr.bf16.mxu0 %v6794_v24  ;;  %v7206_v11 = vpack.c.bf16 %v379_v10, %v378_v9  ;;  %v7231_v27 = vrot.slane %v1124_v23, 7  ;;  %5813 = vmatpush3.bf16.msra.mxu1 %v6840_v42  ;;  %v6815_v45 = vld [vmem:[%s8126_s1 + $0x138] sm:$0xff]   ;;  %v6932_v58 = vld [vmem:[#allocation2 + $0x10] sm:$0xff]  ;;  %v6816_v61 = vld [vmem:[%s8126_s1 + $0x140] sm:$0xff]  }
  0x2d   : > { %v908_v30 = vrot.slane %v906_v22, 1  ;;  %5814 = vmatprep.subr.bf16.mxu1 %v6842_v43  ;;  %v6817_v62 = vld [vmem:[%s8126_s1 + $0x148] sm:$0xff]   ;;  %v7314_v63 = vld [vmem:[#allocation2 + $0x18] sm:$0xff]  ;;  %v6818_v1 = vld [vmem:[%s8126_s1 + $0x150] sm:$0xff]  }
  0x2e   : > { %5865 = vmatmul.mubr.bf16.gmra.mrb[4].mxu0 %v7135_v37  ;;  %404 = vst [vmem:[#allocation2 + $0x50] sm:$0xff] %v7206_v11  ;;  %v1783_v33 = vor.u32 %v1127_v32, %v7231_v27  ;;  %v7330_v26 = vld [vmem:[#allocation2 + $0x28] sm:$0xff]  ;;  %v7334_v10 = vld [vmem:[#allocation2 + $0x30] sm:$0xff]  ;;  %v7344_v16 = vld [vmem:[#allocation2 + $0x38] sm:$0xff] }
  0x2f   : > { %5881 = vmatpush3.bf16.msra.mxu0 %v6794_v24  ;;  %5868 = vmatprep.mubr.bf16.mxu0 %v7138_v38  ;;  %v6805_v24 = vld [vmem:[%s8126_s1 + $0xe8] sm:$0xff]   ;;  %v909_v35 = vsel %vm841_vm1, %v7191_v3, %v908_v30  ;;  %v7348_v17 = vld [vmem:[#allocation2 + $0x40] sm:$0xff]  ;;  %v6823_v21 = vld [vmem:[%s8126_s1 + $0x178] sm:$0xff]  }
  0x30   : > { %5882 = vmatprep.subr.bf16.mxu0 %v6795_v39  ;;  %v7251_v19 = vsel %vm593_vm0, %v7164_v55, %v1783_v33  ;;  %5815 = vmatpush3.bf16.msra.mxu1 %v6842_v43  ;;  %v6814_v55 = vld [vmem:[%s8126_s1 + $0x130] sm:$0xff]   ;;  %v2442_v22 = vld [vmem:[%s8132_s7] sm:$0xff]  ;;  %v2445_v30 = vld [vmem:[%s8132_s7 + $0x18] sm:$0xff] }
  0x31   : > { %5816 = vmatprep.subr.bf16.mxu1 %v6844_v47  ;;  %v6825_v33 = vld [vmem:[%s8126_s1 + $0x188] sm:$0xff]   ;;  %v6856_v42 = vld [vmem:[%s8128_s3 + $0x40] sm:$0xff]  }
  0x32   : > { %v2451_v43 = vld [vmem:[%s8132_s7 + $0x48] sm:$0xff] }
  0x33   : > { %5883 = vmatpush3.bf16.msra.mxu0 %v6795_v39  ;;  %v1104_v39 = vsel %vm593_vm0, %v1101_v25, %v7096_v2  ;;  %v6809_v2 = vld [vmem:[%s8126_s1 + $0x108] sm:$0xff]   ;;  %v2444_v25 = vld [vmem:[%s8132_s7 + $0x10] sm:$0xff] }
  0x34   : > { %5884 = vmatprep.subr.bf16.mxu0 %v6796_v44  ;;  %5817 = vmatpush3.bf16.msra.mxu1 %v6844_v47 }
  0x35   : > { %5818 = vmatprep.subr.bf16.mxu1 %v6846_v48  ;;  %v1486_v47 = vld [vmem:[#allocation2 + $0x50] sm:$0x1] }
  0x36   : > { %5869 = vmatmul.mubr.bf16.gmra.mrb[8].mxu0 %v7158_v51 }
  0x37   : > { %5885 = vmatpush3.bf16.msra.mxu0 %v6796_v44  ;;  %5872 = vmatprep.mubr.bf16.mxu0 %v7144_v40  ;;  %v6810_v44 = vld [vmem:[%s8126_s1 + $0x110] sm:$0xff]  }
  0x38   : > { %5886 = vmatprep.subr.bf16.mxu0 %v6797_v57  ;;  %5819 = vmatpush3.bf16.msra.mxu1 %v6846_v48  ;;  %v2452_v48 = vld [vmem:[%s8132_s7 + $0x50] sm:$0xff] }
  0x39   : > { %5820 = vmatprep.subr.bf16.mxu1 %v6848_v50 }
  0x3b   : > { %5887 = vmatpush3.bf16.msra.mxu0 %v6797_v57  ;;  %v6854_v57 = vld [vmem:[%s8126_s1 + $0x78] sm:$0xff]  }
  0x3c   : > { %5888 = vmatprep.subr.bf16.mxu0 %v6798_v34  ;;  %5821 = vmatpush3.bf16.msra.mxu1 %v6848_v50  ;;  %v6829_v50 = vld [vmem:[%s8126_s1 + $0x1a8] sm:$0xff]  }
  0x3d   : > { %5822 = vmatprep.subr.bf16.mxu1 %v6850_v54 }
  0x3e   : > { %5873 = vmatmul.mubr.bf16.gmra.mrb[12].mxu0 %v7194_v4 }
  0x3f   : > { %5889 = vmatpush3.bf16.msra.mxu0 %v6798_v34  ;;  %5892 = vmatprep.mubr.bf16.mxu0 %v853_v6  ;;  %v7318_v34 = vld [vmem:[#allocation2 + $0x20] sm:$0xff]  ;;  %v356_v6 = vld [vmem:[%s7024_s18 + $0xb0] sm:$0xff] }
  0x40   : > { %5890 = vmatprep.subr.bf16.mxu0 %v6799_v5  ;;  %5823 = vmatpush3.bf16.msra.mxu1 %v6850_v54  ;;  %v380_v8 = vmax.f32 %v356_v6, 0.0  ;;  %v6835_v6 = vld [vmem:[%s8126_s1 + $0x1d8] sm:$0xff]  }
  0x41   : > { %5824 = vmatprep.subr.bf16.mxu1 %v6852_v28 }
  0x43   : > { %5891 = vmatpush3.bf16.msra.mxu0 %v6799_v5  ;;  %v6819_v5 = vld [vmem:[%s8126_s1 + $0x158] sm:$0xff]  }
  0x44   : > { %5908 = vmatprep.subr.bf16.mxu0 %v6800_v18  ;;  %5825 = vmatpush3.bf16.msra.mxu1 %v6852_v28 }
  0x45   : > { %5826 = vmatprep.subr.bf16.mxu1 %v6854_v57 }
  0x46   : > { %5893 = vmatmul.mubr.bf16.vlgmr.msra.gmra.mrb[0].mxu0 %v7153_v46 }
  0x47   : > { %5909 = vmatpush3.bf16.msra.mxu0 %v6800_v18  ;;  %5896 = vmatprep.mubr.bf16.mxu0 %v7162_v53  ;;  %v357_v18 = vld [vmem:[%s7024_s18 + $0xb8] sm:$0xff] }
  0x48   : > { %5910 = vmatprep.subr.bf16.mxu0 %v6801_v12  ;;  %5827 = vmatpush3.bf16.msra.mxu1 %v6854_v57  ;;  %v381_v9 = vmax.f32 %v357_v18, 0.0 }
  0x49   : > { %6100 = vmatprep.subr.bf16.mxu1 %v6856_v42 }
  0x4b   : > { %5911 = vmatpush3.bf16.msra.mxu0 %v6801_v12  ;;  %5829 = vmatmul.mubr.bf16.vlgmr.msra.gmra.mrb[0].mxu1 %v6932_v58  ;;  %v6820_v12 = vld [vmem:[%s8126_s1 + $0x160] sm:$0xff]  }
  0x4c   : > { %5912 = vmatprep.subr.bf16.mxu0 %v6802_v13  ;;  %5832 = vmatprep.mubr.bf16.mxu1 %v7314_v63 }
  0x4d   : > { %6101 = vmatpush3.bf16.msra.mxu1 %v6856_v42 }
  0x4e   : > { %5897 = vmatmul.mubr.bf16.gmra.mrb[4].mxu0 %v7167_v56 }
  0x4f   : > { %5913 = vmatpush3.bf16.msra.mxu0 %v6802_v13  ;;  %5900 = vmatprep.mubr.bf16.mxu0 %v7175_v59  ;;  %v393_v13 = vpack.c.bf16 %v381_v9, %v380_v8  ;;  %v1789_v8 = vshll.u32 %v7206_v11, 16  ;;  %v6858_v9 = vld [vmem:[%s8128_s3 + $0x50] sm:$0xff]  }
  0x50   : > { %5914 = vmatprep.subr.bf16.mxu0 %v6803_v15 }
  0x51   : > { %405 = vst [vmem:[#allocation2 + $0x58] sm:$0xff] %v393_v13  ;;  %v6841_v13 = vld [vmem:[%s8126_s1 + $0x200] sm:$0xff]  }
  0x53   : > { %5915 = vmatpush3.bf16.msra.mxu0 %v6803_v15  ;;  %5833 = vmatmul.mubr.bf16.gmra.mrb[4].mxu1 %v7318_v34  ;;  %v6821_v15 = vld [vmem:[%s8126_s1 + $0x168] sm:$0xff]  }
  0x54   : > { %5916 = vmatprep.subr.bf16.mxu0 %v6804_v20  ;;  %5836 = vmatprep.mubr.bf16.mxu1 %v7330_v26 }
  0x56   : > { %5901 = vmatmul.mubr.bf16.gmra.mrb[8].mxu0 %v7178_v60 }
  0x57   : > { %5917 = vmatpush3.bf16.msra.mxu0 %v6804_v20  ;;  %5904 = vmatprep.mubr.bf16.mxu0 %v7184_v0  ;;  %v6822_v20 = vld [vmem:[%s8126_s1 + $0x170] sm:$0xff]  }
  0x58   : > { %5918 = vmatprep.subr.bf16.mxu0 %v6805_v24 }
  0x5b   : > { %5919 = vmatpush3.bf16.msra.mxu0 %v6805_v24  ;;  %5837 = vmatmul.mubr.bf16.gmra.mrb[8].mxu1 %v7334_v10  ;;  %v6950_v24 = vmov 0  }
  0x5c   : > { %5920 = vmatprep.subr.bf16.mxu0 %v6806_v29  ;;  %5840 = vmatprep.mubr.bf16.mxu1 %v7344_v16  ;;  %2554 = vst [vmem:[#allocation3] sm:$0xff] %v6950_v24  ;;  %2555 = vst [vmem:[#allocation3 + $0x8] sm:$0xff] %v6950_v24 }
  0x5d   : > { %2556 = vst [vmem:[#allocation3 + $0x50] sm:$0xff] %v6950_v24  ;;  %2557 = vst [vmem:[#allocation3 + $0x58] sm:$0xff] %v6950_v24  ;;  %6782 = vset.pattern.permute.xlu0 %v6950_v24  ;;  %6783 = vset.pattern.permute.xlu1 %v6950_v24 }
  0x5e   : > { %5905 = vmatmul.mubr.bf16.gmra.mrb[12].mxu0 %v909_v35  ;;  %2460 = vperm.xlu0 %6782, %v2442_v22   ;;  %v2446_v35 = vld [vmem:[%s8132_s7 + $0x20] sm:$0xff]  ;;  %v6851_v22 = vld [vmem:[%s8126_s1 + $0x228] sm:$0xff]  }
  0x5f   : > { %5921 = vmatpush3.bf16.msra.mxu0 %v6806_v29  ;;  %5924 = vmatprep.mubr.bf16.mxu0 %v1104_v39  ;;  %v6824_v29 = vld [vmem:[%s8126_s1 + $0x180] sm:$0xff]   ;;  %v6826_v39 = vld [vmem:[%s8126_s1 + $0x190] sm:$0xff]  }
  0x60   : > { %5922 = vmatprep.subr.bf16.mxu0 %v6807_v36  ;;  %2470 = vperm.xlu1 %6783, %v2444_v25  }
  0x63   : > { %5923 = vmatpush3.bf16.msra.mxu0 %v6807_v36  ;;  %5841 = vmatmul.mubr.bf16.gmra.mrb[12].mxu1 %v7348_v17  ;;  %v2447_v36 = vld [vmem:[%s8132_s7 + $0x28] sm:$0xff] }
  0x64   : > { %5940 = vmatprep.subr.bf16.mxu0 %v6808_v41  ;;  %6116 = vmatprep.mubr.bf16.mxu1 %v6950_v24 }
  0x65   : > { %2475 = vperm.xlu1 %6783, %v2445_v30   ;;  %v6853_v30 = vld [vmem:[%s8126_s1 + $0x230] sm:$0xff]  }
  0x66   : > { %5925 = vmatmul.mubr.bf16.vlgmr.msra.gmra.mrb[0].mxu0 %v7117_v14  ;;  %v6811_v14 = vld [vmem:[%s8126_s1 + $0x118] sm:$0xff]  }
  0x67   : > { %5941 = vmatpush3.bf16.msra.mxu0 %v6808_v41  ;;  %5928 = vmatprep.mubr.bf16.mxu0 %v7135_v37  ;;  %v6827_v41 = vld [vmem:[%s8126_s1 + $0x198] sm:$0xff]  }
  0x68   : > { %5942 = vmatprep.subr.bf16.mxu0 %v6809_v2 }
  0x69   : > { %2485 = vperm.xlu1 %6783, %v2447_v36   ;;  %v2143_v36 = vld [vmem:[#allocation2 + $0x30] sm:$0xff] }
  0x6a   : > { %v2190_v42 = vshll.u32 %v2143_v36, 16 }
  0x6b   : > { %5943 = vmatpush3.bf16.msra.mxu0 %v6809_v2  ;;  %v2450_v2 = vld [vmem:[%s8132_s7 + $0x40] sm:$0xff] }
  0x6c   : > { %5944 = vmatprep.subr.bf16.mxu0 %v6810_v44 }
  0x6e   : > { %5929 = vmatmul.mubr.bf16.gmra.mrb[4].mxu0 %v7138_v38 }
  0x6f   : > { %5945 = vmatpush3.bf16.msra.mxu0 %v6810_v44  ;;  %5932 = vmatprep.mubr.bf16.mxu0 %v7158_v51  ;;  %v6828_v44 = vld [vmem:[%s8126_s1 + $0x1a0] sm:$0xff]  }
  0x70   : > { %5946 = vmatprep.subr.bf16.mxu0 %v6811_v14 }
  0x73   : > { %5947 = vmatpush3.bf16.msra.mxu0 %v6811_v14  ;;  %v6857_v14 = vld [vmem:[%s8128_s3 + $0x48] sm:$0xff]  }
  0x74   : > { %5948 = vmatprep.subr.bf16.mxu0 %v6812_v49  ;;  %6102 = vmatprep.subr.bf16.mxu1 %v6857_v14 }
  0x75   : > { %6103 = vmatpush3.bf16.msra.mxu1 %v6857_v14 }
  0x76   : > { %5933 = vmatmul.mubr.bf16.gmra.mrb[8].mxu0 %v7144_v40  ;;  %6104 = vmatprep.subr.bf16.mxu1 %v6858_v9 }
  0x77   : > { %5949 = vmatpush3.bf16.msra.mxu0 %v6812_v49  ;;  %5936 = vmatprep.mubr.bf16.mxu0 %v7194_v4  ;;  %v1568_v49 = vshll.u32 %v1486_v47, 16  ;;  %v2144_v47 = vld [vmem:[#allocation2 + $0x38] sm:$0xff] }
  0x78   : > { %5950 = vmatprep.subr.bf16.mxu0 %v6813_v52 }
  0x79   : > { %6105 = vmatpush3.bf16.msra.mxu1 %v6858_v9 }
  0x7b   : > { %5951 = vmatpush3.bf16.msra.mxu0 %v6813_v52 }
  0x7c   : > { %5952 = vmatprep.subr.bf16.mxu0 %v6814_v55 }
  0x7e   : > { %5937 = vmatmul.mubr.bf16.gmra.mrb[12].mxu0 %v7251_v19 }
  0x7f   : > { %5953 = vmatpush3.bf16.msra.mxu0 %v6814_v55  ;;  %5956 = vmatprep.mubr.bf16.mxu0 %v6932_v58  ;;  %v2454_v55 = vld [vmem:[%s8132_s7 + $0x60] sm:$0xff]  ;;  %v2457_v58 = vld [vmem:[%s8132_s7 + $0x78] sm:$0xff] }
  0x80   : > { %5954 = vmatprep.subr.bf16.mxu0 %v6815_v45 }
  0x83   : > { %5955 = vmatpush3.bf16.msra.mxu0 %v6815_v45  ;;  %v1570_v45 = vrot.slane %v1568_v49, 1  ;;  %v2198_v49 = vshll.u32 %v2144_v47, 16 }
  0x84   : > { %5972 = vmatprep.subr.bf16.mxu0 %v6816_v61 }
  0x86   : > { %5957 = vmatmul.mubr.bf16.vlgmr.msra.gmra.mrb[0].mxu0 %v7314_v63 }
  0x87   : > { %5973 = vmatpush3.bf16.msra.mxu0 %v6816_v61  ;;  %5960 = vmatprep.mubr.bf16.mxu0 %v7318_v34  ;;  %v6831_v61 = vld [vmem:[%s8126_s1 + $0x1b8] sm:$0xff]  }
  0x88   : > { %5974 = vmatprep.subr.bf16.mxu0 %v6817_v62 }
  0x8b   : > { %5975 = vmatpush3.bf16.msra.mxu0 %v6817_v62 }
  0x8c   : > { %5976 = vmatprep.subr.bf16.mxu0 %v6818_v1 }
  0x8e   : > { %5961 = vmatmul.mubr.bf16.gmra.mrb[4].mxu0 %v7330_v26 }
  0x8f   : > { %5977 = vmatpush3.bf16.msra.mxu0 %v6818_v1  ;;  %5964 = vmatprep.mubr.bf16.mxu0 %v7334_v10  ;;  %v6832_v1 = vld [vmem:[%s8126_s1 + $0x1c0] sm:$0xff]  }
  0x90   : > { %5978 = vmatprep.subr.bf16.mxu0 %v6819_v5 }
  0x93   : > { %5979 = vmatpush3.bf16.msra.mxu0 %v6819_v5  ;;  %v6833_v5 = vld [vmem:[%s8126_s1 + $0x1c8] sm:$0xff]  }
  0x94   : > { %5980 = vmatprep.subr.bf16.mxu0 %v6820_v12 }
  0x96   : > { %5965 = vmatmul.mubr.bf16.gmra.mrb[8].mxu0 %v7344_v16 }
  0x97   : > { %5981 = vmatpush3.bf16.msra.mxu0 %v6820_v12  ;;  %5968 = vmatprep.mubr.bf16.mxu0 %v7348_v17  ;;  %v6838_v12 = vld [vmem:[%s8126_s1 + $0x1f0] sm:$0xff]  }
  0x98   : > { %5982 = vmatprep.subr.bf16.mxu0 %v6821_v15 }
  0x9b   : > { %5983 = vmatpush3.bf16.msra.mxu0 %v6821_v15  ;;  %v6847_v15 = vld [vmem:[%s8126_s1 + $0x218] sm:$0xff]  }
  0x9c   : > { %5984 = vmatprep.subr.bf16.mxu0 %v6822_v20 }
  0x9e   : > { %5969 = vmatmul.mubr.bf16.gmra.mrb[12].mxu0 %v7128_v31  ;;  %v2456_v31 = vld [vmem:[%s8132_s7 + $0x70] sm:$0xff] }
  0x9f   : > { %5985 = vmatpush3.bf16.msra.mxu0 %v6822_v20  ;;  %5988 = vmatprep.mubr.bf16.mxu0 %v7153_v46  ;;  %v2443_v46 = vld [vmem:[%s8132_s7 + $0x8] sm:$0xff]  ;;  %v2140_v20 = vld [vmem:[#allocation2 + $0x18] sm:$0xff] }
  0xa0   : > { %5986 = vmatprep.subr.bf16.mxu0 %v6823_v21  ;;  %2465 = vperm.xlu0 %6782, %v2443_v46   ;;  %v2167_v25 = vshrl.u32 %v2140_v20, 16 }
  0xa3   : > { %5987 = vmatpush3.bf16.msra.mxu0 %v6823_v21  ;;  %v2141_v21 = vld [vmem:[#allocation2 + $0x20] sm:$0xff] }
  0xa4   : > { %6004 = vmatprep.subr.bf16.mxu0 %v6824_v29  ;;  %2480 = vperm.xlu0 %6782, %v2446_v35   ;;  %v2174_v46 = vshll.u32 %v2141_v21, 16 }
  0xa6   : > { %5989 = vmatmul.mubr.bf16.vlgmr.msra.gmra.mrb[0].mxu0 %v7162_v53  ;;  %v2448_v53 = vld [vmem:[%s8132_s7 + $0x30] sm:$0xff]  ;;  %v2176_v35 = vrot.slane %v2174_v46, 1 }
  0xa7   : > { %6005 = vmatpush3.bf16.msra.mxu0 %v6824_v29  ;;  %5992 = vmatprep.mubr.bf16.mxu0 %v7167_v56  ;;  %v2449_v56 = vld [vmem:[%s8132_s7 + $0x38] sm:$0xff] }
  0xa8   : > { %6006 = vmatprep.subr.bf16.mxu0 %v6825_v33  ;;  %2490 = vperm.xlu0 %6782, %v2448_v53   ;;  %v2178_v53 = vshrl.u32 %v2141_v21, 16 }
  0xa9   : > { %2495 = vperm.xlu1 %6783, %v2449_v56  }
  0xab   : > { %6007 = vmatpush3.bf16.msra.mxu0 %v6825_v33 }
  0xac   : > { %6008 = vmatprep.subr.bf16.mxu0 %v6826_v39  ;;  %2500 = vperm.xlu0 %6782, %v2450_v2   ;;  %v6940_v2 = vld [vmem:[#allocation2 + $0x50] sm:$0xff] }
  0xad   : > { %2505 = vperm.xlu1 %6783, %v2451_v43  }
  0xae   : > { %5993 = vmatmul.mubr.bf16.gmra.mrb[4].mxu0 %v7175_v59  ;;  %v7421_v59 = vrot.slane %v1127_v32, 1  ;;  %v2453_v32 = vld [vmem:[%s8132_s7 + $0x58] sm:$0xff] }
  0xaf   : > { %6009 = vmatpush3.bf16.msra.mxu0 %v6826_v39  ;;  %5996 = vmatprep.mubr.bf16.mxu0 %v7178_v60  ;;  %v1741_v60 = vld [vmem:[#allocation2 + $0x10] sm:$0x80] }
  0xb0   : > { %6010 = vmatprep.subr.bf16.mxu0 %v6827_v41  ;;  %v1563_v52 = vsel %vm841_vm1, %v7191_v3, %v7421_v59  ;;  %v1761_v54 = vshrl.u32 %v1741_v60, 16  ;;  %2510 = vperm.xlu0 %6782, %v2452_v48   ;;  %v7445_v28 = vor.u32 %v7421_v59, %v1124_v23  ;;  %v2455_v3 = vld [vmem:[%s8132_s7 + $0x68] sm:$0xff]  ;;  %v2192_v60 = vrot.slane %v2190_v42, 1  ;;  %v2145_v48 = vld [vmem:[#allocation2 + $0x40] sm:$0xff] }
  0xb1   : > { %2515 = vperm.xlu1 %6783, %v2453_v32  }
  0xb2   : > { %v1763_v57 = vrot.slane %v1761_v54, 7  ;;  %v1571_v23 = vsel %vm841_vm1, %v7445_v28, %v1570_v45  ;;  %v2202_v54 = vshrl.u32 %v2144_v47, 16  ;;  %v2200_v45 = vrot.slane %v2198_v49, 1 }
  0xb3   : > { %6011 = vmatpush3.bf16.msra.mxu0 %v6827_v41 }
  0xb4   : > { %6012 = vmatprep.subr.bf16.mxu0 %v6828_v44  ;;  %2520 = vperm.xlu0 %6782, %v2454_v55   ;;  %v1766_v62 = vsel %vm593_vm0, %v1763_v57, %v7105_v7  ;;  %v6834_v7 = vld [vmem:[%s8126_s1 + $0x1d0] sm:$0xff]   ;;  %v2206_v55 = vshll.u32 %v2145_v48, 16 }
  0xb5   : > { %2525 = vperm.xlu1 %6783, %v2455_v3  }
  0xb6   : > { %5997 = vmatmul.mubr.bf16.gmra.mrb[8].mxu0 %v7184_v0  ;;  %v6830_v0 = vld [vmem:[%s8126_s1 + $0x1b0] sm:$0xff]   ;;  %v2208_v57 = vrot.slane %v2206_v55, 1 }
  0xb7   : > { %6013 = vmatpush3.bf16.msra.mxu0 %v6828_v44  ;;  %6000 = vmatprep.mubr.bf16.mxu0 %v1563_v52  ;;  %v2180_v44 = vor.u32 %v2178_v53, %v2176_v35 }
  0xb8   : > { %6014 = vmatprep.subr.bf16.mxu0 %v6829_v50  ;;  %2530 = vperm.xlu0 %6782, %v2456_v31  }
  0xb9   : > { %2535 = vperm.xlu1 %6783, %v2457_v58  }
  0xbb   : > { %6015 = vmatpush3.bf16.msra.mxu0 %v6829_v50  ;;  %v2194_v50 = vshrl.u32 %v2143_v36, 16  ;;  %v7588_v36 = vld [vmem:[%s8127_s2] ss:$0 sm:$0xff] }
  0xbc   : > { %6016 = vmatprep.subr.bf16.mxu0 %v6830_v0 }
  0xbd   : > { %v2196_v3 = vor.u32 %v2194_v50, %v2192_v60 }
  0xbe   : > { %6001 = vmatmul.mubr.bf16.gmra.mrb[12].mxu0 %v1571_v23  ;;  %v2210_v23 = vshrl.u32 %v2145_v48, 16 }
  0xbf   : > { %6017 = vmatpush3.bf16.msra.mxu0 %v6830_v0  ;;  %6020 = vmatprep.mubr.bf16.mxu0 %v1766_v62  ;;  %v2204_v0 = vor.u32 %v2202_v54, %v2200_v45  ;;  %v2201_v31 = vsel %vm841_vm1, %v2196_v3, %v2200_v45  ;;  %v2224_v62 = vrot.slane %v1789_v8, 1 }
  0xc0   : > { %6018 = vmatprep.subr.bf16.mxu0 %v6831_v61 }
  0xc1   : > { %v2209_v58 = vsel %vm841_vm1, %v2204_v0, %v2208_v57 }
  0xc3   : > { %6019 = vmatpush3.bf16.msra.mxu0 %v6831_v61  ;;  %v2212_v61 = vor.u32 %v2210_v23, %v2208_v57 }
  0xc4   : > { %6036 = vmatprep.subr.bf16.mxu0 %v6832_v1 }
  0xc6   : > { %6021 = vmatmul.mubr.bf16.vlgmr.msra.gmra.mrb[0].mxu0 %v7135_v37  ;;  %v1786_v37 = vshrl.u32 %v7206_v11, 16 }
  0xc7   : > { %6037 = vmatpush3.bf16.msra.mxu0 %v6832_v1  ;;  %6024 = vmatprep.mubr.bf16.mxu0 %v7138_v38  ;;  %v6836_v38 = vld [vmem:[%s8126_s1 + $0x1e0] sm:$0xff]   ;;  %v2148_v1 = vld [vmem:[#allocation2 + $0x58] sm:$0x1] }
  0xc8   : > { %6038 = vmatprep.subr.bf16.mxu0 %v6833_v5  ;;  %v1788_v18 = vrot.slane %v1786_v37, 7 }
  0xcb   : > { %6039 = vmatpush3.bf16.msra.mxu0 %v6833_v5  ;;  %v2217_v5 = vsel %vm841_vm1, %v2212_v61, %v7421_v59  ;;  %v6860_v59 = vld [vmem:[%s8128_s3 + $0x60] sm:$0xff]  }
  0xcc   : > { %6040 = vmatprep.subr.bf16.mxu0 %v6834_v7 }
  0xce   : > { %6025 = vmatmul.mubr.bf16.gmra.mrb[4].mxu0 %v7158_v51  ;;  %v6837_v51 = vld [vmem:[%s8126_s1 + $0x1e8] sm:$0xff]  }
  0xcf   : > { %6041 = vmatpush3.bf16.msra.mxu0 %v6834_v7  ;;  %6028 = vmatprep.mubr.bf16.mxu0 %v7144_v40  ;;  %v1791_v40 = vor.u32 %v1789_v8, %v1788_v18  ;;  %v2230_v7 = vshll.u32 %v2148_v1, 16  ;;  %v6859_v8 = vld [vmem:[%s8128_s3 + $0x58] sm:$0xff]  }
  0xd0   : > { %6042 = vmatprep.subr.bf16.mxu0 %v6835_v6  ;;  %6106 = vmatprep.subr.bf16.mxu1 %v6859_v8 }
  0xd1   : > { %v2232_v18 = vrot.slane %v2230_v7, 1  ;;  %6107 = vmatpush3.bf16.msra.mxu1 %v6859_v8  ;;  %v6865_v8 = vld [vmem:[%s8128_s3 + $0x8] sm:$0xff]  }
  0xd2   : > { %6108 = vmatprep.subr.bf16.mxu1 %v6860_v59 }
  0xd3   : > { %6043 = vmatpush3.bf16.msra.mxu0 %v6835_v6  ;;  %v2225_v6 = vsel %vm841_vm1, %v7445_v28, %v2224_v62 }
  0xd4   : > { %6044 = vmatprep.subr.bf16.mxu0 %v6836_v38 }
  0xd5   : > { %6109 = vmatpush3.bf16.msra.mxu1 %v6860_v59 }
  0xd6   : > { %6029 = vmatmul.mubr.bf16.gmra.mrb[8].mxu0 %v7194_v4  ;;  %v1792_v4 = vsel %vm593_vm0, %v7231_v27, %v1791_v40  ;;  %v6843_v27 = vld [vmem:[%s8126_s1 + $0x208] sm:$0xff]  }
  0xd7   : > { %6045 = vmatpush3.bf16.msra.mxu0 %v6836_v38  ;;  %6032 = vmatprep.mubr.bf16.mxu0 %v7251_v19  ;;  %v6839_v19 = vld [vmem:[%s8126_s1 + $0x1f8] sm:$0xff]   ;;  %v2228_v38 = vor.u32 %v2224_v62, %v1786_v37  ;;  %v6861_v37 = vld [vmem:[%s8128_s3 + $0x68] sm:$0xff]  }
  0xd8   : > { %6046 = vmatprep.subr.bf16.mxu0 %v6837_v51  ;;  %6110 = vmatprep.subr.bf16.mxu1 %v6861_v37 }
  0xd9   : > { %6111 = vmatpush3.bf16.msra.mxu1 %v6861_v37 }
  0xdb   : > { %6047 = vmatpush3.bf16.msra.mxu0 %v6837_v51  ;;  %v2233_v51 = vsel %vm841_vm1, %v2228_v38, %v2232_v18 }
  0xdc   : > { %6048 = vmatprep.subr.bf16.mxu0 %v6838_v12 }
  0xde   : > { %6033 = vmatmul.mubr.bf16.gmra.mrb[12].mxu0 %v1792_v4 }
  0xdf   : > { %6049 = vmatpush3.bf16.msra.mxu0 %v6838_v12  ;;  %6052 = vmatprep.mubr.bf16.mxu0 %v7314_v63  ;;  %v6845_v63 = vld [vmem:[%s8126_s1 + $0x210] sm:$0xff]  }
  0xe0   : > { %6050 = vmatprep.subr.bf16.mxu0 %v6839_v19  ;;  %v6862_v12 = vld [vmem:[%s8128_s3 + $0x70] sm:$0xff]  }
  0xe1   : > { %6112 = vmatprep.subr.bf16.mxu1 %v6862_v12 }
  0xe2   : > { %6113 = vmatpush3.bf16.msra.mxu1 %v6862_v12 }
  0xe3   : > { %6051 = vmatpush3.bf16.msra.mxu0 %v6839_v19 }
  0xe4   : > { %6068 = vmatprep.subr.bf16.mxu0 %v6841_v13 }
  0xe6   : > { %6053 = vmatmul.mubr.bf16.vlgmr.msra.gmra.mrb[0].mxu0 %v7318_v34  ;;  %v6849_v34 = vld [vmem:[%s8126_s1 + $0x220] sm:$0xff]  }
  0xe7   : > { %6069 = vmatpush3.bf16.msra.mxu0 %v6841_v13  ;;  %6056 = vmatprep.mubr.bf16.mxu0 %v7330_v26  ;;  %v2169_v26 = vshll.u32 %v2140_v20, 16 }
  0xe8   : > { %6070 = vmatprep.subr.bf16.mxu0 %v6843_v27 }
  0xe9   : > { %v2171_v29 = vrot.slane %v2169_v26, 1 }
  0xeb   : > { %6071 = vmatpush3.bf16.msra.mxu0 %v6843_v27  ;;  %v2172_v33 = vor.u32 %v2171_v29, %v2167_v25  ;;  %v6863_v27 = vld [vmem:[%s8128_s3 + $0x78] sm:$0xff]  }
  0xec   : > { %6072 = vmatprep.subr.bf16.mxu0 %v6845_v63  ;;  %6114 = vmatprep.subr.bf16.mxu1 %v6863_v27 }
  0xed   : > { %v2177_v56 = vsel %vm841_vm1, %v2172_v33, %v2176_v35  ;;  %6115 = vmatpush3.bf16.msra.mxu1 %v6863_v27 }
  0xee   : > { %6057 = vmatmul.mubr.bf16.gmra.mrb[4].mxu0 %v7334_v10  ;;  %v6939_v10 = vld [vmem:[#allocation2 + $0x48] sm:$0xff] }
  0xef   : > { %6073 = vmatpush3.bf16.msra.mxu0 %v6845_v63  ;;  %6060 = vmatprep.mubr.bf16.mxu0 %v7344_v16  ;;  %v2142_v16 = vld [vmem:[#allocation2 + $0x28] sm:$0xff] }
  0xf0   : > { %6074 = vmatprep.subr.bf16.mxu0 %v6847_v15  ;;  %v2182_v39 = vshll.u32 %v2142_v16, 16  ;;  %v2186_v41 = vshrl.u32 %v2142_v16, 16  ;;  %v2471_v16 = vpop.permute.xlu1 %2470 }
  0xf2   : > { %v2184_v43 = vrot.slane %v2182_v39, 1 }
  0xf3   : > { %6075 = vmatpush3.bf16.msra.mxu0 %v6847_v15  ;;  %v6864_v15 = vld [vmem:[%s8128_s3] sm:$0xff]  }
  0xf4   : > { %6076 = vmatprep.subr.bf16.mxu0 %v6849_v34  ;;  %v2188_v14 = vor.u32 %v2186_v41, %v2184_v43  ;;  %v2185_v32 = vsel %vm841_vm1, %v2180_v44, %v2184_v43  ;;  %6132 = vmatprep.subr.bf16.mxu1 %v6864_v15  ;;  %v2476_v33 = vpop.permute.xlu1 %2475 }
  0xf6   : > { %6061 = vmatmul.mubr.bf16.gmra.mrb[8].mxu0 %v7348_v17  ;;  %v6855_v17 = vld [vmem:[%s8126_s1 + $0x238] sm:$0xff]   ;;  %v2193_v52 = vsel %vm841_vm1, %v2188_v14, %v2192_v60 }
  0xf7   : > { %6077 = vmatpush3.bf16.msra.mxu0 %v6849_v34  ;;  %6064 = vmatprep.mubr.bf16.mxu0 %v6939_v10  ;;  %v2461_v10 = vpop.permute.xlu0 %2460 }
  0xf8   : > { %6078 = vmatprep.subr.bf16.mxu0 %v6851_v22 }
  0xfb   : > { %6079 = vmatpush3.bf16.msra.mxu0 %v6851_v22 }
  0xfc   : > { %6080 = vmatprep.subr.bf16.mxu0 %v6853_v30 }
  0xfe   : > { %6065 = vmatmul.mubr.bf16.gmra.mrb[12].mxu0 %v6940_v2 }
  0xff   : > { %6081 = vmatpush3.bf16.msra.mxu0 %v6853_v30  ;;  %6084 = vmatprep.mubr.bf16.mxu0 %v2177_v56  ;;  %v2486_v56 = vpop.permute.xlu1 %2485 }
 0x100   : > { %6082 = vmatprep.subr.bf16.mxu0 %v6855_v17 }
 0x103   : > { %6083 = vmatpush3.bf16.msra.mxu0 %v6855_v17 }
 0x106   : > { %6085 = vmatmul.mubr.bf16.vlgmr.msra.gmra.mrb[0].mxu0 %v2185_v32 }
 0x107   : > { %6088 = vmatprep.mubr.bf16.mxu0 %v2193_v52 }
 0x10e   : > { %6089 = vmatmul.mubr.bf16.gmra.mrb[4].mxu0 %v2201_v31 }
 0x10f   : > { %6092 = vmatprep.mubr.bf16.mxu0 %v2209_v58 }
 0x116   : > { %6093 = vmatmul.mubr.bf16.gmra.mrb[8].mxu0 %v2217_v5 }
 0x117   : > { %6096 = vmatprep.mubr.bf16.mxu0 %v2225_v6 }
 0x11e   : > { %6097 = vmatmul.mubr.bf16.gmra.mrb[12].mxu0 %v2233_v51  ;;  %v5830_v28 = vpop.f32.mrb[0].mxu1 }
 0x11f   : > { %v530_v40 = vpop.f32.mrb[1].mxu1  ;;  %v2466_v30 = vpop.permute.xlu0 %2465 }
 0x120   : > { %v5831_v11 = vpop.f32.mrb[2].mxu1 }
 0x121   : > { %v533_v9 = vpop.f32.mrb[3].mxu1 }
 0x123   : > { %v2481_v39 = vpop.permute.xlu0 %2480 }
 0x126   : > { %v5834_v4 = vpop.f32.mrb[4].mxu1 }
 0x127   : > { %v546_v19 = vpop.f32.mrb[5].mxu1  ;;  %v2491_v50 = vpop.permute.xlu0 %2490 }
 0x128   : > { %v5835_v13 = vpop.f32.mrb[6].mxu1  ;;  %v2496_v54 = vpop.permute.xlu1 %2495 }
 0x129   : > { %v549_v63 = vpop.f32.mrb[7].mxu1 }
 0x12b   : > { %v2501_v59 = vpop.permute.xlu0 %2500 }
 0x12e   : > { %v7569_v20 = vpop.f32.mrb[8].mxu1 }
 0x12f   : > { %v7571_v34 = vpop.f32.mrb[9].mxu1 }
 0x130   : > { %v7573_v26 = vpop.f32.mrb[10].mxu1 }
 0x131   : > { %v7575_v21 = vpop.f32.mrb[11].mxu1 }
 0x136   : > { %v7577_v22 = vpop.f32.mrb[12].mxu1 }
 0x137   : > { %v7579_v25 = vpop.f32.mrb[13].mxu1 }
 0x138   : > { %v7581_v29 = vpop.f32.mrb[14].mxu1 }
 0x139   : > { %v7583_v46 = vpop.f32.mrb[15].mxu1 }
 0x1d9   : > { %v6086_v35 = vpop.f32.mrb[0].mxu0 }
 0x1da   : > { %v6484_v53 = vadd.f32 %v6086_v35, %v5830_v28  ;;  %v2324_v17 = vpop.f32.mrb[1].mxu0 }
 0x1db   : > { %v6485_v41 = vadd.f32 %v2324_v17, %v530_v40  ;;  %v6087_v42 = vpop.f32.mrb[2].mxu0  ;;  %v2511_v17 = vpop.permute.xlu0 %2510 }
 0x1dc   : > { %v2412_v2 = vadd.f32 %v6484_v53, %v7588_v36  ;;  %v6486_v43 = vadd.f32 %v6087_v42, %v5831_v11  ;;  %v2327_v44 = vpop.f32.mrb[3].mxu0  ;;  %v2506_v11 = vpop.permute.xlu1 %2505 }
 0x1dd   : > { %v2410_v47 = vadd.f32 %v6485_v41, %v7588_v36  ;;  %v6487_v14 = vadd.f32 %v2327_v44, %v533_v9 }
 0x1de   : > { %v2428_v60 = vmax.f32 %v2412_v2, 0.0  ;;  %v2413_v48 = vadd.f32 %v6486_v43, %v7588_v36 }
 0x1df   : > { %v2426_v49 = vmax.f32 %v2410_v47, 0.0  ;;  %v2411_v32 = vadd.f32 %v6487_v14, %v7588_v36 }
 0x1e0   : > { %v2429_v52 = vmax.f32 %v2413_v48, 0.0  ;;  %v2540_v3 = vmul.f32 %v2471_v16, %v2428_v60  ;;  %v2516_v43 = vpop.permute.xlu1 %2515 }
 0x1e1   : > { %v2427_v55 = vmax.f32 %v2411_v32, 0.0  ;;  %v6090_v45 = vpop.f32.mrb[4].mxu0  ;;  %v2538_v23 = vmul.f32 %v2461_v10, %v2426_v49  ;;  %v6868_v49 = vld [vmem:[%s8128_s3 + $0x20] sm:$0xff]   ;;  %v2521_v32 = vpop.permute.xlu0 %2520 }
 0x1e2   : > { %v2541_v0 = vmul.f32 %v2476_v33, %v2429_v52  ;;  %v6488_v57 = vadd.f32 %v6090_v45, %v5834_v4  ;;  %v2340_v31 = vpop.f32.mrb[5].mxu0  ;;  %v2574_v45 = vld [vmem:[#allocation3] sm:$0x80] }
 0x1e3   : > { %v2539_v58 = vmul.f32 %v2466_v30, %v2427_v55  ;;  %v6489_v61 = vadd.f32 %v2340_v31, %v546_v19  ;;  %v6091_v62 = vpop.f32.mrb[6].mxu0 }
 0x1e4   : > { %v7594_v1 = vpack.c.bf16 %v2541_v0, %v2540_v3  ;;  %v2416_v5 = vadd.f32 %v6488_v57, %v7588_v36  ;;  %v6490_v7 = vadd.f32 %v6091_v62, %v5835_v13  ;;  %v2343_v6 = vpop.f32.mrb[7].mxu0  ;;  %v6866_v13 = vld [vmem:[%s8128_s3 + $0x10] sm:$0xff]   ;;  %v2526_v3 = vpop.permute.xlu1 %2525 }
 0x1e5   : > { %v7597_v38 = vpack.c.bf16 %v2539_v58, %v2538_v23  ;;  %v2414_v18 = vadd.f32 %v6489_v61, %v7588_v36  ;;  %v6491_v51 = vadd.f32 %v2343_v6, %v549_v63 }
 0x1e6   : > { %2567 = vst [vmem:[#allocation3 + $0x18] sm:$0xff] %v7594_v1  ;;  %v2432_v28 = vmax.f32 %v2416_v5, 0.0  ;;  %v2417_v40 = vadd.f32 %v6490_v7, %v7588_v36 }
 0x1e7   : > { %2566 = vst [vmem:[#allocation3 + $0x10] sm:$0xff] %v7597_v38  ;;  %v2430_v37 = vmax.f32 %v2414_v18, 0.0  ;;  %v2415_v9 = vadd.f32 %v6491_v51, %v7588_v36  ;;  %6117 = vmatmul.mubr.bf16.vlgmr.msra.gmra.mrb[16].mxu1 %v7597_v38  ;;  %v2762_v18 = vshrl.u32 %v2574_v45, 16  ;;  %v2782_v51 = vshrl.u32 %v7594_v1, 16 }
 0x1e8   : > { %v2433_v12 = vmax.f32 %v2417_v40, 0.0  ;;  %6120 = vmatprep.mubr.bf16.mxu1 %v7594_v1  ;;  %6133 = vmatpush3.bf16.msra.mxu1 %v6864_v15  ;;  %v2544_v27 = vmul.f32 %v2491_v50, %v2432_v28  ;;  %v7653_v28 = vrot.slane %v6950_v24, 7 }
 0x1e9   : > { %v2431_v4 = vmax.f32 %v2415_v9, 0.0  ;;  %v6094_v19 = vpop.f32.mrb[8].mxu0  ;;  %6134 = vmatprep.subr.bf16.mxu1 %v6865_v8  ;;  %v2542_v30 = vmul.f32 %v2481_v39, %v2430_v37 }
 0x1ea   : > { %v2545_v63 = vmul.f32 %v2496_v54, %v2433_v12  ;;  %v6492_v10 = vadd.f32 %v6094_v19, %v7569_v20  ;;  %v2356_v16 = vpop.f32.mrb[9].mxu0  ;;  %v2531_v12 = vpop.permute.xlu0 %2530 }
 0x1eb   : > { %v2543_v33 = vmul.f32 %v2486_v56, %v2431_v4  ;;  %v6493_v35 = vadd.f32 %v2356_v16, %v7571_v34  ;;  %v6095_v53 = vpop.f32.mrb[10].mxu0  ;;  %v6867_v34 = vld [vmem:[%s8128_s3 + $0x18] sm:$0xff]   ;;  %v2536_v4 = vpop.permute.xlu1 %2535 }
 0x1ec   : > { %v7614_v41 = vpack.c.bf16 %v2545_v63, %v2544_v27  ;;  %v2420_v15 = vadd.f32 %v6492_v10, %v7588_v36  ;;  %v6494_v42 = vadd.f32 %v6095_v53, %v7573_v26  ;;  %v2359_v2 = vpop.f32.mrb[11].mxu0  ;;  %6135 = vmatpush3.bf16.msra.mxu1 %v6865_v8  ;;  %v2764_v27 = vrot.slane %v2762_v18, 7 }
 0x1ed   : > { %v7618_v44 = vpack.c.bf16 %v2543_v33, %v2542_v30  ;;  %v2418_v20 = vadd.f32 %v6493_v35, %v7588_v36  ;;  %v6495_v39 = vadd.f32 %v2359_v2, %v7575_v21  ;;  %6136 = vmatprep.subr.bf16.mxu1 %v6866_v13  ;;  %v7666_v63 = vrot.slane %v2782_v51, 7 }
 0x1ee   : > { %2569 = vst [vmem:[#allocation3 + $0x28] sm:$0xff] %v7614_v41  ;;  %v2436_v56 = vmax.f32 %v2420_v15, 0.0  ;;  %v2421_v47 = vadd.f32 %v6494_v42, %v7588_v36  ;;  %v2785_v33 = vshll.u32 %v7594_v1, 16 }
 0x1ef   : > { %2568 = vst [vmem:[#allocation3 + $0x20] sm:$0xff] %v7618_v44  ;;  %v2434_v26 = vmax.f32 %v2418_v20, 0.0  ;;  %v2419_v14 = vadd.f32 %v6495_v39, %v7588_v36  ;;  %6121 = vmatmul.mubr.bf16.gmra.mrb[20].mxu1 %v7618_v44  ;;  %v2790_v9 = vshrl.u32 %v7618_v44, 16 }
 0x1f0   : > { %v2437_v60 = vmax.f32 %v2421_v47, 0.0  ;;  %6124 = vmatprep.mubr.bf16.mxu1 %v7614_v41  ;;  %6137 = vmatpush3.bf16.msra.mxu1 %v6866_v13  ;;  %v2548_v50 = vmul.f32 %v2511_v17, %v2436_v56  ;;  %v2772_v56 = vsel %vm593_vm0, %v2764_v27, %v7653_v28  ;;  %v2777_v47 = vshll.u32 %v7597_v38, 16 }
 0x1f1   : > { %v2435_v21 = vmax.f32 %v2419_v14, 0.0  ;;  %v6098_v48 = vpop.f32.mrb[12].mxu0  ;;  %6138 = vmatprep.subr.bf16.mxu1 %v6867_v34  ;;  %v2546_v0 = vmul.f32 %v2501_v59, %v2434_v26  ;;  %v2798_v59 = vshrl.u32 %v7614_v41, 16  ;;  %v2792_v2 = vrot.slane %v2790_v9, 7 }
 0x1f2   : > { %v2549_v52 = vmul.f32 %v2516_v43, %v2437_v60  ;;  %v6496_v54 = vadd.f32 %v6098_v48, %v7577_v22  ;;  %v2372_v55 = vpop.f32.mrb[13].mxu0  ;;  %v2801_v43 = vshll.u32 %v7614_v41, 16  ;;  %v7693_v26 = vor.u32 %v2785_v33, %v7666_v63 }
 0x1f3   : > { %v2547_v57 = vmul.f32 %v2506_v11, %v2435_v21  ;;  %v6497_v31 = vadd.f32 %v2372_v55, %v7579_v25  ;;  %v6099_v23 = vpop.f32.mrb[14].mxu0  ;;  %v6869_v25 = vld [vmem:[%s8128_s3 + $0x28] sm:$0xff]   ;;  %v2774_v11 = vshrl.u32 %v7597_v38, 16  ;;  %v7670_v30 = vrot.slane %v2798_v59, 7 }
 0x1f4   : > { %v7636_v58 = vpack.c.bf16 %v2549_v52, %v2548_v50  ;;  %v2424_v61 = vadd.f32 %v6496_v54, %v7588_v36  ;;  %v6498_v62 = vadd.f32 %v6099_v23, %v7581_v29  ;;  %v2375_v5 = vpop.f32.mrb[15].mxu0  ;;  %6139 = vmatpush3.bf16.msra.mxu1 %v6867_v34  ;;  %v6871_v34 = vld [vmem:[%s8128_s3 + $0x38] sm:$0xff]   ;;  %v6872_v52 = vld [vmem:[%s8128_s3 + $0x80] sm:$0xff]   ;;  %v7714_v45 = vrot.slane %v2777_v47, 1 }
 0x1f5   : > { %v7640_v7 = vpack.c.bf16 %v2547_v57, %v2546_v0  ;;  %v2422_v22 = vadd.f32 %v6497_v31, %v7588_v36  ;;  %v6499_v6 = vadd.f32 %v2375_v5, %v7583_v46  ;;  %6140 = vmatprep.subr.bf16.mxu1 %v6868_v49  ;;  %v2776_v15 = vrot.slane %v2774_v11, 7 }
 0x1f6   : > { %2571 = vst [vmem:[#allocation3 + $0x38] sm:$0xff] %v7636_v58  ;;  %v2440_v8 = vmax.f32 %v2424_v61, 0.0  ;;  %v2425_v29 = vadd.f32 %v6498_v62, %v7588_v36  ;;  %v2814_v13 = vshrl.u32 %v7636_v58, 16  ;;  %v3278_v14 = vor.u32 %v2801_v43, %v7670_v30  ;;  %v6873_v62 = vld [vmem:[%s8128_s3 + $0x88] sm:$0xff]  }
 0x1f7   : > { %2570 = vst [vmem:[#allocation3 + $0x30] sm:$0xff] %v7640_v7  ;;  %v2438_v46 = vmax.f32 %v2422_v22, 0.0  ;;  %v2423_v40 = vadd.f32 %v6499_v6, %v7588_v36  ;;  %6125 = vmatmul.mubr.bf16.gmra.mrb[24].mxu1 %v7640_v7  ;;  %v6870_v36 = vld [vmem:[%s8128_s3 + $0x30] sm:$0xff]   ;;  %v2806_v17 = vshrl.u32 %v7640_v7, 16  ;;  %v2817_v21 = vshll.u32 %v7636_v58, 16 }
 0x1f8   : > { %v2441_v37 = vmax.f32 %v2425_v29, 0.0  ;;  %6128 = vmatprep.mubr.bf16.mxu1 %v7636_v58  ;;  %6141 = vmatpush3.bf16.msra.mxu1 %v6868_v49  ;;  %v2552_v10 = vmul.f32 %v2531_v12, %v2440_v8  ;;  %v7683_v39 = vrot.slane %v2814_v13, 7  ;;  %v7701_v48 = vsel %vm593_vm0, %v2776_v15, %v7693_v26 }
 0x1f9   : > { %v2439_v19 = vmax.f32 %v2423_v40, 0.0  ;;  %6142 = vmatprep.subr.bf16.mxu1 %v6869_v25  ;;  %v2550_v35 = vmul.f32 %v2521_v32, %v2438_v46  ;;  %v2808_v60 = vrot.slane %v2806_v17, 7  ;;  %v7704_v49 = vsel %vm593_vm0, %v2792_v2, %v3278_v14 }
 0x1fa   : > { %v2553_v16 = vmul.f32 %v2536_v4, %v2441_v37  ;;  %v2793_v32 = vshll.u32 %v7618_v44, 16  ;;  %v2809_v50 = vshll.u32 %v7640_v7, 16  ;;  %v3284_v54 = vor.u32 %v2817_v21, %v7683_v39  ;;  %v6874_v4 = vld [vmem:[%s8128_s3 + $0x90] sm:$0xff]  }
 0x1fb   : > { %v2551_v53 = vmul.f32 %v2526_v3, %v2439_v19  ;;  %v7712_v55 = vor.u32 %v2777_v47, %v2776_v15  ;;  %v3680_v3 = vrot.slane %v2785_v33, 1  ;;  %v3676_v31 = vor.u32 %v7714_v45, %v2774_v11  ;;  %v6879_v47 = vld [vmem:[%s8128_s3 + $0xb8] sm:$0xff]  }
 0x1fc   : > { %v7674_v42 = vpack.c.bf16 %v2553_v16, %v2552_v10  ;;  %6143 = vmatpush3.bf16.msra.mxu1 %v6869_v25  ;;  %v7717_v0 = vsel %vm593_vm0, %v2808_v60, %v3284_v54  ;;  %v3688_v5 = vrot.slane %v2793_v32, 1  ;;  %v3696_v22 = vrot.slane %v2801_v43, 1  ;;  %v3245_v54 = vld [vmem:[#allocation3 + $0x8] sm:$0x80] }
 0x1fd   : > { %v7679_v20 = vpack.c.bf16 %v2551_v53, %v2550_v35  ;;  %6144 = vmatprep.subr.bf16.mxu1 %v6870_v36  ;;  %v3684_v23 = vor.u32 %v3680_v3, %v2782_v51  ;;  %v3704_v6 = vrot.slane %v2809_v50, 1  ;;  %v2780_v25 = vsel %vm593_vm0, %v7653_v28, %v7712_v55 }
 0x1fe   : > { %2573 = vst [vmem:[#allocation3 + $0x48] sm:$0xff] %v7674_v42  ;;  %v3290_v18 = vshrl.u32 %v7674_v42, 16  ;;  %v7732_v8 = vsel %vm841_vm1, %v3676_v31, %v3680_v3  ;;  %v3692_v29 = vor.u32 %v3688_v5, %v2790_v9  ;;  %v3700_v46 = vor.u32 %v3696_v22, %v2798_v59  ;;  %v6886_v31 = vld [vmem:[%s8128_s3 + $0xf0] sm:$0xff]  }
 0x1ff   : > { %2572 = vst [vmem:[#allocation3 + $0x40] sm:$0xff] %v7679_v20  ;;  %6129 = vmatmul.mubr.bf16.gmra.mrb[28].mxu1 %v7679_v20  ;;  %v2825_v57 = vshll.u32 %v7679_v20, 16  ;;  %v2822_v61 = vshrl.u32 %v7679_v20, 16  ;;  %v7735_v51 = vsel %vm841_vm1, %v3684_v23, %v3688_v5  ;;  %v3708_v40 = vor.u32 %v3704_v6, %v2806_v17  ;;  %v6875_v17 = vld [vmem:[%s8128_s3 + $0x98] sm:$0xff]  }
 0x200   : > { %6145 = vmatpush3.bf16.msra.mxu1 %v6870_v36  ;;  %6148 = vmatprep.mubr.bf16.mxu1 %v2772_v56  ;;  %v2795_v11 = vor.u32 %v2793_v32, %v2792_v2  ;;  %v3712_v28 = vrot.slane %v2817_v21, 1  ;;  %v7746_v19 = vsel %vm841_vm1, %v3692_v29, %v3696_v22  ;;  %v7749_v9 = vsel %vm841_vm1, %v3700_v46, %v3704_v6  ;;  %v6882_v21 = vld [vmem:[%s8128_s3 + $0xd0] sm:$0xff]   ;;  %v6883_v32 = vld [vmem:[%s8128_s3 + $0xd8] sm:$0xff]   ;;  %v6888_v6 = vld [vmem:[%s8128_s3 + $0x100] sm:$0xff]  }
 0x201   : > { %6146 = vmatprep.subr.bf16.mxu1 %v6871_v34  ;;  %v3720_v37 = vrot.slane %v2825_v57, 1  ;;  %v2824_v12 = vrot.slane %v2822_v61, 7  ;;  %v7753_v59 = vrot.slane %v3290_v18, 7  ;;  %v3293_v16 = vshll.u32 %v7674_v42, 16  ;;  %v6891_v29 = vld [vmem:[%s8128_s3 + $0x118] sm:$0xff]   ;;  %v6893_v46 = vld [vmem:[%s8128_s3 + $0x128] sm:$0xff]  }
 0x202   : > { %v7756_v36 = vsel %vm841_vm1, %v3708_v40, %v3712_v28  ;;  %v3716_v27 = vor.u32 %v3712_v28, %v2814_v13  ;;  %v3940_v35 = vor.u32 %v2809_v50, %v2808_v60  ;;  %v7768_v53 = vsel %vm593_vm0, %v7666_v63, %v2795_v11  ;;  %v6881_v60 = vld [vmem:[%s8128_s3 + $0xc8] sm:$0xff]   ;;  %v6884_v50 = vld [vmem:[%s8128_s3 + $0xe0] sm:$0xff]   ;;  %v6894_v40 = vld [vmem:[%s8128_s3 + $0x130] sm:$0xff]  }
 0x203   : > { %v7760_v10 = vor.u32 %v3720_v37, %v2822_v61  ;;  %v3946_v15 = vor.u32 %v2825_v57, %v2824_v12  ;;  %v3949_v2 = vor.u32 %v3293_v16, %v7753_v59  ;;  %v3013_v56 = vrot.slane %v6950_v24, 1  ;;  %v6880_v24 = vld [vmem:[%s8128_s3 + $0xc0] sm:$0xff]   ;;  %v6895_v11 = vld [vmem:[%s8128_s3 + $0x138] sm:$0xff]  }
 0x204   : > { %6147 = vmatpush3.bf16.msra.mxu1 %v6871_v34  ;;  %v7764_v33 = vsel %vm841_vm1, %v3716_v27, %v3720_v37  ;;  %v7775_v13 = vsel %vm593_vm0, %v7670_v30, %v3940_v35  ;;  %v6876_v30 = vld [vmem:[%s8128_s3 + $0xa0] sm:$0xff]   ;;  %v6877_v34 = vld [vmem:[%s8128_s3 + $0xa8] sm:$0xff]   ;;  %v3265_v57 = vshrl.u32 %v3245_v54, 16  ;;  %v6902_v35 = vld [vmem:[%s8128_s3 + $0x170] sm:$0xff]  }
 0x205   : > { %6164 = vmatprep.subr.bf16.mxu1 %v6872_v52  ;;  %v7784_v63 = vsel %vm593_vm0, %v7683_v39, %v3946_v15  ;;  %v7787_v43 = vsel %vm593_vm0, %v2824_v12, %v3949_v2  ;;  %v6878_v39 = vld [vmem:[%s8128_s3 + $0xb0] sm:$0xff]   ;;  %v3019_v14 = vsel %vm841_vm1, %v3013_v56, %v7714_v45  ;;  %v6885_v45 = vld [vmem:[%s8128_s3 + $0xe8] sm:$0xff]   ;;  %v6896_v28 = vld [vmem:[%s8128_s3 + $0x140] sm:$0xff]   ;;  %v3728_v56 = vrot.slane %v3293_v16, 1 }
 0x206   : > { %v3267_v61 = vrot.slane %v3265_v57, 7  ;;  %v6897_v37 = vld [vmem:[%s8128_s3 + $0x148] sm:$0xff]   ;;  %v6899_v12 = vld [vmem:[%s8128_s3 + $0x158] sm:$0xff]   ;;  %v6904_v15 = vld [vmem:[%s8128_s3 + $0x180] sm:$0xff]  }
 0x207   : > { %6149 = vmatmul.mubr.bf16.vlgmr.msra.gmra.mrb[16].mxu1 %v2780_v25  ;;  %v6889_v25 = vld [vmem:[%s8128_s3 + $0x108] sm:$0xff]   ;;  %v3732_v16 = vor.u32 %v3728_v56, %v3290_v18  ;;  %v6912_v18 = vld [vmem:[%s8128_s3 + $0x1c0] sm:$0xff]   ;;  %v6919_v57 = vld [vmem:[%s8128_s3 + $0x1f8] sm:$0xff]  }
 0x208   : > { %6152 = vmatprep.mubr.bf16.mxu1 %v7701_v48  ;;  %6165 = vmatpush3.bf16.msra.mxu1 %v6872_v52  ;;  %v2990_v52 = vld [vmem:[#allocation3 + $0x48] sm:$0x1]  ;;  %v3270_v22 = vsel %vm593_vm0, %v3267_v61, %v7712_v55  ;;  %v6890_v55 = vld [vmem:[%s8128_s3 + $0x110] sm:$0xff]  }
 0x209   : > { %6166 = vmatprep.subr.bf16.mxu1 %v6873_v62  ;;  %v3072_v3 = vshll.u32 %v2990_v52, 16  ;;  %v6901_v27 = vld [vmem:[%s8128_s3 + $0x168] sm:$0xff]  }
 0x20a   : > { %v6905_v2 = vld [vmem:[%s8128_s3 + $0x188] sm:$0xff]  }
 0x20b   : > { %v3074_v23 = vrot.slane %v3072_v3, 1  ;;  %v6917_v54 = vld [vmem:[%s8128_s3 + $0x1e8] sm:$0xff]  }
 0x20c   : > { %6167 = vmatpush3.bf16.msra.mxu1 %v6873_v62  ;;  %v6887_v62 = vld [vmem:[%s8128_s3 + $0xf8] sm:$0xff]   ;;  %v6925_v61 = vld [vmem:[%s8128_s3 + $0x228] sm:$0xff]  }
 0x20d   : > { %6168 = vmatprep.subr.bf16.mxu1 %v6874_v4  ;;  %v3075_v5 = vsel %vm841_vm1, %v7760_v10, %v3074_v23  ;;  %v4307_v23 = vld [vmem:[#allocation3 + $0x20] sm:$0xff] }
 0x20f   : > { %6153 = vmatmul.mubr.bf16.gmra.mrb[20].mxu1 %v7768_v53 }
 0x210   : > { %6156 = vmatprep.mubr.bf16.mxu1 %v7704_v49  ;;  %6169 = vmatpush3.bf16.msra.mxu1 %v6874_v4  ;;  %v6900_v4 = vld [vmem:[%s8128_s3 + $0x160] sm:$0xff]  }
 0x211   : > { %6170 = vmatprep.subr.bf16.mxu1 %v6875_v17 }
 0x214   : > { %6171 = vmatpush3.bf16.msra.mxu1 %v6875_v17  ;;  %v6903_v17 = vld [vmem:[%s8128_s3 + $0x178] sm:$0xff]  }
 0x215   : > { %6172 = vmatprep.subr.bf16.mxu1 %v6876_v30 }
 0x217   : > { %6157 = vmatmul.mubr.bf16.gmra.mrb[24].mxu1 %v7775_v13 }
 0x218   : > { %6160 = vmatprep.mubr.bf16.mxu1 %v7717_v0  ;;  %6173 = vmatpush3.bf16.msra.mxu1 %v6876_v30  ;;  %v6907_v30 = vld [vmem:[%s8128_s3 + $0x198] sm:$0xff]  }
 0x219   : > { %6174 = vmatprep.subr.bf16.mxu1 %v6877_v34 }
 0x21c   : > { %6175 = vmatpush3.bf16.msra.mxu1 %v6877_v34  ;;  %v3907_v34 = vld [vmem:[#allocation3 + $0x10] sm:$0x80] }
 0x21d   : > { %6176 = vmatprep.subr.bf16.mxu1 %v6878_v39 }
 0x21f   : > { %6161 = vmatmul.mubr.bf16.gmra.mrb[28].mxu1 %v7784_v63 }
 0x220   : > { %6177 = vmatpush3.bf16.msra.mxu1 %v6878_v39  ;;  %6180 = vmatprep.mubr.bf16.mxu1 %v3019_v14  ;;  %v6909_v39 = vld [vmem:[%s8128_s3 + $0x1a8] sm:$0xff]   ;;  %v6910_v14 = vld [vmem:[%s8128_s3 + $0x1b0] sm:$0xff]  }
 0x221   : > { %6178 = vmatprep.subr.bf16.mxu1 %v6879_v47 }
 0x224   : > { %6179 = vmatpush3.bf16.msra.mxu1 %v6879_v47  ;;  %v3927_v47 = vshrl.u32 %v3907_v34, 16 }
 0x225   : > { %6196 = vmatprep.subr.bf16.mxu1 %v6880_v24 }
 0x227   : > { %6181 = vmatmul.mubr.bf16.vlgmr.msra.gmra.mrb[16].mxu1 %v7732_v8 }
 0x228   : > { %6184 = vmatprep.mubr.bf16.mxu1 %v7735_v51  ;;  %6197 = vmatpush3.bf16.msra.mxu1 %v6880_v24 }
 0x229   : > { %6198 = vmatprep.subr.bf16.mxu1 %v6881_v60 }
 0x22c   : > { %6199 = vmatpush3.bf16.msra.mxu1 %v6881_v60  ;;  %v3929_v60 = vrot.slane %v3927_v47, 7 }
 0x22d   : > { %6200 = vmatprep.subr.bf16.mxu1 %v6882_v21 }
 0x22f   : > { %6185 = vmatmul.mubr.bf16.gmra.mrb[20].mxu1 %v7746_v19 }
 0x230   : > { %6188 = vmatprep.mubr.bf16.mxu1 %v7749_v9  ;;  %6201 = vmatpush3.bf16.msra.mxu1 %v6882_v21  ;;  %v3932_v21 = vsel %vm593_vm0, %v3929_v60, %v7693_v26  ;;  %v6914_v26 = vld [vmem:[%s8128_s3 + $0x1d0] sm:$0xff]   ;;  %v4314_v60 = vld [vmem:[#allocation3 + $0x58] sm:$0x1] }
 0x231   : > { %6202 = vmatprep.subr.bf16.mxu1 %v6883_v32 }
 0x234   : > { %6203 = vmatpush3.bf16.msra.mxu1 %v6883_v32  ;;  %v6913_v32 = vld [vmem:[%s8128_s3 + $0x1c8] sm:$0xff]  }
 0x235   : > { %6204 = vmatprep.subr.bf16.mxu1 %v6884_v50 }
 0x237   : > { %6189 = vmatmul.mubr.bf16.gmra.mrb[24].mxu1 %v7756_v36 }
 0x238   : > { %6192 = vmatprep.mubr.bf16.mxu1 %v7764_v33  ;;  %6205 = vmatpush3.bf16.msra.mxu1 %v6884_v50  ;;  %v6915_v50 = vld [vmem:[%s8128_s3 + $0x1d8] sm:$0xff]  }
 0x239   : > { %6206 = vmatprep.subr.bf16.mxu1 %v6885_v45 }
 0x23c   : > { %6207 = vmatpush3.bf16.msra.mxu1 %v6885_v45  ;;  %v6918_v45 = vld [vmem:[%s8128_s3 + $0x1f0] sm:$0xff]  }
 0x23d   : > { %6208 = vmatprep.subr.bf16.mxu1 %v6886_v31 }
 0x23f   : > { %6193 = vmatmul.mubr.bf16.gmra.mrb[28].mxu1 %v3075_v5 }
 0x240   : > { %6209 = vmatpush3.bf16.msra.mxu1 %v6886_v31  ;;  %6212 = vmatprep.mubr.bf16.mxu1 %v3270_v22  ;;  %v6921_v31 = vld [vmem:[%s8128_s3 + $0x208] sm:$0xff]  }
 0x241   : > { %6210 = vmatprep.subr.bf16.mxu1 %v6887_v62  ;;  %v4308_v22 = vld [vmem:[#allocation3 + $0x28] sm:$0xff] }
 0x244   : > { %6211 = vmatpush3.bf16.msra.mxu1 %v6887_v62 }
 0x245   : > { %6228 = vmatprep.subr.bf16.mxu1 %v6888_v6 }
 0x247   : > { %6213 = vmatmul.mubr.bf16.vlgmr.msra.gmra.mrb[16].mxu1 %v7701_v48  ;;  %v6892_v48 = vld [vmem:[%s8128_s3 + $0x120] sm:$0xff]  }
 0x248   : > { %6216 = vmatprep.mubr.bf16.mxu1 %v7768_v53  ;;  %6229 = vmatpush3.bf16.msra.mxu1 %v6888_v6 }
 0x249   : > { %6230 = vmatprep.subr.bf16.mxu1 %v6889_v25 }
 0x24c   : > { %6231 = vmatpush3.bf16.msra.mxu1 %v6889_v25 }
 0x24d   : > { %6232 = vmatprep.subr.bf16.mxu1 %v6890_v55 }
 0x24f   : > { %6217 = vmatmul.mubr.bf16.gmra.mrb[20].mxu1 %v7704_v49 }
 0x250   : > { %6220 = vmatprep.mubr.bf16.mxu1 %v7775_v13  ;;  %6233 = vmatpush3.bf16.msra.mxu1 %v6890_v55  ;;  %v4309_v55 = vld [vmem:[#allocation3 + $0x30] sm:$0xff] }
 0x251   : > { %6234 = vmatprep.subr.bf16.mxu1 %v6891_v29 }
 0x254   : > { %6235 = vmatpush3.bf16.msra.mxu1 %v6891_v29 }
 0x255   : > { %6236 = vmatprep.subr.bf16.mxu1 %v6892_v48 }
 0x257   : > { %6221 = vmatmul.mubr.bf16.gmra.mrb[24].mxu1 %v7717_v0 }
 0x258   : > { %6224 = vmatprep.mubr.bf16.mxu1 %v7784_v63  ;;  %6237 = vmatpush3.bf16.msra.mxu1 %v6892_v48  ;;  %v4348_v48 = vshll.u32 %v4308_v22, 16 }
 0x259   : > { %6238 = vmatprep.subr.bf16.mxu1 %v6893_v46 }
 0x25c   : > { %6239 = vmatpush3.bf16.msra.mxu1 %v6893_v46  ;;  %v4356_v46 = vshll.u32 %v4309_v55, 16 }
 0x25d   : > { %6240 = vmatprep.subr.bf16.mxu1 %v6894_v40 }
 0x25f   : > { %6225 = vmatmul.mubr.bf16.gmra.mrb[28].mxu1 %v7787_v43 }
 0x260   : > { %6241 = vmatpush3.bf16.msra.mxu1 %v6894_v40  ;;  %6244 = vmatprep.mubr.bf16.mxu1 %v7597_v38  ;;  %v6898_v38 = vld [vmem:[%s8128_s3 + $0x150] sm:$0xff]   ;;  %v4344_v40 = vshrl.u32 %v4307_v23, 16 }
 0x261   : > { %6242 = vmatprep.subr.bf16.mxu1 %v6895_v11 }
 0x264   : > { %6243 = vmatpush3.bf16.msra.mxu1 %v6895_v11  ;;  %v4350_v11 = vrot.slane %v4348_v48, 1 }
 0x265   : > { %6260 = vmatprep.subr.bf16.mxu1 %v6896_v28 }
 0x267   : > { %6245 = vmatmul.mubr.bf16.vlgmr.msra.gmra.mrb[16].mxu1 %v7594_v1 }
 0x268   : > { %6248 = vmatprep.mubr.bf16.mxu1 %v7618_v44  ;;  %6261 = vmatpush3.bf16.msra.mxu1 %v6896_v28 }
 0x269   : > { %6262 = vmatprep.subr.bf16.mxu1 %v6897_v37 }
 0x26c   : > { %6263 = vmatpush3.bf16.msra.mxu1 %v6897_v37  ;;  %v4310_v37 = vld [vmem:[#allocation3 + $0x38] sm:$0xff] }
 0x26d   : > { %6264 = vmatprep.subr.bf16.mxu1 %v6898_v38  ;;  %v4368_v34 = vshrl.u32 %v4310_v37, 16 }
 0x26f   : > { %6249 = vmatmul.mubr.bf16.gmra.mrb[20].mxu1 %v7614_v41 }
 0x270   : > { %6252 = vmatprep.mubr.bf16.mxu1 %v7640_v7  ;;  %6265 = vmatpush3.bf16.msra.mxu1 %v6898_v38  ;;  %v4352_v38 = vshrl.u32 %v4308_v22, 16 }
 0x271   : > { %6266 = vmatprep.subr.bf16.mxu1 %v6899_v12 }
 0x274   : > { %6267 = vmatpush3.bf16.msra.mxu1 %v6899_v12  ;;  %v4358_v12 = vrot.slane %v4356_v46, 1  ;;  %v4795_v46 = vld [vmem:[%s7024_s18 + $0x28] sm:$0xff] }
 0x275   : > { %6268 = vmatprep.subr.bf16.mxu1 %v6900_v4 }
 0x277   : > { %6253 = vmatmul.mubr.bf16.gmra.mrb[24].mxu1 %v7636_v58 }
 0x278   : > { %6256 = vmatprep.mubr.bf16.mxu1 %v7679_v20  ;;  %6269 = vmatpush3.bf16.msra.mxu1 %v6900_v4  ;;  %v4311_v4 = vld [vmem:[#allocation3 + $0x40] sm:$0xff] }
 0x279   : > { %6270 = vmatprep.subr.bf16.mxu1 %v6901_v27 }
 0x27c   : > { %6271 = vmatpush3.bf16.msra.mxu1 %v6901_v27  ;;  %v4354_v27 = vor.u32 %v4352_v38, %v4350_v11 }
 0x27d   : > { %6272 = vmatprep.subr.bf16.mxu1 %v6902_v35 }
 0x27f   : > { %6257 = vmatmul.mubr.bf16.gmra.mrb[28].mxu1 %v7674_v42 }
 0x280   : > { %6273 = vmatpush3.bf16.msra.mxu1 %v6902_v35  ;;  %6276 = vmatprep.mubr.bf16.mxu1 %v7732_v8  ;;  %v6906_v8 = vld [vmem:[%s8128_s3 + $0x190] sm:$0xff]   ;;  %v4364_v35 = vshll.u32 %v4310_v37, 16 }
 0x281   : > { %6274 = vmatprep.subr.bf16.mxu1 %v6903_v17 }
 0x284   : > { %6275 = vmatpush3.bf16.msra.mxu1 %v6903_v17 }
 0x285   : > { %6292 = vmatprep.subr.bf16.mxu1 %v6904_v15 }
 0x287   : > { %6277 = vmatmul.mubr.bf16.vlgmr.msra.gmra.mrb[16].mxu1 %v7735_v51  ;;  %v6908_v51 = vld [vmem:[%s8128_s3 + $0x1a0] sm:$0xff]  }
 0x288   : > { %6280 = vmatprep.mubr.bf16.mxu1 %v7746_v19  ;;  %6293 = vmatpush3.bf16.msra.mxu1 %v6904_v15  ;;  %v3652_v19 = vld [vmem:[#allocation3 + $0x50] sm:$0x1]  ;;  %v4359_v15 = vsel %vm841_vm1, %v4354_v27, %v4358_v12 }
 0x289   : > { %6294 = vmatprep.subr.bf16.mxu1 %v6905_v2 }
 0x28c   : > { %6295 = vmatpush3.bf16.msra.mxu1 %v6905_v2  ;;  %v4372_v2 = vshll.u32 %v4311_v4, 16 }
 0x28d   : > { %6296 = vmatprep.subr.bf16.mxu1 %v6906_v8 }
 0x28f   : > { %6281 = vmatmul.mubr.bf16.gmra.mrb[20].mxu1 %v7749_v9  ;;  %v3734_v9 = vshll.u32 %v3652_v19, 16 }
 0x290   : > { %6284 = vmatprep.mubr.bf16.mxu1 %v7756_v36  ;;  %6297 = vmatpush3.bf16.msra.mxu1 %v6906_v8  ;;  %v3729_v36 = vsel %vm841_vm1, %v7760_v10, %v3728_v56  ;;  %v4360_v8 = vshrl.u32 %v4309_v55, 16  ;;  %v4374_v56 = vrot.slane %v4372_v2, 1 }
 0x291   : > { %6298 = vmatprep.subr.bf16.mxu1 %v6907_v30  ;;  %v3736_v24 = vrot.slane %v3734_v9, 1 }
 0x292   : > { %v4362_v19 = vor.u32 %v4360_v8, %v4358_v12  ;;  %v4796_v8 = vld [vmem:[%s7024_s18 + $0x30] sm:$0xff] }
 0x293   : > { %v3737_v10 = vsel %vm841_vm1, %v3732_v16, %v3736_v24  ;;  %v4376_v16 = vshrl.u32 %v4311_v4, 16 }
 0x294   : > { %6299 = vmatpush3.bf16.msra.mxu1 %v6907_v30  ;;  %v4312_v30 = vld [vmem:[#allocation3 + $0x48] sm:$0xff] }
 0x295   : > { %6300 = vmatprep.subr.bf16.mxu1 %v6908_v51  ;;  %v4384_v24 = vshrl.u32 %v4312_v30, 16 }
 0x297   : > { %6285 = vmatmul.mubr.bf16.gmra.mrb[24].mxu1 %v7764_v33  ;;  %v6911_v33 = vld [vmem:[%s8128_s3 + $0x1b8] sm:$0xff]  }
 0x298   : > { %6288 = vmatprep.mubr.bf16.mxu1 %v3729_v36  ;;  %6301 = vmatpush3.bf16.msra.mxu1 %v6908_v51  ;;  %v4366_v51 = vrot.slane %v4364_v35, 1 }
 0x299   : > { %6302 = vmatprep.subr.bf16.mxu1 %v6909_v39 }
 0x29a   : > { %v4370_v9 = vor.u32 %v4368_v34, %v4366_v51  ;;  %v4367_v36 = vsel %vm841_vm1, %v4362_v19, %v4366_v51 }
 0x29c   : > { %6303 = vmatpush3.bf16.msra.mxu1 %v6909_v39  ;;  %v4380_v39 = vshll.u32 %v4312_v30, 16  ;;  %v4375_v47 = vsel %vm841_vm1, %v4370_v9, %v4374_v56  ;;  %v4797_v30 = vld [vmem:[%s7024_s18 + $0x38] sm:$0xff] }
 0x29d   : > { %6304 = vmatprep.subr.bf16.mxu1 %v6910_v14 }
 0x29f   : > { %6289 = vmatmul.mubr.bf16.gmra.mrb[28].mxu1 %v3737_v10 }
 0x2a0   : > { %6305 = vmatpush3.bf16.msra.mxu1 %v6910_v14  ;;  %6308 = vmatprep.mubr.bf16.mxu1 %v3932_v21  ;;  %v4382_v14 = vrot.slane %v4380_v39, 1 }
 0x2a1   : > { %6306 = vmatprep.subr.bf16.mxu1 %v6911_v33 }
 0x2a2   : > { %v4386_v10 = vor.u32 %v4384_v24, %v4382_v14 }
 0x2a4   : > { %6307 = vmatpush3.bf16.msra.mxu1 %v6911_v33  ;;  %v4378_v33 = vor.u32 %v4376_v16, %v4374_v56 }
 0x2a5   : > { %6324 = vmatprep.subr.bf16.mxu1 %v6912_v18 }
 0x2a7   : > { %6309 = vmatmul.mubr.bf16.vlgmr.msra.gmra.mrb[16].mxu1 %v7768_v53  ;;  %v7962_v53 = vld [vmem:[#allocation3] sm:$0xff] }
 0x2a8   : > { %6312 = vmatprep.mubr.bf16.mxu1 %v7704_v49  ;;  %6325 = vmatpush3.bf16.msra.mxu1 %v6912_v18  ;;  %v6916_v49 = vld [vmem:[%s8128_s3 + $0x1e0] sm:$0xff]   ;;  %v3952_v52 = vshrl.u32 %v7962_v53, 16  ;;  %v4396_v18 = vshll.u32 %v4314_v60, 16 }
 0x2a9   : > { %6326 = vmatprep.subr.bf16.mxu1 %v6913_v32 }
 0x2ac   : > { %6327 = vmatpush3.bf16.msra.mxu1 %v6913_v32  ;;  %v4383_v32 = vsel %vm841_vm1, %v4378_v33, %v4382_v14 }
 0x2ad   : > { %6328 = vmatprep.subr.bf16.mxu1 %v6914_v26 }
 0x2af   : > { %6313 = vmatmul.mubr.bf16.gmra.mrb[20].mxu1 %v7775_v13  ;;  %v3954_v13 = vrot.slane %v3952_v52, 7 }
 0x2b0   : > { %6316 = vmatprep.mubr.bf16.mxu1 %v7717_v0  ;;  %6329 = vmatpush3.bf16.msra.mxu1 %v6914_v26  ;;  %v3955_v0 = vshll.u32 %v7962_v53, 16 }
 0x2b1   : > { %6330 = vmatprep.subr.bf16.mxu1 %v6915_v50 }
 0x2b2   : > { %v3957_v3 = vor.u32 %v3955_v0, %v3954_v13  ;;  %v4390_v21 = vrot.slane %v3955_v0, 1  ;;  %v8030_v13 = vld [vmem:[%s8133_s8] sm:$0xff]  }
 0x2b3   : > { %6428 = vmatprep.mubr.bf16.mxu0 %v8030_v13 }
 0x2b4   : > { %6331 = vmatpush3.bf16.msra.mxu1 %v6915_v50  ;;  %v4391_v26 = vsel %vm841_vm1, %v4386_v10, %v4390_v21  ;;  %v4394_v50 = vor.u32 %v4390_v21, %v3952_v52 }
 0x2b5   : > { %6332 = vmatprep.subr.bf16.mxu1 %v6916_v49 }
 0x2b7   : > { %6317 = vmatmul.mubr.bf16.gmra.mrb[24].mxu1 %v7784_v63  ;;  %v3958_v63 = vsel %vm593_vm0, %v7753_v59, %v3957_v3  ;;  %v6923_v59 = vld [vmem:[%s8128_s3 + $0x218] sm:$0xff]  }
 0x2b8   : > { %6320 = vmatprep.mubr.bf16.mxu1 %v7787_v43  ;;  %6333 = vmatpush3.bf16.msra.mxu1 %v6916_v49  ;;  %v6920_v43 = vld [vmem:[%s8128_s3 + $0x200] sm:$0xff]   ;;  %v4398_v49 = vrot.slane %v4396_v18, 1 }
 0x2b9   : > { %6334 = vmatprep.subr.bf16.mxu1 %v6917_v54  ;;  %v4798_v18 = vld [vmem:[%s7024_s18 + $0x40] sm:$0xff] }
 0x2bc   : > { %6335 = vmatpush3.bf16.msra.mxu1 %v6917_v54  ;;  %v4399_v54 = vsel %vm841_vm1, %v4394_v50, %v4398_v49 }
 0x2bd   : > { %6336 = vmatprep.subr.bf16.mxu1 %v6918_v45 }
 0x2bf   : > { %6321 = vmatmul.mubr.bf16.gmra.mrb[28].mxu1 %v3958_v63 }
 0x2c0   : > { %6337 = vmatpush3.bf16.msra.mxu1 %v6918_v45  ;;  %6340 = vmatprep.mubr.bf16.mxu1 %v7594_v1  ;;  %v6922_v1 = vld [vmem:[%s8128_s3 + $0x210] sm:$0xff]  }
 0x2c1   : > { %6338 = vmatprep.subr.bf16.mxu1 %v6919_v57 }
 0x2c4   : > { %6339 = vmatpush3.bf16.msra.mxu1 %v6919_v57 }
 0x2c5   : > { %6356 = vmatprep.subr.bf16.mxu1 %v6920_v43 }
 0x2c7   : > { %6341 = vmatmul.mubr.bf16.vlgmr.msra.gmra.mrb[16].mxu1 %v7618_v44  ;;  %v4306_v44 = vld [vmem:[#allocation3 + $0x18] sm:$0xff] }
 0x2c8   : > { %6344 = vmatprep.mubr.bf16.mxu1 %v7614_v41  ;;  %6357 = vmatpush3.bf16.msra.mxu1 %v6920_v43  ;;  %v6924_v41 = vld [vmem:[%s8128_s3 + $0x220] sm:$0xff]   ;;  %v4335_v62 = vshll.u32 %v4306_v44, 16  ;;  %v4333_v6 = vshrl.u32 %v4306_v44, 16 }
 0x2c9   : > { %6358 = vmatprep.subr.bf16.mxu1 %v6921_v31 }
 0x2ca   : > { %v4337_v5 = vrot.slane %v4335_v62, 1 }
 0x2cc   : > { %6359 = vmatpush3.bf16.msra.mxu1 %v6921_v31  ;;  %v4338_v29 = vor.u32 %v4337_v5, %v4333_v6 }
 0x2cd   : > { %6360 = vmatprep.subr.bf16.mxu1 %v6922_v1 }
 0x2cf   : > { %6345 = vmatmul.mubr.bf16.gmra.mrb[20].mxu1 %v7640_v7  ;;  %v4340_v7 = vshll.u32 %v4307_v23, 16 }
 0x2d0   : > { %6348 = vmatprep.mubr.bf16.mxu1 %v7636_v58  ;;  %6361 = vmatpush3.bf16.msra.mxu1 %v6922_v1  ;;  %v6926_v58 = vld [vmem:[%s8128_s3 + $0x230] sm:$0xff]  }
 0x2d1   : > { %6362 = vmatprep.subr.bf16.mxu1 %v6923_v59  ;;  %v4342_v25 = vrot.slane %v4340_v7, 1 }
 0x2d3   : > { %v4346_v28 = vor.u32 %v4344_v40, %v4342_v25 }
 0x2d4   : > { %6363 = vmatpush3.bf16.msra.mxu1 %v6923_v59 }
 0x2d5   : > { %6364 = vmatprep.subr.bf16.mxu1 %v6924_v41  ;;  %v4351_v17 = vsel %vm841_vm1, %v4346_v28, %v4350_v11 }
 0x2d7   : > { %6349 = vmatmul.mubr.bf16.gmra.mrb[24].mxu1 %v7679_v20  ;;  %v6927_v20 = vld [vmem:[%s8128_s3 + $0x238] sm:$0xff]  }
 0x2d8   : > { %6352 = vmatprep.mubr.bf16.mxu1 %v7674_v42  ;;  %6365 = vmatpush3.bf16.msra.mxu1 %v6924_v41  ;;  %v4343_v42 = vsel %vm841_vm1, %v4338_v29, %v4342_v25 }
 0x2d9   : > { %6366 = vmatprep.subr.bf16.mxu1 %v6925_v61 }
 0x2dc   : > { %6367 = vmatpush3.bf16.msra.mxu1 %v6925_v61 }
 0x2dd   : > { %6368 = vmatprep.subr.bf16.mxu1 %v6926_v58 }
 0x2df   : > { %6353 = vmatmul.mubr.bf16.gmra.mrb[28].mxu1 %v7962_v53 }
 0x2e0   : > { %6369 = vmatpush3.bf16.msra.mxu1 %v6926_v58  ;;  %6372 = vmatprep.mubr.bf16.mxu1 %v4343_v42  ;;  %v4794_v42 = vld [vmem:[%s7024_s18 + $0x20] sm:$0xff] }
 0x2e1   : > { %6370 = vmatprep.subr.bf16.mxu1 %v6927_v20  ;;  %v8036_v27 = vpack.c.bf16 %v4795_v46, %v4794_v42 }
 0x2e3   : > { %v4818_v56 = vunpack.c.l.bf16 %v8036_v27 }
 0x2e4   : > { %6371 = vmatpush3.bf16.msra.mxu1 %v6927_v20 }
 0x2e5   : > { %v4834_v49 = vsub.f32 %v4794_v42, %v4818_v56  ;;  %v8061_v42 = vld [vmem:[%s8133_s8 + $0x8] sm:$0xff]   ;;  %v8085_v56 = vld [vmem:[%s8133_s8 + $0x18] sm:$0xff]  }
 0x2e7   : > { %6373 = vmatmul.mubr.bf16.vlgmr.msra.gmra.mrb[16].mxu1 %v4351_v17 }
 0x2e8   : > { %6376 = vmatprep.mubr.bf16.mxu1 %v4359_v15 }
 0x2ef   : > { %6377 = vmatmul.mubr.bf16.gmra.mrb[20].mxu1 %v4367_v36  ;;  %v4819_v36 = vunpack.c.h.bf16 %v8036_v27 }
 0x2f0   : > { %6380 = vmatprep.mubr.bf16.mxu1 %v4375_v47  ;;  %v8042_v47 = vpack.c.bf16 %v4797_v30, %v4796_v8 }
 0x2f7   : > { %6381 = vmatmul.mubr.bf16.gmra.mrb[24].mxu1 %v4383_v32  ;;  %v4799_v32 = vld [vmem:[%s7024_s18 + $0x48] sm:$0xff] }
 0x2f8   : > { %6384 = vmatprep.mubr.bf16.mxu1 %v4391_v26 }
 0x2ff   : > { %6385 = vmatmul.mubr.bf16.gmra.mrb[28].mxu1 %v4399_v54  ;;  %v4835_v54 = vsub.f32 %v4795_v46, %v4819_v36 }
 0x300   : > { %6404 = vmatprep.mubr.bf16.mxu1 %v8030_v13 }
 0x3ba   : > { %v6374_v0 = vpop.f32.mrb[16].mxu1 }
 0x3bb   : > { %v4490_v45 = vpop.f32.mrb[17].mxu1 }
 0x3bc   : > { %v6375_v3 = vpop.f32.mrb[18].mxu1 }
 0x3bd   : > { %v4570_v57 = vpack.c.bf16 %v6375_v3, %v6374_v0  ;;  %v4493_v63 = vpop.f32.mrb[19].mxu1 }
 0x3be   : > { %v4569_v53 = vpack.c.bf16 %v4493_v63, %v4490_v45 }
 0x3bf   : > { %v4579_v52 = vunpack.c.l.bf16 %v4570_v57  ;;  %v4580_v43 = vunpack.c.h.bf16 %v4570_v57 }
 0x3c0   : > { %v4577_v31 = vunpack.c.l.bf16 %v4569_v53  ;;  %v4578_v1 = vunpack.c.h.bf16 %v4569_v53  ;;  %6412 = vmatprep.subr.bf16.mxu0 %v4569_v53 }
 0x3c1   : > { %v4595_v59 = vsub.f32 %v6374_v0, %v4579_v52  ;;  %v4596_v41 = vsub.f32 %v6375_v3, %v4580_v43  ;;  %6413 = vmatpush3.bf16.msra.mxu0 %v4569_v53  ;;  %v4820_v0 = vunpack.c.l.bf16 %v8042_v47  ;;  %v8048_v53 = vpack.c.bf16 %v4799_v32, %v4798_v18  ;;  %v4800_v52 = vld [vmem:[%s7024_s18 + $0x50] sm:$0xff]  ;;  %v4801_v43 = vld [vmem:[%s7024_s18 + $0x58] sm:$0xff] }
 0x3c2   : > { %v4593_v44 = vsub.f32 %v4490_v45, %v4577_v31  ;;  %v4594_v23 = vsub.f32 %v4493_v63, %v4578_v1  ;;  %v6378_v61 = vpop.f32.mrb[20].mxu1  ;;  %6414 = vmatprep.subr.bf16.mxu0 %v4570_v57 }
 0x3c3   : > { %v4610_v62 = vpack.c.bf16 %v4596_v41, %v4595_v59  ;;  %v4506_v7 = vpop.f32.mrb[21].mxu1 }
 0x3c4   : > { %v4609_v58 = vpack.c.bf16 %v4594_v23, %v4593_v44  ;;  %v6379_v5 = vpop.f32.mrb[22].mxu1  ;;  %v4850_v44 = vpack.c.bf16 %v4835_v54, %v4834_v49  ;;  %v4836_v23 = vsub.f32 %v4796_v8, %v4820_v0 }
 0x3c5   : > { %v4572_v22 = vpack.c.bf16 %v6379_v5, %v6378_v61  ;;  %v4509_v6 = vpop.f32.mrb[23].mxu1  ;;  %6415 = vmatpush3.bf16.msra.mxu0 %v4570_v57  ;;  %v4821_v57 = vunpack.c.h.bf16 %v8042_v47 }
 0x3c6   : > { %v4571_v25 = vpack.c.bf16 %v4509_v6, %v4506_v7  ;;  %6388 = vmatprep.subr.bf16.mxu1 %v4609_v58 }
 0x3c7   : > { %v4583_v55 = vunpack.c.l.bf16 %v4572_v22  ;;  %v4584_v29 = vunpack.c.h.bf16 %v4572_v22  ;;  %6389 = vmatpush3.bf16.msra.mxu1 %v4609_v58  ;;  %v8052_v58 = vpack.c.bf16 %v4801_v43, %v4800_v52 }
 0x3c8   : > { %v4581_v20 = vunpack.c.l.bf16 %v4571_v25  ;;  %v4582_v48 = vunpack.c.h.bf16 %v4571_v25  ;;  %6390 = vmatprep.subr.bf16.mxu1 %v4610_v62  ;;  %6416 = vmatprep.subr.bf16.mxu0 %v4571_v25 }
 0x3c9   : > { %v4599_v40 = vsub.f32 %v6378_v61, %v4583_v55  ;;  %v4600_v11 = vsub.f32 %v6379_v5, %v4584_v29  ;;  %6417 = vmatpush3.bf16.msra.mxu0 %v4571_v25  ;;  %v4823_v25 = vunpack.c.h.bf16 %v8048_v53  ;;  %v4802_v29 = vld [vmem:[%s7024_s18 + $0x60] sm:$0xff] }
 0x3ca   : > { %v4597_v28 = vsub.f32 %v4506_v7, %v4581_v20  ;;  %v4598_v37 = vsub.f32 %v4509_v6, %v4582_v48  ;;  %v6382_v38 = vpop.f32.mrb[24].mxu1  ;;  %6418 = vmatprep.subr.bf16.mxu0 %v4572_v22  ;;  %v4837_v7 = vsub.f32 %v4797_v30, %v4821_v57  ;;  %v4822_v6 = vunpack.c.l.bf16 %v8048_v53  ;;  %v4803_v20 = vld [vmem:[%s7024_s18 + $0x68] sm:$0xff] }
 0x3cb   : > { %v4612_v12 = vpack.c.bf16 %v4600_v11, %v4599_v40  ;;  %v4522_v4 = vpop.f32.mrb[25].mxu1  ;;  %6391 = vmatpush3.bf16.msra.mxu1 %v4610_v62  ;;  %v4824_v40 = vunpack.c.l.bf16 %v8052_v58  ;;  %v4825_v11 = vunpack.c.h.bf16 %v8052_v58 }
 0x3cc   : > { %v4611_v35 = vpack.c.bf16 %v4598_v37, %v4597_v28  ;;  %v6383_v17 = vpop.f32.mrb[26].mxu1  ;;  %v4851_v46 = vpack.c.bf16 %v4837_v7, %v4836_v23  ;;  %v8068_v28 = vld [vmem:[%s8133_s8 + $0x10] sm:$0xff]   ;;  %v4838_v37 = vsub.f32 %v4798_v18, %v4822_v6 }
 0x3cd   : > { %v4574_v15 = vpack.c.bf16 %v6383_v17, %v6382_v38  ;;  %v4525_v2 = vpop.f32.mrb[27].mxu1  ;;  %6419 = vmatpush3.bf16.msra.mxu0 %v4572_v22 }
 0x3ce   : > { %v4573_v51 = vpack.c.bf16 %v4525_v2, %v4522_v4  ;;  %6392 = vmatprep.subr.bf16.mxu1 %v4611_v35 }
 0x3cf   : > { %v4587_v19 = vunpack.c.l.bf16 %v4574_v15  ;;  %v4588_v34 = vunpack.c.h.bf16 %v4574_v15  ;;  %6393 = vmatpush3.bf16.msra.mxu1 %v4611_v35  ;;  %v4805_v35 = vld [vmem:[%s7024_s18 + $0x78] sm:$0xff] }
 0x3d0   : > { %v4585_v39 = vunpack.c.l.bf16 %v4573_v51  ;;  %v4586_v9 = vunpack.c.h.bf16 %v4573_v51  ;;  %6394 = vmatprep.subr.bf16.mxu1 %v4612_v12  ;;  %6420 = vmatprep.subr.bf16.mxu0 %v4573_v51 }
 0x3d1   : > { %v4603_v14 = vsub.f32 %v6382_v38, %v4587_v19  ;;  %v4604_v16 = vsub.f32 %v6383_v17, %v4588_v34  ;;  %6421 = vmatpush3.bf16.msra.mxu0 %v4573_v51  ;;  %v4839_v38 = vsub.f32 %v4799_v32, %v4823_v25  ;;  %v4840_v17 = vsub.f32 %v4800_v52, %v4824_v40  ;;  %v4806_v19 = vld [vmem:[%s7024_s18 + $0x80] sm:$0xff]  ;;  %v4807_v34 = vld [vmem:[%s7024_s18 + $0x88] sm:$0xff] }
 0x3d2   : > { %v4601_v24 = vsub.f32 %v4522_v4, %v4585_v39  ;;  %v4602_v60 = vsub.f32 %v4525_v2, %v4586_v9  ;;  %v6386_v33 = vpop.f32.mrb[28].mxu1  ;;  %6422 = vmatprep.subr.bf16.mxu0 %v4574_v15  ;;  %v4804_v4 = vld [vmem:[%s7024_s18 + $0x70] sm:$0xff] }
 0x3d3   : > { %v4614_v10 = vpack.c.bf16 %v4604_v16, %v4603_v14  ;;  %v4538_v21 = vpop.f32.mrb[29].mxu1  ;;  %6395 = vmatpush3.bf16.msra.mxu1 %v4612_v12  ;;  %v8070_v12 = vpack.c.bf16 %v4803_v20, %v4802_v29  ;;  %v8075_v2 = vpack.c.bf16 %v4805_v35, %v4804_v4  ;;  %v4852_v8 = vpack.c.bf16 %v4839_v38, %v4838_v37 }
 0x3d4   : > { %v4613_v26 = vpack.c.bf16 %v4602_v60, %v4601_v24  ;;  %v6387_v50 = vpop.f32.mrb[30].mxu1  ;;  %v4816_v24 = vpack.c.bf16 %v4807_v34, %v4806_v19  ;;  %v4808_v60 = vld [vmem:[%s7024_s18 + $0x90] sm:$0xff] }
 0x3d5   : > { %v4576_v45 = vpack.c.bf16 %v6387_v50, %v6386_v33  ;;  %v4541_v3 = vpop.f32.mrb[31].mxu1  ;;  %6423 = vmatpush3.bf16.msra.mxu0 %v4574_v15  ;;  %v4841_v15 = vsub.f32 %v4801_v43, %v4825_v11  ;;  %v4826_v30 = vunpack.c.l.bf16 %v8070_v12  ;;  %v4827_v51 = vunpack.c.h.bf16 %v8070_v12 }
 0x3d6   : > { %v4575_v63 = vpack.c.bf16 %v4541_v3, %v4538_v21  ;;  %6396 = vmatprep.subr.bf16.mxu1 %v4613_v26  ;;  %v4828_v9 = vunpack.c.l.bf16 %v8075_v2  ;;  %v4829_v36 = vunpack.c.h.bf16 %v8075_v2  ;;  %v4830_v32 = vunpack.c.l.bf16 %v4816_v24 }
 0x3d7   : > { %v4591_v31 = vunpack.c.l.bf16 %v4576_v45  ;;  %v4592_v1 = vunpack.c.h.bf16 %v4576_v45  ;;  %6397 = vmatpush3.bf16.msra.mxu1 %v4613_v26  ;;  %v4853_v39 = vpack.c.bf16 %v4841_v15, %v4840_v17  ;;  %v4842_v14 = vsub.f32 %v4802_v29, %v4826_v30 }
 0x3d8   : > { %v4589_v59 = vunpack.c.l.bf16 %v4575_v63  ;;  %v4590_v41 = vunpack.c.h.bf16 %v4575_v63  ;;  %6398 = vmatprep.subr.bf16.mxu1 %v4614_v10  ;;  %6424 = vmatprep.subr.bf16.mxu0 %v4575_v63  ;;  %v4843_v16 = vsub.f32 %v4803_v20, %v4827_v51  ;;  %v4831_v26 = vunpack.c.h.bf16 %v4816_v24 }
 0x3d9   : > { %v4607_v61 = vsub.f32 %v6386_v33, %v4591_v31  ;;  %v4608_v62 = vsub.f32 %v6387_v50, %v4592_v1  ;;  %6425 = vmatpush3.bf16.msra.mxu0 %v4575_v63  ;;  %v4809_v33 = vld [vmem:[%s7024_s18 + $0x98] sm:$0xff]  ;;  %v4846_v54 = vsub.f32 %v4806_v19, %v4830_v32 }
 0x3da   : > { %v4605_v5 = vsub.f32 %v4538_v21, %v4589_v59  ;;  %v4606_v22 = vsub.f32 %v4541_v3, %v4590_v41  ;;  %6426 = vmatprep.subr.bf16.mxu0 %v4576_v45  ;;  %v4845_v21 = vsub.f32 %v4805_v35, %v4829_v36  ;;  %v4854_v18 = vpack.c.bf16 %v4843_v16, %v4842_v14 }
 0x3db   : > { %v4616_v55 = vpack.c.bf16 %v4608_v62, %v4607_v61  ;;  %6399 = vmatpush3.bf16.msra.mxu1 %v4614_v10  ;;  %v4844_v10 = vsub.f32 %v4804_v4, %v4828_v9  ;;  %v4817_v50 = vpack.c.bf16 %v4809_v33, %v4808_v60  ;;  %v4847_v0 = vsub.f32 %v4807_v34, %v4831_v26 }
 0x3dc   : > { %v4615_v48 = vpack.c.bf16 %v4606_v22, %v4605_v5 }
 0x3dd   : > { %6427 = vmatpush3.bf16.msra.mxu0 %v4576_v45  ;;  %v4855_v49 = vpack.c.bf16 %v4845_v21, %v4844_v10  ;;  %v4832_v45 = vunpack.c.l.bf16 %v4817_v50  ;;  %v4833_v3 = vunpack.c.h.bf16 %v4817_v50  ;;  %v4856_v57 = vpack.c.bf16 %v4847_v0, %v4846_v54 }
 0x3de   : > { %6400 = vmatprep.subr.bf16.mxu1 %v4615_v48  ;;  %6436 = vmatprep.subr.bf16.mxu0 %v4850_v44 }
 0x3df   : > { %6401 = vmatpush3.bf16.msra.mxu1 %v4615_v48  ;;  %v4848_v63 = vsub.f32 %v4808_v60, %v4832_v45  ;;  %v4849_v52 = vsub.f32 %v4809_v33, %v4833_v3 }
 0x3e0   : > { %6402 = vmatprep.subr.bf16.mxu1 %v4616_v55  ;;  %6429 = vmatmul.mubr.bf16.vlgmr.msra.gmra.mrb[16].mxu0 %v8061_v42 }
 0x3e1   : > { %6437 = vmatpush3.bf16.msra.mxu0 %v4850_v44  ;;  %6432 = vmatprep.mubr.bf16.mxu0 %v8068_v28  ;;  %v4857_v43 = vpack.c.bf16 %v4849_v52, %v4848_v63  ;;  %v5472_v44 = vld [vmem:[%s8129_s4] ss:$0 sm:$0xff] }
 0x3e2   : > { %6438 = vmatprep.subr.bf16.mxu0 %v4851_v46 }
 0x3e3   : > { %6403 = vmatpush3.bf16.msra.mxu1 %v4616_v55 }
 0x3e5   : > { %6439 = vmatpush3.bf16.msra.mxu0 %v4851_v46 }
 0x3e6   : > { %6440 = vmatprep.subr.bf16.mxu0 %v4852_v8  ;;  %6405 = vmatmul.mubr.bf16.vlgmr.msra.gmra.mrb[32].mxu1 %v8061_v42 }
 0x3e7   : > { %6408 = vmatprep.mubr.bf16.mxu1 %v8068_v28 }
 0x3e8   : > { %6433 = vmatmul.mubr.bf16.gmra.mrb[20].mxu0 %v8085_v56 }
 0x3e9   : > { %6441 = vmatpush3.bf16.msra.mxu0 %v4852_v8  ;;  %6452 = vmatprep.mubr.bf16.mxu0 %v8030_v13 }
 0x3ea   : > { %6442 = vmatprep.subr.bf16.mxu0 %v4853_v39 }
 0x3ed   : > { %6443 = vmatpush3.bf16.msra.mxu0 %v4853_v39 }
 0x3ee   : > { %6444 = vmatprep.subr.bf16.mxu0 %v4854_v18  ;;  %6409 = vmatmul.mubr.bf16.gmra.mrb[36].mxu1 %v8085_v56 }
 0x3f1   : > { %6445 = vmatpush3.bf16.msra.mxu0 %v4854_v18 }
 0x3f2   : > { %6446 = vmatprep.subr.bf16.mxu0 %v4855_v49 }
 0x3f5   : > { %6447 = vmatpush3.bf16.msra.mxu0 %v4855_v49 }
 0x3f6   : > { %6448 = vmatprep.subr.bf16.mxu0 %v4856_v57 }
 0x3f9   : > { %6449 = vmatpush3.bf16.msra.mxu0 %v4856_v57 }
 0x3fa   : > { %6450 = vmatprep.subr.bf16.mxu0 %v4857_v43 }
 0x3fd   : > { %6451 = vmatpush3.bf16.msra.mxu0 %v4857_v43 }
 0x3fe   : > { %6460 = vmatprep.subr.bf16.mxu0 %v8036_v27 }
 0x400   : > { %6453 = vmatmul.mubr.bf16.vlgmr.msra.gmra.mrb[16].mxu0 %v8061_v42 }
 0x401   : > { %6461 = vmatpush3.bf16.msra.mxu0 %v8036_v27  ;;  %6456 = vmatprep.mubr.bf16.mxu0 %v8068_v28 }
 0x402   : > { %6462 = vmatprep.subr.bf16.mxu0 %v8042_v47 }
 0x405   : > { %6463 = vmatpush3.bf16.msra.mxu0 %v8042_v47 }
 0x406   : > { %6464 = vmatprep.subr.bf16.mxu0 %v8048_v53 }
 0x408   : > { %6457 = vmatmul.mubr.bf16.gmra.mrb[20].mxu0 %v8085_v56 }
 0x409   : > { %6465 = vmatpush3.bf16.msra.mxu0 %v8048_v53  ;;  %6476 = vmatprep.mubr.bf16.mxu0 %v8030_v13 }
 0x40a   : > { %6466 = vmatprep.subr.bf16.mxu0 %v8052_v58 }
 0x40d   : > { %6467 = vmatpush3.bf16.msra.mxu0 %v8052_v58 }
 0x40e   : > { %6468 = vmatprep.subr.bf16.mxu0 %v8070_v12 }
 0x411   : > { %6469 = vmatpush3.bf16.msra.mxu0 %v8070_v12 }
 0x412   : > { %6470 = vmatprep.subr.bf16.mxu0 %v8075_v2 }
 0x415   : > { %6471 = vmatpush3.bf16.msra.mxu0 %v8075_v2 }
 0x416   : > { %6472 = vmatprep.subr.bf16.mxu0 %v4816_v24 }
 0x419   : > { %6473 = vmatpush3.bf16.msra.mxu0 %v4816_v24 }
 0x41a   : > { %6474 = vmatprep.subr.bf16.mxu0 %v4817_v50 }
 0x41d   : > { %6475 = vmatpush3.bf16.msra.mxu0 %v4817_v50 }
 0x420   : > { %6477 = vmatmul.mubr.bf16.vlgmr.msra.gmra.mrb[16].mxu0 %v8061_v42 }
 0x421   : > { %6480 = vmatprep.mubr.bf16.mxu0 %v8068_v28 }
 0x428   : > { %6481 = vmatmul.mubr.bf16.gmra.mrb[20].mxu0 %v8085_v56 }
 0x4b9   : > { %v6406_v13 = vpop.f32.mrb[32].mxu1 }
 0x4ba   : > { %v4683_v27 = vpop.f32.mrb[33].mxu1  ;;  %v6500_v23 = vadd.f32 %v6406_v13, %v5472_v44 }
 0x4bb   : > { %v6407_v47 = vpop.f32.mrb[34].mxu1  ;;  %v6502_v61 = vadd.f32 %v5472_v44, %v4683_v27 }
 0x4bc   : > { %v4686_v53 = vpop.f32.mrb[35].mxu1  ;;  %v6504_v7 = vadd.f32 %v6407_v47, %v5472_v44 }
 0x4bd   : > { %v6506_v22 = vadd.f32 %v5472_v44, %v4686_v53 }
 0x4c1   : > { %v6410_v31 = vpop.f32.mrb[36].mxu1 }
 0x4c2   : > { %v4699_v1 = vpop.f32.mrb[37].mxu1  ;;  %v6508_v48 = vadd.f32 %v6410_v31, %v5472_v44 }
 0x4c3   : > { %v6411_v59 = vpop.f32.mrb[38].mxu1  ;;  %v6510_v42 = vadd.f32 %v5472_v44, %v4699_v1 }
 0x4c4   : > { %v4702_v41 = vpop.f32.mrb[39].mxu1  ;;  %v6512_v40 = vadd.f32 %v6411_v59, %v5472_v44 }
 0x4c5   : > { %v6514_v37 = vadd.f32 %v5472_v44, %v4702_v41 }
 0x4f3   : > { %v6478_v62 = vpop.f32.mrb[16].mxu0 }
 0x4f4   : > { %v6501_v58 = vadd.f32 %v6500_v23, %v6478_v62  ;;  %v4957_v5 = vpop.f32.mrb[17].mxu0 }
 0x4f5   : > { %v6503_v6 = vadd.f32 %v6502_v61, %v4957_v5  ;;  %v6479_v25 = vpop.f32.mrb[18].mxu0 }
 0x4f6   : > { %4998 = vst [vmem:[%s332_s27 + $0x10] sm:$0xff] %v6501_v58  ;;  %v6505_v55 = vadd.f32 %v6504_v7, %v6479_v25  ;;  %v4960_v29 = vpop.f32.mrb[19].mxu0 }
 0x4f7   : > { %4996 = vst [vmem:[%s332_s27] sm:$0xff] %v6503_v6  ;;  %v6507_v20 = vadd.f32 %v6506_v22, %v4960_v29 }
 0x4f8   : > { %4999 = vst [vmem:[%s332_s27 + $0x18] sm:$0xff] %v6505_v55 }
 0x4f9   : > { %4997 = vst [vmem:[%s332_s27 + $0x8] sm:$0xff] %v6507_v20 }
 0x4fb   : > { %v6482_v46 = vpop.f32.mrb[20].mxu0 }
 0x4fc   : > { %v6509_v11 = vadd.f32 %v6508_v48, %v6482_v46  ;;  %v4973_v28 = vpop.f32.mrb[21].mxu0 }
 0x4fd   : > { %v6511_v38 = vadd.f32 %v6510_v42, %v4973_v28  ;;  %v6483_v12 = vpop.f32.mrb[22].mxu0 }
 0x4fe   : > { %5002 = vst [vmem:[%s332_s27 + $0x30] sm:$0xff] %v6509_v11  ;;  %v6513_v4 = vadd.f32 %v6512_v40, %v6483_v12  ;;  %v4976_v35 = vpop.f32.mrb[23].mxu0 }
 0x4ff   : > { %5000 = vst [vmem:[%s332_s27 + $0x20] sm:$0xff] %v6511_v38  ;;  %v6515_v17 = vadd.f32 %v6514_v37, %v4976_v35 }
 0x500   : > { %5003 = vst [vmem:[%s332_s27 + $0x38] sm:$0xff] %v6513_v4 }
 0x501   : > { %5001 = vst [vmem:[%s332_s27 + $0x28] sm:$0xff] %v6515_v17 }
 0x502 PF: > { %s19_s30 = sadd.s32 1, %s6948_s30  }
 0x503   : > { %p16_p4 = scmp.ge.s32.totalorder %s19_s30, 4  }
 0x505   :  { %18 = sbr.rel (!%p16_p4) target bundleno = 1 (0x1), region = 102 }

// kernel: network.2
= control target key start
LH: loop header
LB: loop body
LE: loop exit
PB: predicated region body
PF: predicated region fallthrough
CT: control target
= control target key end

     0   :  { %s14960_s30 = smov 0   ;;  %s18685_s0 = inlined_call_operand.vmem [shape: f32[2,480,128], index: 0, kind: input, shape index: {}]   ;;  %s18686_s1 = inlined_call_operand.vmem [shape: bf16[9,128,128], index: 1, kind: input, shape index: {}]   ;;  %s18687_s2 = inlined_call_operand.vmem [shape: f32[1,128], index: 2, kind: input, shape index: {}]   ;;  %s18688_s3 = inlined_call_operand.vmem [shape: bf16[9,128,128], index: 3, kind: input, shape index: {}]   ;;  %s18689_s4 = inlined_call_operand.vmem [shape: f32[1,128], index: 4, kind: input, shape index: {}]   ;;  %s18690_s5 = inlined_call_operand.vmem [shape: bf16[128,128], index: 5, kind: input, shape index: {}]   ;;  %s18691_s6 = inlined_call_operand.vmem [shape: f32[1,128], index: 6, kind: input, shape index: {}]   ;;  %s18692_s7 = inlined_call_operand.vmem [shape: f32[384,1], index: 7, kind: input, shape index: {}]   ;;  %s18693_s8 = inlined_call_operand.vmem [shape: bf16[64,384], index: 8, kind: input, shape index: {}]   ;;  %s18694_s9 = inlined_call_operand.vmem [shape: f32[2,64,128], index: 9, kind: output, shape index: {}]  }
   0x1 LB: > { %s11256_s10 = sadd.s32 4294967295, %s14907_s30   ;;  %p11260_p0 = scmp.ge.s32.totalorder %s14907_s30, 1  ;;  %s14907_s30 = sphi %s14960_s30, %s19_s30  }
   0x2   : > { %p287_p1 = scmp.lt.s32.totalorder %s14907_s30, 3 }
   0x4   : > { %p288_p2 = pnand %p11260_p0, %p287_p1 }
   0x6   : > { %291 = sbr.rel (%p288_p2) target bundleno = 2777 (0xad9), region = 56 }
   0xd   : > { %v14686_v0 = vld [vmem:[%s18686_s1 + $0x40] sm:$0xff]   ;;  %p323_p3 = scmp.lt.s32.totalorder %s11256_s10, 1  ;;  %v14687_v1 = vld [vmem:[%s18686_s1 + $0x48] sm:$0xff]   ;;  %v14688_v2 = vld [vmem:[%s18686_s1 + $0x50] sm:$0xff]   ;;  %vm598_vm0 = vcmask 1043456  }
   0xe   : > { %12506 = vmatprep.subr.bf16.mxu0 %v14686_v0  ;;  %v14689_v3 = vld [vmem:[%s18686_s1 + $0x58] sm:$0xff]   ;;  %v14690_v9 = vld [vmem:[%s18686_s1 + $0x60] sm:$0xff]   ;;  %v14691_v39 = vld [vmem:[%s18686_s1 + $0x68] sm:$0xff]   ;;  %vm945_vm1 = vsmask.f32 4352 }
   0xf   : > { %s19047_s10 = smov (!%p323_p3, %s11256_s10), 1  ;;  %12507 = vmatpush3.bf16.msra.mxu0 %v14686_v0  ;;  %v14692_v53 = vld [vmem:[%s18686_s1 + $0x70] sm:$0xff]   ;;  %vm1485_vm2 = vsmask.f32 3328  ;;  %vm1982_vm3 = vsmask.f32 256 }
  0x10   : > { %12508 = vmatprep.subr.bf16.mxu0 %v14687_v1  ;;  %s14674_s17 = smul.u32 480, %s19047_s10  ;;  %vm2904_vm4 = vsmask.f32 7424  ;;  %s11689_s27 = sshll.u32 %s19047_s10, 6 }
  0x11   : > { %s18671_s13 = scalar_lea.vmem %s18694_s9, %s11689_s27 }
  0x12   : > { %s14983_s20 = scalar_lea.vmem %s18685_s0, %s14674_s17 }
  0x13   : > { %12509 = vmatpush3.bf16.msra.mxu0 %v14687_v1  ;;  %v336_v4 = vld [vmem:[%s14983_s20 + $0x10] sm:$0xff]  ;;  %v337_v5 = vld [vmem:[%s14983_s20 + $0x18] sm:$0xff]  ;;  %v338_v6 = vld [vmem:[%s14983_s20 + $0x20] sm:$0xff] }
  0x14   : > { %12510 = vmatprep.subr.bf16.mxu0 %v14688_v2  ;;  %v339_v7 = vld [vmem:[%s14983_s20 + $0x28] sm:$0xff]  ;;  %v396_v8 = vmax.f32 %v336_v4, 0.0  ;;  %v397_v10 = vmax.f32 %v337_v5, 0.0  ;;  %v398_v11 = vmax.f32 %v338_v6, 0.0  ;;  %v340_v13 = vld [vmem:[%s14983_s20 + $0x30] sm:$0xff]  ;;  %v341_v14 = vld [vmem:[%s14983_s20 + $0x38] sm:$0xff] }
  0x15   : > { %v399_v12 = vmax.f32 %v339_v7, 0.0  ;;  %v400_v15 = vmax.f32 %v340_v13, 0.0  ;;  %v342_v16 = vld [vmem:[%s14983_s20 + $0x40] sm:$0xff]  ;;  %v343_v17 = vld [vmem:[%s14983_s20 + $0x48] sm:$0xff]  ;;  %v401_v20 = vmax.f32 %v341_v14, 0.0  ;;  %v344_v22 = vld [vmem:[%s14983_s20 + $0x50] sm:$0xff] }
  0x16   : > { %v455_v18 = vpack.c.bf16 %v397_v10, %v396_v8  ;;  %v402_v21 = vmax.f32 %v342_v16, 0.0  ;;  %v345_v23 = vld [vmem:[%s14983_s20 + $0x58] sm:$0xff]  ;;  %v346_v24 = vld [vmem:[%s14983_s20 + $0x60] sm:$0xff]  ;;  %v403_v25 = vmax.f32 %v343_v17, 0.0  ;;  %v404_v26 = vmax.f32 %v344_v22, 0.0  ;;  %v347_v28 = vld [vmem:[%s14983_s20 + $0x68] sm:$0xff] }
  0x17   : > { %12511 = vmatpush3.bf16.msra.mxu0 %v14688_v2  ;;  %v14999_v19 = vpack.c.bf16 %v399_v12, %v398_v11  ;;  %v405_v27 = vmax.f32 %v345_v23, 0.0  ;;  %v348_v29 = vld [vmem:[%s14983_s20 + $0x70] sm:$0xff]  ;;  %v15007_v30 = vpack.c.bf16 %v401_v20, %v400_v15  ;;  %v349_v31 = vld [vmem:[%s14983_s20 + $0x78] sm:$0xff]  ;;  %v406_v34 = vmax.f32 %v346_v24, 0.0  ;;  %v350_v36 = vld [vmem:[%s14983_s20 + $0x80] sm:$0xff] }
  0x18   : > { %12512 = vmatprep.subr.bf16.mxu0 %v14689_v3  ;;  %485 = vst [vmem:[#allocation2 + $0x8] sm:$0xff] %v455_v18  ;;  %v15010_v32 = vpack.c.bf16 %v403_v25, %v402_v21  ;;  %v407_v35 = vmax.f32 %v347_v28, 0.0  ;;  %v351_v37 = vld [vmem:[%s14983_s20 + $0x88] sm:$0xff]  ;;  %v352_v38 = vld [vmem:[%s14983_s20 + $0x90] sm:$0xff]  ;;  %v408_v40 = vmax.f32 %v348_v29, 0.0  ;;  %v409_v42 = vmax.f32 %v349_v31, 0.0 }
  0x19   : > { %486 = vst [vmem:[#allocation2 + $0x10] sm:$0xff] %v14999_v19  ;;  %v15012_v33 = vpack.c.bf16 %v405_v27, %v404_v26  ;;  %487 = vst [vmem:[#allocation2 + $0x18] sm:$0xff] %v15007_v30  ;;  %v353_v43 = vld [vmem:[%s14983_s20 + $0x98] sm:$0xff]  ;;  %v354_v44 = vld [vmem:[%s14983_s20 + $0xa0] sm:$0xff]  ;;  %v410_v46 = vmax.f32 %v350_v36, 0.0  ;;  %v411_v47 = vmax.f32 %v351_v37, 0.0 }
  0x1a   : > { %488 = vst [vmem:[#allocation2 + $0x20] sm:$0xff] %v15010_v32  ;;  %v15023_v41 = vpack.c.bf16 %v407_v35, %v406_v34  ;;  %v355_v45 = vld [vmem:[%s14983_s20 + $0xa8] sm:$0xff]  ;;  %v412_v48 = vmax.f32 %v352_v38, 0.0  ;;  %v356_v49 = vld [vmem:[%s14983_s20 + $0xb0] sm:$0xff]  ;;  %v357_v50 = vld [vmem:[%s14983_s20 + $0xb8] sm:$0xff]  ;;  %v600_v51 = vrot.slane %v14999_v19, 4  ;;  %v15032_v52 = vpack.c.bf16 %v409_v42, %v408_v40 }
  0x1b   : > { %12513 = vmatpush3.bf16.msra.mxu0 %v14689_v3  ;;  %489 = vst [vmem:[#allocation2 + $0x28] sm:$0xff] %v15012_v33  ;;  %v15037_v54 = vpack.c.bf16 %v411_v47, %v410_v46  ;;  %v413_v55 = vmax.f32 %v353_v43, 0.0  ;;  %v414_v56 = vmax.f32 %v354_v44, 0.0  ;;  %v415_v57 = vmax.f32 %v355_v45, 0.0  ;;  %v358_v58 = vld [vmem:[%s14983_s20 + $0xc0] sm:$0xff]  ;;  %v359_v59 = vld [vmem:[%s14983_s20 + $0xc8] sm:$0xff] }
  0x1c   : > { %12514 = vmatprep.subr.bf16.mxu0 %v14690_v9  ;;  %490 = vst [vmem:[#allocation2 + $0x30] sm:$0xff] %v15023_v41  ;;  %491 = vst [vmem:[#allocation2 + $0x38] sm:$0xff] %v15032_v52  ;;  %v416_v61 = vmax.f32 %v356_v49, 0.0  ;;  %v417_v62 = vmax.f32 %v357_v50, 0.0  ;;  %v360_v63 = vld [vmem:[%s14983_s20 + $0xd0] sm:$0xff]  ;;  %v361_v0 = vld [vmem:[%s14983_s20 + $0xd8] sm:$0xff] }
  0x1d   : > { %v14693_v1 = vld [vmem:[%s18686_s1 + $0x78] sm:$0xff]   ;;  %v955_v3 = vshrl.u32 %v14999_v19, 16  ;;  %492 = vst [vmem:[#allocation2 + $0x40] sm:$0xff] %v15037_v54  ;;  %v15049_v4 = vpack.c.bf16 %v413_v55, %v412_v48  ;;  %v15051_v5 = vpack.c.bf16 %v415_v57, %v414_v56  ;;  %v362_v6 = vld [vmem:[%s14983_s20 + $0xe0] sm:$0xff]  ;;  %v363_v7 = vld [vmem:[%s14983_s20 + $0xe8] sm:$0xff]  ;;  %v418_v10 = vmax.f32 %v358_v58, 0.0 }
  0x1e   : > { %v364_v8 = vld [vmem:[%s14983_s20 + $0xf0] sm:$0xff]  ;;  %v419_v11 = vmax.f32 %v359_v59, 0.0  ;;  %v958_v13 = vshll.u32 %v14999_v19, 16  ;;  %v602_v14 = vrot.slane %v15007_v30, 4  ;;  %v365_v15 = vld [vmem:[%s14983_s20 + $0xf8] sm:$0xff]  ;;  %v366_v16 = vld [vmem:[%s14983_s20 + $0x100] sm:$0xff] }
  0x1f   : > { %12515 = vmatpush3.bf16.msra.mxu0 %v14690_v9  ;;  %v555_v60 = vld [vmem:[#allocation2 + $0x8] sm:$0xf0]  ;;  %v15056_v9 = vpack.c.bf16 %v417_v62, %v416_v61  ;;  %493 = vst [vmem:[#allocation2 + $0x48] sm:$0xff] %v15049_v4  ;;  %494 = vst [vmem:[#allocation2 + $0x50] sm:$0xff] %v15051_v5  ;;  %v420_v18 = vmax.f32 %v360_v63, 0.0  ;;  %v421_v20 = vmax.f32 %v361_v0, 0.0 }
  0x20   : > { %12516 = vmatprep.subr.bf16.mxu0 %v14691_v39  ;;  %v599_v2 = vrot.slane %v555_v60, 4  ;;  %v15068_v17 = vpack.c.bf16 %v419_v11, %v418_v10  ;;  %v367_v21 = vld [vmem:[%s14983_s20 + $0x108] sm:$0xff]  ;;  %v368_v22 = vld [vmem:[%s14983_s20 + $0x110] sm:$0xff]  ;;  %v604_v23 = vrot.slane %v15010_v32, 4  ;;  %v422_v24 = vmax.f32 %v362_v6, 0.0  ;;  %v369_v26 = vld [vmem:[%s14983_s20 + $0x118] sm:$0xff] }
  0x21   : > { %495 = vst [vmem:[#allocation2 + $0x58] sm:$0xff] %v15056_v9  ;;  %v423_v25 = vmax.f32 %v363_v7, 0.0  ;;  %v370_v27 = vld [vmem:[%s14983_s20 + $0x120] sm:$0xff]  ;;  %v371_v28 = vld [vmem:[%s14983_s20 + $0x128] sm:$0xff]  ;;  %v15077_v29 = vpack.c.bf16 %v421_v20, %v420_v18  ;;  %v424_v31 = vmax.f32 %v364_v8, 0.0  ;;  %v372_v34 = vld [vmem:[%s14983_s20 + $0x130] sm:$0xff] }
  0x22   : > { %v601_v12 = vsel %vm598_vm0, %v599_v2, %v600_v51  ;;  %496 = vst [vmem:[#allocation2 + $0x60] sm:$0xff] %v15068_v17  ;;  %v425_v36 = vmax.f32 %v365_v15, 0.0  ;;  %v426_v37 = vmax.f32 %v366_v16, 0.0  ;;  %v427_v38 = vmax.f32 %v367_v21, 0.0  ;;  %v373_v44 = vld [vmem:[%s14983_s20 + $0x138] sm:$0xff]  ;;  %v374_v49 = vld [vmem:[%s14983_s20 + $0x140] sm:$0xff] }
  0x23   : > { %12517 = vmatpush3.bf16.msra.mxu0 %v14691_v39  ;;  %12522 = vmatprep.mubr.bf16.mxu0 %v601_v12  ;;  %v15080_v35 = vpack.c.bf16 %v423_v25, %v422_v24  ;;  %v14694_v39 = vld [vmem:[%s18686_s1] sm:$0xff]   ;;  %v964_v40 = vshrl.u32 %v15007_v30, 16  ;;  %497 = vst [vmem:[#allocation2 + $0x68] sm:$0xff] %v15077_v29  ;;  %v428_v42 = vmax.f32 %v368_v22, 0.0  ;;  %v429_v43 = vmax.f32 %v369_v26, 0.0  ;;  %v375_v50 = vld [vmem:[%s14983_s20 + $0x148] sm:$0xff] }
  0x24   : > { %12518 = vmatprep.subr.bf16.mxu0 %v14692_v53  ;;  %v967_v45 = vshll.u32 %v15007_v30, 16  ;;  %v15090_v46 = vpack.c.bf16 %v425_v36, %v424_v31  ;;  %v15092_v47 = vpack.c.bf16 %v427_v38, %v426_v37  ;;  %v430_v48 = vmax.f32 %v370_v27, 0.0  ;;  %v14695_v58 = vld [vmem:[%s18686_s1 + $0x8] sm:$0xff]   ;;  %v376_v59 = vld [vmem:[%s14983_s20 + $0x150] sm:$0xff]  ;;  %v377_v62 = vld [vmem:[%s14983_s20 + $0x158] sm:$0xff] }
  0x25   : > { %498 = vst [vmem:[#allocation2 + $0x70] sm:$0xff] %v15080_v35  ;;  %v15099_v55 = vpack.c.bf16 %v429_v43, %v428_v42  ;;  %v431_v56 = vmax.f32 %v371_v28, 0.0  ;;  %v432_v57 = vmax.f32 %v372_v34, 0.0  ;;  %v605_v60 = vsel %vm598_vm0, %v602_v14, %v604_v23  ;;  %v378_v63 = vld [vmem:[%s14983_s20 + $0x160] sm:$0xff]  ;;  %v379_v6 = vld [vmem:[%s14983_s20 + $0x168] sm:$0xff]  ;;  %v380_v7 = vld [vmem:[%s14983_s20 + $0x170] sm:$0xff] }
  0x26   : > { %v606_v61 = vrot.slane %v15012_v33, 4  ;;  %499 = vst [vmem:[#allocation2 + $0x78] sm:$0xff] %v15090_v46  ;;  %500 = vst [vmem:[#allocation2 + $0x80] sm:$0xff] %v15092_v47  ;;  %v435_v2 = vmax.f32 %v375_v50, 0.0  ;;  %v608_v8 = vrot.slane %v15023_v41, 4  ;;  %v436_v11 = vmax.f32 %v376_v59, 0.0 }
  0x27   : > { %12519 = vmatpush3.bf16.msra.mxu0 %v14692_v53  ;;  %v603_v53 = vsel %vm598_vm0, %v600_v51, %v602_v14  ;;  %v433_v51 = vmax.f32 %v373_v44, 0.0  ;;  %501 = vst [vmem:[#allocation2 + $0x88] sm:$0xff] %v15099_v55  ;;  %v15114_v0 = vpack.c.bf16 %v431_v56, %v430_v48  ;;  %v14696_v12 = vld [vmem:[%s18686_s1 + $0x10] sm:$0xff]   ;;  %v381_v14 = vld [vmem:[%s14983_s20 + $0x178] sm:$0xff]  ;;  %v610_v15 = vrot.slane %v15032_v52, 4  ;;  %v382_v20 = vld [vmem:[%s14983_s20 + $0x180] sm:$0xff] }
  0x28   : > { %12520 = vmatprep.subr.bf16.mxu0 %v14693_v1  ;;  %v437_v18 = vmax.f32 %v377_v62, 0.0  ;;  %v383_v21 = vld [vmem:[%s14983_s20 + $0x188] sm:$0xff]  ;;  %v438_v22 = vmax.f32 %v378_v63, 0.0  ;;  %v439_v24 = vmax.f32 %v379_v6, 0.0  ;;  %v440_v25 = vmax.f32 %v380_v7, 0.0  ;;  %v384_v26 = vld [vmem:[%s14983_s20 + $0x190] sm:$0xff] }
  0x29   : > { %v15119_v10 = vpack.c.bf16 %v433_v51, %v432_v57  ;;  %502 = vst [vmem:[#allocation2 + $0x90] sm:$0xff] %v15114_v0  ;;  %v441_v28 = vmax.f32 %v381_v14, 0.0  ;;  %v385_v31 = vld [vmem:[%s14983_s20 + $0x198] sm:$0xff]  ;;  %v612_v34 = vrot.slane %v15037_v54, 4  ;;  %v442_v37 = vmax.f32 %v382_v20, 0.0  ;;  %v14698_v63 = vld [vmem:[%s18686_s1 + $0x20] sm:$0xff]  }
  0x2a   : > { %v15134_v27 = vpack.c.bf16 %v437_v18, %v436_v11  ;;  %v476_v36 = vpack.c.bf16 %v439_v24, %v438_v22  ;;  %v443_v38 = vmax.f32 %v383_v21, 0.0  ;;  %v609_v42 = vsel %vm598_vm0, %v606_v61, %v608_v8  ;;  %v14697_v43 = vld [vmem:[%s18686_s1 + $0x18] sm:$0xff]   ;;  %v14699_v22 = vld [vmem:[%s18686_s1 + $0x28] sm:$0xff]  }
  0x2b   : > { %12521 = vmatpush3.bf16.msra.mxu0 %v14693_v1  ;;  %v434_v1 = vmax.f32 %v374_v49, 0.0  ;;  %503 = vst [vmem:[#allocation2 + $0x98] sm:$0xff] %v15119_v10  ;;  %v477_v44 = vpack.c.bf16 %v441_v28, %v440_v25  ;;  %v444_v48 = vmax.f32 %v384_v26, 0.0  ;;  %v614_v56 = vrot.slane %v15049_v4, 4 }
  0x2c   : > { %12570 = vmatprep.subr.bf16.mxu0 %v14694_v39  ;;  %505 = vst [vmem:[#allocation2 + $0xa8] sm:$0xff] %v15134_v27  ;;  %v638_v49 = vrot.slane %v15134_v27, 4  ;;  %506 = vst [vmem:[#allocation2 + $0xb0] sm:$0xff] %v476_v36  ;;  %v640_v50 = vrot.slane %v476_v36, 4  ;;  %v616_v59 = vrot.slane %v15051_v5, 4  ;;  %v969_v7 = vrot.slane %v967_v45, 4 }
  0x2d   : > { %v15127_v16 = vpack.c.bf16 %v435_v2, %v434_v1  ;;  %507 = vst [vmem:[#allocation2 + $0xb8] sm:$0xff] %v477_v44  ;;  %v642_v57 = vrot.slane %v477_v44, 4  ;;  %v960_v1 = vrot.slane %v958_v13, 4  ;;  %v966_v2 = vrot.slane %v964_v40, 3 }
  0x2e   : > { %12523 = vmatmul.mubr.bf16.vlgmr.msra.gmra.mrb[0].mxu0 %v603_v53  ;;  %v15149_v53 = vpack.c.bf16 %v443_v38, %v442_v37  ;;  %v973_v11 = vshrl.u32 %v15010_v32, 16  ;;  %v611_v14 = vsel %vm598_vm0, %v608_v8, %v610_v15  ;;  %v982_v20 = vshrl.u32 %v15012_v33, 16 }
  0x2f   : > { %12526 = vmatprep.mubr.bf16.mxu0 %v605_v60  ;;  %12571 = vmatpush3.bf16.msra.mxu0 %v14694_v39  ;;  %504 = vst [vmem:[#allocation2 + $0xa0] sm:$0xff] %v15127_v16  ;;  %v607_v39 = vsel %vm598_vm0, %v604_v23, %v606_v61  ;;  %v445_v23 = vmax.f32 %v385_v31, 0.0  ;;  %v15158_v60 = vsel %vm598_vm0, %v638_v49, %v640_v50  ;;  %v985_v21 = vshll.u32 %v15012_v33, 16 }
  0x30   : > { %12572 = vmatprep.subr.bf16.mxu0 %v14695_v58  ;;  %508 = vst [vmem:[#allocation2 + $0xc0] sm:$0xff] %v15149_v53  ;;  %v644_v61 = vrot.slane %v15149_v53, 4  ;;  %v15163_v62 = vsel %vm598_vm0, %v640_v50, %v642_v57  ;;  %v970_v24 = vor.u32 %v969_v7, %v966_v2  ;;  %v975_v25 = vrot.slane %v973_v11, 3 }
  0x31   : > { %v479_v51 = vpack.c.bf16 %v445_v23, %v444_v48  ;;  %v991_v28 = vshrl.u32 %v15023_v41, 16  ;;  %v613_v8 = vsel %vm598_vm0, %v610_v15, %v612_v34  ;;  %v984_v31 = vrot.slane %v982_v20, 3 }
  0x32   : > { %v15175_v6 = vsel %vm598_vm0, %v642_v57, %v644_v61  ;;  %v987_v36 = vrot.slane %v985_v21, 4  ;;  %v994_v37 = vshll.u32 %v15023_v41, 16  ;;  %v1000_v15 = vshrl.u32 %v15032_v52, 16 }
  0x33   : > { %12573 = vmatpush3.bf16.msra.mxu0 %v14695_v58  ;;  %v957_v58 = vrot.slane %v955_v3, 3  ;;  %509 = vst [vmem:[#allocation2 + $0xc8] sm:$0xff] %v479_v51  ;;  %v1003_v48 = vshll.u32 %v15032_v52, 16  ;;  %v1009_v50 = vshrl.u32 %v15037_v54, 16  ;;  %v1018_v51 = vshrl.u32 %v15049_v4, 16 }
  0x34   : > { %12574 = vmatprep.subr.bf16.mxu0 %v14696_v12  ;;  %v996_v44 = vrot.slane %v994_v37, 4  ;;  %v1002_v57 = vrot.slane %v1000_v15, 3  ;;  %v1502_v19 = vrot.slane %v973_v11, 4  ;;  %v1511_v33 = vrot.slane %v994_v37, 5 }
  0x35   : > { %v15186_v18 = vor.u32 %v960_v1, %v957_v58  ;;  %v1012_v58 = vshll.u32 %v15037_v54, 16  ;;  %v1005_v7 = vrot.slane %v1003_v48, 4  ;;  %v1515_v27 = vrot.slane %v1003_v48, 5 }
  0x36   : > { %12527 = vmatmul.mubr.bf16.gmra.mrb[4].mxu0 %v607_v39  ;;  %v1518_v41 = vrot.slane %v1009_v50, 4  ;;  %v1522_v52 = vrot.slane %v1018_v51, 4  ;;  %v1039_v53 = vshll.u32 %v15056_v9, 16 }
  0x37   : > { %12530 = vmatprep.mubr.bf16.mxu0 %v609_v42  ;;  %12575 = vmatpush3.bf16.msra.mxu0 %v14696_v12  ;;  %v976_v12 = vshll.u32 %v15010_v32, 16  ;;  %v15210_v38 = vsel %vm945_vm1, %v15186_v18, %v970_v24  ;;  %v993_v42 = vrot.slane %v991_v28, 3  ;;  %v1510_v32 = vrot.slane %v991_v28, 4 }
  0x38   : > { %12576 = vmatprep.subr.bf16.mxu0 %v14697_v43 }
  0x39   : > { %v978_v26 = vrot.slane %v976_v12, 4  ;;  %v997_v2 = vor.u32 %v996_v44, %v993_v42  ;;  %v615_v42 = vsel %vm598_vm0, %v612_v34, %v614_v56  ;;  %v1503_v30 = vrot.slane %v976_v12, 5 }
  0x3a   : > { %v1514_v12 = vrot.slane %v1000_v15, 4 }
  0x3b   : > { %12577 = vmatpush3.bf16.msra.mxu0 %v14697_v43  ;;  %v979_v39 = vor.u32 %v978_v26, %v975_v25  ;;  %v988_v43 = vor.u32 %v987_v36, %v984_v31  ;;  %v1014_v25 = vrot.slane %v1012_v58, 4  ;;  %v1021_v26 = vshll.u32 %v15049_v4, 16 }
  0x3c   : > { %12578 = vmatprep.subr.bf16.mxu0 %v14698_v63  ;;  %v1006_v31 = vor.u32 %v1005_v7, %v1002_v57  ;;  %v14701_v57 = vld [vmem:[%s18686_s1 + $0x38] sm:$0xff]  }
  0x3d   : > { %v15220_v23 = vsel %vm945_vm1, %v970_v24, %v979_v39  ;;  %v15227_v1 = vsel %vm945_vm1, %v979_v39, %v988_v43  ;;  %v14700_v24 = vld [vmem:[%s18686_s1 + $0x30] sm:$0xff]   ;;  %v1023_v39 = vrot.slane %v1021_v26, 4  ;;  %v1523_v28 = vrot.slane %v1021_v26, 5 }
  0x3e   : > { %12531 = vmatmul.mubr.bf16.gmra.mrb[8].mxu0 %v611_v14  ;;  %v1011_v14 = vrot.slane %v1009_v50, 3  ;;  %v15252_v44 = vsel %vm945_vm1, %v997_v2, %v1006_v31  ;;  %v1045_v26 = vshrl.u32 %v15068_v17, 16 }
  0x3f   : > { %12534 = vmatprep.mubr.bf16.mxu0 %v613_v8  ;;  %12579 = vmatpush3.bf16.msra.mxu0 %v14698_v63  ;;  %v1020_v63 = vrot.slane %v1018_v51, 3  ;;  %v15242_v8 = vsel %vm945_vm1, %v988_v43, %v997_v2  ;;  %v617_v43 = vsel %vm598_vm0, %v614_v56, %v616_v59  ;;  %v620_v56 = vrot.slane %v15068_v17, 4 }
  0x40   : > { %12580 = vmatprep.subr.bf16.mxu0 %v14699_v22  ;;  %v1015_v36 = vor.u32 %v1014_v25, %v1011_v14  ;;  %v15360_v48 = vor.u32 %v1523_v28, %v1522_v52 }
  0x41   : > { %v15265_v14 = vor.u32 %v1023_v39, %v1020_v63  ;;  %v15280_v63 = vld [vmem:[%s18686_s1 + $0x80] sm:$0xff]   ;;  %v626_v39 = vrot.slane %v15090_v46, 4 }
  0x42   : > { %v15263_v7 = vsel %vm945_vm1, %v1006_v31, %v1015_v36  ;;  %v624_v31 = vrot.slane %v15080_v35, 4  ;;  %v632_v35 = vrot.slane %v15114_v0, 4  ;;  %v1494_v0 = vrot.slane %v955_v3, 4 }
  0x43   : > { %12581 = vmatpush3.bf16.msra.mxu0 %v14699_v22  ;;  %v15269_v34 = vsel %vm945_vm1, %v1015_v36, %v15265_v14  ;;  %v618_v22 = vrot.slane %v15056_v9, 4 }
  0x44   : > { %12582 = vmatprep.subr.bf16.mxu0 %v14700_v24 }
  0x45   : > { %v619_v2 = vsel %vm598_vm0, %v616_v59, %v618_v22  ;;  %v621_v25 = vsel %vm598_vm0, %v618_v22, %v620_v56  ;;  %v514_v22 = vld [vmem:[#allocation2 + $0x8] sm:$0xf8] }
  0x46   : > { %12535 = vmatmul.mubr.bf16.gmra.mrb[12].mxu0 %v615_v42  ;;  %v628_v42 = vrot.slane %v15092_v47, 4 }
  0x47   : > { %12538 = vmatprep.mubr.bf16.mxu0 %v617_v43  ;;  %12583 = vmatpush3.bf16.msra.mxu0 %v14700_v24  ;;  %v622_v24 = vrot.slane %v15077_v29, 4  ;;  %v627_v43 = vsel %vm598_vm0, %v624_v31, %v626_v39 }
  0x48   : > { %12584 = vmatprep.subr.bf16.mxu0 %v14701_v57 }
  0x49   : > { %v623_v36 = vsel %vm598_vm0, %v620_v56, %v622_v24  ;;  %v625_v59 = vsel %vm598_vm0, %v622_v24, %v624_v31  ;;  %v634_v56 = vrot.slane %v15119_v10, 4  ;;  %v950_v24 = vshll.u32 %v514_v22, 16 }
  0x4a   : > { %v636_v31 = vrot.slane %v15127_v16, 4  ;;  %v1030_v10 = vshll.u32 %v15051_v5, 16  ;;  %v1499_v16 = vrot.slane %v967_v45, 5  ;;  %v1504_v45 = vor.u32 %v1503_v30, %v1502_v19 }
  0x4b   : > { %12585 = vmatpush3.bf16.msra.mxu0 %v14701_v57  ;;  %v629_v57 = vsel %vm598_vm0, %v626_v39, %v628_v42 }
  0x4c   : > { %12634 = vmatprep.subr.bf16.mxu0 %v15280_v63  ;;  %v1032_v51 = vrot.slane %v1030_v10, 4 }
  0x4e   : > { %12539 = vmatmul.mubr.bf16.gmra.mrb[16].mxu0 %v619_v2  ;;  %v630_v2 = vrot.slane %v15099_v55, 4  ;;  %v952_v55 = vrot.slane %v950_v24, 4  ;;  %v637_v24 = vsel %vm598_vm0, %v634_v56, %v636_v31 }
  0x4f   : > { %12542 = vmatprep.mubr.bf16.mxu0 %v621_v25  ;;  %v947_v25 = vshrl.u32 %v514_v22, 16 }
  0x50   : > { %v631_v46 = vsel %vm598_vm0, %v628_v42, %v630_v2  ;;  %v633_v47 = vsel %vm598_vm0, %v630_v2, %v632_v35  ;;  %v1495_v42 = vrot.slane %v958_v13, 5  ;;  %v1506_v13 = vrot.slane %v982_v20, 4 }
  0x51   : > { %v1512_v20 = vor.u32 %v1511_v33, %v1510_v32  ;;  %v15445_v33 = vld [vmem:[#allocation2 + $0x78] sm:$0xff] }
  0x52   : > { %v15310_v22 = vor.u32 %v1495_v42, %v1494_v0  ;;  %v14707_v0 = vld [vmem:[%s18686_s1 + $0xa8] sm:$0xff]   ;;  %v15413_v42 = vld [vmem:[#allocation2 + $0x70] sm:$0xff] }
  0x56   : > { %12543 = vmatmul.mubr.bf16.gmra.mrb[20].mxu0 %v623_v36  ;;  %v15294_v36 = vld [vmem:[#allocation2 + $0xc8] sm:$0xf] }
  0x57   : > { %12546 = vmatprep.mubr.bf16.mxu0 %v625_v59  ;;  %v949_v59 = vrot.slane %v947_v25, 3  ;;  %v646_v39 = vrot.slane %v15294_v36, 4  ;;  %v635_v25 = vsel %vm598_vm0, %v632_v35, %v634_v56  ;;  %v639_v56 = vsel %vm598_vm0, %v636_v31, %v638_v49 }
  0x58   : > { %v1516_v49 = vor.u32 %v1515_v27, %v1514_v12  ;;  %v1041_v31 = vrot.slane %v1039_v53, 4  ;;  %v1072_v12 = vshrl.u32 %v15445_v33, 16  ;;  %v1075_v27 = vshll.u32 %v15445_v33, 16 }
  0x59   : > { %v953_v37 = vor.u32 %v952_v55, %v949_v59  ;;  %v647_v54 = vsel %vm598_vm0, %v644_v61, %v646_v39  ;;  %v14703_v61 = vld [vmem:[%s18686_s1 + $0x88] sm:$0xff]   ;;  %v14704_v59 = vld [vmem:[%s18686_s1 + $0x90] sm:$0xff]   ;;  %v1054_v39 = vshrl.u32 %v15077_v29, 16  ;;  %v14706_v55 = vld [vmem:[%s18686_s1 + $0xa0] sm:$0xff]  }
  0x5a   : > { %v1074_v28 = vrot.slane %v1072_v12, 3 }
  0x5b   : > { %v962_v50 = vsel %vm945_vm1, %v953_v37, %v15186_v18  ;;  %v1077_v37 = vrot.slane %v1075_v27, 4 }
  0x5e   : > { %12547 = vmatmul.mubr.bf16.gmra.mrb[24].mxu0 %v627_v43  ;;  %v1027_v43 = vshrl.u32 %v15051_v5, 16 }
  0x5f   : > { %12550 = vmatprep.mubr.bf16.mxu0 %v629_v57  ;;  %v1498_v57 = vrot.slane %v964_v40, 4  ;;  %v1507_v40 = vrot.slane %v985_v21, 5 }
  0x60   : > { %v1029_v4 = vrot.slane %v1027_v43, 3 }
  0x61   : > { %v1500_v2 = vor.u32 %v1499_v16, %v1498_v57  ;;  %v1508_v35 = vor.u32 %v1507_v40, %v1506_v13  ;;  %v1063_v57 = vshrl.u32 %v15413_v42, 16  ;;  %v1066_v40 = vshll.u32 %v15413_v42, 16 }
  0x63   : > { %v15315_v3 = vsel %vm1485_vm2, %v15310_v22, %v1500_v2  ;;  %v15333_v11 = vsel %vm1485_vm2, %v1504_v45, %v1508_v35  ;;  %v15345_v21 = vsel %vm1485_vm2, %v1508_v35, %v1512_v20  ;;  %v1065_v13 = vrot.slane %v1063_v57, 3 }
  0x64   : > { %v1068_v35 = vrot.slane %v1066_v40, 4 }
  0x66   : > { %12551 = vmatmul.mubr.bf16.gmra.mrb[28].mxu0 %v631_v46  ;;  %v15327_v46 = vsel %vm1485_vm2, %v1500_v2, %v1504_v45  ;;  %v14708_v2 = vld [vmem:[%s18686_s1 + $0xb0] sm:$0xff]  }
  0x67   : > { %12554 = vmatprep.mubr.bf16.mxu0 %v633_v47  ;;  %v15348_v47 = vsel %vm1485_vm2, %v1512_v20, %v1516_v49  ;;  %v1069_v20 = vor.u32 %v1068_v35, %v1065_v13 }
  0x6e   : > { %12555 = vmatmul.mubr.bf16.gmra.mrb[32].mxu0 %v635_v25  ;;  %v1033_v25 = vor.u32 %v1032_v51, %v1029_v4  ;;  %v1078_v4 = vor.u32 %v1077_v37, %v1074_v28  ;;  %v15463_v51 = vld [vmem:[#allocation2 + $0x88] sm:$0xff] }
  0x6f   : > { %12558 = vmatprep.mubr.bf16.mxu0 %v637_v24 }
  0x70   : > { %v1034_v24 = vsel %vm945_vm1, %v15265_v14, %v1033_v25 }
  0x76   : > { %12559 = vmatmul.mubr.bf16.gmra.mrb[36].mxu0 %v639_v56  ;;  %v15442_v56 = vld [vmem:[%s18686_s1 + $0xc0] sm:$0xff]  }
  0x77   : > { %12562 = vmatprep.mubr.bf16.mxu0 %v15158_v60  ;;  %v1519_v60 = vrot.slane %v1012_v58, 5  ;;  %v1036_v58 = vshrl.u32 %v15056_v9, 16 }
  0x79   : > { %v1520_v15 = vor.u32 %v1519_v60, %v1518_v41  ;;  %v1038_v18 = vrot.slane %v1036_v58, 3  ;;  %v1530_v5 = vrot.slane %v1036_v58, 4 }
  0x7b   : > { %v1042_v30 = vor.u32 %v1041_v31, %v1038_v18  ;;  %v1093_v18 = vshll.u32 %v15463_v51, 16 }
  0x7d   : > { %v1043_v14 = vsel %vm945_vm1, %v1033_v25, %v1042_v30 }
  0x7e   : > { %12563 = vmatmul.mubr.bf16.gmra.mrb[40].mxu0 %v15163_v62  ;;  %v15363_v62 = vsel %vm1485_vm2, %v1516_v49, %v1520_v15  ;;  %v15449_v49 = vld [vmem:[#allocation2 + $0x80] sm:$0xff] }
  0x7f   : > { %12566 = vmatprep.mubr.bf16.mxu0 %v15175_v6  ;;  %v15370_v6 = vsel %vm1485_vm2, %v1520_v15, %v15360_v48  ;;  %v1081_v41 = vshrl.u32 %v15449_v49, 16  ;;  %v1084_v60 = vshll.u32 %v15449_v49, 16 }
  0x86   : > { %12567 = vmatmul.mubr.bf16.gmra.mrb[44].mxu0 %v647_v54  ;;  %v1083_v54 = vrot.slane %v1081_v41, 3 }
  0x87   : > { %12586 = vmatprep.mubr.bf16.mxu0 %v962_v50  ;;  %v1086_v50 = vrot.slane %v1084_v60, 4 }
  0x89   : > { %v1087_v31 = vor.u32 %v1086_v50, %v1083_v54  ;;  %v15499_v54 = vld [vmem:[#allocation2 + $0xa8] sm:$0xff] }
  0x8a   : > { %v18695_v50 = vshrl.u32 %v15499_v54, 16 }
  0x8e   : > { %12587 = vmatmul.mubr.bf16.vlgmr.msra.gmra.mrb[0].mxu0 %v15210_v38  ;;  %v14705_v38 = vld [vmem:[%s18686_s1 + $0x98] sm:$0xff]  }
  0x8f   : > { %12590 = vmatprep.mubr.bf16.mxu0 %v15220_v23  ;;  %12635 = vmatpush3.bf16.msra.mxu0 %v15280_v63  ;;  %v1048_v23 = vshll.u32 %v15068_v17, 16  ;;  %v1047_v63 = vrot.slane %v1045_v26, 3 }
  0x90   : > { %12636 = vmatprep.subr.bf16.mxu0 %v14703_v61 }
  0x91   : > { %v1050_v16 = vrot.slane %v1048_v23, 4 }
  0x93   : > { %12637 = vmatpush3.bf16.msra.mxu0 %v14703_v61  ;;  %v1051_v45 = vor.u32 %v1050_v16, %v1047_v63  ;;  %v1090_v61 = vshrl.u32 %v15463_v51, 16  ;;  %v1095_v16 = vrot.slane %v1093_v18, 4 }
  0x94   : > { %12638 = vmatprep.subr.bf16.mxu0 %v14704_v59 }
  0x95   : > { %v1554_v33 = vrot.slane %v1090_v61, 4 }
  0x96   : > { %12591 = vmatmul.mubr.bf16.gmra.mrb[4].mxu0 %v15227_v1  ;;  %v15410_v1 = vld [vmem:[#allocation2 + $0x68] sm:$0xff] }
  0x97   : > { %12594 = vmatprep.mubr.bf16.mxu0 %v15242_v8  ;;  %12639 = vmatpush3.bf16.msra.mxu0 %v14704_v59  ;;  %v1057_v8 = vshll.u32 %v15410_v1, 16  ;;  %v15467_v59 = vld [vmem:[#allocation2 + $0x90] sm:$0xff]  ;;  %v1546_v1 = vrot.slane %v1072_v12, 4  ;;  %v386_v12 = vld [vmem:[%s14983_s20 + $0x1a0] sm:$0xff] }
  0x98   : > { %12640 = vmatprep.subr.bf16.mxu0 %v14705_v38  ;;  %v18706_v63 = vshll.u32 %v15467_v59, 16  ;;  %v18843_v49 = vshrl.u32 %v15467_v59, 16 }
  0x99   : > { %v1059_v19 = vrot.slane %v1057_v8, 4  ;;  %v1539_v17 = vrot.slane %v1057_v8, 5  ;;  %v1547_v8 = vrot.slane %v1075_v27, 5  ;;  %v1555_v27 = vrot.slane %v1093_v18, 5 }
  0x9b   : > { %12641 = vmatpush3.bf16.msra.mxu0 %v14705_v38  ;;  %v18707_v38 = vshrl.u32 %v15467_v59, 16 }
  0x9c   : > { %12642 = vmatprep.subr.bf16.mxu0 %v14706_v55 }
  0x9d   : > { %v1101_v25 = vrot.slane %v18707_v38, 3 }
  0x9e   : > { %12595 = vmatmul.mubr.bf16.gmra.mrb[8].mxu0 %v15252_v44  ;;  %v14709_v44 = vld [vmem:[%s18686_s1 + $0xb8] sm:$0xff]  }
  0x9f   : > { %12598 = vmatprep.mubr.bf16.mxu0 %v15263_v7  ;;  %12643 = vmatpush3.bf16.msra.mxu0 %v14706_v55  ;;  %v1056_v7 = vrot.slane %v1054_v39, 3  ;;  %v1079_v55 = vsel %vm945_vm1, %v1069_v20, %v1078_v4 }
  0xa0   : > { %12644 = vmatprep.subr.bf16.mxu0 %v14707_v0 }
  0xa1   : > { %v1060_v32 = vor.u32 %v1059_v19, %v1056_v7  ;;  %v15481_v7 = vld [vmem:[#allocation2 + $0x98] sm:$0xff] }
  0xa2   : > { %v18704_v19 = vshrl.u32 %v15481_v7, 16  ;;  %v18845_v18 = vshrl.u32 %v15481_v7, 16 }
  0xa3   : > { %12645 = vmatpush3.bf16.msra.mxu0 %v14707_v0  ;;  %v1061_v52 = vsel %vm945_vm1, %v1051_v45, %v1060_v32  ;;  %v1070_v15 = vsel %vm945_vm1, %v1060_v32, %v1069_v20  ;;  %v1092_v0 = vrot.slane %v1090_v61, 3 }
  0xa4   : > { %12646 = vmatprep.subr.bf16.mxu0 %v14708_v2  ;;  %v1110_v32 = vrot.slane %v18704_v19, 3 }
  0xa6   : > { %12599 = vmatmul.mubr.bf16.gmra.mrb[12].mxu0 %v15269_v34  ;;  %v1052_v34 = vsel %vm945_vm1, %v1042_v30, %v1051_v45  ;;  %v18702_v30 = vshll.u32 %v15481_v7, 16  ;;  %v15485_v45 = vld [vmem:[#allocation2 + $0xa0] sm:$0xff] }
  0xa7   : > { %12602 = vmatprep.mubr.bf16.mxu0 %v1034_v24  ;;  %12647 = vmatpush3.bf16.msra.mxu0 %v14708_v2  ;;  %v1088_v2 = vsel %vm945_vm1, %v1078_v4, %v1087_v31  ;;  %v1096_v24 = vor.u32 %v1095_v16, %v1092_v0  ;;  %v18696_v4 = vshll.u32 %v15499_v54, 16 }
  0xa8   : > { %12648 = vmatprep.subr.bf16.mxu0 %v14709_v44  ;;  %v1113_v20 = vrot.slane %v18702_v30, 4 }
  0xa9   : > { %v1097_v35 = vsel %vm945_vm1, %v1087_v31, %v1096_v24 }
  0xab   : > { %12649 = vmatpush3.bf16.msra.mxu0 %v14709_v44  ;;  %v1104_v44 = vrot.slane %v18706_v63, 4 }
  0xac   : > { %12698 = vmatprep.subr.bf16.mxu0 %v15442_v56 }
  0xad   : > { %v1105_v13 = vor.u32 %v1104_v44, %v1101_v25  ;;  %v1128_v25 = vrot.slane %v18695_v50, 3  ;;  %v1131_v44 = vrot.slane %v18696_v4, 4  ;;  %v15521_v50 = vld [vmem:[#allocation2 + $0xc0] sm:$0xff] }
  0xae   : > { %12603 = vmatmul.mubr.bf16.gmra.mrb[16].mxu0 %v1043_v14  ;;  %v18701_v14 = vshrl.u32 %v15485_v45, 16  ;;  %v1156_v4 = vshll.u32 %v15521_v50, 16 }
  0xaf   : > { %12606 = vmatprep.mubr.bf16.mxu0 %v1052_v34  ;;  %v18699_v34 = vshll.u32 %v15485_v45, 16 }
  0xb0   : > { %v1119_v28 = vrot.slane %v18701_v14, 3 }
  0xb1   : > { %v1122_v37 = vrot.slane %v18699_v34, 4 }
  0xb3   : > { %v1123_v31 = vor.u32 %v1122_v37, %v1119_v28 }
  0xb6   : > { %12607 = vmatmul.mubr.bf16.gmra.mrb[20].mxu0 %v1061_v52  ;;  %v1106_v52 = vsel %vm945_vm1, %v1096_v24, %v1105_v13 }
  0xb7   : > { %12610 = vmatprep.mubr.bf16.mxu0 %v1070_v15  ;;  %v1114_v15 = vor.u32 %v1113_v20, %v1110_v32  ;;  %v1132_v20 = vor.u32 %v1131_v44, %v1128_v25 }
  0xb9   : > { %v1124_v24 = vsel %vm945_vm1, %v1114_v15, %v1123_v31 }
  0xbe   : > { %12611 = vmatmul.mubr.bf16.gmra.mrb[24].mxu0 %v1079_v55  ;;  %v15503_v55 = vld [vmem:[#allocation2 + $0xb0] sm:$0xff] }
  0xbf   : > { %12614 = vmatprep.mubr.bf16.mxu0 %v1088_v2  ;;  %v18697_v0 = vshrl.u32 %v15503_v55, 16  ;;  %v18698_v16 = vshll.u32 %v15503_v55, 16  ;;  %v1115_v2 = vsel %vm945_vm1, %v1105_v13, %v1114_v15  ;;  %v18705_v15 = vshrl.u32 %v15521_v50, 16 }
  0xc1   : > { %v1140_v32 = vrot.slane %v18698_v16, 4  ;;  %v1162_v16 = vshrl.u32 %v15294_v36, 16 }
  0xc6   : > { %12615 = vmatmul.mubr.bf16.gmra.mrb[28].mxu0 %v1097_v35  ;;  %v1137_v35 = vrot.slane %v18697_v0, 3  ;;  %v1133_v0 = vsel %vm945_vm1, %v1123_v31, %v1132_v20  ;;  %v1165_v31 = vshll.u32 %v15294_v36, 16 }
  0xc7   : > { %12618 = vmatprep.mubr.bf16.mxu0 %v1106_v52  ;;  %v15517_v52 = vld [vmem:[#allocation2 + $0xb8] sm:$0xff] }
  0xc8   : > { %v18700_v13 = vshrl.u32 %v15517_v52, 16  ;;  %v18703_v28 = vshll.u32 %v15517_v52, 16  ;;  %v1141_v37 = vor.u32 %v1140_v32, %v1137_v35  ;;  %v1158_v35 = vrot.slane %v1156_v4, 4 }
  0xc9   : > { %v1167_v19 = vrot.slane %v1165_v31, 4  ;;  %v1556_v31 = vor.u32 %v1555_v27, %v1554_v33 }
  0xca   : > { %v1149_v25 = vrot.slane %v18703_v28, 4  ;;  %v1142_v44 = vsel %vm945_vm1, %v1132_v20, %v1141_v37  ;;  %v1164_v20 = vrot.slane %v1162_v16, 3  ;;  %v14711_v16 = vld [vmem:[%s18686_s1 + $0xc8] sm:$0xff]  }
  0xce   : > { %12619 = vmatmul.mubr.bf16.gmra.mrb[32].mxu0 %v1115_v2  ;;  %v1146_v2 = vrot.slane %v18700_v13, 3  ;;  %v14866_v13 = vld [vmem:[#allocation2 + $0x8] sm:$0xf0] }
  0xcf   : > { %12622 = vmatprep.mubr.bf16.mxu0 %v1124_v24  ;;  %v1155_v24 = vrot.slane %v18705_v15, 3  ;;  %v1487_v14 = vshrl.u32 %v14866_v13, 16  ;;  %v1490_v30 = vshll.u32 %v14866_v13, 16 }
  0xd0   : > { %v1150_v32 = vor.u32 %v1149_v25, %v1146_v2 }
  0xd1   : > { %v1159_v34 = vor.u32 %v1158_v35, %v1155_v24  ;;  %v1489_v63 = vrot.slane %v1487_v14, 4  ;;  %v1492_v38 = vrot.slane %v1490_v30, 5  ;;  %v15598_v30 = vld [vmem:[%s18686_s1 + $0x100] sm:$0xff]   ;;  %v1551_v14 = vrot.slane %v1084_v60, 5 }
  0xd2   : > { %v1151_v28 = vsel %vm945_vm1, %v1141_v37, %v1150_v32  ;;  %v387_v37 = vld [vmem:[%s14983_s20 + $0x1a8] sm:$0xff]  ;;  %v1558_v60 = vrot.slane %v18843_v49, 4  ;;  %v18844_v24 = vshll.u32 %v15467_v59, 16  ;;  %v18847_v59 = vshrl.u32 %v15485_v45, 16 }
  0xd3   : > { %v1160_v15 = vsel %vm945_vm1, %v1150_v32, %v1159_v34  ;;  %v1493_v2 = vor.u32 %v1492_v38, %v1489_v63  ;;  %v14712_v38 = vld [vmem:[%s18686_s1 + $0xd0] sm:$0xff]  }
  0xd4   : > { %v14716_v63 = vld [vmem:[%s18686_s1 + $0xf0] sm:$0xff]   ;;  %v1559_v35 = vrot.slane %v18844_v24, 5 }
  0xd5   : > { %v1497_v36 = vsel %vm1485_vm2, %v1493_v2, %v15310_v22  ;;  %v14713_v22 = vld [vmem:[%s18686_s1 + $0xd8] sm:$0xff]  }
  0xd6   : > { %12623 = vmatmul.mubr.bf16.gmra.mrb[36].mxu0 %v1133_v0  ;;  %v1168_v0 = vor.u32 %v1167_v19, %v1164_v20  ;;  %v14717_v19 = vld [vmem:[%s18686_s1 + $0xf8] sm:$0xff]   ;;  %v1560_v61 = vor.u32 %v1559_v35, %v1558_v60  ;;  %v1562_v20 = vrot.slane %v18845_v18, 4 }
  0xd7   : > { %12626 = vmatprep.mubr.bf16.mxu0 %v1142_v44  ;;  %v447_v44 = vmax.f32 %v387_v37, 0.0 }
  0xd8   : > { %v1169_v25 = vsel %vm945_vm1, %v1159_v34, %v1168_v0  ;;  %v1548_v34 = vor.u32 %v1547_v8, %v1546_v1  ;;  %v18846_v0 = vshll.u32 %v15481_v7, 16  ;;  %v18850_v7 = vshll.u32 %v15499_v54, 16 }
  0xda   : > { %v1563_v2 = vrot.slane %v18846_v0, 5 }
  0xde   : > { %12627 = vmatmul.mubr.bf16.gmra.mrb[40].mxu0 %v1151_v28 }
  0xdf   : > { %12630 = vmatprep.mubr.bf16.mxu0 %v1160_v15  ;;  %v446_v15 = vmax.f32 %v386_v12, 0.0  ;;  %v15666_v12 = vld [vmem:[#allocation2 + $0x28] sm:$0xff] }
  0xe1   : > { %v15623_v32 = vpack.c.bf16 %v447_v44, %v446_v15  ;;  %v15672_v44 = vshrl.u32 %v15666_v12, 16 }
  0xe3   : > { %510 = vst [vmem:[#allocation2 + $0xd0] sm:$0xff] %v15623_v32  ;;  %v2006_v35 = vrot.slane %v15672_v44, 7 }
  0xe6   : > { %12631 = vmatmul.mubr.bf16.gmra.mrb[44].mxu0 %v1169_v25  ;;  %v1561_v25 = vsel %vm1485_vm2, %v1556_v31, %v1560_v61 }
  0xe7   : > { %12650 = vmatprep.mubr.bf16.mxu0 %v1497_v36  ;;  %v1566_v36 = vrot.slane %v18847_v59, 4 }
  0xee   : > { %12651 = vmatmul.mubr.bf16.vlgmr.msra.gmra.mrb[0].mxu0 %v15315_v3  ;;  %v14714_v3 = vld [vmem:[%s18686_s1 + $0xe0] sm:$0xff]  }
  0xef   : > { %12654 = vmatprep.mubr.bf16.mxu0 %v15327_v46  ;;  %12699 = vmatpush3.bf16.msra.mxu0 %v15442_v56  ;;  %v1526_v46 = vrot.slane %v1027_v43, 4  ;;  %v1527_v56 = vrot.slane %v1030_v10, 5  ;;  %v1531_v43 = vrot.slane %v1039_v53, 5  ;;  %v1538_v53 = vrot.slane %v1054_v39, 4 }
  0xf0   : > { %12700 = vmatprep.subr.bf16.mxu0 %v14711_v16 }
  0xf1   : > { %v1532_v9 = vor.u32 %v1531_v43, %v1530_v5  ;;  %v1540_v29 = vor.u32 %v1539_v17, %v1538_v53  ;;  %v18851_v5 = vshrl.u32 %v15503_v55, 16  ;;  %v18855_v17 = vshrl.u32 %v15521_v50, 16 }
  0xf3   : > { %12701 = vmatpush3.bf16.msra.mxu0 %v14711_v16  ;;  %v18848_v16 = vshll.u32 %v15485_v45, 16  ;;  %v1574_v43 = vrot.slane %v18851_v5, 4  ;;  %v18852_v45 = vshll.u32 %v15503_v55, 16  ;;  %v1583_v55 = vrot.slane %v1156_v4, 5  ;;  %v14720_v5 = vld [vmem:[%s18686_s1 + $0x110] sm:$0xff]  }
  0xf4   : > { %12702 = vmatprep.subr.bf16.mxu0 %v14712_v38 }
  0xf6   : > { %12655 = vmatmul.mubr.bf16.gmra.mrb[4].mxu0 %v15333_v11  ;;  %v14715_v11 = vld [vmem:[%s18686_s1 + $0xe8] sm:$0xff]  }
  0xf7   : > { %12658 = vmatprep.mubr.bf16.mxu0 %v15345_v21  ;;  %12703 = vmatpush3.bf16.msra.mxu0 %v14712_v38  ;;  %v1528_v21 = vor.u32 %v1527_v56, %v1526_v46  ;;  %v1567_v38 = vrot.slane %v18848_v16, 5  ;;  %v18849_v56 = vshrl.u32 %v15499_v54, 16  ;;  %v18854_v54 = vshll.u32 %v15517_v52, 16 }
  0xf8   : > { %12704 = vmatprep.subr.bf16.mxu0 %v14713_v22 }
  0xf9   : > { %v1529_v10 = vsel %vm1485_vm2, %v15360_v48, %v1528_v21  ;;  %v1533_v48 = vsel %vm1485_vm2, %v1528_v21, %v1532_v9  ;;  %v1571_v21 = vrot.slane %v18850_v7, 5 }
  0xfb   : > { %12705 = vmatpush3.bf16.msra.mxu0 %v14713_v22  ;;  %v1564_v22 = vor.u32 %v1563_v2, %v1562_v20 }
  0xfc   : > { %12706 = vmatprep.subr.bf16.mxu0 %v14714_v3 }
  0xfd   : > { %v1565_v46 = vsel %vm1485_vm2, %v1560_v61, %v1564_v22  ;;  %v15683_v61 = vld [vmem:[#allocation2 + $0x30] sm:$0xff] }
  0xfe   : > { %12659 = vmatmul.mubr.bf16.gmra.mrb[8].mxu0 %v15348_v47  ;;  %v1534_v47 = vrot.slane %v1045_v26, 4  ;;  %v15690_v20 = vshrl.u32 %v15683_v61, 16 }
  0xff   : > { %12662 = vmatprep.mubr.bf16.mxu0 %v15363_v62  ;;  %12707 = vmatpush3.bf16.msra.mxu0 %v14714_v3  ;;  %v1535_v62 = vrot.slane %v1048_v23, 5  ;;  %v1542_v23 = vrot.slane %v1063_v57, 4  ;;  %v1568_v3 = vor.u32 %v1567_v38, %v1566_v36  ;;  %v15699_v36 = vshll.u32 %v15683_v61, 16 }
 0x100   : > { %12708 = vmatprep.subr.bf16.mxu0 %v14715_v11  ;;  %v2014_v59 = vrot.slane %v15690_v20, 7 }
 0x101   : > { %v1536_v58 = vor.u32 %v1535_v62, %v1534_v47 }
 0x103   : > { %12709 = vmatpush3.bf16.msra.mxu0 %v14715_v11  ;;  %v1537_v26 = vsel %vm1485_vm2, %v1532_v9, %v1536_v58  ;;  %v1541_v42 = vsel %vm1485_vm2, %v1536_v58, %v1540_v29  ;;  %v1570_v11 = vrot.slane %v18849_v56, 4  ;;  %v18853_v9 = vshrl.u32 %v15517_v52, 16  ;;  %v15711_v56 = vld [vmem:[#allocation2 + $0x48] sm:$0xff] }
 0x104   : > { %12710 = vmatprep.subr.bf16.mxu0 %v14716_v63 }
 0x105   : > { %v1572_v47 = vor.u32 %v1571_v21, %v1570_v11  ;;  %v1578_v58 = vrot.slane %v18853_v9, 4  ;;  %v2017_v11 = vor.u32 %v15699_v36, %v2014_v59  ;;  %v14721_v9 = vld [vmem:[%s18686_s1 + $0x118] sm:$0xff]  }
 0x106   : > { %12663 = vmatmul.mubr.bf16.gmra.mrb[12].mxu0 %v15370_v6  ;;  %v1543_v6 = vrot.slane %v1066_v40, 5  ;;  %v1550_v40 = vrot.slane %v1081_v41, 4 }
 0x107   : > { %12666 = vmatprep.mubr.bf16.mxu0 %v1529_v10  ;;  %12711 = vmatpush3.bf16.msra.mxu0 %v14716_v63  ;;  %v1569_v63 = vsel %vm1485_vm2, %v1564_v22, %v1568_v3  ;;  %v1575_v10 = vrot.slane %v18852_v45, 5 }
 0x108   : > { %12712 = vmatprep.subr.bf16.mxu0 %v14717_v19  ;;  %v1544_v39 = vor.u32 %v1543_v6, %v1542_v23  ;;  %v1552_v13 = vor.u32 %v1551_v14, %v1550_v40  ;;  %v1467_v23 = vld [vmem:[#allocation2 + $0xc8] sm:$0x1f]  ;;  %v15656_v6 = vld [vmem:[#allocation2 + $0x18] sm:$0xff] }
 0x109   : > { %v1576_v62 = vor.u32 %v1575_v10, %v1574_v43  ;;  %v1590_v1 = vshll.u32 %v1467_v23, 16  ;;  %v18710_v52 = vshrl.u32 %v15656_v6, 16  ;;  %v2018_v43 = vsel %vm1982_vm3, %v2006_v35, %v2017_v11 }
 0x10a   : > { %v1545_v57 = vsel %vm1485_vm2, %v1540_v29, %v1544_v39  ;;  %v1549_v28 = vsel %vm1485_vm2, %v1544_v39, %v1548_v34  ;;  %v1553_v41 = vsel %vm1485_vm2, %v1548_v34, %v1552_v13  ;;  %v1557_v51 = vsel %vm1485_vm2, %v1552_v13, %v1556_v31 }
 0x10b   : > { %12713 = vmatpush3.bf16.msra.mxu0 %v14717_v19  ;;  %v1573_v19 = vsel %vm1485_vm2, %v1568_v3, %v1572_v47  ;;  %v1577_v53 = vsel %vm1485_vm2, %v1572_v47, %v1576_v62  ;;  %v1587_v39 = vshrl.u32 %v1467_v23, 16  ;;  %v1592_v14 = vrot.slane %v1590_v1, 5  ;;  %v15706_v3 = vld [vmem:[#allocation2 + $0x40] sm:$0xff] }
 0x10c   : > { %12762 = vmatprep.subr.bf16.mxu0 %v15598_v30  ;;  %v1990_v4 = vrot.slane %v18710_v52, 7  ;;  %v18711_v13 = vshll.u32 %v15656_v6, 16  ;;  %v15681_v31 = vshll.u32 %v15666_v12, 16  ;;  %v15715_v7 = vshrl.u32 %v15706_v3, 16 }
 0x10d   : > { %v1589_v40 = vrot.slane %v1587_v39, 4  ;;  %v15728_v10 = vshll.u32 %v15706_v3, 16 }
 0x10e   : > { %12667 = vmatmul.mubr.bf16.gmra.mrb[16].mxu0 %v1533_v48  ;;  %v1579_v48 = vrot.slane %v18854_v54, 5  ;;  %v1993_v15 = vor.u32 %v18711_v13, %v1990_v4  ;;  %v2009_v0 = vor.u32 %v15681_v31, %v2006_v35  ;;  %v2030_v45 = vrot.slane %v15715_v7, 7 }
 0x10f   : > { %12670 = vmatprep.mubr.bf16.mxu0 %v1537_v26  ;;  %v1582_v26 = vrot.slane %v18855_v17, 4  ;;  %v1593_v37 = vor.u32 %v1592_v14, %v1589_v40  ;;  %v15768_v40 = vld [vmem:[#allocation2 + $0x68] sm:$0xff] }
 0x110   : > { %v1580_v29 = vor.u32 %v1579_v48, %v1578_v58  ;;  %v15740_v58 = vld [vmem:[#allocation2 + $0x58] sm:$0xff]  ;;  %v2033_v54 = vor.u32 %v15728_v10, %v2030_v45  ;;  %v15789_v35 = vshll.u32 %v15768_v40, 16 }
 0x111   : > { %v1584_v8 = vor.u32 %v1583_v55, %v1582_v26  ;;  %v15748_v17 = vshrl.u32 %v15740_v58, 16  ;;  %v14722_v26 = vld [vmem:[%s18686_s1 + $0x120] sm:$0xff]  }
 0x113   : > { %v1585_v34 = vsel %vm1485_vm2, %v1580_v29, %v1584_v8  ;;  %v2054_v1 = vrot.slane %v15748_v17, 7 }
 0x116   : > { %12671 = vmatmul.mubr.bf16.gmra.mrb[20].mxu0 %v1541_v42  ;;  %v1940_v42 = vld [vmem:[#allocation2 + $0x10] sm:$0x80] }
 0x117   : > { %12674 = vmatprep.mubr.bf16.mxu0 %v1545_v57  ;;  %v1581_v57 = vsel %vm1485_vm2, %v1576_v62, %v1580_v29  ;;  %v1984_v50 = vshrl.u32 %v1940_v42, 16  ;;  %v15733_v62 = vshll.u32 %v15711_v56, 16  ;;  %v15763_v42 = vld [vmem:[#allocation2 + $0x60] sm:$0xff] }
 0x119   : > { %v1986_v27 = vrot.slane %v1984_v50, 7 }
 0x11b   : > { %v1994_v24 = vsel %vm1982_vm3, %v1986_v27, %v1993_v15 }
 0x11e   : > { %12675 = vmatmul.mubr.bf16.gmra.mrb[24].mxu0 %v1549_v28  ;;  %v15664_v28 = vld [vmem:[#allocation2 + $0x20] sm:$0xff] }
 0x11f   : > { %12678 = vmatprep.mubr.bf16.mxu0 %v1553_v41  ;;  %v18708_v33 = vshrl.u32 %v15664_v28, 16  ;;  %v1594_v41 = vsel %vm1485_vm2, %v1584_v8, %v1593_v37  ;;  %v18709_v60 = vshll.u32 %v15664_v28, 16  ;;  %v15761_v8 = vshll.u32 %v15740_v58, 16  ;;  %v14724_v37 = vld [vmem:[%s18686_s1 + $0x130] sm:$0xff]  }
 0x121   : > { %v1998_v49 = vrot.slane %v18708_v33, 7  ;;  %v2057_v50 = vor.u32 %v15761_v8, %v2054_v1 }
 0x123   : > { %v2001_v18 = vor.u32 %v18709_v60, %v1998_v49  ;;  %v2010_v16 = vsel %vm1982_vm3, %v1998_v49, %v2009_v0  ;;  %v14725_v0 = vld [vmem:[%s18686_s1 + $0x138] sm:$0xff]  }
 0x126   : > { %12679 = vmatmul.mubr.bf16.gmra.mrb[28].mxu0 %v1557_v51  ;;  %v15685_v51 = vld [vmem:[#allocation2 + $0x38] sm:$0xff] }
 0x127   : > { %12682 = vmatprep.mubr.bf16.mxu0 %v1561_v25  ;;  %v15694_v2 = vshrl.u32 %v15685_v51, 16  ;;  %v2002_v25 = vsel %vm1982_vm3, %v1990_v4, %v2001_v18  ;;  %v15704_v22 = vshll.u32 %v15685_v51, 16  ;;  %v15776_v4 = vshrl.u32 %v15768_v40, 16  ;;  %v15791_v18 = vld [vmem:[#allocation2 + $0x70] sm:$0xff] }
 0x129   : > { %v2022_v38 = vrot.slane %v15694_v2, 7 }
 0x12b   : > { %v2025_v21 = vor.u32 %v15704_v22, %v2022_v38  ;;  %v2034_v55 = vsel %vm1982_vm3, %v2022_v38, %v2033_v54  ;;  %v15823_v54 = vld [vmem:[#allocation2 + $0x88] sm:$0xff] }
 0x12e   : > { %12683 = vmatmul.mubr.bf16.gmra.mrb[32].mxu0 %v1565_v46  ;;  %v14719_v46 = vld [vmem:[%s18686_s1 + $0x108] sm:$0xff]  }
 0x12f   : > { %12686 = vmatprep.mubr.bf16.mxu0 %v1569_v63  ;;  %v15720_v63 = vshrl.u32 %v15711_v56, 16 }
 0x131   : > { %v2038_v47 = vrot.slane %v15720_v63, 7 }
 0x136   : > { %12687 = vmatmul.mubr.bf16.gmra.mrb[36].mxu0 %v1573_v19  ;;  %v15735_v19 = vld [vmem:[#allocation2 + $0x50] sm:$0xff] }
 0x137   : > { %12690 = vmatprep.mubr.bf16.mxu0 %v1577_v53  ;;  %v15744_v48 = vshrl.u32 %v15735_v19, 16  ;;  %v2041_v53 = vor.u32 %v15733_v62, %v2038_v47  ;;  %v15756_v29 = vshll.u32 %v15735_v19, 16 }
 0x139   : > { %v2046_v23 = vrot.slane %v15744_v48, 7  ;;  %v2042_v39 = vsel %vm1982_vm3, %v2030_v45, %v2041_v53 }
 0x13b   : > { %v2049_v14 = vor.u32 %v15756_v29, %v2046_v23  ;;  %v2058_v49 = vsel %vm1982_vm3, %v2046_v23, %v2057_v50  ;;  %v15832_v23 = vshrl.u32 %v15823_v54, 16 }
 0x13d   : > { %v2050_v27 = vsel %vm1982_vm3, %v2038_v47, %v2049_v14  ;;  %v15816_v47 = vld [vmem:[#allocation2 + $0x80] sm:$0xff]  ;;  %18857 = vst [vmem:[#allocation5_spill] sm:$0xff] %v15832_v23  ;;  %v2102_v50 = vrot.slane %v15832_v23, 7 }
 0x13e   : > { %12691 = vmatmul.mubr.bf16.gmra.mrb[40].mxu0 %v1581_v57  ;;  %v14723_v57 = vld [vmem:[%s18686_s1 + $0x128] sm:$0xff]  }
 0x13f   : > { %12694 = vmatprep.mubr.bf16.mxu0 %v1585_v34  ;;  %v15772_v34 = vshrl.u32 %v15763_v42, 16 }
 0x141   : > { %v2062_v15 = vrot.slane %v15772_v34, 7 }
 0x146   : > { %12695 = vmatmul.mubr.bf16.gmra.mrb[44].mxu0 %v1594_v41  ;;  %v15784_v41 = vshll.u32 %v15763_v42, 16 }
 0x147   : > { %12714 = vmatprep.mubr.bf16.mxu0 %v1994_v24  ;;  %v2070_v24 = vrot.slane %v15776_v4, 7 }
 0x149   : > { %v2073_v38 = vor.u32 %v15789_v35, %v2070_v24 }
 0x14e   : > { %12715 = vmatmul.mubr.bf16.vlgmr.msra.gmra.mrb[0].mxu0 %v2002_v25  ;;  %v15796_v25 = vld [vmem:[#allocation2 + $0x78] sm:$0xff] }
 0x14f   : > { %12718 = vmatprep.mubr.bf16.mxu0 %v2010_v16  ;;  %12763 = vmatpush3.bf16.msra.mxu0 %v15598_v30  ;;  %v2026_v30 = vsel %vm1982_vm3, %v2014_v59, %v2025_v21  ;;  %v2065_v59 = vor.u32 %v15784_v41, %v2062_v15  ;;  %v15800_v16 = vshrl.u32 %v15791_v18, 16 }
 0x150   : > { %12764 = vmatprep.subr.bf16.mxu0 %v14719_v46 }
 0x151   : > { %v2066_v11 = vsel %vm1982_vm3, %v2054_v1, %v2065_v59  ;;  %v2078_v21 = vrot.slane %v15800_v16, 7 }
 0x153   : > { %12765 = vmatpush3.bf16.msra.mxu0 %v14719_v46  ;;  %v15804_v46 = vshrl.u32 %v15796_v25, 16 }
 0x154   : > { %12766 = vmatprep.subr.bf16.mxu0 %v14720_v5 }
 0x155   : > { %v2086_v45 = vrot.slane %v15804_v46, 7 }
 0x156   : > { %12719 = vmatmul.mubr.bf16.gmra.mrb[4].mxu0 %v2018_v43  ;;  %v2074_v43 = vsel %vm1982_vm3, %v2062_v15, %v2073_v38  ;;  %v15846_v15 = vld [vmem:[#allocation2 + $0x98] sm:$0xff] }
 0x157   : > { %12722 = vmatprep.mubr.bf16.mxu0 %v2026_v30  ;;  %12767 = vmatpush3.bf16.msra.mxu0 %v14720_v5  ;;  %v15809_v5 = vshll.u32 %v15791_v18, 16  ;;  %v15814_v30 = vshll.u32 %v15796_v25, 16  ;;  %v15854_v59 = vshrl.u32 %v15846_v15, 16 }
 0x158   : > { %12768 = vmatprep.subr.bf16.mxu0 %v14721_v9 }
 0x159   : > { %v2081_v53 = vor.u32 %v15809_v5, %v2078_v21  ;;  %18859 = vst [vmem:[#allocation7_spill] sm:$0xff] %v15854_v59 }
 0x15b   : > { %12769 = vmatpush3.bf16.msra.mxu0 %v14721_v9  ;;  %v15821_v9 = vld [vmem:[%s18686_s1 + $0x140] sm:$0xff]  }
 0x15c   : > { %12770 = vmatprep.subr.bf16.mxu0 %v14722_v26 }
 0x15e   : > { %12723 = vmatmul.mubr.bf16.gmra.mrb[8].mxu0 %v2034_v55  ;;  %v2089_v55 = vor.u32 %v15814_v30, %v2086_v45 }
 0x15f   : > { %12726 = vmatprep.mubr.bf16.mxu0 %v2042_v39  ;;  %12771 = vmatpush3.bf16.msra.mxu0 %v14722_v26  ;;  %v15828_v26 = vshrl.u32 %v15816_v47, 16  ;;  %v2082_v39 = vsel %vm1982_vm3, %v2070_v24, %v2081_v53  ;;  %v2118_v53 = vrot.slane %v15854_v59, 7  ;;  %v15888_v59 = vld [vmem:[#allocation2 + $0xb0] sm:$0xff] }
 0x160   : > { %12772 = vmatprep.subr.bf16.mxu0 %v14723_v57  ;;  %v2090_v14 = vsel %vm1982_vm3, %v2078_v21, %v2089_v55  ;;  %v15864_v55 = vshll.u32 %v15846_v15, 16 }
 0x161   : > { %18856 = vst [vmem:[#allocation4_spill] sm:$0xff] %v15828_v26  ;;  %v2094_v1 = vrot.slane %v15828_v26, 7  ;;  %v15934_v26 = vshrl.u32 %v15623_v32, 16 }
 0x162   : > { %18861 = vst [vmem:[#allocation9_spill] sm:$0xff] %v15864_v55  ;;  %v2121_v33 = vor.u32 %v15864_v55, %v2118_v53  ;;  %v15903_v55 = vshll.u32 %v15888_v59, 16 }
 0x163   : > { %12773 = vmatpush3.bf16.msra.mxu0 %v14723_v57  ;;  %v15837_v57 = vshll.u32 %v15816_v47, 16 }
 0x164   : > { %12774 = vmatprep.subr.bf16.mxu0 %v14724_v37  ;;  %18868 = vst [vmem:[#allocation16_spill] sm:$0xff] %v15903_v55 }
 0x166   : > { %12727 = vmatmul.mubr.bf16.gmra.mrb[12].mxu0 %v2050_v27  ;;  %v15844_v27 = vld [vmem:[#allocation2 + $0x90] sm:$0xff] }
 0x167   : > { %12730 = vmatprep.mubr.bf16.mxu0 %v2058_v49  ;;  %12775 = vmatpush3.bf16.msra.mxu0 %v14724_v37  ;;  %v15842_v37 = vshll.u32 %v15823_v54, 16  ;;  %v2097_v49 = vor.u32 %v15837_v57, %v2094_v1  ;;  %v15850_v24 = vshrl.u32 %v15844_v27, 16  ;;  %v15859_v21 = vshll.u32 %v15844_v27, 16 }
 0x168   : > { %12776 = vmatprep.subr.bf16.mxu0 %v14725_v0 }
 0x169   : > { %18858 = vst [vmem:[#allocation6_spill] sm:$0xff] %v15850_v24  ;;  %v2098_v38 = vsel %vm1982_vm3, %v2086_v45, %v2097_v49  ;;  %18860 = vst [vmem:[#allocation8_spill] sm:$0xff] %v15859_v21 }
 0x16b   : > { %12777 = vmatpush3.bf16.msra.mxu0 %v14725_v0  ;;  %v2105_v0 = vor.u32 %v15842_v37, %v2102_v50 }
 0x16c   : > { %12826 = vmatprep.subr.bf16.mxu0 %v15821_v9 }
 0x16e   : > { %12731 = vmatmul.mubr.bf16.gmra.mrb[16].mxu0 %v2066_v11  ;;  %v2110_v11 = vrot.slane %v15850_v24, 7  ;;  %v15890_v24 = vld [vmem:[#allocation2 + $0xb8] sm:$0xff] }
 0x16f   : > { %12734 = vmatprep.mubr.bf16.mxu0 %v2074_v43  ;;  %v2106_v43 = vsel %vm1982_vm3, %v2094_v1, %v2105_v0 }
 0x170   : > { %v2113_v45 = vor.u32 %v15859_v21, %v2110_v11  ;;  %v15910_v21 = vld [vmem:[#allocation2 + $0xc0] sm:$0xff] }
 0x171   : > { %v15925_v23 = vshll.u32 %v15910_v21, 16 }
 0x172   : > { %v2114_v0 = vsel %vm1982_vm3, %v2102_v50, %v2113_v45  ;;  %v15894_v45 = vshrl.u32 %v15888_v59, 16 }
 0x174   : > { %18866 = vst [vmem:[#allocation14_spill] sm:$0xff] %v15894_v45 }
 0x176   : > { %12735 = vmatmul.mubr.bf16.gmra.mrb[20].mxu0 %v2082_v39  ;;  %v15866_v39 = vld [vmem:[#allocation2 + $0xa0] sm:$0xff] }
 0x177   : > { %12738 = vmatprep.mubr.bf16.mxu0 %v2090_v14  ;;  %v15868_v14 = vld [vmem:[#allocation2 + $0xa8] sm:$0xff]  ;;  %v15872_v49 = vshrl.u32 %v15866_v39, 16  ;;  %v15881_v52 = vshll.u32 %v15866_v39, 16 }
 0x178   : > { %v15876_v1 = vshrl.u32 %v15868_v14, 16  ;;  %v15886_v13 = vshll.u32 %v15868_v14, 16 }
 0x179   : > { %18862 = vst [vmem:[#allocation10_spill] sm:$0xff] %v15872_v49  ;;  %v2126_v60 = vrot.slane %v15872_v49, 7  ;;  %18864 = vst [vmem:[#allocation12_spill] sm:$0xff] %v15881_v52 }
 0x17a   : > { %18863 = vst [vmem:[#allocation11_spill] sm:$0xff] %v15876_v1  ;;  %18865 = vst [vmem:[#allocation13_spill] sm:$0xff] %v15886_v13 }
 0x17b   : > { %v2129_v50 = vor.u32 %v15881_v52, %v2126_v60  ;;  %v15908_v52 = vshll.u32 %v15890_v24, 16 }
 0x17d   : > { %18869 = vst [vmem:[#allocation17_spill] sm:$0xff] %v15908_v52 }
 0x17e   : > { %12739 = vmatmul.mubr.bf16.gmra.mrb[24].mxu0 %v2098_v38  ;;  %v2122_v38 = vsel %vm1982_vm3, %v2110_v11, %v2121_v33  ;;  %v15898_v33 = vshrl.u32 %v15890_v24, 16  ;;  %v2130_v11 = vsel %vm1982_vm3, %v2118_v53, %v2129_v50  ;;  %v15916_v50 = vshrl.u32 %v15910_v21, 16 }
 0x17f   : > { %12742 = vmatprep.mubr.bf16.mxu0 %v2106_v43  ;;  %v2134_v43 = vrot.slane %v15876_v1, 7  ;;  %v2142_v1 = vrot.slane %v15894_v45, 7 }
 0x180   : > { %18867 = vst [vmem:[#allocation15_spill] sm:$0xff] %v15898_v33  ;;  %18870 = vst [vmem:[#allocation18_spill] sm:$0xff] %v15916_v50 }
 0x181   : > { %v2137_v49 = vor.u32 %v15886_v13, %v2134_v43  ;;  %v15912_v13 = vld [vmem:[#allocation2 + $0xc8] sm:$0xff]  ;;  %v2145_v53 = vor.u32 %v15903_v55, %v2142_v1 }
 0x182   : > { %v15930_v55 = vshll.u32 %v15912_v13, 16 }
 0x186   : > { %12743 = vmatmul.mubr.bf16.gmra.mrb[28].mxu0 %v2114_v0  ;;  %v2138_v0 = vsel %vm1982_vm3, %v2126_v60, %v2137_v49  ;;  %v15920_v60 = vshrl.u32 %v15912_v13, 16  ;;  %v2146_v49 = vsel %vm1982_vm3, %v2134_v43, %v2145_v53 }
 0x187   : > { %12746 = vmatprep.mubr.bf16.mxu0 %v2122_v38  ;;  %v2150_v38 = vrot.slane %v15898_v33, 7  ;;  %v2158_v33 = vrot.slane %v15916_v50, 7  ;;  %v2174_v50 = vrot.slane %v15934_v26, 7 }
 0x189   : > { %v2153_v45 = vor.u32 %v15908_v52, %v2150_v38  ;;  %v2161_v52 = vor.u32 %v15925_v23, %v2158_v33 }
 0x18b   : > { %v2162_v53 = vsel %vm1982_vm3, %v2150_v38, %v2161_v52  ;;  %v14727_v52 = vld [vmem:[%s18686_s1 + $0x148] sm:$0xff]   ;;  %v14729_v38 = vld [vmem:[%s18686_s1 + $0x158] sm:$0xff]  }
 0x18e   : > { %12747 = vmatmul.mubr.bf16.gmra.mrb[32].mxu0 %v2130_v11  ;;  %v2154_v11 = vsel %vm1982_vm3, %v2142_v1, %v2153_v45  ;;  %v15940_v1 = vshll.u32 %v15623_v32, 16 }
 0x18f   : > { %12750 = vmatprep.mubr.bf16.mxu0 %v2138_v0  ;;  %v2166_v0 = vrot.slane %v15920_v60, 7 }
 0x190   : > { %18871 = vst [vmem:[#allocation19_spill] sm:$0xff] %v15940_v1 }
 0x191   : > { %v2169_v43 = vor.u32 %v15930_v55, %v2166_v0 }
 0x193   : > { %v2170_v45 = vsel %vm1982_vm3, %v2158_v33, %v2169_v43  ;;  %v14728_v33 = vld [vmem:[%s18686_s1 + $0x150] sm:$0xff]  }
 0x196   : > { %12751 = vmatmul.mubr.bf16.gmra.mrb[36].mxu0 %v2146_v49  ;;  %v2177_v49 = vor.u32 %v15940_v1, %v2174_v50  ;;  %v389_v50 = vld [vmem:[%s14983_s20 + $0x1b8] sm:$0xff] }
 0x197   : > { %12754 = vmatprep.mubr.bf16.mxu0 %v2154_v11  ;;  %v449_v43 = vmax.f32 %v389_v50, 0.0  ;;  %v2971_v50 = vrot.slane %v15761_v8, 1 }
 0x198   : > { %v2178_v11 = vsel %vm1982_vm3, %v2166_v0, %v2177_v49 }
 0x19e   : > { %12755 = vmatmul.mubr.bf16.gmra.mrb[40].mxu0 %v2162_v53  ;;  %v2947_v53 = vrot.slane %v15728_v10, 1 }
 0x19f   : > { %12758 = vmatprep.mubr.bf16.mxu0 %v2170_v45  ;;  %v14736_v45 = vld [vmem:[%s18686_s1 + $0x190] sm:$0xff]  }
 0x1a6   : > { %12759 = vmatmul.mubr.bf16.gmra.mrb[44].mxu0 %v2178_v11 }
 0x1a7   : > { %12778 = vmatprep.mubr.bf16.mxu0 %v15656_v6 }
 0x1ae   : > { %12779 = vmatmul.mubr.bf16.vlgmr.msra.gmra.mrb[0].mxu0 %v15664_v28 }
 0x1af   : > { %12782 = vmatprep.mubr.bf16.mxu0 %v15666_v12  ;;  %12827 = vmatpush3.bf16.msra.mxu0 %v15821_v9  ;;  %v14730_v12 = vld [vmem:[%s18686_s1 + $0x160] sm:$0xff]   ;;  %v14731_v9 = vld [vmem:[%s18686_s1 + $0x168] sm:$0xff]  }
 0x1b0   : > { %12828 = vmatprep.subr.bf16.mxu0 %v14727_v52 }
 0x1b3   : > { %12829 = vmatpush3.bf16.msra.mxu0 %v14727_v52  ;;  %v14737_v52 = vld [vmem:[%s18686_s1 + $0x198] sm:$0xff]  }
 0x1b4   : > { %12830 = vmatprep.subr.bf16.mxu0 %v14728_v33 }
 0x1b6   : > { %12783 = vmatmul.mubr.bf16.gmra.mrb[4].mxu0 %v15683_v61  ;;  %v14732_v61 = vld [vmem:[%s18686_s1 + $0x170] sm:$0xff]  }
 0x1b7   : > { %12786 = vmatprep.mubr.bf16.mxu0 %v15685_v51  ;;  %12831 = vmatpush3.bf16.msra.mxu0 %v14728_v33  ;;  %v14733_v51 = vld [vmem:[%s18686_s1 + $0x178] sm:$0xff]   ;;  %v2955_v33 = vrot.slane %v15733_v62, 1 }
 0x1b8   : > { %12832 = vmatprep.subr.bf16.mxu0 %v14729_v38 }
 0x1bb   : > { %12833 = vmatpush3.bf16.msra.mxu0 %v14729_v38  ;;  %v2951_v38 = vor.u32 %v2947_v53, %v15715_v7 }
 0x1bc   : > { %12834 = vmatprep.subr.bf16.mxu0 %v14730_v12 }
 0x1be   : > { %12787 = vmatmul.mubr.bf16.gmra.mrb[8].mxu0 %v15706_v3  ;;  %v14734_v3 = vld [vmem:[%s18686_s1 + $0x180] sm:$0xff]  }
 0x1bf   : > { %12790 = vmatprep.mubr.bf16.mxu0 %v15711_v56  ;;  %12835 = vmatpush3.bf16.msra.mxu0 %v14730_v12  ;;  %v388_v56 = vld [vmem:[%s14983_s20 + $0x1b0] sm:$0xff]  ;;  %v2959_v12 = vor.u32 %v2955_v33, %v15720_v63 }
 0x1c0   : > { %12836 = vmatprep.subr.bf16.mxu0 %v14731_v9  ;;  %v448_v0 = vmax.f32 %v388_v56, 0.0  ;;  %v14739_v56 = vld [vmem:[%s18686_s1 + $0x1a8] sm:$0xff]  }
 0x1c3   : > { %12837 = vmatpush3.bf16.msra.mxu0 %v14731_v9  ;;  %v2963_v9 = vrot.slane %v15756_v29, 1 }
 0x1c4   : > { %12838 = vmatprep.subr.bf16.mxu0 %v14732_v61 }
 0x1c6   : > { %12791 = vmatmul.mubr.bf16.gmra.mrb[12].mxu0 %v15735_v19  ;;  %v15985_v19 = vpack.c.bf16 %v449_v43, %v448_v0  ;;  %v2967_v0 = vor.u32 %v2963_v9, %v15744_v48  ;;  %v2975_v43 = vor.u32 %v2971_v50, %v15748_v17 }
 0x1c7   : > { %12794 = vmatprep.mubr.bf16.mxu0 %v15740_v58  ;;  %12839 = vmatpush3.bf16.msra.mxu0 %v14732_v61  ;;  %v18872_v58 = vshll.u32 %v15656_v6, 16  ;;  %v14738_v61 = vld [vmem:[%s18686_s1 + $0x1a0] sm:$0xff]  }
 0x1c8   : > { %12840 = vmatprep.subr.bf16.mxu0 %v14733_v51  ;;  %511 = vst [vmem:[#allocation2 + $0xd8] sm:$0xff] %v15985_v19 }
 0x1cb   : > { %12841 = vmatpush3.bf16.msra.mxu0 %v14733_v51  ;;  %v2956_v51 = vsel %vm2904_vm4, %v2951_v38, %v2955_v33  ;;  %v3019_v33 = vrot.slane %v15842_v37, 1  ;;  %v18876_v38 = vld [vmem:[#allocation4_spill] sm:$0xff] }
 0x1cc   : > { %12890 = vmatprep.subr.bf16.mxu0 %v14734_v3 }
 0x1ce   : > { %12795 = vmatmul.mubr.bf16.gmra.mrb[16].mxu0 %v15763_v42  ;;  %v2910_v42 = vrot.slane %v18872_v58, 1  ;;  %v2979_v58 = vrot.slane %v15784_v41, 1 }
 0x1cf   : > { %12798 = vmatprep.mubr.bf16.mxu0 %v15768_v40  ;;  %v18873_v40 = vshrl.u32 %v15656_v6, 16 }
 0x1d6   : > { %12799 = vmatmul.mubr.bf16.gmra.mrb[20].mxu0 %v15791_v18  ;;  %v2911_v18 = vor.u32 %v2910_v42, %v18873_v40  ;;  %v14740_v42 = vld [vmem:[%s18686_s1 + $0x1b0] sm:$0xff]   ;;  %v2972_v40 = vsel %vm2904_vm4, %v2967_v0, %v2971_v50  ;;  %v18879_v0 = vld [vmem:[#allocation9_spill] sm:$0xff] }
 0x1d7   : > { %12802 = vmatprep.mubr.bf16.mxu0 %v15796_v25  ;;  %v18874_v25 = vshll.u32 %v15664_v28, 16 }
 0x1de   : > { %12803 = vmatmul.mubr.bf16.gmra.mrb[24].mxu0 %v15816_v47  ;;  %v2915_v47 = vrot.slane %v18874_v25, 1  ;;  %v14741_v25 = vld [vmem:[%s18686_s1 + $0x1b8] sm:$0xff]  }
 0x1df   : > { %12806 = vmatprep.mubr.bf16.mxu0 %v15823_v54 }
 0x1e0   : > { %v2916_v54 = vsel %vm2904_vm4, %v2911_v18, %v2915_v47  ;;  %v2980_v18 = vsel %vm2904_vm4, %v2975_v43, %v2979_v58  ;;  %v3035_v43 = vrot.slane %v18879_v0, 1 }
 0x1e6   : > { %12807 = vmatmul.mubr.bf16.gmra.mrb[28].mxu0 %v15844_v27  ;;  %v2923_v27 = vrot.slane %v15681_v31, 1 }
 0x1e7   : > { %12810 = vmatprep.mubr.bf16.mxu0 %v15846_v15  ;;  %v18875_v15 = vshrl.u32 %v15664_v28, 16 }
 0x1ee   : > { %12811 = vmatmul.mubr.bf16.gmra.mrb[32].mxu0 %v15866_v39  ;;  %v14735_v39 = vld [vmem:[%s18686_s1 + $0x188] sm:$0xff]  }
 0x1ef   : > { %12814 = vmatprep.mubr.bf16.mxu0 %v15868_v14 }
 0x1f6   : > { %12815 = vmatmul.mubr.bf16.gmra.mrb[36].mxu0 %v15888_v59  ;;  %v2927_v59 = vor.u32 %v2923_v27, %v15672_v44 }
 0x1f7   : > { %12818 = vmatprep.mubr.bf16.mxu0 %v15890_v24  ;;  %v2919_v24 = vor.u32 %v2915_v47, %v18875_v15  ;;  %v2987_v47 = vrot.slane %v15789_v35, 1  ;;  %v2995_v15 = vrot.slane %v15809_v5, 1 }
 0x1f9   : > { %v2924_v6 = vsel %vm2904_vm4, %v2919_v24, %v2923_v27  ;;  %v2991_v27 = vor.u32 %v2987_v47, %v15776_v4 }
 0x1fe   : > { %12819 = vmatmul.mubr.bf16.gmra.mrb[40].mxu0 %v15910_v21 }
 0x1ff   : > { %12822 = vmatprep.mubr.bf16.mxu0 %v15912_v13  ;;  %v2931_v13 = vrot.slane %v15699_v36, 1 }
 0x201   : > { %v2932_v21 = vsel %vm2904_vm4, %v2927_v59, %v2931_v13  ;;  %v2935_v28 = vor.u32 %v2931_v13, %v15690_v20  ;;  %v2996_v59 = vsel %vm2904_vm4, %v2991_v27, %v2995_v15  ;;  %v16061_v13 = vld [vmem:[%s18686_s1 + $0x1c0] sm:$0xff]  }
 0x206   : > { %12823 = vmatmul.mubr.bf16.gmra.mrb[44].mxu0 %v15623_v32  ;;  %v2939_v32 = vrot.slane %v15704_v22, 1 }
 0x207   : > { %12842 = vmatprep.mubr.bf16.mxu0 %v2916_v54  ;;  %v2983_v54 = vor.u32 %v2979_v58, %v15772_v34  ;;  %v18880_v58 = vld [vmem:[#allocation6_spill] sm:$0xff] }
 0x208   : > { %v2943_v14 = vor.u32 %v2939_v32, %v15694_v2  ;;  %v2940_v49 = vsel %vm2904_vm4, %v2935_v28, %v2939_v32  ;;  %v3011_v32 = vrot.slane %v15837_v57, 1  ;;  %v390_v28 = vld [vmem:[%s14983_s20 + $0x1c0] sm:$0xff] }
 0x209   : > { %v2988_v24 = vsel %vm2904_vm4, %v2983_v54, %v2987_v47 }
 0x20a   : > { %v2948_v11 = vsel %vm2904_vm4, %v2943_v14, %v2947_v53  ;;  %v391_v14 = vld [vmem:[%s14983_s20 + $0x1c8] sm:$0xff] }
 0x20e   : > { %12843 = vmatmul.mubr.bf16.vlgmr.msra.gmra.mrb[0].mxu0 %v2924_v6  ;;  %v3003_v6 = vrot.slane %v15814_v30, 1 }
 0x20f   : > { %12846 = vmatprep.mubr.bf16.mxu0 %v2932_v21  ;;  %12891 = vmatpush3.bf16.msra.mxu0 %v14734_v3  ;;  %v2964_v3 = vsel %vm2904_vm4, %v2959_v12, %v2963_v9  ;;  %v2999_v21 = vor.u32 %v2995_v15, %v15800_v16  ;;  %v3015_v12 = vor.u32 %v3011_v32, %v18876_v38  ;;  %v18877_v9 = vld [vmem:[#allocation5_spill] sm:$0xff] }
 0x210   : > { %12892 = vmatprep.subr.bf16.mxu0 %v14735_v39  ;;  %v18883_v15 = vld [vmem:[#allocation13_spill] sm:$0xff] }
 0x211   : > { %v3004_v53 = vsel %vm2904_vm4, %v2999_v21, %v3003_v6  ;;  %v18885_v21 = vld [vmem:[#allocation11_spill] sm:$0xff] }
 0x213   : > { %12893 = vmatpush3.bf16.msra.mxu0 %v14735_v39  ;;  %v3007_v39 = vor.u32 %v3003_v6, %v15804_v46 }
 0x214   : > { %12894 = vmatprep.subr.bf16.mxu0 %v14736_v45 }
 0x216   : > { %12847 = vmatmul.mubr.bf16.gmra.mrb[4].mxu0 %v2940_v49  ;;  %v451_v49 = vmax.f32 %v391_v14, 0.0 }
 0x217   : > { %12850 = vmatprep.mubr.bf16.mxu0 %v2948_v11  ;;  %12895 = vmatpush3.bf16.msra.mxu0 %v14736_v45  ;;  %v450_v45 = vmax.f32 %v390_v28, 0.0  ;;  %v3012_v11 = vsel %vm2904_vm4, %v3007_v39, %v3011_v32  ;;  %v18886_v32 = vld [vmem:[#allocation16_spill] sm:$0xff] }
 0x218   : > { %12896 = vmatprep.subr.bf16.mxu0 %v14737_v52  ;;  %v3059_v28 = vrot.slane %v18886_v32, 1 }
 0x21b   : > { %12897 = vmatpush3.bf16.msra.mxu0 %v14737_v52  ;;  %v482_v52 = vpack.c.bf16 %v451_v49, %v450_v45  ;;  %v18887_v45 = vld [vmem:[#allocation17_spill] sm:$0xff] }
 0x21c   : > { %12898 = vmatprep.subr.bf16.mxu0 %v14738_v61  ;;  %v3067_v49 = vrot.slane %v18887_v45, 1 }
 0x21d   : > { %512 = vst [vmem:[#allocation2 + $0xe0] sm:$0xff] %v482_v52 }
 0x21e   : > { %12851 = vmatmul.mubr.bf16.gmra.mrb[8].mxu0 %v2956_v51  ;;  %v18878_v51 = vld [vmem:[#allocation8_spill] sm:$0xff] }
 0x21f   : > { %12854 = vmatprep.mubr.bf16.mxu0 %v2964_v3  ;;  %12899 = vmatpush3.bf16.msra.mxu0 %v14738_v61  ;;  %v3023_v61 = vor.u32 %v3019_v33, %v18877_v9  ;;  %v3027_v3 = vrot.slane %v18878_v51, 1 }
 0x220   : > { %12900 = vmatprep.subr.bf16.mxu0 %v14739_v56 }
 0x221   : > { %v3028_v50 = vsel %vm2904_vm4, %v3023_v61, %v3027_v3  ;;  %v3075_v61 = vrot.slane %v15925_v23, 1 }
 0x223   : > { %12901 = vmatpush3.bf16.msra.mxu0 %v14739_v56  ;;  %v3020_v56 = vsel %vm2904_vm4, %v3015_v12, %v3019_v33  ;;  %v18889_v33 = vld [vmem:[#allocation15_spill] sm:$0xff] }
 0x224   : > { %12902 = vmatprep.subr.bf16.mxu0 %v14740_v42  ;;  %v3071_v12 = vor.u32 %v3067_v49, %v18889_v33 }
 0x226   : > { %12855 = vmatmul.mubr.bf16.gmra.mrb[12].mxu0 %v2972_v40  ;;  %v18881_v40 = vld [vmem:[#allocation7_spill] sm:$0xff] }
 0x227   : > { %12858 = vmatprep.mubr.bf16.mxu0 %v2980_v18  ;;  %12903 = vmatpush3.bf16.msra.mxu0 %v14740_v42  ;;  %v3031_v42 = vor.u32 %v3027_v3, %v18880_v58  ;;  %v3039_v18 = vor.u32 %v3035_v43, %v18881_v40 }
 0x228   : > { %12904 = vmatprep.subr.bf16.mxu0 %v14741_v25 }
 0x229   : > { %v3036_v54 = vsel %vm2904_vm4, %v3031_v42, %v3035_v43  ;;  %v3446_v43 = vld [vmem:[#allocation2 + $0x20] sm:$0xf8]  ;;  %v18890_v42 = vld [vmem:[#allocation18_spill] sm:$0xff] }
 0x22b   : > { %12905 = vmatpush3.bf16.msra.mxu0 %v14741_v25  ;;  %v18882_v25 = vld [vmem:[#allocation12_spill] sm:$0xff] }
 0x22c   : > { %12954 = vmatprep.subr.bf16.mxu0 %v16061_v13  ;;  %v3043_v47 = vrot.slane %v18882_v25, 1 }
 0x22e   : > { %12859 = vmatmul.mubr.bf16.gmra.mrb[16].mxu0 %v2988_v24  ;;  %v3044_v27 = vsel %vm2904_vm4, %v3039_v18, %v3043_v47  ;;  %v3051_v24 = vrot.slane %v18883_v15, 1  ;;  %v3079_v18 = vor.u32 %v3075_v61, %v18890_v42 }
 0x22f   : > { %12862 = vmatprep.mubr.bf16.mxu0 %v2996_v59  ;;  %v18884_v59 = vld [vmem:[#allocation10_spill] sm:$0xff] }
 0x230   : > { %v3047_v6 = vor.u32 %v3043_v47, %v18884_v59  ;;  %v3055_v39 = vor.u32 %v3051_v24, %v18885_v21 }
 0x232   : > { %v3052_v14 = vsel %vm2904_vm4, %v3047_v6, %v3051_v24  ;;  %v3489_v24 = vshrl.u32 %v3446_v43, 16  ;;  %v3492_v6 = vshll.u32 %v3446_v43, 16 }
 0x236   : > { %12863 = vmatmul.mubr.bf16.gmra.mrb[20].mxu0 %v3004_v53  ;;  %v3060_v53 = vsel %vm2904_vm4, %v3055_v39, %v3059_v28 }
 0x237   : > { %12866 = vmatprep.mubr.bf16.mxu0 %v3012_v11  ;;  %v18888_v11 = vld [vmem:[#allocation14_spill] sm:$0xff] }
 0x238   : > { %v3063_v52 = vor.u32 %v3059_v28, %v18888_v11 }
 0x23a   : > { %v3068_v3 = vsel %vm2904_vm4, %v3063_v52, %v3067_v49  ;;  %v3494_v49 = vrot.slane %v3492_v6, 4  ;;  %v3499_v52 = vrot.slane %v15672_v44, 3 }
 0x23e   : > { %12867 = vmatmul.mubr.bf16.gmra.mrb[24].mxu0 %v3020_v56  ;;  %v3076_v56 = vsel %vm2904_vm4, %v3071_v12, %v3075_v61  ;;  %v3502_v12 = vrot.slane %v15681_v31, 4 }
 0x23f   : > { %12870 = vmatprep.mubr.bf16.mxu0 %v3028_v50  ;;  %v3083_v50 = vrot.slane %v15930_v55, 1 }
 0x241   : > { %v3087_v47 = vor.u32 %v3083_v50, %v15920_v60  ;;  %v3084_v39 = vsel %vm2904_vm4, %v3079_v18, %v3083_v50  ;;  %v3508_v50 = vrot.slane %v15690_v20, 3  ;;  %v3511_v18 = vrot.slane %v15699_v36, 4 }
 0x243   : > { %v3512_v6 = vor.u32 %v3511_v18, %v3508_v50  ;;  %v3547_v50 = vrot.slane %v15756_v29, 4 }
 0x246   : > { %12871 = vmatmul.mubr.bf16.gmra.mrb[28].mxu0 %v3036_v54  ;;  %v3091_v54 = vrot.slane %v15940_v1, 1  ;;  %v3503_v1 = vor.u32 %v3502_v12, %v3499_v52  ;;  %v3538_v52 = vrot.slane %v15733_v62, 4  ;;  %v14743_v12 = vld [vmem:[%s18686_s1 + $0x1c8] sm:$0xff]  }
 0x247   : > { %12874 = vmatprep.mubr.bf16.mxu0 %v3044_v27  ;;  %v2886_v27 = vld [vmem:[#allocation2 + $0xd8] sm:$0x1] }
 0x248   : > { %v3092_v28 = vsel %vm2904_vm4, %v3087_v47, %v3091_v54  ;;  %v3095_v61 = vor.u32 %v3091_v54, %v15934_v26  ;;  %v3513_v54 = vsel %vm945_vm1, %v3503_v1, %v3512_v6 }
 0x24e   : > { %12875 = vmatmul.mubr.bf16.gmra.mrb[32].mxu0 %v3052_v14  ;;  %v3097_v14 = vshll.u32 %v2886_v27, 16  ;;  %v3517_v27 = vrot.slane %v15694_v2, 3 }
 0x24f   : > { %12878 = vmatprep.mubr.bf16.mxu0 %v3060_v53  ;;  %v3491_v53 = vrot.slane %v3489_v24, 3  ;;  %v3520_v24 = vrot.slane %v15704_v22, 4 }
 0x256   : > { %12879 = vmatmul.mubr.bf16.gmra.mrb[36].mxu0 %v3068_v3  ;;  %v3099_v3 = vrot.slane %v3097_v14, 1  ;;  %v3529_v14 = vrot.slane %v15728_v10, 4 }
 0x257   : > { %12882 = vmatprep.mubr.bf16.mxu0 %v3076_v56  ;;  %v3495_v56 = vor.u32 %v3494_v49, %v3491_v53  ;;  %v3535_v49 = vrot.slane %v15720_v63, 3 }
 0x258   : > { %v3100_v43 = vsel %vm2904_vm4, %v3095_v61, %v3099_v3  ;;  %v14744_v3 = vld [vmem:[%s18686_s1 + $0x1d0] sm:$0xff]  }
 0x259   : > { %v3504_v47 = vsel %vm945_vm1, %v3495_v56, %v3503_v1  ;;  %v3539_v1 = vor.u32 %v3538_v52, %v3535_v49  ;;  %v3571_v49 = vrot.slane %v15776_v4, 3  ;;  %v3574_v52 = vrot.slane %v15789_v35, 4 }
 0x25e   : > { %12883 = vmatmul.mubr.bf16.gmra.mrb[40].mxu0 %v3084_v39  ;;  %v3521_v39 = vor.u32 %v3520_v24, %v3517_v27  ;;  %v3556_v27 = vrot.slane %v15761_v8, 4 }
 0x25f   : > { %12886 = vmatprep.mubr.bf16.mxu0 %v3092_v28  ;;  %v3526_v28 = vrot.slane %v15715_v7, 3 }
 0x260   : > { %v3522_v53 = vsel %vm945_vm1, %v3512_v6, %v3521_v39 }
 0x261   : > { %v3530_v61 = vor.u32 %v3529_v14, %v3526_v28  ;;  %v3562_v28 = vrot.slane %v15772_v34, 3  ;;  %v3565_v14 = vrot.slane %v15784_v41, 4 }
 0x263   : > { %v3531_v56 = vsel %vm945_vm1, %v3521_v39, %v3530_v61  ;;  %v3540_v18 = vsel %vm945_vm1, %v3530_v61, %v3539_v1  ;;  %v14746_v39 = vld [vmem:[%s18686_s1 + $0x1e0] sm:$0xff]   ;;  %v3566_v61 = vor.u32 %v3565_v14, %v3562_v28  ;;  %v3601_v28 = vrot.slane %v15837_v57, 4 }
 0x266   : > { %12887 = vmatmul.mubr.bf16.gmra.mrb[44].mxu0 %v3100_v43  ;;  %v3544_v43 = vrot.slane %v15744_v48, 3 }
 0x267   : > { %12906 = vmatprep.mubr.bf16.mxu0 %v3504_v47  ;;  %v3553_v47 = vrot.slane %v15748_v17, 3 }
 0x268   : > { %v3548_v24 = vor.u32 %v3547_v50, %v3544_v43  ;;  %v3580_v43 = vrot.slane %v15800_v16, 3  ;;  %v3583_v50 = vrot.slane %v15809_v5, 4 }
 0x269   : > { %v3557_v6 = vor.u32 %v3556_v27, %v3553_v47  ;;  %v3589_v47 = vrot.slane %v15804_v46, 3  ;;  %v3592_v27 = vrot.slane %v15814_v30, 4 }
 0x26e   : > { %12907 = vmatmul.mubr.bf16.vlgmr.msra.gmra.mrb[0].mxu0 %v3513_v54  ;;  %v3549_v54 = vsel %vm945_vm1, %v3539_v1, %v3548_v24  ;;  %v3575_v1 = vor.u32 %v3574_v52, %v3571_v49  ;;  %v3610_v49 = vrot.slane %v15842_v37, 4  ;;  %v16166_v52 = vld [vmem:[%s18686_s1 + $0x200] sm:$0xff]  }
 0x26f   : > { %12910 = vmatprep.mubr.bf16.mxu0 %v3522_v53  ;;  %12955 = vmatpush3.bf16.msra.mxu0 %v16061_v13  ;;  %v14745_v13 = vld [vmem:[%s18686_s1 + $0x1d8] sm:$0xff]   ;;  %v3558_v53 = vsel %vm945_vm1, %v3548_v24, %v3557_v6  ;;  %v3584_v24 = vor.u32 %v3583_v50, %v3580_v43  ;;  %v3625_v50 = vrot.slane %v18881_v40, 3 }
 0x270   : > { %12956 = vmatprep.subr.bf16.mxu0 %v14743_v12 }
 0x273   : > { %12957 = vmatpush3.bf16.msra.mxu0 %v14743_v12  ;;  %v14747_v12 = vld [vmem:[%s18686_s1 + $0x1e8] sm:$0xff]  }
 0x274   : > { %12958 = vmatprep.subr.bf16.mxu0 %v14744_v3 }
 0x276   : > { %12911 = vmatmul.mubr.bf16.gmra.mrb[4].mxu0 %v3531_v56  ;;  %v3567_v56 = vsel %vm945_vm1, %v3557_v6, %v3566_v61  ;;  %v3593_v6 = vor.u32 %v3592_v27, %v3589_v47 }
 0x277   : > { %12914 = vmatprep.mubr.bf16.mxu0 %v3540_v18  ;;  %12959 = vmatpush3.bf16.msra.mxu0 %v14744_v3  ;;  %v14748_v3 = vld [vmem:[%s18686_s1 + $0x1f0] sm:$0xff]   ;;  %v3576_v18 = vsel %vm945_vm1, %v3566_v61, %v3575_v1 }
 0x278   : > { %12960 = vmatprep.subr.bf16.mxu0 %v14745_v13  ;;  %v3594_v14 = vsel %vm945_vm1, %v3584_v24, %v3593_v6 }
 0x27b   : > { %12961 = vmatpush3.bf16.msra.mxu0 %v14745_v13  ;;  %v14749_v13 = vld [vmem:[%s18686_s1 + $0x1f8] sm:$0xff]  }
 0x27c   : > { %12962 = vmatprep.subr.bf16.mxu0 %v14746_v39 }
 0x27e   : > { %12915 = vmatmul.mubr.bf16.gmra.mrb[8].mxu0 %v3549_v54  ;;  %v3598_v54 = vrot.slane %v18876_v38, 3 }
 0x27f   : > { %12918 = vmatprep.mubr.bf16.mxu0 %v3558_v53  ;;  %12963 = vmatpush3.bf16.msra.mxu0 %v14746_v39  ;;  %v3585_v39 = vsel %vm945_vm1, %v3575_v1, %v3584_v24  ;;  %v3607_v53 = vrot.slane %v18877_v9, 3  ;;  %v3634_v24 = vrot.slane %v18884_v59, 3 }
 0x280   : > { %12964 = vmatprep.subr.bf16.mxu0 %v14747_v12 }
 0x281   : > { %v3611_v61 = vor.u32 %v3610_v49, %v3607_v53 }
 0x283   : > { %12965 = vmatpush3.bf16.msra.mxu0 %v14747_v12  ;;  %v3602_v12 = vor.u32 %v3601_v28, %v3598_v54  ;;  %v3643_v54 = vrot.slane %v18885_v21, 3  ;;  %v3646_v28 = vrot.slane %v18883_v15, 4 }
 0x284   : > { %12966 = vmatprep.subr.bf16.mxu0 %v14748_v3 }
 0x285   : > { %v3603_v1 = vsel %vm945_vm1, %v3593_v6, %v3602_v12  ;;  %v3612_v43 = vsel %vm945_vm1, %v3602_v12, %v3611_v61  ;;  %v3637_v6 = vrot.slane %v18882_v25, 4  ;;  %v3647_v53 = vor.u32 %v3646_v28, %v3643_v54 }
 0x286   : > { %12919 = vmatmul.mubr.bf16.gmra.mrb[12].mxu0 %v3567_v56  ;;  %v3619_v56 = vrot.slane %v18878_v51, 4  ;;  %v3652_v12 = vrot.slane %v18888_v11, 3  ;;  %v3679_v28 = vrot.slane %v15920_v60, 3 }
 0x287   : > { %12922 = vmatprep.mubr.bf16.mxu0 %v3576_v18  ;;  %12967 = vmatpush3.bf16.msra.mxu0 %v14748_v3  ;;  %v3616_v3 = vrot.slane %v18880_v58, 3  ;;  %v3628_v18 = vrot.slane %v18879_v0, 4 }
 0x288   : > { %12968 = vmatprep.subr.bf16.mxu0 %v14749_v13 }
 0x289   : > { %v3620_v47 = vor.u32 %v3619_v56, %v3616_v3  ;;  %v3629_v27 = vor.u32 %v3628_v18, %v3625_v50  ;;  %v3661_v3 = vrot.slane %v18889_v33, 3  ;;  %v3664_v56 = vrot.slane %v18887_v45, 4  ;;  %v5071_v50 = vld [vmem:[%s18692_s7 + $0x10] sm:$0xff] }
 0x28b   : > { %12969 = vmatpush3.bf16.msra.mxu0 %v14749_v13  ;;  %v3621_v13 = vsel %vm945_vm1, %v3611_v61, %v3620_v47  ;;  %v3655_v61 = vrot.slane %v18886_v32, 4 }
 0x28c   : > { %13018 = vmatprep.subr.bf16.mxu0 %v16166_v52 }
 0x28d   : > { %v3656_v18 = vor.u32 %v3655_v61, %v3652_v12 }
 0x28e   : > { %12923 = vmatmul.mubr.bf16.gmra.mrb[16].mxu0 %v3585_v39  ;;  %v3630_v39 = vsel %vm945_vm1, %v3620_v47, %v3629_v27  ;;  %v18744_v47 = vmov 0  }
 0x28f   : > { %12926 = vmatprep.mubr.bf16.mxu0 %v3594_v14  ;;  %v3638_v14 = vor.u32 %v3637_v6, %v3634_v24  ;;  %14684 = vset.pattern.permute.xlu0 %v18744_v47  ;;  %5405 = vst [vmem:[#allocation3] sm:$0xff] %v18744_v47  ;;  %5406 = vst [vmem:[#allocation3 + $0x8] sm:$0xff] %v18744_v47  ;;  %v3657_v24 = vsel %vm945_vm1, %v3647_v53, %v3656_v18  ;;  %v3670_v6 = vrot.slane %v18890_v42, 3 }
 0x290   : > { %5407 = vst [vmem:[#allocation3 + $0x10] sm:$0xff] %v18744_v47  ;;  %5408 = vst [vmem:[#allocation3 + $0xd8] sm:$0xff] %v18744_v47  ;;  %14685 = vset.pattern.permute.xlu1 %v18744_v47 }
 0x291   : > { %v3639_v49 = vsel %vm945_vm1, %v3629_v27, %v3638_v14  ;;  %5409 = vst [vmem:[#allocation3 + $0xe0] sm:$0xff] %v18744_v47  ;;  %v3665_v27 = vor.u32 %v3664_v56, %v3661_v3  ;;  %5129 = vperm.xlu1 %14685, %v5071_v50   ;;  %v18746_v3 = vshll.u32 %v15985_v19, 16  ;;  %v5074_v56 = vld [vmem:[%s18692_s7 + $0x28] sm:$0xff] }
 0x293   : > { %v3666_v54 = vsel %vm945_vm1, %v3656_v18, %v3665_v27  ;;  %v3688_v18 = vrot.slane %v15934_v26, 3 }
 0x296   : > { %12927 = vmatmul.mubr.bf16.gmra.mrb[20].mxu0 %v3603_v1  ;;  %v3648_v1 = vsel %vm945_vm1, %v3638_v14, %v3647_v53  ;;  %v3682_v14 = vrot.slane %v15930_v55, 4  ;;  %v5073_v53 = vld [vmem:[%s18692_s7 + $0x20] sm:$0xff] }
 0x297   : > { %12930 = vmatprep.mubr.bf16.mxu0 %v3612_v43  ;;  %v5069_v43 = vld [vmem:[%s18692_s7] sm:$0xff] }
 0x298   : > { %5119 = vperm.xlu0 %14684, %v5069_v43   ;;  %v3683_v61 = vor.u32 %v3682_v14, %v3679_v28  ;;  %v5075_v43 = vld [vmem:[%s18692_s7 + $0x30] sm:$0xff]  ;;  %v16231_v28 = vld [vmem:[#allocation2 + $0xe0] sm:$0xf] }
 0x299   : > { %v5077_v14 = vld [vmem:[%s18692_s7 + $0x40] sm:$0xff] }
 0x29e   : > { %12931 = vmatmul.mubr.bf16.gmra.mrb[24].mxu0 %v3621_v13  ;;  %v5070_v13 = vld [vmem:[%s18692_s7 + $0x8] sm:$0xff] }
 0x29f   : > { %12934 = vmatprep.mubr.bf16.mxu0 %v3630_v39  ;;  %v3673_v39 = vrot.slane %v15925_v23, 4  ;;  %5124 = vperm.xlu0 %14684, %v5070_v13   ;;  %v18891_v13 = vld [vmem:[#allocation19_spill] sm:$0xff] }
 0x2a1   : > { %v3674_v12 = vor.u32 %v3673_v39, %v3670_v6 }
 0x2a3   : > { %5139 = vperm.xlu0 %14684, %v5073_v53   ;;  %v3675_v50 = vsel %vm945_vm1, %v3665_v27, %v3674_v12  ;;  %v3684_v6 = vsel %vm945_vm1, %v3674_v12, %v3683_v61  ;;  %v5076_v27 = vld [vmem:[%s18692_s7 + $0x38] sm:$0xff]  ;;  %v3704_v53 = vshrl.u32 %v16231_v28, 16  ;;  %v3707_v12 = vshll.u32 %v16231_v28, 16 }
 0x2a6   : > { %12935 = vmatmul.mubr.bf16.gmra.mrb[28].mxu0 %v3639_v49  ;;  %v5072_v49 = vld [vmem:[%s18692_s7 + $0x18] sm:$0xff] }
 0x2a7   : > { %12938 = vmatprep.mubr.bf16.mxu0 %v3648_v1  ;;  %5134 = vperm.xlu1 %14685, %v5072_v49   ;;  %v3695_v1 = vshrl.u32 %v15985_v19, 16 }
 0x2a8   : > { %5149 = vperm.xlu0 %14684, %v5075_v43   ;;  %v5078_v43 = vld [vmem:[%s18692_s7 + $0x48] sm:$0xff] }
 0x2a9   : > { %v3697_v39 = vrot.slane %v3695_v1, 3 }
 0x2ab   : > { %5144 = vperm.xlu1 %14685, %v5074_v56  }
 0x2ac   : > { %5159 = vperm.xlu0 %14684, %v5077_v14   ;;  %v14867_v14 = vld [vmem:[#allocation2 + $0x28] sm:$0xff] }
 0x2ae   : > { %12939 = vmatmul.mubr.bf16.gmra.mrb[32].mxu0 %v3657_v24  ;;  %v3691_v24 = vrot.slane %v18891_v13, 4 }
 0x2af   : > { %12942 = vmatprep.mubr.bf16.mxu0 %v3666_v54  ;;  %v3700_v54 = vrot.slane %v18746_v3, 4  ;;  %5154 = vperm.xlu1 %14685, %v5076_v27   ;;  %v3706_v3 = vrot.slane %v3704_v53, 3  ;;  %v4101_v53 = vrot.slane %v14867_v14, 4 }
 0x2b0   : > { %v3692_v49 = vor.u32 %v3691_v24, %v3688_v18  ;;  %v16249_v24 = vld [vmem:[#allocation2 + $0x20] sm:$0xf0] }
 0x2b1   : > { %v3701_v56 = vor.u32 %v3700_v54, %v3697_v39  ;;  %v5080_v39 = vld [vmem:[%s18692_s7 + $0x58] sm:$0xff]  ;;  %v5081_v54 = vld [vmem:[%s18692_s7 + $0x60] sm:$0xff] }
 0x2b2   : > { %v3693_v47 = vsel %vm945_vm1, %v3683_v61, %v3692_v49  ;;  %v4100_v61 = vrot.slane %v16249_v24, 4 }
 0x2b3   : > { %5164 = vperm.xlu1 %14685, %v5078_v43   ;;  %v3702_v18 = vsel %vm945_vm1, %v3692_v49, %v3701_v56  ;;  %v5083_v49 = vld [vmem:[%s18692_s7 + $0x70] sm:$0xff] }
 0x2b4   : > { %v4102_v43 = vsel %vm598_vm0, %v4100_v61, %v4101_v53 }
 0x2b6   : > { %12943 = vmatmul.mubr.bf16.gmra.mrb[36].mxu0 %v3675_v50  ;;  %v5079_v50 = vld [vmem:[%s18692_s7 + $0x50] sm:$0xff] }
 0x2b7   : > { %12946 = vmatprep.mubr.bf16.mxu0 %v3684_v6  ;;  %v3709_v6 = vrot.slane %v3707_v12, 4  ;;  %5169 = vperm.xlu0 %14684, %v5079_v50   ;;  %v5085_v50 = vld [vmem:[%s18692_s7 + $0x80] sm:$0xff] }
 0x2b8   : > { %5174 = vperm.xlu1 %14685, %v5080_v39   ;;  %v14869_v39 = vld [vmem:[#allocation2 + $0x38] sm:$0xff] }
 0x2b9   : > { %v3710_v27 = vor.u32 %v3709_v6, %v3706_v3  ;;  %v5084_v3 = vld [vmem:[%s18692_s7 + $0x78] sm:$0xff]  ;;  %v14868_v6 = vld [vmem:[#allocation2 + $0x30] sm:$0xff] }
 0x2bb   : > { %5179 = vperm.xlu0 %14684, %v5081_v54   ;;  %v3711_v12 = vsel %vm945_vm1, %v3701_v56, %v3710_v27  ;;  %v4105_v54 = vrot.slane %v14869_v39, 4  ;;  %v5086_v56 = vld [vmem:[%s18692_s7 + $0x88] sm:$0xff]  ;;  %v5087_v27 = vld [vmem:[%s18692_s7 + $0x90] sm:$0xff] }
 0x2bc   : > { %v5091_v39 = vld [vmem:[%s18692_s7 + $0xb0] sm:$0xff] }
 0x2be   : > { %12947 = vmatmul.mubr.bf16.gmra.mrb[40].mxu0 %v3693_v47  ;;  %v5082_v47 = vld [vmem:[%s18692_s7 + $0x68] sm:$0xff] }
 0x2bf   : > { %12950 = vmatprep.mubr.bf16.mxu0 %v3702_v18  ;;  %5184 = vperm.xlu1 %14685, %v5082_v47   ;;  %v4103_v18 = vrot.slane %v14868_v6, 4  ;;  %v14751_v47 = vld [vmem:[%s18686_s1 + $0x208] sm:$0xff]   ;;  %v14752_v6 = vld [vmem:[%s18686_s1 + $0x210] sm:$0xff]  }
 0x2c0   : > { %5189 = vperm.xlu0 %14684, %v5083_v49   ;;  %v5088_v49 = vld [vmem:[%s18692_s7 + $0x98] sm:$0xff] }
 0x2c1   : > { %v4104_v61 = vsel %vm598_vm0, %v4101_v53, %v4103_v18  ;;  %v4106_v14 = vsel %vm598_vm0, %v4103_v18, %v4105_v54  ;;  %v5090_v18 = vld [vmem:[%s18692_s7 + $0xa8] sm:$0xff] }
 0x2c3   : > { %5194 = vperm.xlu1 %14685, %v5084_v3   ;;  %v14871_v3 = vld [vmem:[#allocation2 + $0x48] sm:$0xff] }
 0x2c4   : > { %5199 = vperm.xlu0 %14684, %v5085_v50   ;;  %v4109_v50 = vrot.slane %v14871_v3, 4  ;;  %v5095_v3 = vld [vmem:[%s18692_s7 + $0xd0] sm:$0xff] }
 0x2c6   : > { %12951 = vmatmul.mubr.bf16.gmra.mrb[44].mxu0 %v3711_v12  ;;  %v5089_v12 = vld [vmem:[%s18692_s7 + $0xa0] sm:$0xff] }
 0x2c7   : > { %12970 = vmatprep.mubr.bf16.mxu0 %v4102_v43  ;;  %5204 = vperm.xlu1 %14685, %v5086_v56   ;;  %v14870_v43 = vld [vmem:[#allocation2 + $0x40] sm:$0xff] }
 0x2c8   : > { %5209 = vperm.xlu0 %14684, %v5087_v27   ;;  %v4107_v53 = vrot.slane %v14870_v43, 4  ;;  %v14753_v27 = vld [vmem:[%s18686_s1 + $0x218] sm:$0xff]   ;;  %v14754_v43 = vld [vmem:[%s18686_s1 + $0x220] sm:$0xff]  }
 0x2ca   : > { %v4108_v56 = vsel %vm598_vm0, %v4105_v54, %v4107_v53  ;;  %v14872_v54 = vld [vmem:[#allocation2 + $0x50] sm:$0xff] }
 0x2cb   : > { %5214 = vperm.xlu1 %14685, %v5088_v49   ;;  %v14873_v49 = vld [vmem:[#allocation2 + $0x58] sm:$0xff] }
 0x2cc   : > { %5219 = vperm.xlu0 %14684, %v5089_v12   ;;  %v4113_v12 = vrot.slane %v14873_v49, 4  ;;  %v5099_v49 = vld [vmem:[%s18692_s7 + $0xf0] sm:$0xff] }
 0x2ce   : > { %12971 = vmatmul.mubr.bf16.vlgmr.msra.gmra.mrb[0].mxu0 %v4104_v61  ;;  %v5092_v61 = vld [vmem:[%s18692_s7 + $0xb8] sm:$0xff] }
 0x2cf   : > { %12974 = vmatprep.mubr.bf16.mxu0 %v4106_v14  ;;  %13019 = vmatpush3.bf16.msra.mxu0 %v16166_v52  ;;  %v4110_v52 = vsel %vm598_vm0, %v4107_v53, %v4109_v50  ;;  %v5093_v14 = vld [vmem:[%s18692_s7 + $0xc0] sm:$0xff]  ;;  %v5094_v53 = vld [vmem:[%s18692_s7 + $0xc8] sm:$0xff] }
 0x2d0   : > { %13020 = vmatprep.subr.bf16.mxu0 %v14751_v47  ;;  %5224 = vperm.xlu1 %14685, %v5090_v18  }
 0x2d1   : > { %5229 = vperm.xlu0 %14684, %v5091_v39   ;;  %v14755_v39 = vld [vmem:[%s18686_s1 + $0x228] sm:$0xff]  }
 0x2d3   : > { %13021 = vmatpush3.bf16.msra.mxu0 %v14751_v47  ;;  %v4111_v47 = vrot.slane %v14872_v54, 4  ;;  %v14756_v54 = vld [vmem:[%s18686_s1 + $0x230] sm:$0xff]  }
 0x2d4   : > { %13022 = vmatprep.subr.bf16.mxu0 %v14752_v6  ;;  %5234 = vperm.xlu1 %14685, %v5092_v61   ;;  %v14875_v61 = vld [vmem:[#allocation2 + $0x68] sm:$0xff] }
 0x2d5   : > { %5239 = vperm.xlu0 %14684, %v5093_v14   ;;  %v4112_v18 = vsel %vm598_vm0, %v4109_v50, %v4111_v47  ;;  %v14874_v50 = vld [vmem:[#allocation2 + $0x60] sm:$0xff]  ;;  %v4117_v14 = vrot.slane %v14875_v61, 4 }
 0x2d6   : > { %12975 = vmatmul.mubr.bf16.gmra.mrb[4].mxu0 %v4108_v56  ;;  %v5096_v56 = vld [vmem:[%s18692_s7 + $0xd8] sm:$0xff] }
 0x2d7   : > { %12978 = vmatprep.mubr.bf16.mxu0 %v4110_v52  ;;  %13023 = vmatpush3.bf16.msra.mxu0 %v14752_v6  ;;  %v4114_v6 = vsel %vm598_vm0, %v4111_v47, %v4113_v12  ;;  %v5097_v52 = vld [vmem:[%s18692_s7 + $0xe0] sm:$0xff]  ;;  %v5098_v47 = vld [vmem:[%s18692_s7 + $0xe8] sm:$0xff] }
 0x2d8   : > { %13024 = vmatprep.subr.bf16.mxu0 %v14753_v27  ;;  %5244 = vperm.xlu1 %14685, %v5094_v53  }
 0x2d9   : > { %5249 = vperm.xlu0 %14684, %v5095_v3   ;;  %v14757_v3 = vld [vmem:[%s18686_s1 + $0x238] sm:$0xff]  }
 0x2db   : > { %13025 = vmatpush3.bf16.msra.mxu0 %v14753_v27  ;;  %v4115_v27 = vrot.slane %v14874_v50, 4  ;;  %v5102_v50 = vld [vmem:[%s18692_s7 + $0x108] sm:$0xff] }
 0x2dc   : > { %13026 = vmatprep.subr.bf16.mxu0 %v14754_v43  ;;  %5254 = vperm.xlu1 %14685, %v5096_v56   ;;  %v14877_v56 = vld [vmem:[#allocation2 + $0x78] sm:$0xff] }
 0x2dd   : > { %5259 = vperm.xlu0 %14684, %v5097_v52   ;;  %v4116_v53 = vsel %vm598_vm0, %v4113_v12, %v4115_v27  ;;  %v14876_v12 = vld [vmem:[#allocation2 + $0x70] sm:$0xff]  ;;  %v4121_v52 = vrot.slane %v14877_v56, 4  ;;  %v5108_v56 = vld [vmem:[%s18692_s7 + $0x138] sm:$0xff] }
 0x2de   : > { %12979 = vmatmul.mubr.bf16.gmra.mrb[8].mxu0 %v4112_v18  ;;  %v5100_v18 = vld [vmem:[%s18692_s7 + $0xf8] sm:$0xff] }
 0x2df   : > { %12982 = vmatprep.mubr.bf16.mxu0 %v4114_v6  ;;  %13027 = vmatpush3.bf16.msra.mxu0 %v14754_v43  ;;  %v4118_v43 = vsel %vm598_vm0, %v4115_v27, %v4117_v14  ;;  %v5101_v6 = vld [vmem:[%s18692_s7 + $0x100] sm:$0xff]  ;;  %v5103_v27 = vld [vmem:[%s18692_s7 + $0x110] sm:$0xff] }
 0x2e0   : > { %13028 = vmatprep.subr.bf16.mxu0 %v14755_v39  ;;  %5264 = vperm.xlu1 %14685, %v5098_v47  }
 0x2e1   : > { %5269 = vperm.xlu0 %14684, %v5099_v49   ;;  %v5105_v49 = vld [vmem:[%s18692_s7 + $0x120] sm:$0xff] }
 0x2e3   : > { %13029 = vmatpush3.bf16.msra.mxu0 %v14755_v39  ;;  %v4119_v39 = vrot.slane %v14876_v12, 4 }
 0x2e4   : > { %13030 = vmatprep.subr.bf16.mxu0 %v14756_v54  ;;  %5274 = vperm.xlu1 %14685, %v5100_v18   ;;  %v14879_v18 = vld [vmem:[#allocation2 + $0x88] sm:$0xff] }
 0x2e5   : > { %5279 = vperm.xlu0 %14684, %v5101_v6   ;;  %v4120_v61 = vsel %vm598_vm0, %v4117_v14, %v4119_v39  ;;  %v4122_v47 = vsel %vm598_vm0, %v4119_v39, %v4121_v52  ;;  %v4125_v6 = vrot.slane %v14879_v18, 4  ;;  %v5106_v14 = vld [vmem:[%s18692_s7 + $0x128] sm:$0xff]  ;;  %v5112_v18 = vld [vmem:[%s18692_s7 + $0x158] sm:$0xff] }
 0x2e6   : > { %12983 = vmatmul.mubr.bf16.gmra.mrb[12].mxu0 %v4116_v53  ;;  %v14878_v53 = vld [vmem:[#allocation2 + $0x80] sm:$0xff] }
 0x2e7   : > { %12986 = vmatprep.mubr.bf16.mxu0 %v4118_v43  ;;  %13031 = vmatpush3.bf16.msra.mxu0 %v14756_v54  ;;  %v5104_v54 = vld [vmem:[%s18692_s7 + $0x118] sm:$0xff]  ;;  %v4123_v43 = vrot.slane %v14878_v53, 4 }
 0x2e8   : > { %13032 = vmatprep.subr.bf16.mxu0 %v14757_v3  ;;  %5284 = vperm.xlu1 %14685, %v5102_v50   ;;  %v5109_v50 = vld [vmem:[%s18692_s7 + $0x140] sm:$0xff] }
 0x2e9   : > { %5289 = vperm.xlu0 %14684, %v5103_v27   ;;  %v4124_v12 = vsel %vm598_vm0, %v4121_v52, %v4123_v43  ;;  %v4126_v39 = vsel %vm598_vm0, %v4123_v43, %v4125_v6  ;;  %v14880_v27 = vld [vmem:[#allocation2 + $0x90] sm:$0xff]  ;;  %v5110_v52 = vld [vmem:[%s18692_s7 + $0x148] sm:$0xff] }
 0x2eb   : > { %13033 = vmatpush3.bf16.msra.mxu0 %v14757_v3  ;;  %v5107_v3 = vld [vmem:[%s18692_s7 + $0x130] sm:$0xff] }
 0x2ec   : > { %5294 = vperm.xlu1 %14685, %v5104_v54  }
 0x2ed   : > { %5299 = vperm.xlu0 %14684, %v5105_v49   ;;  %v5111_v49 = vld [vmem:[%s18692_s7 + $0x150] sm:$0xff] }
 0x2ee   : > { %12987 = vmatmul.mubr.bf16.gmra.mrb[16].mxu0 %v4120_v61  ;;  %v4127_v61 = vrot.slane %v14880_v27, 4 }
 0x2ef   : > { %12990 = vmatprep.mubr.bf16.mxu0 %v4122_v47  ;;  %v14881_v47 = vld [vmem:[#allocation2 + $0x98] sm:$0xff] }
 0x2f0   : > { %5304 = vperm.xlu1 %14685, %v5106_v14   ;;  %v4129_v54 = vrot.slane %v14881_v47, 4  ;;  %v4128_v53 = vsel %vm598_vm0, %v4125_v6, %v4127_v61  ;;  %v5113_v14 = vld [vmem:[%s18692_s7 + $0x160] sm:$0xff]  ;;  %v5114_v6 = vld [vmem:[%s18692_s7 + $0x168] sm:$0xff]  ;;  %v5116_v47 = vld [vmem:[%s18692_s7 + $0x178] sm:$0xff] }
 0x2f1   : > { %5309 = vperm.xlu0 %14684, %v5107_v3   ;;  %v14882_v3 = vld [vmem:[#allocation2 + $0xa0] sm:$0xff] }
 0x2f2   : > { %v4130_v43 = vsel %vm598_vm0, %v4127_v61, %v4129_v54 }
 0x2f4   : > { %5314 = vperm.xlu1 %14685, %v5108_v56  }
 0x2f5   : > { %5319 = vperm.xlu0 %14684, %v5109_v50   ;;  %v5115_v50 = vld [vmem:[%s18692_s7 + $0x170] sm:$0xff] }
 0x2f6   : > { %12991 = vmatmul.mubr.bf16.gmra.mrb[20].mxu0 %v4124_v12  ;;  %v4131_v12 = vrot.slane %v14882_v3, 4 }
 0x2f7   : > { %12994 = vmatprep.mubr.bf16.mxu0 %v4126_v39  ;;  %v14883_v39 = vld [vmem:[#allocation2 + $0xa8] sm:$0xff] }
 0x2f8   : > { %5324 = vperm.xlu1 %14685, %v5110_v52   ;;  %v4133_v56 = vrot.slane %v14883_v39, 4  ;;  %v4132_v27 = vsel %vm598_vm0, %v4129_v54, %v4131_v12  ;;  %v14758_v52 = vld [vmem:[%s18688_s3 + $0x40] sm:$0xff]  }
 0x2f9   : > { %5329 = vperm.xlu0 %14684, %v5111_v49   ;;  %v14759_v49 = vld [vmem:[%s18688_s3 + $0x48] sm:$0xff]   ;;  %13082 = vmatprep.subr.bf16.mxu1 %v14758_v52  ;;  %v14886_v39 = vld [vmem:[#allocation2 + $0xc0] sm:$0xff] }
 0x2fa   : > { %v4134_v61 = vsel %vm598_vm0, %v4131_v12, %v4133_v56  ;;  %13083 = vmatpush3.bf16.msra.mxu1 %v14758_v52  ;;  %v14888_v52 = vld [vmem:[#allocation2 + $0xd0] sm:$0xff] }
 0x2fb   : > { %13084 = vmatprep.subr.bf16.mxu1 %v14759_v49 }
 0x2fc   : > { %5334 = vperm.xlu1 %14685, %v5112_v18  }
 0x2fd   : > { %5339 = vperm.xlu0 %14684, %v5113_v14   ;;  %v14760_v14 = vld [vmem:[%s18688_s3 + $0x50] sm:$0xff]  }
 0x2fe   : > { %12995 = vmatmul.mubr.bf16.gmra.mrb[24].mxu0 %v4128_v53  ;;  %v14884_v53 = vld [vmem:[#allocation2 + $0xb0] sm:$0xff]  ;;  %13085 = vmatpush3.bf16.msra.mxu1 %v14759_v49  ;;  %v4513_v49 = vshrl.u32 %v16249_v24, 16 }
 0x2ff   : > { %12998 = vmatprep.mubr.bf16.mxu0 %v4130_v43  ;;  %v4135_v54 = vrot.slane %v14884_v53, 4  ;;  %v14885_v43 = vld [vmem:[#allocation2 + $0xb8] sm:$0xff]  ;;  %13086 = vmatprep.subr.bf16.mxu1 %v14760_v14  ;;  %v4143_v53 = vrot.slane %v14888_v52, 4 }
 0x300   : > { %5344 = vperm.xlu1 %14685, %v5114_v6   ;;  %v4137_v18 = vrot.slane %v14885_v43, 4  ;;  %v4139_v6 = vrot.slane %v14886_v39, 4  ;;  %v4521_v39 = vrot.slane %v15681_v31, 5 }
 0x301   : > { %5349 = vperm.xlu0 %14684, %v5115_v50   ;;  %v4136_v3 = vsel %vm598_vm0, %v4133_v56, %v4135_v54  ;;  %v14887_v50 = vld [vmem:[#allocation2 + $0xc8] sm:$0xff]  ;;  %v4145_v56 = vrot.slane %v15985_v19, 4 }
 0x302   : > { %v4138_v12 = vsel %vm598_vm0, %v4135_v54, %v4137_v18  ;;  %13087 = vmatpush3.bf16.msra.mxu1 %v14760_v14  ;;  %v4516_v54 = vshll.u32 %v16249_v24, 16  ;;  %v4524_v24 = vrot.slane %v15690_v20, 4 }
 0x304   : > { %5354 = vperm.xlu1 %14685, %v5116_v47   ;;  %v4518_v14 = vrot.slane %v4516_v54, 5  ;;  %v4532_v54 = vrot.slane %v15715_v7, 4 }
 0x306   : > { %12999 = vmatmul.mubr.bf16.gmra.mrb[28].mxu0 %v4132_v27  ;;  %v4141_v27 = vrot.slane %v14887_v50, 4 }
 0x307   : > { %13002 = vmatprep.mubr.bf16.mxu0 %v4134_v61  ;;  %v4140_v61 = vsel %vm598_vm0, %v4137_v18, %v4139_v6  ;;  %v4520_v18 = vrot.slane %v15672_v44, 4  ;;  %v4529_v44 = vrot.slane %v15704_v22, 5 }
 0x308   : > { %v4142_v47 = vsel %vm598_vm0, %v4139_v6, %v4141_v27  ;;  %v4144_v43 = vsel %vm598_vm0, %v4141_v27, %v4143_v53  ;;  %v4147_v6 = vrot.slane %v16231_v28, 4  ;;  %v4525_v27 = vrot.slane %v15699_v36, 5 }
 0x309   : > { %v4536_v36 = vrot.slane %v15720_v63, 4 }
 0x30a   : > { %v4526_v31 = vor.u32 %v4525_v27, %v4524_v24  ;;  %v4556_v24 = vrot.slane %v15800_v16, 4  ;;  %v4557_v27 = vrot.slane %v15809_v5, 5  ;;  %v4568_v5 = vrot.slane %v18877_v9, 4 }
 0x30e   : > { %13003 = vmatmul.mubr.bf16.gmra.mrb[32].mxu0 %v4136_v3  ;;  %v4146_v3 = vsel %vm598_vm0, %v4143_v53, %v4145_v56  ;;  %v4528_v53 = vrot.slane %v15694_v2, 4 }
 0x30f   : > { %13006 = vmatprep.mubr.bf16.mxu0 %v4138_v12  ;;  %v4515_v12 = vrot.slane %v4513_v49, 4 }
 0x310   : > { %v4530_v49 = vor.u32 %v4529_v44, %v4528_v53  ;;  %v4564_v44 = vrot.slane %v18876_v38, 4 }
 0x311   : > { %v4519_v50 = vor.u32 %v4518_v14, %v4515_v12  ;;  %v4540_v12 = vrot.slane %v15744_v48, 4  ;;  %v4541_v14 = vrot.slane %v15756_v29, 5  ;;  %v4552_v29 = vrot.slane %v15776_v4, 4 }
 0x312   : > { %v4531_v20 = vsel %vm1485_vm2, %v4526_v31, %v4530_v49  ;;  %v4558_v4 = vor.u32 %v4557_v27, %v4556_v24 }
 0x313   : > { %v4542_v63 = vor.u32 %v4541_v14, %v4540_v12  ;;  %v4588_v12 = vrot.slane %v18888_v11, 4  ;;  %v4589_v14 = vrot.slane %v18886_v32, 5  ;;  %v4600_v32 = vrot.slane %v15920_v60, 4 }
 0x316   : > { %13007 = vmatmul.mubr.bf16.gmra.mrb[36].mxu0 %v4140_v61  ;;  %v4522_v61 = vor.u32 %v4521_v39, %v4520_v18  ;;  %v4545_v18 = vrot.slane %v15761_v8, 5 }
 0x317   : > { %13010 = vmatprep.mubr.bf16.mxu0 %v4142_v47  ;;  %v4148_v47 = vsel %vm598_vm0, %v4145_v56, %v4147_v6  ;;  %v4533_v56 = vrot.slane %v15728_v10, 5  ;;  %v4544_v10 = vrot.slane %v15748_v17, 4  ;;  %v4548_v6 = vrot.slane %v15772_v34, 4 }
 0x318   : > { %v4523_v52 = vsel %vm1485_vm2, %v4519_v50, %v4522_v61  ;;  %v4527_v28 = vsel %vm1485_vm2, %v4522_v61, %v4526_v31  ;;  %v4549_v50 = vrot.slane %v15784_v41, 5  ;;  %v4553_v61 = vrot.slane %v15789_v35, 5 }
 0x319   : > { %v4534_v2 = vor.u32 %v4533_v56, %v4532_v54  ;;  %v4560_v41 = vrot.slane %v15804_v46, 4  ;;  %v4565_v31 = vrot.slane %v15837_v57, 5  ;;  %v4572_v54 = vrot.slane %v18880_v58, 4 }
 0x31a   : > { %v4550_v17 = vor.u32 %v4549_v50, %v4548_v6  ;;  %v4554_v8 = vor.u32 %v4553_v61, %v4552_v29  ;;  %v4573_v56 = vrot.slane %v18878_v51, 5  ;;  %v4576_v57 = vrot.slane %v18881_v40, 4  ;;  %v4494_v29 = vld [vmem:[#allocation2 + $0xe0] sm:$0x1f] }
 0x31b   : > { %v4566_v46 = vor.u32 %v4565_v31, %v4564_v44  ;;  %v4584_v51 = vrot.slane %v18885_v21, 4  ;;  %v4590_v21 = vor.u32 %v4589_v14, %v4588_v12  ;;  %v4604_v6 = vrot.slane %v15934_v26, 4  ;;  %v14761_v26 = vld [vmem:[%s18688_s3 + $0x58] sm:$0xff]  }
 0x31c   : > { %v4555_v34 = vsel %vm1485_vm2, %v4550_v17, %v4554_v8  ;;  %v4559_v53 = vsel %vm1485_vm2, %v4554_v8, %v4558_v4  ;;  %v4574_v9 = vor.u32 %v4573_v56, %v4572_v54  ;;  %v4605_v50 = vrot.slane %v18891_v13, 5  ;;  %13088 = vmatprep.subr.bf16.mxu1 %v14761_v26 }
 0x31d   : > { %v4613_v61 = vshrl.u32 %v4494_v29, 16  ;;  %13089 = vmatpush3.bf16.msra.mxu1 %v14761_v26  ;;  %v18893_v44 = vmov 0  }
 0x31e   : > { %13011 = vmatmul.mubr.bf16.gmra.mrb[40].mxu0 %v4144_v43  ;;  %v4537_v43 = vrot.slane %v15733_v62, 5  ;;  %v4546_v62 = vor.u32 %v4545_v18, %v4544_v10  ;;  %v4596_v18 = vrot.slane %v18890_v42, 4  ;;  %v16511_v31 = vrot.slane %v18893_v44, 4 }
 0x31f   : > { %13014 = vmatprep.mubr.bf16.mxu0 %v4146_v3  ;;  %v4535_v3 = vsel %vm1485_vm2, %v4530_v49, %v4534_v2  ;;  %v4569_v49 = vrot.slane %v15842_v37, 5 }
 0x320   : > { %v4538_v22 = vor.u32 %v4537_v43, %v4536_v36  ;;  %v4547_v48 = vsel %vm1485_vm2, %v4542_v63, %v4546_v62  ;;  %v4580_v43 = vrot.slane %v18884_v59, 4 }
 0x322   : > { %v4539_v7 = vsel %vm1485_vm2, %v4534_v2, %v4538_v22  ;;  %v4543_v39 = vsel %vm1485_vm2, %v4538_v22, %v4542_v63  ;;  %v4581_v2 = vrot.slane %v18882_v25, 5  ;;  %v4585_v22 = vrot.slane %v18883_v15, 5 }
 0x323   : > { %v4592_v25 = vrot.slane %v18889_v33, 4  ;;  %v4597_v63 = vrot.slane %v15925_v23, 5  ;;  %v4608_v23 = vrot.slane %v3695_v1, 4 }
 0x324   : > { %v4582_v40 = vor.u32 %v4581_v2, %v4580_v43 }
 0x325   : > { %v4598_v33 = vor.u32 %v4597_v63, %v4596_v18 }
 0x326   : > { %13015 = vmatmul.mubr.bf16.gmra.mrb[44].mxu0 %v4148_v47  ;;  %v4551_v47 = vsel %vm1485_vm2, %v4546_v62, %v4550_v17  ;;  %v4601_v62 = vrot.slane %v15930_v55, 5  ;;  %v4606_v55 = vor.u32 %v4605_v50, %v4604_v6  ;;  %v4616_v17 = vshll.u32 %v4494_v29, 16 }
 0x327   : > { %13034 = vmatprep.mubr.bf16.mxu0 %v4523_v52  ;;  %v4561_v52 = vrot.slane %v15814_v30, 5  ;;  %v4570_v30 = vor.u32 %v4569_v49, %v4568_v5  ;;  %v6437_v5 = vrot.slane %v18893_v44, 5  ;;  %v5900_v29 = vrot.slane %v18893_v44, 3 }
 0x328   : > { %v4618_v24 = vrot.slane %v4616_v17, 5 }
 0x329   : > { %v4562_v35 = vor.u32 %v4561_v52, %v4560_v41  ;;  %v4571_v38 = vsel %vm1485_vm2, %v4566_v46, %v4570_v30  ;;  %v4575_v36 = vsel %vm1485_vm2, %v4570_v30, %v4574_v9  ;;  %v14764_v52 = vld [vmem:[%s18688_s3 + $0x70] sm:$0xff]   ;;  %v16517_v49 = vor.u32 %v6437_v5, %v16511_v31  ;;  %v5130_v30 = vpop.permute.xlu1 %5129 }
 0x32a   : > { %v16576_v44 = vor.u32 %v5900_v29, %v16511_v31 }
 0x32b   : > { %v4563_v16 = vsel %vm1485_vm2, %v4558_v4, %v4562_v35  ;;  %v14765_v4 = vld [vmem:[%s18688_s3 + $0x78] sm:$0xff]   ;;  %18894 = vst [vmem:[#allocation4_spill] sm:$0xff] %v16517_v49 }
 0x32d   : > { %v5135_v56 = vpop.permute.xlu1 %5134 }
 0x32e   : > { %13035 = vmatmul.mubr.bf16.vlgmr.msra.gmra.mrb[0].mxu0 %v4527_v28  ;;  %v4567_v28 = vsel %vm1485_vm2, %v4562_v35, %v4566_v46  ;;  %v5500_v35 = vld [vmem:[#allocation3 + $0x8] sm:$0xf0]  ;;  %v5120_v46 = vpop.permute.xlu0 %5119 }
 0x32f   : > { %13038 = vmatprep.mubr.bf16.mxu0 %v4531_v20  ;;  %v4577_v20 = vrot.slane %v18879_v0, 5  ;;  %v4586_v0 = vor.u32 %v4585_v22, %v4584_v51 }
 0x331   : > { %v4578_v37 = vor.u32 %v4577_v20, %v4576_v57  ;;  %v4587_v59 = vsel %vm1485_vm2, %v4582_v40, %v4586_v0  ;;  %v4591_v10 = vsel %vm1485_vm2, %v4586_v0, %v4590_v21  ;;  %v16527_v57 = vpop.permute.xlu1 %5144  ;;  %v16548_v0 = vld [vmem:[%s18687_s2] ss:$0 sm:$0xff] }
 0x332   : > { %v5125_v54 = vpop.permute.xlu0 %5124 }
 0x333   : > { %v4579_v58 = vsel %vm1485_vm2, %v4574_v9, %v4578_v37 }
 0x335   : > { %v5155_v9 = vpop.permute.xlu1 %5154 }
 0x336   : > { %13039 = vmatmul.mubr.bf16.gmra.mrb[4].mxu0 %v4535_v3  ;;  %v4583_v3 = vsel %vm1485_vm2, %v4578_v37, %v4582_v40 }
 0x337   : > { %13042 = vmatprep.mubr.bf16.mxu0 %v4539_v7  ;;  %v4593_v7 = vrot.slane %v18887_v45, 5  ;;  %v4602_v45 = vor.u32 %v4601_v62, %v4600_v32 }
 0x339   : > { %v4594_v15 = vor.u32 %v4593_v7, %v4592_v25  ;;  %v4603_v42 = vsel %vm1485_vm2, %v4598_v33, %v4602_v45  ;;  %v4607_v13 = vsel %vm1485_vm2, %v4602_v45, %v4606_v55 }
 0x33b   : > { %v4595_v11 = vsel %vm1485_vm2, %v4590_v21, %v4594_v15 }
 0x33e   : > { %13043 = vmatmul.mubr.bf16.gmra.mrb[8].mxu0 %v4543_v39  ;;  %v4599_v39 = vsel %vm1485_vm2, %v4594_v15, %v4598_v33 }
 0x33f   : > { %13046 = vmatprep.mubr.bf16.mxu0 %v4547_v48  ;;  %v18892_v48 = vshll.u32 %v15985_v19, 16  ;;  %v14762_v19 = vld [vmem:[%s18688_s3 + $0x60] sm:$0xff]  }
 0x340   : > { %13090 = vmatprep.subr.bf16.mxu1 %v14762_v19 }
 0x341   : > { %v4609_v60 = vrot.slane %v18892_v48, 5  ;;  %13091 = vmatpush3.bf16.msra.mxu1 %v14762_v19 }
 0x343   : > { %v4610_v8 = vor.u32 %v4609_v60, %v4608_v23 }
 0x345   : > { %v4611_v1 = vsel %vm1485_vm2, %v4606_v55, %v4610_v8 }
 0x346   : > { %13047 = vmatmul.mubr.bf16.gmra.mrb[12].mxu0 %v4551_v47  ;;  %v4615_v47 = vrot.slane %v4613_v61, 4 }
 0x347   : > { %13050 = vmatprep.mubr.bf16.mxu0 %v4555_v34  ;;  %v14763_v34 = vld [vmem:[%s18688_s3 + $0x68] sm:$0xff]  }
 0x348   : > { %v4619_v27 = vor.u32 %v4618_v24, %v4615_v47  ;;  %13092 = vmatprep.subr.bf16.mxu1 %v14763_v34 }
 0x349   : > { %13093 = vmatpush3.bf16.msra.mxu1 %v14763_v34 }
 0x34a   : > { %v4620_v41 = vsel %vm1485_vm2, %v4610_v8, %v4619_v27  ;;  %13094 = vmatprep.subr.bf16.mxu1 %v14764_v52 }
 0x34d   : > { %13095 = vmatpush3.bf16.msra.mxu1 %v14764_v52 }
 0x34e   : > { %13051 = vmatmul.mubr.bf16.gmra.mrb[16].mxu0 %v4559_v53  ;;  %13096 = vmatprep.subr.bf16.mxu1 %v14765_v4  ;;  %v5543_v53 = vrot.slane %v5500_v35, 4 }
 0x34f   : > { %13054 = vmatprep.mubr.bf16.mxu0 %v4563_v16 }
 0x350   : > { %v5545_v16 = vsel %vm598_vm0, %v5543_v53, %v16511_v31  ;;  %v14767_v53 = vld [vmem:[%s18688_s3 + $0x8] sm:$0xff]  }
 0x351   : > { %13097 = vmatpush3.bf16.msra.mxu1 %v14765_v4  ;;  %13098 = vmatprep.mubr.bf16.mxu1 %v5545_v16 }
 0x356   : > { %13055 = vmatmul.mubr.bf16.gmra.mrb[20].mxu0 %v4567_v28  ;;  %v16522_v28 = vld [vmem:[%s18688_s3] sm:$0xff]  }
 0x357   : > { %13058 = vmatprep.mubr.bf16.mxu0 %v4571_v38  ;;  %13146 = vmatprep.subr.bf16.mxu1 %v16522_v28  ;;  %v16525_v38 = vpop.permute.xlu0 %5139 }
 0x35b   : > { %v5150_v20 = vpop.permute.xlu0 %5149 }
 0x35e   : > { %13059 = vmatmul.mubr.bf16.gmra.mrb[24].mxu0 %v4575_v36  ;;  %v16531_v36 = vpop.permute.xlu1 %5164 }
 0x35f   : > { %13062 = vmatprep.mubr.bf16.mxu0 %v4579_v58  ;;  %v16529_v37 = vpop.permute.xlu0 %5159 }
 0x362   : > { %v16535_v2 = vpop.permute.xlu1 %5174 }
 0x363   : > { %v16533_v43 = vpop.permute.xlu0 %5169 }
 0x366   : > { %13063 = vmatmul.mubr.bf16.gmra.mrb[28].mxu0 %v4583_v3  ;;  %v16539_v51 = vpop.permute.xlu1 %5184 }
 0x367   : > { %13066 = vmatprep.mubr.bf16.mxu0 %v4587_v59  ;;  %v16537_v58 = vpop.permute.xlu0 %5179 }
 0x36a   : > { %v16543_v40 = vpop.permute.xlu1 %5194 }
 0x36b   : > { %v16541_v22 = vpop.permute.xlu0 %5189 }
 0x36e   : > { %13067 = vmatmul.mubr.bf16.gmra.mrb[32].mxu0 %v4591_v10  ;;  %v16555_v18 = vpop.permute.xlu1 %5204 }
 0x36f   : > { %13070 = vmatprep.mubr.bf16.mxu0 %v4595_v11  ;;  %v16552_v7 = vpop.permute.xlu0 %5199 }
 0x372   : > { %v16564_v55 = vpop.permute.xlu1 %5214 }
 0x376   : > { %13071 = vmatmul.mubr.bf16.gmra.mrb[36].mxu0 %v4599_v39 }
 0x377   : > { %13074 = vmatprep.mubr.bf16.mxu0 %v4603_v42  ;;  %v16558_v42 = vpop.permute.xlu0 %5209 }
 0x37e   : > { %13075 = vmatmul.mubr.bf16.gmra.mrb[40].mxu0 %v4607_v13 }
 0x37f   : > { %13078 = vmatprep.mubr.bf16.mxu0 %v4611_v1 }
 0x386   : > { %13079 = vmatmul.mubr.bf16.gmra.mrb[44].mxu0 %v4620_v41 }
 0x401   : > { %v13036_v3 = vpop.f32.mrb[0].mxu0 }
 0x402   : > { %v4975_v12 = vadd.f32 %v13036_v3, %v16548_v0  ;;  %v4727_v14 = vpop.f32.mrb[1].mxu0 }
 0x403   : > { %v4973_v59 = vadd.f32 %v16548_v0, %v4727_v14  ;;  %v13037_v25 = vpop.f32.mrb[2].mxu0  ;;  %v16586_v14 = vpop.permute.xlu1 %5224 }
 0x404   : > { %v5023_v21 = vmax.f32 %v4975_v12, 0.0  ;;  %v4976_v15 = vadd.f32 %v13037_v25, %v16548_v0  ;;  %v4730_v10 = vpop.f32.mrb[3].mxu0 }
 0x405   : > { %v5021_v63 = vmax.f32 %v4973_v59, 0.0  ;;  %v4974_v11 = vadd.f32 %v16548_v0, %v4730_v10 }
 0x406   : > { %v5024_v32 = vmax.f32 %v4976_v15, 0.0  ;;  %v5359_v33 = vmul.f32 %v5130_v30, %v5023_v21 }
 0x407   : > { %v5022_v62 = vmax.f32 %v4974_v11, 0.0  ;;  %v5357_v39 = vmul.f32 %v5120_v46, %v5021_v63  ;;  %v14768_v11 = vld [vmem:[%s18688_s3 + $0x10] sm:$0xff]  }
 0x408   : > { %v5360_v45 = vmul.f32 %v5135_v56, %v5024_v32 }
 0x409   : > { %v5358_v6 = vmul.f32 %v5125_v54, %v5022_v62  ;;  %v13040_v50 = vpop.f32.mrb[4].mxu0  ;;  %v16583_v54 = vpop.permute.xlu0 %5219 }
 0x40a   : > { %v16560_v23 = vpack.c.bf16 %v5360_v45, %v5359_v33  ;;  %v4979_v48 = vadd.f32 %v13040_v50, %v16548_v0  ;;  %v4743_v60 = vpop.f32.mrb[5].mxu0 }
 0x40b   : > { %v5411_v61 = vpack.c.bf16 %v5358_v6, %v5357_v39  ;;  %v4977_v17 = vadd.f32 %v16548_v0, %v4743_v60  ;;  %v13041_v8 = vpop.f32.mrb[6].mxu0 }
 0x40c   : > { %5436 = vst [vmem:[#allocation3 + $0x20] sm:$0xff] %v16560_v23  ;;  %v5027_v26 = vmax.f32 %v4979_v48, 0.0  ;;  %v4980_v13 = vadd.f32 %v13041_v8, %v16548_v0  ;;  %v4746_v47 = vpop.f32.mrb[7].mxu0  ;;  %v5548_v24 = vrot.slane %v16560_v23, 4  ;;  %v5916_v1 = vshrl.u32 %v16560_v23, 16 }
 0x40d   : > { %5435 = vst [vmem:[#allocation3 + $0x18] sm:$0xff] %v5411_v61  ;;  %v5025_v19 = vmax.f32 %v4977_v17, 0.0  ;;  %v4978_v27 = vadd.f32 %v16548_v0, %v4746_v47  ;;  %v5546_v34 = vrot.slane %v5411_v61, 4  ;;  %v5907_v41 = vshrl.u32 %v5411_v61, 16 }
 0x40e   : > { %v5363_v52 = vmul.f32 %v5150_v20, %v5027_v26  ;;  %v5028_v4 = vmax.f32 %v4980_v13, 0.0  ;;  %v5910_v35 = vshll.u32 %v5411_v61, 16  ;;  %v5918_v30 = vrot.slane %v5916_v1, 3  ;;  %v16610_v26 = vpop.permute.xlu0 %5229 }
 0x40f   : > { %v5026_v16 = vmax.f32 %v4978_v27, 0.0  ;;  %v5547_v5 = vsel %vm598_vm0, %v16511_v31, %v5546_v34  ;;  %v5549_v46 = vsel %vm598_vm0, %v5546_v34, %v5548_v24  ;;  %v5909_v20 = vrot.slane %v5907_v41, 3  ;;  %v16618_v34 = vpop.permute.xlu1 %5234 }
 0x410   : > { %v5364_v56 = vmul.f32 %v5155_v9, %v5028_v4  ;;  %13099 = vmatmul.mubr.bf16.vlgmr.msra.gmra.mrb[0].mxu1 %v5547_v5  ;;  %v5912_v3 = vrot.slane %v5910_v35, 4  ;;  %v5919_v12 = vshll.u32 %v16560_v23, 16  ;;  %v5361_v59 = vmul.f32 %v16525_v38, %v5025_v19 }
 0x411   : > { %v5362_v25 = vmul.f32 %v16527_v57, %v5026_v16  ;;  %v13044_v31 = vpop.f32.mrb[8].mxu0  ;;  %13102 = vmatprep.mubr.bf16.mxu1 %v5549_v46  ;;  %13147 = vmatpush3.bf16.msra.mxu1 %v16522_v28  ;;  %v6440_v21 = vrot.slane %v5907_v41, 4  ;;  %v6441_v15 = vrot.slane %v5910_v35, 5  ;;  %v6444_v38 = vrot.slane %v5916_v1, 4  ;;  %v14769_v1 = vld [vmem:[%s18688_s3 + $0x18] sm:$0xff]  }
 0x412   : > { %v16591_v10 = vpack.c.bf16 %v5364_v56, %v5363_v52  ;;  %v4983_v9 = vadd.f32 %v13044_v31, %v16548_v0  ;;  %v4759_v63 = vpop.f32.mrb[9].mxu0  ;;  %13148 = vmatprep.subr.bf16.mxu1 %v14767_v53  ;;  %v5921_v32 = vrot.slane %v5919_v12, 4  ;;  %v16600_v28 = vor.u32 %v5912_v3, %v5909_v20 }
 0x413   : > { %v16597_v62 = vpack.c.bf16 %v5362_v25, %v5361_v59  ;;  %v4981_v57 = vadd.f32 %v16548_v0, %v4759_v63  ;;  %v13045_v33 = vpop.f32.mrb[10].mxu0  ;;  %v16602_v45 = vor.u32 %v6441_v15, %v6440_v21  ;;  %v6445_v60 = vrot.slane %v5919_v12, 5 }
 0x414   : > { %5438 = vst [vmem:[#allocation3 + $0x30] sm:$0xff] %v16591_v10  ;;  %v5031_v39 = vmax.f32 %v4983_v9, 0.0  ;;  %v4984_v6 = vadd.f32 %v13045_v33, %v16548_v0  ;;  %v4762_v50 = vpop.f32.mrb[11].mxu0  ;;  %v5552_v48 = vrot.slane %v16591_v10, 4  ;;  %v5922_v8 = vor.u32 %v5921_v32, %v5918_v30  ;;  %v16659_v9 = vpop.permute.xlu0 %5239 }
 0x415   : > { %5437 = vst [vmem:[#allocation3 + $0x28] sm:$0xff] %v16597_v62  ;;  %v5029_v29 = vmax.f32 %v4981_v57, 0.0  ;;  %v4982_v61 = vadd.f32 %v16548_v0, %v4762_v50  ;;  %v5550_v17 = vrot.slane %v16597_v62, 4  ;;  %13149 = vmatpush3.bf16.msra.mxu1 %v14767_v53  ;;  %v5925_v19 = vshrl.u32 %v16597_v62, 16  ;;  %v16667_v33 = vpop.permute.xlu1 %5244 }
 0x416   : > { %v5367_v13 = vmul.f32 %v16533_v43, %v5031_v39  ;;  %v5032_v47 = vmax.f32 %v4984_v6, 0.0  ;;  %13150 = vmatprep.subr.bf16.mxu1 %v14768_v11  ;;  %v5928_v27 = vshll.u32 %v16597_v62, 16  ;;  %v16630_v53 = vsel %vm945_vm1, %v16600_v28, %v5922_v8 }
 0x417   : > { %v5365_v41 = vmul.f32 %v16529_v37, %v5029_v29  ;;  %v5030_v52 = vmax.f32 %v4982_v61, 0.0  ;;  %v5551_v4 = vsel %vm598_vm0, %v5548_v24, %v5550_v17  ;;  %v5553_v43 = vsel %vm598_vm0, %v5550_v17, %v5552_v48  ;;  %v14771_v17 = vld [vmem:[%s18688_s3 + $0x28] sm:$0xff]  }
 0x418   : > { %v5368_v35 = vmul.f32 %v16535_v2, %v5032_v47  ;;  %13103 = vmatmul.mubr.bf16.gmra.mrb[4].mxu1 %v5551_v4  ;;  %v5927_v16 = vrot.slane %v5925_v19, 3  ;;  %v5930_v37 = vrot.slane %v5928_v27, 4  ;;  %v5934_v5 = vshrl.u32 %v16591_v10, 16 }
 0x419   : > { %v5366_v23 = vmul.f32 %v16531_v36, %v5030_v52  ;;  %v13048_v24 = vpop.f32.mrb[12].mxu0  ;;  %13106 = vmatprep.mubr.bf16.mxu1 %v5553_v43  ;;  %13151 = vmatpush3.bf16.msra.mxu1 %v14768_v11  ;;  %v5937_v2 = vshll.u32 %v16591_v10, 16  ;;  %v16642_v46 = vsel %vm1485_vm2, %v16517_v49, %v16602_v45  ;;  %v14770_v36 = vld [vmem:[%s18688_s3 + $0x20] sm:$0xff]   ;;  %v16650_v12 = vor.u32 %v6445_v60, %v6444_v38 }
 0x41a   : > { %18895 = vst [vmem:[#allocation5_spill] sm:$0xff] %v16642_v46  ;;  %v16644_v30 = vpack.c.bf16 %v5368_v35, %v5367_v13  ;;  %v4987_v56 = vadd.f32 %v13048_v24, %v16548_v0  ;;  %v4775_v20 = vpop.f32.mrb[13].mxu0  ;;  %13152 = vmatprep.subr.bf16.mxu1 %v14769_v1  ;;  %v5931_v3 = vor.u32 %v5930_v37, %v5927_v16  ;;  %v5936_v21 = vrot.slane %v5934_v5, 3 }
 0x41b   : > { %v16652_v59 = vpack.c.bf16 %v5366_v23, %v5365_v41  ;;  %v4985_v25 = vadd.f32 %v16548_v0, %v4775_v20  ;;  %v13049_v31 = vpop.f32.mrb[14].mxu0  ;;  %v5939_v15 = vrot.slane %v5937_v2, 4  ;;  %v16701_v23 = vpop.permute.xlu0 %5249 }
 0x41c   : > { %5440 = vst [vmem:[#allocation3 + $0x40] sm:$0xff] %v16644_v30  ;;  %v5035_v63 = vmax.f32 %v4987_v56, 0.0  ;;  %v4988_v11 = vadd.f32 %v13049_v31, %v16548_v0  ;;  %v4778_v32 = vpop.f32.mrb[15].mxu0  ;;  %v5556_v38 = vrot.slane %v16644_v30, 4  ;;  %v16665_v57 = vsel %vm945_vm1, %v5922_v8, %v5931_v3 }
 0x41d   : > { %5439 = vst [vmem:[#allocation3 + $0x38] sm:$0xff] %v16652_v59  ;;  %v5033_v39 = vmax.f32 %v4985_v25, 0.0  ;;  %v4986_v6 = vadd.f32 %v16548_v0, %v4778_v32  ;;  %v5554_v50 = vrot.slane %v16652_v59, 4  ;;  %13153 = vmatpush3.bf16.msra.mxu1 %v14769_v1  ;;  %v5940_v60 = vor.u32 %v5939_v15, %v5936_v21  ;;  %v16713_v25 = vpop.permute.xlu1 %5254 }
 0x41e   : > { %v5371_v29 = vmul.f32 %v16541_v22, %v5035_v63  ;;  %v5036_v61 = vmax.f32 %v4988_v11, 0.0  ;;  %13154 = vmatprep.subr.bf16.mxu1 %v14770_v36  ;;  %v18766_v8 = vshrl.u32 %v16652_v59, 16  ;;  %v18765_v13 = vshll.u32 %v16652_v59, 16 }
 0x41f   : > { %v5369_v47 = vmul.f32 %v16537_v58, %v5033_v39  ;;  %v5034_v41 = vmax.f32 %v4986_v6, 0.0  ;;  %v5555_v1 = vsel %vm598_vm0, %v5552_v48, %v5554_v50  ;;  %v5557_v22 = vsel %vm598_vm0, %v5554_v50, %v5556_v38 }
 0x420   : > { %v5372_v52 = vmul.f32 %v16543_v40, %v5036_v61  ;;  %13107 = vmatmul.mubr.bf16.gmra.mrb[8].mxu1 %v5555_v1  ;;  %v16687_v4 = vsel %vm945_vm1, %v5931_v3, %v5940_v60  ;;  %v5945_v43 = vrot.slane %v18766_v8, 3  ;;  %v5948_v58 = vrot.slane %v18765_v13, 4 }
 0x421   : > { %v5370_v35 = vmul.f32 %v16539_v51, %v5034_v41  ;;  %v13052_v16 = vpop.f32.mrb[16].mxu0  ;;  %13110 = vmatprep.mubr.bf16.mxu1 %v5557_v22  ;;  %13155 = vmatpush3.bf16.msra.mxu1 %v14770_v36  ;;  %v18764_v48 = vshrl.u32 %v16644_v30, 16  ;;  %v18763_v37 = vshll.u32 %v16644_v30, 16  ;;  %v16699_v40 = vsel %vm1485_vm2, %v16602_v45, %v16650_v12  ;;  %v14772_v51 = vld [vmem:[%s18688_s3 + $0x30] sm:$0xff]   ;;  %v14773_v22 = vld [vmem:[%s18688_s3 + $0x38] sm:$0xff]  }
 0x422   : > { %18896 = vst [vmem:[#allocation8_spill] sm:$0xff] %v16699_v40  ;;  %v16703_v24 = vpack.c.bf16 %v5372_v52, %v5371_v29  ;;  %v4991_v56 = vadd.f32 %v13052_v16, %v16548_v0  ;;  %v4791_v20 = vpop.f32.mrb[17].mxu0  ;;  %13156 = vmatprep.subr.bf16.mxu1 %v14771_v17  ;;  %v5949_v36 = vor.u32 %v5948_v58, %v5945_v43  ;;  %v16711_v3 = vrot.slane %v5925_v19, 4 }
 0x423   : > { %v16715_v45 = vpack.c.bf16 %v5370_v35, %v5369_v47  ;;  %v4989_v31 = vadd.f32 %v16548_v0, %v4791_v20  ;;  %v13053_v21 = vpop.f32.mrb[18].mxu0  ;;  %v5954_v15 = vrot.slane %v18764_v48, 3  ;;  %v5957_v63 = vrot.slane %v18763_v37, 4  ;;  %v16744_v35 = vpop.permute.xlu0 %5259 }
 0x424   : > { %5442 = vst [vmem:[#allocation3 + $0x50] sm:$0xff] %v16703_v24  ;;  %v5039_v11 = vmax.f32 %v4991_v56, 0.0  ;;  %v4992_v32 = vadd.f32 %v13053_v21, %v16548_v0  ;;  %v4794_v19 = vpop.f32.mrb[19].mxu0  ;;  %v5560_v39 = vrot.slane %v16703_v24, 4  ;;  %v16726_v6 = vsel %vm945_vm1, %v5940_v60, %v5949_v36 }
 0x425   : > { %5441 = vst [vmem:[#allocation3 + $0x48] sm:$0xff] %v16715_v45  ;;  %v5037_v50 = vmax.f32 %v4989_v31, 0.0  ;;  %v4990_v29 = vadd.f32 %v16548_v0, %v4794_v19  ;;  %v5558_v61 = vrot.slane %v16715_v45, 4  ;;  %13157 = vmatpush3.bf16.msra.mxu1 %v14771_v17  ;;  %v5958_v47 = vor.u32 %v5957_v63, %v5954_v15  ;;  %v16754_v31 = vpop.permute.xlu1 %5264 }
 0x426   : > { %v5375_v41 = vmul.f32 %v16558_v42, %v5039_v11  ;;  %v5040_v1 = vmax.f32 %v4992_v32, 0.0  ;;  %13158 = vmatprep.subr.bf16.mxu1 %v14772_v51  ;;  %v18760_v60 = vshrl.u32 %v16715_v45, 16  ;;  %v18757_v52 = vshll.u32 %v16715_v45, 16 }
 0x427   : > { %v5373_v43 = vmul.f32 %v16552_v7, %v5037_v50  ;;  %v5038_v58 = vmax.f32 %v4990_v29, 0.0  ;;  %v5559_v17 = vsel %vm598_vm0, %v5556_v38, %v5558_v61  ;;  %v5561_v42 = vsel %vm598_vm0, %v5558_v61, %v5560_v39 }
 0x428   : > { %v5376_v16 = vmul.f32 %v16564_v55, %v5040_v1  ;;  %13111 = vmatmul.mubr.bf16.gmra.mrb[12].mxu1 %v5559_v17  ;;  %v16748_v56 = vsel %vm945_vm1, %v5949_v36, %v5958_v47  ;;  %v5963_v7 = vrot.slane %v18760_v60, 3  ;;  %v5966_v20 = vrot.slane %v18757_v52, 4 }
 0x429   : > { %v5374_v38 = vmul.f32 %v16555_v18, %v5038_v58  ;;  %v13056_v21 = vpop.f32.mrb[20].mxu0  ;;  %13114 = vmatprep.mubr.bf16.mxu1 %v5561_v42  ;;  %13159 = vmatpush3.bf16.msra.mxu1 %v14772_v51  ;;  %v18756_v15 = vshrl.u32 %v16703_v24, 16  ;;  %v18751_v55 = vshll.u32 %v16703_v24, 16  ;;  %v6449_v36 = vrot.slane %v5928_v27, 5 }
 0x42a   : > { %v16761_v63 = vpack.c.bf16 %v5376_v16, %v5375_v41  ;;  %v4995_v11 = vadd.f32 %v13056_v21, %v16548_v0  ;;  %v4807_v32 = vpop.f32.mrb[21].mxu0  ;;  %13160 = vmatprep.subr.bf16.mxu1 %v14773_v22  ;;  %v5967_v19 = vor.u32 %v5966_v20, %v5963_v7  ;;  %v16766_v18 = vrot.slane %v5934_v5, 4  ;;  %v16784_v7 = vpop.permute.xlu0 %5269 }
 0x42b   : > { %v16768_v50 = vpack.c.bf16 %v5374_v38, %v5373_v43  ;;  %v4993_v51 = vadd.f32 %v16548_v0, %v4807_v32  ;;  %v13057_v29 = vpop.f32.mrb[22].mxu0  ;;  %v5972_v62 = vrot.slane %v18756_v15, 3  ;;  %v5975_v27 = vrot.slane %v18751_v55, 4 }
 0x42c   : > { %5444 = vst [vmem:[#allocation3 + $0x60] sm:$0xff] %v16761_v63  ;;  %v5043_v61 = vmax.f32 %v4995_v11, 0.0  ;;  %v4996_v41 = vadd.f32 %v13057_v29, %v16548_v0  ;;  %v4810_v1 = vpop.f32.mrb[23].mxu0  ;;  %v5564_v5 = vrot.slane %v16761_v63, 4  ;;  %v16779_v43 = vsel %vm945_vm1, %v5958_v47, %v5967_v19  ;;  %v16789_v47 = vpop.permute.xlu1 %5274 }
 0x42d   : > { %5443 = vst [vmem:[#allocation3 + $0x58] sm:$0xff] %v16768_v50  ;;  %v5041_v58 = vmax.f32 %v4993_v51, 0.0  ;;  %v4994_v17 = vadd.f32 %v16548_v0, %v4810_v1  ;;  %v5562_v42 = vrot.slane %v16768_v50, 4  ;;  %13161 = vmatpush3.bf16.msra.mxu1 %v14773_v22  ;;  %v5976_v16 = vor.u32 %v5975_v27, %v5972_v62 }
 0x42e   : > { %v5379_v20 = vmul.f32 %v16610_v26, %v5043_v61  ;;  %v5044_v38 = vmax.f32 %v4996_v41, 0.0  ;;  %v18750_v21 = vshrl.u32 %v16768_v50, 16  ;;  %v18749_v11 = vshll.u32 %v16768_v50, 16 }
 0x42f   : > { %v5377_v32 = vmul.f32 %v16583_v54, %v5041_v58  ;;  %v5042_v51 = vmax.f32 %v4994_v17, 0.0  ;;  %v5563_v29 = vsel %vm598_vm0, %v5560_v39, %v5562_v42  ;;  %v5565_v22 = vsel %vm598_vm0, %v5562_v42, %v5564_v5 }
 0x430   : > { %v5380_v62 = vmul.f32 %v16618_v34, %v5044_v38  ;;  %13115 = vmatmul.mubr.bf16.gmra.mrb[16].mxu1 %v5563_v29  ;;  %v16798_v26 = vsel %vm945_vm1, %v5967_v19, %v5976_v16  ;;  %v5981_v27 = vrot.slane %v18750_v21, 3  ;;  %v5984_v61 = vrot.slane %v18749_v11, 4 }
 0x431   : > { %v5378_v54 = vmul.f32 %v16586_v14, %v5042_v51  ;;  %v13060_v41 = vpop.f32.mrb[24].mxu0  ;;  %13118 = vmatprep.mubr.bf16.mxu1 %v5565_v22  ;;  %v18748_v39 = vshrl.u32 %v16761_v63, 16  ;;  %v18747_v1 = vshll.u32 %v16761_v63, 16  ;;  %v16808_v34 = vor.u32 %v6449_v36, %v16711_v3  ;;  %v16822_v36 = vpop.permute.xlu0 %5279 }
 0x432   : > { %v16810_v58 = vpack.c.bf16 %v5380_v62, %v5379_v20  ;;  %v4999_v19 = vadd.f32 %v13060_v41, %v16548_v0  ;;  %v4823_v17 = vpop.f32.mrb[25].mxu0  ;;  %v5985_v42 = vor.u32 %v5984_v61, %v5981_v27  ;;  %v6453_v38 = vrot.slane %v5937_v2, 5  ;;  %v16830_v27 = vpop.permute.xlu1 %5284 }
 0x433   : > { %v16815_v29 = vpack.c.bf16 %v5378_v54, %v5377_v32  ;;  %v4997_v14 = vadd.f32 %v16548_v0, %v4823_v17  ;;  %v13061_v51 = vpop.f32.mrb[26].mxu0  ;;  %v5990_v22 = vrot.slane %v18748_v39, 3  ;;  %v5993_v3 = vrot.slane %v18747_v1, 4 }
 0x434   : > { %5446 = vst [vmem:[#allocation3 + $0x70] sm:$0xff] %v16810_v58  ;;  %v5047_v20 = vmax.f32 %v4999_v19, 0.0  ;;  %v5000_v62 = vadd.f32 %v13061_v51, %v16548_v0  ;;  %v4826_v10 = vpop.f32.mrb[27].mxu0  ;;  %v5568_v2 = vrot.slane %v16810_v58, 4  ;;  %v16828_v32 = vsel %vm945_vm1, %v5976_v16, %v5985_v42 }
 0x435   : > { %5445 = vst [vmem:[#allocation3 + $0x68] sm:$0xff] %v16815_v29  ;;  %v5045_v61 = vmax.f32 %v4997_v14, 0.0  ;;  %v4998_v54 = vadd.f32 %v16548_v0, %v4826_v10  ;;  %v5566_v41 = vrot.slane %v16815_v29, 4  ;;  %v5994_v17 = vor.u32 %v5993_v3, %v5990_v22 }
 0x436   : > { %v5383_v19 = vmul.f32 %v16701_v23, %v5047_v20  ;;  %v5048_v1 = vmax.f32 %v5000_v62, 0.0  ;;  %v18755_v51 = vshrl.u32 %v16815_v29, 16  ;;  %v18754_v39 = vshll.u32 %v16815_v29, 16 }
 0x437   : > { %v5381_v16 = vmul.f32 %v16659_v9, %v5045_v61  ;;  %v5046_v11 = vmax.f32 %v4998_v54, 0.0  ;;  %v5567_v21 = vsel %vm598_vm0, %v5564_v5, %v5566_v41  ;;  %v5569_v55 = vsel %vm598_vm0, %v5566_v41, %v5568_v2  ;;  %v16852_v9 = vld [vmem:[%s18688_s3 + $0x80] sm:$0xff]  }
 0x438   : > { %v5384_v14 = vmul.f32 %v16713_v25, %v5048_v1  ;;  %13119 = vmatmul.mubr.bf16.gmra.mrb[20].mxu1 %v5567_v21  ;;  %v16843_v10 = vsel %vm945_vm1, %v5985_v42, %v5994_v17  ;;  %v5999_v23 = vrot.slane %v18755_v51, 3  ;;  %v6002_v22 = vrot.slane %v18754_v39, 4  ;;  %v16862_v42 = vpop.permute.xlu0 %5289  ;;  %13210 = vmatprep.subr.bf16.mxu1 %v16852_v9 }
 0x439   : > { %v5382_v5 = vmul.f32 %v16667_v33, %v5046_v11  ;;  %v13064_v3 = vpop.f32.mrb[28].mxu0  ;;  %13122 = vmatprep.mubr.bf16.mxu1 %v5569_v55  ;;  %v18752_v25 = vshrl.u32 %v16810_v58, 16  ;;  %v18753_v21 = vshll.u32 %v16810_v58, 16  ;;  %v16860_v1 = vsel %vm1485_vm2, %v16650_v12, %v16808_v34  ;;  %v16871_v55 = vpop.permute.xlu1 %5294 }
 0x43a   : > { %18897 = vst [vmem:[#allocation9_spill] sm:$0xff] %v16860_v1  ;;  %v16864_v20 = vpack.c.bf16 %v5384_v14, %v5383_v19  ;;  %v5003_v62 = vadd.f32 %v13064_v3, %v16548_v0  ;;  %v4839_v61 = vpop.f32.mrb[29].mxu0  ;;  %v6003_v54 = vor.u32 %v6002_v22, %v5999_v23  ;;  %v16869_v33 = vor.u32 %v6453_v38, %v16766_v18 }
 0x43b   : > { %v16873_v11 = vpack.c.bf16 %v5382_v5, %v5381_v16  ;;  %v5001_v12 = vadd.f32 %v16548_v0, %v4839_v61  ;;  %v13065_v41 = vpop.f32.mrb[30].mxu0  ;;  %v6008_v19 = vrot.slane %v18752_v25, 3  ;;  %v6011_v14 = vrot.slane %v18753_v21, 4 }
 0x43c   : > { %5448 = vst [vmem:[#allocation3 + $0x80] sm:$0xff] %v16864_v20  ;;  %v5051_v23 = vmax.f32 %v5003_v62, 0.0  ;;  %v5004_v22 = vadd.f32 %v13065_v41, %v16548_v0  ;;  %v4842_v18 = vpop.f32.mrb[31].mxu0  ;;  %v5572_v38 = vrot.slane %v16864_v20, 4  ;;  %v16884_v16 = vsel %vm945_vm1, %v5994_v17, %v6003_v54 }
 0x43d   : > { %5447 = vst [vmem:[#allocation3 + $0x78] sm:$0xff] %v16873_v11  ;;  %v5049_v5 = vmax.f32 %v5001_v12, 0.0  ;;  %v5002_v3 = vadd.f32 %v16548_v0, %v4842_v18  ;;  %v5570_v61 = vrot.slane %v16873_v11, 4  ;;  %v6012_v25 = vor.u32 %v6011_v14, %v6008_v19  ;;  %v16895_v12 = vld [vmem:[#allocation3 + $0x8] sm:$0xf8]  ;;  %v16897_v18 = vpop.permute.xlu0 %5299 }
 0x43e   : > { %v5387_v21 = vmul.f32 %v16784_v7, %v5051_v23  ;;  %v5052_v39 = vmax.f32 %v5004_v22, 0.0  ;;  %v18759_v62 = vshrl.u32 %v16873_v11, 16  ;;  %v18758_v41 = vshll.u32 %v16873_v11, 16  ;;  %v16907_v23 = vpop.permute.xlu1 %5304 }
 0x43f   : > { %v5385_v51 = vmul.f32 %v16744_v35, %v5049_v5  ;;  %v5050_v15 = vmax.f32 %v5002_v3, 0.0  ;;  %v5571_v17 = vsel %vm598_vm0, %v5568_v2, %v5570_v61  ;;  %v5573_v52 = vsel %vm598_vm0, %v5570_v61, %v5572_v38 }
 0x440   : > { %v5388_v19 = vmul.f32 %v16789_v47, %v5052_v39  ;;  %13123 = vmatmul.mubr.bf16.gmra.mrb[24].mxu1 %v5571_v17  ;;  %v16901_v7 = vsel %vm945_vm1, %v6003_v54, %v6012_v25  ;;  %v6017_v14 = vrot.slane %v18759_v62, 3  ;;  %v6020_v35 = vrot.slane %v18758_v41, 4 }
 0x441   : > { %v5386_v2 = vmul.f32 %v16754_v31, %v5050_v15  ;;  %v13068_v22 = vpop.f32.mrb[32].mxu0  ;;  %13126 = vmatprep.mubr.bf16.mxu1 %v5573_v52  ;;  %v18762_v5 = vshrl.u32 %v16864_v20, 16  ;;  %v18761_v47 = vshll.u32 %v16864_v20, 16  ;;  %v16915_v39 = vsel %vm1485_vm2, %v16808_v34, %v16869_v33 }
 0x442   : > { %18898 = vst [vmem:[#allocation6_spill] sm:$0xff] %v16915_v39  ;;  %v16917_v54 = vpack.c.bf16 %v5388_v19, %v5387_v21  ;;  %v5007_v3 = vadd.f32 %v13068_v22, %v16548_v0  ;;  %v4855_v61 = vpop.f32.mrb[33].mxu0  ;;  %v5890_v17 = vshrl.u32 %v16895_v12, 16  ;;  %v6021_v41 = vor.u32 %v6020_v35, %v6017_v14  ;;  %v5315_v48 = vpop.permute.xlu1 %5314 }
 0x443   : > { %v16921_v31 = vpack.c.bf16 %v5386_v2, %v5385_v51  ;;  %v5005_v52 = vadd.f32 %v16548_v0, %v4855_v61  ;;  %v13069_v15 = vpop.f32.mrb[34].mxu0  ;;  %v6026_v62 = vrot.slane %v18762_v5, 3  ;;  %v6029_v34 = vrot.slane %v18761_v47, 4  ;;  %v5310_v47 = vpop.permute.xlu0 %5309 }
 0x444   : > { %5450 = vst [vmem:[#allocation3 + $0x90] sm:$0xff] %v16917_v54  ;;  %v5055_v21 = vmax.f32 %v5007_v3, 0.0  ;;  %v5008_v19 = vadd.f32 %v13069_v15, %v16548_v0  ;;  %v4858_v22 = vpop.f32.mrb[35].mxu0  ;;  %v5576_v60 = vrot.slane %v16917_v54, 4  ;;  %v16932_v51 = vsel %vm945_vm1, %v6012_v25, %v6021_v41 }
 0x445   : > { %5449 = vst [vmem:[#allocation3 + $0x88] sm:$0xff] %v16921_v31  ;;  %v5053_v14 = vmax.f32 %v5005_v52, 0.0  ;;  %v5006_v35 = vadd.f32 %v16548_v0, %v4858_v22  ;;  %v5574_v2 = vrot.slane %v16921_v31, 4  ;;  %v6030_v61 = vor.u32 %v6029_v34, %v6026_v62 }
 0x446   : > { %v5056_v5 = vmax.f32 %v5008_v19, 0.0  ;;  %v5893_v3 = vshll.u32 %v16895_v12, 16  ;;  %v18767_v15 = vshrl.u32 %v16921_v31, 16  ;;  %v18770_v37 = vshll.u32 %v16921_v31, 16 }
 0x447   : > { %v5391_v25 = vmul.f32 %v16862_v42, %v5055_v21  ;;  %v5054_v13 = vmax.f32 %v5006_v35, 0.0  ;;  %v5575_v8 = vsel %vm598_vm0, %v5572_v38, %v5574_v2  ;;  %v5577_v52 = vsel %vm598_vm0, %v5574_v2, %v5576_v60 }
 0x448   : > { %v5392_v22 = vmul.f32 %v16871_v55, %v5056_v5  ;;  %13127 = vmatmul.mubr.bf16.gmra.mrb[28].mxu1 %v5575_v8  ;;  %v16945_v62 = vsel %vm945_vm1, %v6021_v41, %v6030_v61  ;;  %v6035_v12 = vrot.slane %v18767_v15, 3  ;;  %v6038_v34 = vrot.slane %v18770_v37, 4 }
 0x449   : > { %v5389_v19 = vmul.f32 %v16822_v36, %v5053_v14  ;;  %v5390_v42 = vmul.f32 %v16830_v27, %v5054_v13  ;;  %v13072_v21 = vpop.f32.mrb[36].mxu0  ;;  %13130 = vmatprep.mubr.bf16.mxu1 %v5577_v52  ;;  %v18769_v38 = vshrl.u32 %v16917_v54, 16  ;;  %v18768_v55 = vshll.u32 %v16917_v54, 16  ;;  %v16967_v52 = vpop.permute.xlu0 %5319 }
 0x44a   : > { %v16955_v8 = vpack.c.bf16 %v5392_v22, %v5391_v25  ;;  %v5011_v41 = vadd.f32 %v13072_v21, %v16548_v0  ;;  %v4871_v5 = vpop.f32.mrb[37].mxu0  ;;  %v16958_v35 = vrot.slane %v5890_v17, 3  ;;  %v6039_v2 = vor.u32 %v6038_v34, %v6035_v12 }
 0x44b   : > { %v16960_v15 = vpack.c.bf16 %v5390_v42, %v5389_v19  ;;  %v5009_v36 = vadd.f32 %v16548_v0, %v4871_v5  ;;  %v13073_v14 = vpop.f32.mrb[38].mxu0  ;;  %v6044_v13 = vrot.slane %v18769_v38, 3  ;;  %v6047_v27 = vrot.slane %v18768_v55, 4  ;;  %v16975_v19 = vpop.permute.xlu1 %5324 }
 0x44c   : > { %5452 = vst [vmem:[#allocation3 + $0xa0] sm:$0xff] %v16955_v8  ;;  %v5059_v25 = vmax.f32 %v5011_v41, 0.0  ;;  %v5012_v17 = vadd.f32 %v13073_v14, %v16548_v0  ;;  %v4874_v22 = vpop.f32.mrb[39].mxu0  ;;  %v5580_v12 = vrot.slane %v16955_v8, 4  ;;  %v16973_v34 = vsel %vm945_vm1, %v6030_v61, %v6039_v2 }
 0x44d   : > { %5451 = vst [vmem:[#allocation3 + $0x98] sm:$0xff] %v16960_v15  ;;  %v5057_v42 = vmax.f32 %v5009_v36, 0.0  ;;  %v5010_v21 = vadd.f32 %v16548_v0, %v4874_v22  ;;  %v5578_v5 = vrot.slane %v16960_v15, 4  ;;  %v6048_v55 = vor.u32 %v6047_v27, %v6044_v13 }
 0x44e   : > { %v5060_v38 = vmax.f32 %v5012_v17, 0.0  ;;  %v16980_v41 = vrot.slane %v5893_v3, 4  ;;  %v18774_v14 = vshrl.u32 %v16960_v15, 16  ;;  %v18773_v37 = vshll.u32 %v16960_v15, 16 }
 0x44f   : > { %v5395_v39 = vmul.f32 %v5310_v47, %v5059_v25  ;;  %v5058_v61 = vmax.f32 %v5010_v21, 0.0  ;;  %v5579_v1 = vsel %vm598_vm0, %v5576_v60, %v5578_v5  ;;  %v5581_v40 = vsel %vm598_vm0, %v5578_v5, %v5580_v12  ;;  %v5335_v5 = vpop.permute.xlu1 %5334 }
 0x450   : > { %v5396_v46 = vmul.f32 %v5315_v48, %v5060_v38  ;;  %13131 = vmatmul.mubr.bf16.gmra.mrb[32].mxu1 %v5579_v1  ;;  %v16987_v36 = vsel %vm945_vm1, %v6039_v2, %v6048_v55  ;;  %v6053_v13 = vrot.slane %v18774_v14, 3  ;;  %v6056_v3 = vrot.slane %v18773_v37, 4  ;;  %v5330_v1 = vpop.permute.xlu0 %5329 }
 0x451   : > { %18899 = vst [vmem:[#allocation7_spill] sm:$0xff] %v16987_v36  ;;  %v5393_v27 = vmul.f32 %v16897_v18, %v5057_v42  ;;  %v5394_v47 = vmul.f32 %v16907_v23, %v5058_v61  ;;  %v13076_v25 = vpop.f32.mrb[40].mxu0  ;;  %13134 = vmatprep.mubr.bf16.mxu1 %v5581_v40  ;;  %v18771_v60 = vshrl.u32 %v16955_v8, 16  ;;  %v18772_v48 = vshll.u32 %v16955_v8, 16 }
 0x452   : > { %v16997_v38 = vpack.c.bf16 %v5396_v46, %v5395_v39  ;;  %v5015_v2 = vadd.f32 %v13076_v25, %v16548_v0  ;;  %v4887_v17 = vpop.f32.mrb[41].mxu0  ;;  %v6057_v21 = vor.u32 %v6056_v3, %v6053_v13 }
 0x453   : > { %v17002_v18 = vpack.c.bf16 %v5394_v47, %v5393_v27  ;;  %v5013_v23 = vadd.f32 %v16548_v0, %v4887_v17  ;;  %v13077_v40 = vpop.f32.mrb[42].mxu0  ;;  %v6062_v42 = vrot.slane %v18771_v60, 3  ;;  %v6065_v46 = vrot.slane %v18772_v48, 4 }
 0x454   : > { %5454 = vst [vmem:[#allocation3 + $0xb0] sm:$0xff] %v16997_v38  ;;  %v5063_v39 = vmax.f32 %v5015_v2, 0.0  ;;  %v5016_v61 = vadd.f32 %v13077_v40, %v16548_v0  ;;  %v4890_v25 = vpop.f32.mrb[43].mxu0  ;;  %v5584_v13 = vrot.slane %v16997_v38, 4  ;;  %v17013_v3 = vsel %vm945_vm1, %v6048_v55, %v6057_v21 }
 0x455   : > { %18900 = vst [vmem:[#allocation12_spill] sm:$0xff] %v17013_v3  ;;  %5453 = vst [vmem:[#allocation3 + $0xa8] sm:$0xff] %v17002_v18  ;;  %v5061_v27 = vmax.f32 %v5013_v23, 0.0  ;;  %v5014_v47 = vadd.f32 %v16548_v0, %v4890_v25  ;;  %v5582_v17 = vrot.slane %v17002_v18, 4  ;;  %v6066_v60 = vor.u32 %v6065_v46, %v6062_v42  ;;  %v5340_v23 = vpop.permute.xlu0 %5339 }
 0x456   : > { %v5064_v48 = vmax.f32 %v5016_v61, 0.0  ;;  %v18777_v37 = vshrl.u32 %v17002_v18, 16  ;;  %v18776_v2 = vshll.u32 %v17002_v18, 16  ;;  %v18901_v40 = vshrl.u32 %v16652_v59, 16  ;;  %v5345_v61 = vpop.permute.xlu1 %5344 }
 0x457   : > { %v5399_v22 = vmul.f32 %v5330_v1, %v5063_v39  ;;  %v5062_v49 = vmax.f32 %v5014_v47, 0.0  ;;  %v5583_v55 = vsel %vm598_vm0, %v5580_v12, %v5582_v17  ;;  %v5585_v3 = vsel %vm598_vm0, %v5582_v17, %v5584_v13 }
 0x458   : > { %v6456_v14 = vrot.slane %v18901_v40, 4  ;;  %v5400_v36 = vmul.f32 %v5335_v5, %v5064_v48  ;;  %13135 = vmatmul.mubr.bf16.gmra.mrb[36].mxu1 %v5583_v55  ;;  %v17025_v25 = vsel %vm945_vm1, %v6057_v21, %v6066_v60  ;;  %v6071_v42 = vrot.slane %v18777_v37, 3 }
 0x459   : > { %18902 = vst [vmem:[#allocation13_spill] sm:$0xff] %v17025_v25  ;;  %v6074_v46 = vrot.slane %v18776_v2, 4  ;;  %v5397_v1 = vmul.f32 %v16967_v52, %v5061_v27  ;;  %v5398_v39 = vmul.f32 %v16975_v19, %v5062_v49  ;;  %v13080_v12 = vpop.f32.mrb[44].mxu0  ;;  %13138 = vmatprep.mubr.bf16.mxu1 %v5585_v3  ;;  %v18779_v47 = vshrl.u32 %v16997_v38, 16 }
 0x45a   : > { %v18778_v48 = vshll.u32 %v16997_v38, 16  ;;  %v17035_v5 = vpack.c.bf16 %v5400_v36, %v5399_v22  ;;  %v5019_v21 = vadd.f32 %v13080_v12, %v16548_v0  ;;  %v4903_v17 = vpop.f32.mrb[45].mxu0  ;;  %v18903_v55 = vshll.u32 %v16652_v59, 16  ;;  %v5355_v59 = vpop.permute.xlu1 %5354 }
 0x45b   : > { %v6075_v40 = vor.u32 %v6074_v46, %v6071_v42  ;;  %v17040_v37 = vpack.c.bf16 %v5398_v39, %v5397_v1  ;;  %v5017_v52 = vadd.f32 %v16548_v0, %v4903_v17  ;;  %v13081_v49 = vpop.f32.mrb[46].mxu0  ;;  %v6080_v19 = vrot.slane %v18779_v47, 3  ;;  %v5350_v17 = vpop.permute.xlu0 %5349 }
 0x45c   : > { %v6457_v2 = vrot.slane %v18903_v55, 5  ;;  %v6083_v3 = vrot.slane %v18778_v48, 4  ;;  %5456 = vst [vmem:[#allocation3 + $0xc0] sm:$0xff] %v17035_v5  ;;  %v5067_v36 = vmax.f32 %v5019_v21, 0.0  ;;  %v5020_v22 = vadd.f32 %v13081_v49, %v16548_v0  ;;  %v4906_v27 = vpop.f32.mrb[47].mxu0 }
 0x45d   : > { %v17051_v42 = vsel %vm945_vm1, %v6066_v60, %v6075_v40  ;;  %5455 = vst [vmem:[#allocation3 + $0xb8] sm:$0xff] %v17040_v37  ;;  %v5065_v46 = vmax.f32 %v5017_v52, 0.0  ;;  %v5018_v1 = vadd.f32 %v16548_v0, %v4906_v27  ;;  %v5586_v39 = vrot.slane %v17040_v37, 4 }
 0x45e   : > { %18904 = vst [vmem:[#allocation10_spill] sm:$0xff] %v17051_v42  ;;  %v6084_v12 = vor.u32 %v6083_v3, %v6080_v19  ;;  %v5068_v55 = vmax.f32 %v5020_v22, 0.0  ;;  %v6087_v21 = vshrl.u32 %v17040_v37, 16  ;;  %v18780_v49 = vshll.u32 %v17040_v37, 16 }
 0x45f   : > { %v18905_v48 = vshrl.u32 %v16644_v30, 16  ;;  %v5403_v60 = vmul.f32 %v5350_v17, %v5067_v36  ;;  %v5066_v42 = vmax.f32 %v5018_v1, 0.0  ;;  %v5587_v25 = vsel %vm598_vm0, %v5584_v13, %v5586_v39 }
 0x460   : > { %v18906_v52 = vrot.slane %v17035_v5, 4  ;;  %v5404_v27 = vmul.f32 %v5355_v59, %v5068_v55  ;;  %13139 = vmatmul.mubr.bf16.gmra.mrb[40].mxu1 %v5587_v25  ;;  %v17065_v19 = vsel %vm945_vm1, %v6075_v40, %v6084_v12  ;;  %v6089_v3 = vrot.slane %v6087_v21, 3 }
 0x461   : > { %v6460_v47 = vrot.slane %v18905_v48, 4  ;;  %v6092_v48 = vrot.slane %v18780_v49, 4  ;;  %v5401_v22 = vmul.f32 %v5340_v23, %v5065_v46  ;;  %v5402_v36 = vmul.f32 %v5345_v61, %v5066_v42 }
 0x462   : > { %v5589_v0 = vsel %vm598_vm0, %v5586_v39, %v18906_v52  ;;  %v6096_v13 = vshrl.u32 %v17035_v5, 16  ;;  %v6099_v1 = vshll.u32 %v17035_v5, 16  ;;  %v5434_v17 = vpack.c.bf16 %v5404_v27, %v5403_v60 }
 0x463   : > { %13142 = vmatprep.mubr.bf16.mxu1 %v5589_v0  ;;  %v6093_v39 = vor.u32 %v6092_v48, %v6089_v3  ;;  %v6458_v59 = vor.u32 %v6457_v2, %v6456_v14  ;;  %v18907_v25 = vshll.u32 %v16644_v30, 16  ;;  %v5433_v55 = vpack.c.bf16 %v5402_v36, %v5401_v22 }
 0x464   : > { %v18908_v52 = vor.u32 %v16980_v41, %v16958_v35  ;;  %v6098_v23 = vrot.slane %v6096_v13, 3  ;;  %v6101_v61 = vrot.slane %v6099_v1, 4  ;;  %5458 = vst [vmem:[#allocation3 + $0xd0] sm:$0xff] %v5434_v17  ;;  %v18909_v2 = vshrl.u32 %v16715_v45, 16 }
 0x465   : > { %v6461_v40 = vrot.slane %v18907_v25, 5  ;;  %v17085_v42 = vsel %vm945_vm1, %v6084_v12, %v6093_v39  ;;  %v17089_v30 = vsel %vm1485_vm2, %v16869_v33, %v6458_v59  ;;  %5457 = vst [vmem:[#allocation3 + $0xc8] sm:$0xff] %v5433_v55  ;;  %v18910_v46 = vshll.u32 %v16715_v45, 16 }
 0x466   : > { %v5905_v49 = vsel %vm945_vm1, %v18908_v52, %v16576_v44  ;;  %v6464_v35 = vrot.slane %v18909_v2, 4  ;;  %v6102_v41 = vor.u32 %v6101_v61, %v6098_v23  ;;  %v18911_v0 = vshrl.u32 %v16703_v24, 16 }
 0x467   : > { %v6462_v14 = vor.u32 %v6461_v40, %v6460_v47  ;;  %v6465_v60 = vrot.slane %v18910_v46, 5  ;;  %v18912_v3 = vshll.u32 %v16703_v24, 16  ;;  %v18913_v33 = vshrl.u32 %v16768_v50, 16 }
 0x468   : > { %v6468_v27 = vrot.slane %v18911_v0, 4  ;;  %v18914_v22 = vshll.u32 %v16768_v50, 16  ;;  %v18915_v17 = vshrl.u32 %v16761_v63, 16  ;;  %v17109_v45 = vsel %vm945_vm1, %v6093_v39, %v6102_v41 }
 0x469   : > { %v6469_v12 = vrot.slane %v18912_v3, 5  ;;  %v17100_v48 = vsel %vm1485_vm2, %v6458_v59, %v6462_v14  ;;  %v6472_v47 = vrot.slane %v18913_v33, 4  ;;  %v6466_v40 = vor.u32 %v6465_v60, %v6464_v35 }
 0x46a   : > { %v6473_v36 = vrot.slane %v18914_v22, 5  ;;  %v6476_v25 = vrot.slane %v18915_v17, 4  ;;  %v18916_v24 = vshll.u32 %v16761_v63, 16  ;;  %v18917_v59 = vshrl.u32 %v16815_v29, 16 }
 0x46b   : > { %v6470_v55 = vor.u32 %v6469_v12, %v6468_v27  ;;  %v18918_v2 = vshll.u32 %v16815_v29, 16  ;;  %v18919_v50 = vshrl.u32 %v16810_v58, 16  ;;  %v17120_v3 = vsel %vm1485_vm2, %v6462_v14, %v6466_v40 }
 0x46c   : > { %v6477_v52 = vrot.slane %v18916_v24, 5  ;;  %v6474_v23 = vor.u32 %v6473_v36, %v6472_v47  ;;  %v6480_v61 = vrot.slane %v18917_v59, 4  ;;  %v18920_v63 = vshll.u32 %v16810_v58, 16  ;;  %v5483_v24 = vld [vmem:[#allocation3 + $0xc8] sm:$0xf] }
 0x46d   : > { %v6481_v46 = vrot.slane %v18918_v2, 5  ;;  %v6484_v0 = vrot.slane %v18919_v50, 4  ;;  %v17123_v39 = vsel %vm1485_vm2, %v6466_v40, %v6470_v55  ;;  %v18921_v29 = vshrl.u32 %v16873_v11, 16 }
 0x46e   : > { %v6478_v35 = vor.u32 %v6477_v52, %v6476_v25  ;;  %v6485_v60 = vrot.slane %v18920_v63, 5  ;;  %v17128_v27 = vsel %vm1485_vm2, %v6470_v55, %v6474_v23  ;;  %v18922_v47 = vshll.u32 %v16873_v11, 16 }
 0x46f   : > { %v6482_v12 = vor.u32 %v6481_v46, %v6480_v61  ;;  %v6488_v33 = vrot.slane %v18921_v29, 4  ;;  %v18923_v17 = vshrl.u32 %v16864_v20, 16  ;;  %v18924_v58 = vshll.u32 %v16864_v20, 16 }
 0x470   : > { %v6489_v22 = vrot.slane %v18922_v47, 5  ;;  %v17135_v14 = vsel %vm1485_vm2, %v6474_v23, %v6478_v35  ;;  %v6486_v36 = vor.u32 %v6485_v60, %v6484_v0  ;;  %v18925_v59 = vshrl.u32 %v16921_v31, 16 }
 0x471   : > { %v6492_v25 = vrot.slane %v18923_v17, 4  ;;  %v6493_v40 = vrot.slane %v18924_v58, 5  ;;  %v17142_v55 = vsel %vm1485_vm2, %v6478_v35, %v6482_v12  ;;  %v18926_v11 = vshll.u32 %v16921_v31, 16 }
 0x472   : > { %v6490_v52 = vor.u32 %v6489_v22, %v6488_v33  ;;  %v6496_v61 = vrot.slane %v18925_v59, 4  ;;  %v5590_v23 = vrot.slane %v5483_v24, 4  ;;  %v6105_v46 = vshrl.u32 %v5483_v24, 16 }
 0x473   : > { %v6497_v2 = vrot.slane %v18926_v11, 5  ;;  %v6108_v50 = vshll.u32 %v5483_v24, 16  ;;  %v17149_v0 = vsel %vm1485_vm2, %v6482_v12, %v6486_v36  ;;  %v6494_v63 = vor.u32 %v6493_v40, %v6492_v25 }
 0x474   : > { %v17152_v20 = vsel %vm1485_vm2, %v6486_v36, %v6490_v52  ;;  %v18927_v35 = vshrl.u32 %v16917_v54, 16  ;;  %v18928_v33 = vrot.slane %v17035_v5, 4  ;;  %v6107_v31 = vrot.slane %v6105_v46, 3 }
 0x475   : > { %v6498_v60 = vor.u32 %v6497_v2, %v6496_v61  ;;  %v6110_v22 = vrot.slane %v6108_v50, 4  ;;  %v18929_v17 = vshll.u32 %v16917_v54, 16  ;;  %v17162_v12 = vsel %vm1485_vm2, %v6490_v52, %v6494_v63 }
 0x476   : > { %v6500_v29 = vrot.slane %v18927_v35, 4  ;;  %v5591_v47 = vsel %vm598_vm0, %v18928_v33, %v5590_v23  ;;  %v18930_v25 = vshrl.u32 %v16960_v15, 16  ;;  %v18931_v24 = vshll.u32 %v16960_v15, 16 }
 0x477   : > { %v6501_v58 = vrot.slane %v18929_v17, 5  ;;  %13143 = vmatmul.mubr.bf16.gmra.mrb[44].mxu1 %v5591_v47  ;;  %v17165_v36 = vsel %vm1485_vm2, %v6494_v63, %v6498_v60  ;;  %v6111_v61 = vor.u32 %v6110_v22, %v6107_v31  ;;  %v18932_v2 = vshrl.u32 %v16955_v8, 16 }
 0x478   : > { %v6504_v40 = vrot.slane %v18930_v25, 4  ;;  %v6505_v59 = vrot.slane %v18931_v24, 5  ;;  %13162 = vmatprep.mubr.bf16.mxu1 %v5905_v49  ;;  %v18933_v23 = vshll.u32 %v16955_v8, 16  ;;  %v18934_v50 = vshrl.u32 %v17002_v18, 16 }
 0x479   : > { %v6502_v11 = vor.u32 %v6501_v58, %v6500_v29  ;;  %v6508_v54 = vrot.slane %v18932_v2, 4  ;;  %v18935_v35 = vshll.u32 %v17002_v18, 16  ;;  %v18936_v47 = vshrl.u32 %v16997_v38, 16 }
 0x47a   : > { %v6509_v46 = vrot.slane %v18933_v23, 5  ;;  %v6506_v52 = vor.u32 %v6505_v59, %v6504_v40  ;;  %v6512_v63 = vrot.slane %v18934_v50, 4  ;;  %v17182_v49 = vsel %vm945_vm1, %v6102_v41, %v6111_v61  ;;  %v14775_v59 = vld [vmem:[%s18688_s3 + $0x88] sm:$0xff]  }
 0x47b   : > { %v6513_v33 = vrot.slane %v18935_v35, 5  ;;  %v6516_v15 = vrot.slane %v18936_v47, 4  ;;  %v17185_v29 = vsel %vm1485_vm2, %v6498_v60, %v6502_v11  ;;  %v18937_v8 = vshll.u32 %v16997_v38, 16  ;;  %v18941_v47 = vld [vmem:[#allocation13_spill] sm:$0xff] }
 0x47c   : > { %v6510_v31 = vor.u32 %v6509_v46, %v6508_v54  ;;  %v17190_v17 = vsel %vm1485_vm2, %v6502_v11, %v6506_v52  ;;  %v6520_v18 = vrot.slane %v6087_v21, 4  ;;  %v18938_v25 = vshll.u32 %v17040_v37, 16  ;;  %v17250_v54 = vld [vmem:[#allocation3 + $0x20] sm:$0xff] }
 0x47d   : > { %v6517_v22 = vrot.slane %v18937_v8, 5  ;;  %v6514_v58 = vor.u32 %v6513_v33, %v6512_v63  ;;  %v6524_v60 = vrot.slane %v6096_v13, 4  ;;  %v6525_v38 = vrot.slane %v6099_v1, 5  ;;  %v17248_v1 = vld [vmem:[#allocation3 + $0x18] sm:$0xff]  ;;  %v14782_v63 = vld [vmem:[%s18688_s3 + $0xc0] sm:$0xff]  }
 0x47e   : > { %v6521_v40 = vrot.slane %v18938_v25, 5  ;;  %v17197_v41 = vsel %vm1485_vm2, %v6506_v52, %v6510_v31  ;;  %v5914_v37 = vsel %vm945_vm1, %v16576_v44, %v16600_v28  ;;  %v14776_v44 = vld [vmem:[%s18688_s3 + $0x90] sm:$0xff]   ;;  %v14777_v28 = vld [vmem:[%s18688_s3 + $0x98] sm:$0xff]   ;;  %v6929_v23 = vshrl.u32 %v17248_v1, 16  ;;  %v18940_v33 = vld [vmem:[#allocation12_spill] sm:$0xff] }
 0x47f   : > { %v6518_v24 = vor.u32 %v6517_v22, %v6516_v15  ;;  %v17207_v61 = vsel %vm1485_vm2, %v6510_v31, %v6514_v58  ;;  %v17215_v2 = vor.u32 %v6525_v38, %v6524_v60  ;;  %13163 = vmatmul.mubr.bf16.vlgmr.msra.gmra.mrb[0].mxu1 %v5914_v37  ;;  %v6937_v46 = vshrl.u32 %v17250_v54, 16  ;;  %v14889_v15 = vld [vmem:[#allocation3 + $0x8] sm:$0xf0]  ;;  %v18944_v22 = vld [vmem:[#allocation5_spill] sm:$0xff]  ;;  %v14786_v60 = vld [vmem:[%s18688_s3 + $0xe0] sm:$0xff]  }
 0x480   : > { %v6522_v21 = vor.u32 %v6521_v40, %v6520_v18  ;;  %13166 = vmatprep.mubr.bf16.mxu1 %v16630_v53  ;;  %13211 = vmatpush3.bf16.msra.mxu1 %v16852_v9  ;;  %v14778_v53 = vld [vmem:[%s18688_s3 + $0xa0] sm:$0xff]   ;;  %v14779_v9 = vld [vmem:[%s18688_s3 + $0xa8] sm:$0xff]   ;;  %v6432_v31 = vshll.u32 %v14889_v15, 16 }
 0x481   : > { %v17213_v11 = vsel %vm1485_vm2, %v6514_v58, %v6518_v24  ;;  %13212 = vmatprep.subr.bf16.mxu1 %v14775_v59  ;;  %v18945_v58 = vld [vmem:[#allocation8_spill] sm:$0xff]  ;;  %v18947_v25 = vld [vmem:[#allocation9_spill] sm:$0xff] }
 0x482   : > { %v17218_v5 = vsel %vm1485_vm2, %v6518_v24, %v6522_v21  ;;  %v17224_v13 = vsel %vm1485_vm2, %v6522_v21, %v17215_v2  ;;  %v6434_v8 = vrot.slane %v6432_v31, 5  ;;  %v18948_v24 = vld [vmem:[#allocation6_spill] sm:$0xff]  ;;  %v14787_v21 = vld [vmem:[%s18688_s3 + $0xe8] sm:$0xff]  }
 0x484   : > { %13213 = vmatpush3.bf16.msra.mxu1 %v14775_v59 }
 0x485   : > { %13214 = vmatprep.subr.bf16.mxu1 %v14776_v44 }
 0x487   : > { %13167 = vmatmul.mubr.bf16.gmra.mrb[4].mxu1 %v16665_v57  ;;  %v14780_v57 = vld [vmem:[%s18688_s3 + $0xb0] sm:$0xff]  }
 0x488   : > { %13170 = vmatprep.mubr.bf16.mxu1 %v16687_v4  ;;  %13215 = vmatpush3.bf16.msra.mxu1 %v14776_v44  ;;  %v14781_v4 = vld [vmem:[%s18688_s3 + $0xb8] sm:$0xff]   ;;  %v14788_v44 = vld [vmem:[%s18688_s3 + $0xf0] sm:$0xff]  }
 0x489   : > { %13216 = vmatprep.subr.bf16.mxu1 %v14777_v28 }
 0x48c   : > { %13217 = vmatpush3.bf16.msra.mxu1 %v14777_v28  ;;  %v14789_v28 = vld [vmem:[%s18688_s3 + $0xf8] sm:$0xff]  }
 0x48d   : > { %13218 = vmatprep.subr.bf16.mxu1 %v14778_v53 }
 0x48f   : > { %13171 = vmatmul.mubr.bf16.gmra.mrb[8].mxu1 %v16726_v6  ;;  %v6932_v6 = vshll.u32 %v17248_v1, 16 }
 0x490   : > { %13174 = vmatprep.mubr.bf16.mxu1 %v16748_v56  ;;  %13219 = vmatpush3.bf16.msra.mxu1 %v14778_v53  ;;  %v6940_v56 = vshll.u32 %v17250_v54, 16  ;;  %v17362_v53 = vld [vmem:[#allocation3 + $0x30] sm:$0xff] }
 0x491   : > { %13220 = vmatprep.subr.bf16.mxu1 %v14779_v9  ;;  %v7850_v52 = vrot.slane %v6932_v6, 1  ;;  %18951 = vst [vmem:[#allocation14_spill] sm:$0xff] %v17362_v53 }
 0x492   : > { %v7855_v50 = vrot.slane %v6940_v56, 1 }
 0x494   : > { %13221 = vmatpush3.bf16.msra.mxu1 %v14779_v9  ;;  %v17364_v9 = vld [vmem:[#allocation3 + $0x38] sm:$0xff] }
 0x495   : > { %13222 = vmatprep.subr.bf16.mxu1 %v14780_v57  ;;  %18952 = vst [vmem:[#allocation15_spill] sm:$0xff] %v17364_v9 }
 0x497   : > { %13175 = vmatmul.mubr.bf16.gmra.mrb[12].mxu1 %v16779_v43  ;;  %v7851_v43 = vor.u32 %v7850_v52, %v6929_v23 }
 0x498   : > { %13178 = vmatprep.mubr.bf16.mxu1 %v16798_v26  ;;  %13223 = vmatpush3.bf16.msra.mxu1 %v14780_v57  ;;  %v17266_v26 = vor.u32 %v7855_v50, %v6937_v46 }
 0x499   : > { %13224 = vmatprep.subr.bf16.mxu1 %v14781_v4  ;;  %v17274_v35 = vsel %vm2904_vm4, %v7851_v43, %v7855_v50 }
 0x49c   : > { %13225 = vmatpush3.bf16.msra.mxu1 %v14781_v4 }
 0x49d   : > { %13274 = vmatprep.subr.bf16.mxu1 %v14782_v63 }
 0x49f   : > { %13179 = vmatmul.mubr.bf16.gmra.mrb[16].mxu1 %v16828_v32  ;;  %v18939_v32 = vld [vmem:[#allocation7_spill] sm:$0xff] }
 0x4a0   : > { %13182 = vmatprep.mubr.bf16.mxu1 %v16843_v10  ;;  %v18942_v10 = vld [vmem:[#allocation10_spill] sm:$0xff] }
 0x4a7   : > { %13183 = vmatmul.mubr.bf16.gmra.mrb[20].mxu1 %v16884_v16  ;;  %v6429_v16 = vshrl.u32 %v14889_v15, 16 }
 0x4a8   : > { %13186 = vmatprep.mubr.bf16.mxu1 %v16901_v7 }
 0x4a9   : > { %v6431_v7 = vrot.slane %v6429_v16, 4 }
 0x4af   : > { %13187 = vmatmul.mubr.bf16.gmra.mrb[24].mxu1 %v16932_v51  ;;  %v6435_v51 = vor.u32 %v6434_v8, %v6431_v7  ;;  %v14793_v8 = vld [vmem:[%s18688_s3 + $0x118] sm:$0xff]  }
 0x4b0   : > { %13190 = vmatprep.mubr.bf16.mxu1 %v16945_v62  ;;  %v18943_v62 = vld [vmem:[#allocation4_spill] sm:$0xff] }
 0x4b7   : > { %13191 = vmatmul.mubr.bf16.gmra.mrb[28].mxu1 %v16973_v34  ;;  %v6439_v34 = vsel %vm1485_vm2, %v6435_v51, %v18943_v62 }
 0x4b8   : > { %13194 = vmatprep.mubr.bf16.mxu1 %v18939_v32  ;;  %v17388_v32 = vshll.u32 %v17362_v53, 16 }
 0x4bf   : > { %13195 = vmatmul.mubr.bf16.gmra.mrb[32].mxu1 %v18940_v33  ;;  %v17390_v33 = vld [vmem:[#allocation3 + $0x48] sm:$0xff] }
 0x4c0   : > { %13198 = vmatprep.mubr.bf16.mxu1 %v18941_v47  ;;  %18954 = vst [vmem:[#allocation19_spill] sm:$0xff] %v17390_v33  ;;  %v17393_v47 = vshll.u32 %v17364_v9, 16  ;;  %v17404_v7 = vshrl.u32 %v17390_v33, 16 }
 0x4c7   : > { %13199 = vmatmul.mubr.bf16.gmra.mrb[36].mxu1 %v18942_v10  ;;  %v14792_v10 = vld [vmem:[%s18688_s3 + $0x110] sm:$0xff]  }
 0x4c8   : > { %13202 = vmatprep.mubr.bf16.mxu1 %v17065_v19  ;;  %v14783_v19 = vld [vmem:[%s18688_s3 + $0xc8] sm:$0xff]  }
 0x4cf   : > { %13203 = vmatmul.mubr.bf16.gmra.mrb[40].mxu1 %v17085_v42  ;;  %v14784_v42 = vld [vmem:[%s18688_s3 + $0xd0] sm:$0xff]  }
 0x4d0   : > { %13206 = vmatprep.mubr.bf16.mxu1 %v17109_v45  ;;  %v14785_v45 = vld [vmem:[%s18688_s3 + $0xd8] sm:$0xff]  }
 0x4d7   : > { %13207 = vmatmul.mubr.bf16.gmra.mrb[44].mxu1 %v17182_v49  ;;  %v17302_v49 = vld [vmem:[#allocation3] sm:$0xff] }
 0x4d8   : > { %13226 = vmatprep.mubr.bf16.mxu1 %v6439_v34  ;;  %18946 = vst [vmem:[#allocation11_spill] sm:$0xff] %v17302_v49  ;;  %v18782_v18 = vshrl.u32 %v17302_v49, 16  ;;  %v18781_v40 = vshll.u32 %v17302_v49, 16  ;;  %v17563_v49 = vld [vmem:[#allocation3 + $0xb0] sm:$0xff] }
 0x4d9   : > { %18976 = vst [vmem:[#allocation32_spill] sm:$0xff] %v17563_v49 }
 0x4da   : > { %v9548_v38 = vrot.slane %v18782_v18, 4  ;;  %v9549_v59 = vrot.slane %v18781_v40, 5 }
 0x4dc   : > { %v17318_v37 = vor.u32 %v9549_v59, %v9548_v38 }
 0x4de   : > { %18949 = vst [vmem:[#allocation16_spill] sm:$0xff] %v17318_v37 }
 0x4df   : > { %13227 = vmatmul.mubr.bf16.vlgmr.msra.gmra.mrb[0].mxu1 %v18944_v22  ;;  %v17413_v22 = vld [vmem:[#allocation3 + $0x50] sm:$0xff] }
 0x4e0   : > { %13230 = vmatprep.mubr.bf16.mxu1 %v18945_v58  ;;  %13275 = vmatpush3.bf16.msra.mxu1 %v14782_v63  ;;  %v17385_v63 = vld [vmem:[#allocation3 + $0x40] sm:$0xff]  ;;  %18955 = vst [vmem:[#allocation7_spill] sm:$0xff] %v17413_v22 }
 0x4e1   : > { %13276 = vmatprep.subr.bf16.mxu1 %v14783_v19  ;;  %18953 = vst [vmem:[#allocation18_spill] sm:$0xff] %v17385_v63  ;;  %v17400_v16 = vshrl.u32 %v17385_v63, 16  ;;  %v17416_v58 = vshll.u32 %v17385_v63, 16 }
 0x4e3   : > { %v6971_v62 = vrot.slane %v17400_v16, 7 }
 0x4e4   : > { %13277 = vmatpush3.bf16.msra.mxu1 %v14783_v19  ;;  %v6979_v19 = vrot.slane %v17404_v7, 7 }
 0x4e5   : > { %13278 = vmatprep.subr.bf16.mxu1 %v14784_v42 }
 0x4e7   : > { %13231 = vmatmul.mubr.bf16.gmra.mrb[4].mxu1 %v18947_v25  ;;  %v14794_v25 = vld [vmem:[%s18688_s3 + $0x120] sm:$0xff]  }
 0x4e8   : > { %13234 = vmatprep.mubr.bf16.mxu1 %v18948_v24  ;;  %13279 = vmatpush3.bf16.msra.mxu1 %v14784_v42  ;;  %v17418_v42 = vld [vmem:[#allocation3 + $0x58] sm:$0xff]  ;;  %v6974_v24 = vor.u32 %v17416_v58, %v6971_v62 }
 0x4e9   : > { %13280 = vmatprep.subr.bf16.mxu1 %v14785_v45  ;;  %18956 = vst [vmem:[#allocation12_spill] sm:$0xff] %v17418_v42  ;;  %v17432_v59 = vshrl.u32 %v17418_v42, 16 }
 0x4ec   : > { %13281 = vmatpush3.bf16.msra.mxu1 %v14785_v45  ;;  %v17421_v45 = vshll.u32 %v17390_v33, 16 }
 0x4ed   : > { %13282 = vmatprep.subr.bf16.mxu1 %v14786_v60 }
 0x4ee   : > { %v6982_v38 = vor.u32 %v17421_v45, %v6979_v19 }
 0x4ef   : > { %13235 = vmatmul.mubr.bf16.gmra.mrb[8].mxu1 %v17089_v30  ;;  %v14790_v30 = vld [vmem:[%s18688_s3 + $0x100] sm:$0xff]  }
 0x4f0   : > { %13238 = vmatprep.mubr.bf16.mxu1 %v17100_v48  ;;  %13283 = vmatpush3.bf16.msra.mxu1 %v14786_v60  ;;  %v6410_v48 = vld [vmem:[#allocation3 + $0xc8] sm:$0x1f]  ;;  %v17428_v60 = vshrl.u32 %v17413_v22, 16 }
 0x4f1   : > { %13284 = vmatprep.subr.bf16.mxu1 %v14787_v21 }
 0x4f4   : > { %13285 = vmatpush3.bf16.msra.mxu1 %v14787_v21  ;;  %v14795_v21 = vld [vmem:[%s18688_s3 + $0x128] sm:$0xff]  }
 0x4f5   : > { %13286 = vmatprep.subr.bf16.mxu1 %v14788_v44 }
 0x4f7   : > { %13239 = vmatmul.mubr.bf16.gmra.mrb[12].mxu1 %v17120_v3  ;;  %v6529_v3 = vshrl.u32 %v6410_v48, 16 }
 0x4f8   : > { %13242 = vmatprep.mubr.bf16.mxu1 %v17123_v39  ;;  %13287 = vmatpush3.bf16.msra.mxu1 %v14788_v44  ;;  %v6532_v39 = vshll.u32 %v6410_v48, 16  ;;  %v6995_v48 = vrot.slane %v17432_v59, 7 }
 0x4f9   : > { %13288 = vmatprep.subr.bf16.mxu1 %v14789_v28 }
 0x4fc   : > { %13289 = vmatpush3.bf16.msra.mxu1 %v14789_v28  ;;  %v6987_v28 = vrot.slane %v17428_v60, 7 }
 0x4fd   : > { %13338 = vmatprep.subr.bf16.mxu1 %v14790_v30 }
 0x4ff   : > { %13243 = vmatmul.mubr.bf16.gmra.mrb[16].mxu1 %v17128_v27  ;;  %v6882_v27 = vld [vmem:[#allocation3 + $0x10] sm:$0x80] }
 0x500   : > { %13246 = vmatprep.mubr.bf16.mxu1 %v17135_v14  ;;  %v6531_v14 = vrot.slane %v6529_v3, 4  ;;  %v17441_v3 = vld [vmem:[#allocation3 + $0x60] sm:$0xff] }
 0x501   : > { %18957 = vst [vmem:[#allocation13_spill] sm:$0xff] %v17441_v3 }
 0x507   : > { %13247 = vmatmul.mubr.bf16.gmra.mrb[20].mxu1 %v17142_v55  ;;  %v6534_v55 = vrot.slane %v6532_v39, 5  ;;  %v17444_v39 = vshll.u32 %v17413_v22, 16 }
 0x508   : > { %13250 = vmatprep.mubr.bf16.mxu1 %v17149_v0  ;;  %v6925_v0 = vshrl.u32 %v6882_v27, 16  ;;  %v17446_v27 = vld [vmem:[#allocation3 + $0x68] sm:$0xff] }
 0x509   : > { %18958 = vst [vmem:[#allocation10_spill] sm:$0xff] %v17446_v27 }
 0x50f   : > { %13251 = vmatmul.mubr.bf16.gmra.mrb[24].mxu1 %v17152_v20  ;;  %v6931_v20 = vrot.slane %v6929_v23, 7  ;;  %v17376_v23 = vshrl.u32 %v17364_v9, 16 }
 0x510   : > { %13254 = vmatprep.mubr.bf16.mxu1 %v17162_v12  ;;  %v17349_v12 = vld [vmem:[#allocation3 + $0x28] sm:$0xff] }
 0x511   : > { %18950 = vst [vmem:[#allocation17_spill] sm:$0xff] %v17349_v12  ;;  %v17367_v57 = vshll.u32 %v17349_v12, 16 }
 0x517   : > { %13255 = vmatmul.mubr.bf16.gmra.mrb[28].mxu1 %v17165_v36  ;;  %v6535_v36 = vor.u32 %v6534_v55, %v6531_v14  ;;  %v17449_v14 = vshll.u32 %v17418_v42, 16  ;;  %v14796_v55 = vld [vmem:[%s18688_s3 + $0x130] sm:$0xff]  }
 0x518   : > { %13258 = vmatprep.mubr.bf16.mxu1 %v17185_v29  ;;  %v6927_v29 = vrot.slane %v6925_v0, 7  ;;  %v6990_v0 = vor.u32 %v17444_v39, %v6987_v28 }
 0x51f   : > { %13259 = vmatmul.mubr.bf16.gmra.mrb[32].mxu1 %v17190_v17  ;;  %v6934_v17 = vor.u32 %v6932_v6, %v6931_v20 }
 0x520   : > { %13262 = vmatprep.mubr.bf16.mxu1 %v17197_v41  ;;  %v17354_v41 = vshrl.u32 %v17349_v12, 16 }
 0x527   : > { %13263 = vmatmul.mubr.bf16.gmra.mrb[36].mxu1 %v17207_v61  ;;  %v6536_v61 = vsel %vm1485_vm2, %v17215_v2, %v6535_v36  ;;  %v17372_v2 = vshrl.u32 %v17362_v53, 16  ;;  %v6998_v36 = vor.u32 %v17449_v14, %v6995_v48 }
 0x528   : > { %13266 = vmatprep.mubr.bf16.mxu1 %v17213_v11  ;;  %v6939_v11 = vrot.slane %v6937_v46, 7  ;;  %v14791_v46 = vld [vmem:[%s18688_s3 + $0x108] sm:$0xff]  }
 0x529   : > { %v6955_v50 = vrot.slane %v17372_v2, 7 }
 0x52a   : > { %v6942_v4 = vor.u32 %v6940_v56, %v6939_v11  ;;  %v6963_v56 = vrot.slane %v17376_v23, 7 }
 0x52b   : > { %v6958_v15 = vor.u32 %v17388_v32, %v6955_v50 }
 0x52c   : > { %v6943_v52 = vsel %vm1982_vm3, %v6931_v20, %v6942_v4  ;;  %v6966_v31 = vor.u32 %v17393_v47, %v6963_v56  ;;  %v6975_v44 = vsel %vm1982_vm3, %v6963_v56, %v6974_v24  ;;  %v17456_v20 = vshrl.u32 %v17441_v3, 16  ;;  %v17469_v4 = vld [vmem:[#allocation3 + $0x70] sm:$0xff] }
 0x52d   : > { %18959 = vst [vmem:[#allocation4_spill] sm:$0xff] %v17469_v4 }
 0x52e   : > { %v6967_v34 = vsel %vm1982_vm3, %v6955_v50, %v6966_v31 }
 0x52f   : > { %13267 = vmatmul.mubr.bf16.gmra.mrb[40].mxu1 %v17218_v5  ;;  %v6935_v5 = vsel %vm1982_vm3, %v6927_v29, %v6934_v17  ;;  %v17460_v29 = vshrl.u32 %v17446_v27, 16  ;;  %v14797_v17 = vld [vmem:[%s18688_s3 + $0x138] sm:$0xff]  }
 0x530   : > { %13270 = vmatprep.mubr.bf16.mxu1 %v17224_v13  ;;  %v6947_v13 = vrot.slane %v17354_v41, 7 }
 0x532   : > { %v6950_v6 = vor.u32 %v17367_v57, %v6947_v13  ;;  %v6959_v51 = vsel %vm1982_vm3, %v6947_v13, %v6958_v15  ;;  %v7011_v13 = vrot.slane %v17460_v29, 7 }
 0x534   : > { %v6951_v43 = vsel %vm1982_vm3, %v6939_v11, %v6950_v6  ;;  %v7003_v11 = vrot.slane %v17456_v20, 7  ;;  %v17472_v6 = vshll.u32 %v17441_v3, 16 }
 0x536   : > { %v7006_v50 = vor.u32 %v17472_v6, %v7003_v11 }
 0x537   : > { %13271 = vmatmul.mubr.bf16.gmra.mrb[44].mxu1 %v6536_v61  ;;  %v6991_v61 = vsel %vm1982_vm3, %v6979_v19, %v6990_v0  ;;  %v17499_v19 = vshll.u32 %v17469_v4, 16 }
 0x538   : > { %13290 = vmatprep.mubr.bf16.mxu1 %v6935_v5  ;;  %v6999_v5 = vsel %vm1982_vm3, %v6987_v28, %v6998_v36  ;;  %v7007_v15 = vsel %vm1982_vm3, %v6995_v48, %v7006_v50  ;;  %v17519_v36 = vld [vmem:[#allocation3 + $0x90] sm:$0xff] }
 0x539   : > { %18965 = vst [vmem:[#allocation21_spill] sm:$0xff] %v17519_v36 }
 0x53f   : > { %13291 = vmatmul.mubr.bf16.vlgmr.msra.gmra.mrb[0].mxu1 %v6943_v52  ;;  %v17477_v52 = vshll.u32 %v17446_v27, 16 }
 0x540   : > { %13294 = vmatprep.mubr.bf16.mxu1 %v6951_v43  ;;  %13339 = vmatpush3.bf16.msra.mxu1 %v14790_v30  ;;  %v6983_v30 = vsel %vm1982_vm3, %v6971_v62, %v6982_v38  ;;  %v17481_v43 = vshrl.u32 %v17469_v4, 16  ;;  %v17491_v62 = vld [vmem:[#allocation3 + $0x80] sm:$0xff] }
 0x541   : > { %13340 = vmatprep.subr.bf16.mxu1 %v14791_v46  ;;  %v7014_v56 = vor.u32 %v17477_v52, %v7011_v13  ;;  %18961 = vst [vmem:[#allocation8_spill] sm:$0xff] %v17491_v62 }
 0x542   : > { %v7019_v31 = vrot.slane %v17481_v43, 7 }
 0x544   : > { %13341 = vmatpush3.bf16.msra.mxu1 %v14791_v46  ;;  %v17474_v46 = vld [vmem:[#allocation3 + $0x78] sm:$0xff]  ;;  %v7022_v38 = vor.u32 %v17499_v19, %v7019_v31 }
 0x545   : > { %13342 = vmatprep.subr.bf16.mxu1 %v14792_v10  ;;  %18960 = vst [vmem:[#allocation5_spill] sm:$0xff] %v17474_v46  ;;  %v17504_v24 = vshll.u32 %v17474_v46, 16 }
 0x547   : > { %13295 = vmatmul.mubr.bf16.gmra.mrb[4].mxu1 %v6959_v51 }
 0x548   : > { %13298 = vmatprep.mubr.bf16.mxu1 %v6967_v34  ;;  %13343 = vmatpush3.bf16.msra.mxu1 %v14792_v10  ;;  %v17485_v10 = vshrl.u32 %v17474_v46, 16  ;;  %v17496_v34 = vld [vmem:[%s18688_s3 + $0x140] sm:$0xff]  }
 0x549   : > { %13344 = vmatprep.subr.bf16.mxu1 %v14793_v8 }
 0x54a   : > { %v7027_v51 = vrot.slane %v17485_v10, 7 }
 0x54c   : > { %13345 = vmatpush3.bf16.msra.mxu1 %v14793_v8  ;;  %v7015_v8 = vsel %vm1982_vm3, %v7003_v11, %v7014_v56 }
 0x54d   : > { %13346 = vmatprep.subr.bf16.mxu1 %v14794_v25 }
 0x54f   : > { %13299 = vmatmul.mubr.bf16.gmra.mrb[8].mxu1 %v6975_v44  ;;  %v7030_v44 = vor.u32 %v17504_v24, %v7027_v51 }
 0x550   : > { %13302 = vmatprep.mubr.bf16.mxu1 %v6983_v30  ;;  %13347 = vmatpush3.bf16.msra.mxu1 %v14794_v25  ;;  %v17501_v25 = vld [vmem:[#allocation3 + $0x88] sm:$0xff]  ;;  %v7023_v30 = vsel %vm1982_vm3, %v7011_v13, %v7022_v38  ;;  %v17531_v13 = vshrl.u32 %v17519_v36, 16 }
 0x551   : > { %13348 = vmatprep.subr.bf16.mxu1 %v14795_v21  ;;  %18962 = vst [vmem:[#allocation9_spill] sm:$0xff] %v17501_v25  ;;  %v17513_v28 = vshrl.u32 %v17501_v25, 16  ;;  %v17527_v11 = vshll.u32 %v17501_v25, 16 }
 0x552   : > { %18968 = vst [vmem:[#allocation24_spill] sm:$0xff] %v17531_v13 }
 0x553   : > { %18964 = vst [vmem:[#allocation20_spill] sm:$0xff] %v17513_v28  ;;  %v7043_v0 = vrot.slane %v17513_v28, 7  ;;  %18967 = vst [vmem:[#allocation23_spill] sm:$0xff] %v17527_v11  ;;  %v17607_v28 = vld [vmem:[#allocation3 + $0xd0] sm:$0xff] }
 0x554   : > { %13349 = vmatpush3.bf16.msra.mxu1 %v14795_v21  ;;  %v17509_v21 = vshrl.u32 %v17491_v62, 16  ;;  %18988 = vst [vmem:[#allocation44_spill] sm:$0xff] %v17607_v28 }
 0x555   : > { %13350 = vmatprep.subr.bf16.mxu1 %v14796_v55  ;;  %v7046_v50 = vor.u32 %v17527_v11, %v7043_v0 }
 0x556   : > { %18963 = vst [vmem:[#allocation6_spill] sm:$0xff] %v17509_v21  ;;  %v7035_v48 = vrot.slane %v17509_v21, 7  ;;  %v17590_v21 = vld [vmem:[#allocation3 + $0xc8] sm:$0xff] }
 0x557   : > { %13303 = vmatmul.mubr.bf16.gmra.mrb[12].mxu1 %v6991_v61  ;;  %v17524_v61 = vld [vmem:[#allocation3 + $0x98] sm:$0xff]  ;;  %18984 = vst [vmem:[#allocation40_spill] sm:$0xff] %v17590_v21 }
 0x558   : > { %13306 = vmatprep.mubr.bf16.mxu1 %v6999_v5  ;;  %13351 = vmatpush3.bf16.msra.mxu1 %v14796_v55  ;;  %v7031_v55 = vsel %vm1982_vm3, %v7019_v31, %v7030_v44  ;;  %18966 = vst [vmem:[#allocation22_spill] sm:$0xff] %v17524_v61  ;;  %v17535_v56 = vshrl.u32 %v17524_v61, 16  ;;  %v7051_v31 = vrot.slane %v17531_v13, 7  ;;  %v17541_v44 = vld [vmem:[#allocation3 + $0xa0] sm:$0xff]  ;;  %v17549_v40 = vshll.u32 %v17524_v61, 16 }
 0x559   : > { %13352 = vmatprep.subr.bf16.mxu1 %v14797_v17  ;;  %18970 = vst [vmem:[#allocation26_spill] sm:$0xff] %v17541_v44  ;;  %v17566_v13 = vshll.u32 %v17541_v44, 16 }
 0x55a   : > { %18969 = vst [vmem:[#allocation25_spill] sm:$0xff] %v17535_v56  ;;  %v7059_v38 = vrot.slane %v17535_v56, 7  ;;  %18973 = vst [vmem:[#allocation29_spill] sm:$0xff] %v17549_v40  ;;  %v17568_v56 = vld [vmem:[#allocation3 + $0xb8] sm:$0xff] }
 0x55b   : > { %18977 = vst [vmem:[#allocation33_spill] sm:$0xff] %v17566_v13  ;;  %18978 = vst [vmem:[#allocation34_spill] sm:$0xff] %v17568_v56 }
 0x55c   : > { %13353 = vmatpush3.bf16.msra.mxu1 %v14797_v17  ;;  %v17522_v17 = vshll.u32 %v17491_v62, 16 }
 0x55d   : > { %13402 = vmatprep.subr.bf16.mxu1 %v17496_v34 }
 0x55e   : > { %v7038_v5 = vor.u32 %v17522_v17, %v7035_v48 }
 0x55f   : > { %13307 = vmatmul.mubr.bf16.gmra.mrb[16].mxu1 %v7007_v15 }
 0x560   : > { %13310 = vmatprep.mubr.bf16.mxu1 %v7015_v8  ;;  %v7039_v15 = vsel %vm1982_vm3, %v7027_v51, %v7038_v5  ;;  %v7047_v8 = vsel %vm1982_vm3, %v7035_v48, %v7046_v50  ;;  %v17553_v5 = vshrl.u32 %v17541_v44, 16  ;;  %v7062_v48 = vor.u32 %v17549_v40, %v7059_v38 }
 0x562   : > { %18974 = vst [vmem:[#allocation30_spill] sm:$0xff] %v17553_v5  ;;  %v7063_v18 = vsel %vm1982_vm3, %v7051_v31, %v7062_v48  ;;  %v17579_v48 = vshrl.u32 %v17568_v56, 16 }
 0x564   : > { %18981 = vst [vmem:[#allocation37_spill] sm:$0xff] %v17579_v48 }
 0x567   : > { %13311 = vmatmul.mubr.bf16.gmra.mrb[20].mxu1 %v7023_v30  ;;  %v17544_v30 = vshll.u32 %v17519_v36, 16 }
 0x568   : > { %13314 = vmatprep.mubr.bf16.mxu1 %v7031_v55  ;;  %v17546_v55 = vld [vmem:[#allocation3 + $0xa8] sm:$0xff] }
 0x569   : > { %18971 = vst [vmem:[#allocation27_spill] sm:$0xff] %v17544_v30  ;;  %18972 = vst [vmem:[#allocation28_spill] sm:$0xff] %v17546_v55  ;;  %v7054_v51 = vor.u32 %v17544_v30, %v7051_v31  ;;  %v17557_v50 = vshrl.u32 %v17546_v55, 16  ;;  %v17571_v40 = vshll.u32 %v17546_v55, 16  ;;  %v17585_v30 = vld [vmem:[#allocation3 + $0xc0] sm:$0xff] }
 0x56a   : > { %18982 = vst [vmem:[#allocation38_spill] sm:$0xff] %v17585_v30 }
 0x56b   : > { %18975 = vst [vmem:[#allocation31_spill] sm:$0xff] %v17557_v50  ;;  %v7075_v37 = vrot.slane %v17557_v50, 7  ;;  %18979 = vst [vmem:[#allocation35_spill] sm:$0xff] %v17571_v40  ;;  %v7091_v50 = vrot.slane %v17579_v48, 7 }
 0x56d   : > { %v7078_v31 = vor.u32 %v17571_v40, %v7075_v37  ;;  %v17593_v40 = vshll.u32 %v17568_v56, 16 }
 0x56f   : > { %13315 = vmatmul.mubr.bf16.gmra.mrb[24].mxu1 %v7039_v15  ;;  %v7055_v15 = vsel %vm1982_vm3, %v7043_v0, %v7054_v51  ;;  %v17575_v51 = vshrl.u32 %v17563_v49, 16  ;;  %18985 = vst [vmem:[#allocation41_spill] sm:$0xff] %v17593_v40 }
 0x570   : > { %13318 = vmatprep.mubr.bf16.mxu1 %v7047_v8  ;;  %v7067_v8 = vrot.slane %v17553_v5, 7 }
 0x571   : > { %18980 = vst [vmem:[#allocation36_spill] sm:$0xff] %v17575_v51 }
 0x572   : > { %v7070_v0 = vor.u32 %v17566_v13, %v7067_v8  ;;  %v7079_v5 = vsel %vm1982_vm3, %v7067_v8, %v7078_v31  ;;  %v17588_v13 = vshll.u32 %v17563_v49, 16  ;;  %v7094_v8 = vor.u32 %v17593_v40, %v7091_v50 }
 0x573   : > { %v17601_v31 = vshrl.u32 %v17590_v21, 16  ;;  %v17613_v40 = vshll.u32 %v17590_v21, 16 }
 0x574   : > { %18983 = vst [vmem:[#allocation39_spill] sm:$0xff] %v17588_v13 }
 0x575   : > { %18987 = vst [vmem:[#allocation43_spill] sm:$0xff] %v17601_v31  ;;  %v7107_v48 = vrot.slane %v17601_v31, 7 }
 0x577   : > { %13319 = vmatmul.mubr.bf16.gmra.mrb[28].mxu1 %v7055_v15  ;;  %v7083_v15 = vrot.slane %v17575_v51, 7 }
 0x578   : > { %13322 = vmatprep.mubr.bf16.mxu1 %v7063_v18  ;;  %v7071_v18 = vsel %vm1982_vm3, %v7059_v38, %v7070_v0  ;;  %v17597_v0 = vshrl.u32 %v17585_v30, 16 }
 0x579   : > { %v7086_v38 = vor.u32 %v17588_v13, %v7083_v15  ;;  %v7095_v51 = vsel %vm1982_vm3, %v7083_v15, %v7094_v8  ;;  %v17610_v13 = vshll.u32 %v17585_v30, 16 }
 0x57a   : > { %18986 = vst [vmem:[#allocation42_spill] sm:$0xff] %v17597_v0 }
 0x57f   : > { %13323 = vmatmul.mubr.bf16.gmra.mrb[32].mxu1 %v7071_v18  ;;  %v7099_v18 = vrot.slane %v17597_v0, 7 }
 0x580   : > { %13326 = vmatprep.mubr.bf16.mxu1 %v7079_v5  ;;  %v7087_v5 = vsel %vm1982_vm3, %v7075_v37, %v7086_v38  ;;  %v17617_v37 = vshrl.u32 %v17607_v28, 16  ;;  %v7110_v38 = vor.u32 %v17613_v40, %v7107_v48 }
 0x581   : > { %v7102_v11 = vor.u32 %v17610_v13, %v7099_v18 }
 0x582   : > { %v7115_v8 = vrot.slane %v17617_v37, 7 }
 0x583   : > { %v7103_v15 = vsel %vm1982_vm3, %v7091_v50, %v7102_v11  ;;  %v14799_v11 = vld [vmem:[%s18688_s3 + $0x148] sm:$0xff]   ;;  %v14800_v50 = vld [vmem:[%s18688_s3 + $0x150] sm:$0xff]  }
 0x587   : > { %13327 = vmatmul.mubr.bf16.gmra.mrb[36].mxu1 %v7087_v5  ;;  %v17624_v5 = vshll.u32 %v17607_v28, 16 }
 0x588   : > { %13330 = vmatprep.mubr.bf16.mxu1 %v7095_v51  ;;  %v7111_v51 = vsel %vm1982_vm3, %v7099_v18, %v7110_v38  ;;  %v7863_v18 = vrot.slane %v17367_v57, 1 }
 0x589   : > { %18989 = vst [vmem:[#allocation45_spill] sm:$0xff] %v17624_v5  ;;  %v7118_v0 = vor.u32 %v17624_v5, %v7115_v8  ;;  %v14807_v8 = vld [vmem:[%s18688_s3 + $0x188] sm:$0xff]  }
 0x58a   : > { %v7867_v38 = vor.u32 %v7863_v18, %v17354_v41 }
 0x58b   : > { %v7119_v31 = vsel %vm1982_vm3, %v7107_v48, %v7118_v0  ;;  %v14804_v48 = vld [vmem:[%s18688_s3 + $0x170] sm:$0xff]   ;;  %v14805_v0 = vld [vmem:[%s18688_s3 + $0x178] sm:$0xff]  }
 0x58f   : > { %13331 = vmatmul.mubr.bf16.gmra.mrb[40].mxu1 %v7103_v15  ;;  %v7871_v15 = vrot.slane %v17388_v32, 1 }
 0x590   : > { %13334 = vmatprep.mubr.bf16.mxu1 %v7111_v51  ;;  %v7864_v51 = vsel %vm2904_vm4, %v17266_v26, %v7863_v18  ;;  %v14809_v26 = vld [vmem:[%s18688_s3 + $0x198] sm:$0xff]   ;;  %v14810_v18 = vld [vmem:[%s18688_s3 + $0x1a0] sm:$0xff]  }
 0x597   : > { %13335 = vmatmul.mubr.bf16.gmra.mrb[44].mxu1 %v7119_v31  ;;  %v14806_v31 = vld [vmem:[%s18688_s3 + $0x180] sm:$0xff]  }
 0x598   : > { %13354 = vmatprep.mubr.bf16.mxu1 %v17248_v1  ;;  %v14801_v1 = vld [vmem:[%s18688_s3 + $0x158] sm:$0xff]  }
 0x59f   : > { %13355 = vmatmul.mubr.bf16.vlgmr.msra.gmra.mrb[0].mxu1 %v17250_v54  ;;  %v14802_v54 = vld [vmem:[%s18688_s3 + $0x160] sm:$0xff]  }
 0x5a0   : > { %13358 = vmatprep.mubr.bf16.mxu1 %v17349_v12  ;;  %13403 = vmatpush3.bf16.msra.mxu1 %v17496_v34  ;;  %v14803_v34 = vld [vmem:[%s18688_s3 + $0x168] sm:$0xff]  }
 0x5a1   : > { %13404 = vmatprep.subr.bf16.mxu1 %v14799_v11 }
 0x5a4   : > { %13405 = vmatpush3.bf16.msra.mxu1 %v14799_v11  ;;  %v7872_v11 = vsel %vm2904_vm4, %v7867_v38, %v7871_v15 }
 0x5a5   : > { %13406 = vmatprep.subr.bf16.mxu1 %v14800_v50 }
 0x5a7   : > { %13359 = vmatmul.mubr.bf16.gmra.mrb[4].mxu1 %v17362_v53 }
 0x5a8   : > { %13362 = vmatprep.mubr.bf16.mxu1 %v17364_v9  ;;  %13407 = vmatpush3.bf16.msra.mxu1 %v14800_v50  ;;  %v7879_v50 = vrot.slane %v17393_v47, 1 }
 0x5a9   : > { %13408 = vmatprep.subr.bf16.mxu1 %v14801_v1 }
 0x5ac   : > { %13409 = vmatpush3.bf16.msra.mxu1 %v14801_v1  ;;  %v7883_v1 = vor.u32 %v7879_v50, %v17376_v23 }
 0x5ad   : > { %13410 = vmatprep.subr.bf16.mxu1 %v14802_v54 }
 0x5af   : > { %13363 = vmatmul.mubr.bf16.gmra.mrb[8].mxu1 %v17385_v63 }
 0x5b0   : > { %13366 = vmatprep.mubr.bf16.mxu1 %v17390_v33  ;;  %13411 = vmatpush3.bf16.msra.mxu1 %v14802_v54  ;;  %v7875_v54 = vor.u32 %v7871_v15, %v17372_v2 }
 0x5b1   : > { %13412 = vmatprep.subr.bf16.mxu1 %v14803_v34 }
 0x5b4   : > { %13413 = vmatpush3.bf16.msra.mxu1 %v14803_v34  ;;  %v7887_v34 = vrot.slane %v17416_v58, 1 }
 0x5b5   : > { %13414 = vmatprep.subr.bf16.mxu1 %v14804_v48 }
 0x5b6   : > { %v7891_v15 = vor.u32 %v7887_v34, %v17400_v16 }
 0x5b7   : > { %13367 = vmatmul.mubr.bf16.gmra.mrb[12].mxu1 %v17413_v22 }
 0x5b8   : > { %13370 = vmatprep.mubr.bf16.mxu1 %v17418_v42  ;;  %13415 = vmatpush3.bf16.msra.mxu1 %v14804_v48  ;;  %v7880_v48 = vsel %vm2904_vm4, %v7875_v54, %v7879_v50  ;;  %v8031_v42 = vrot.slane %v17624_v5, 1 }
 0x5b9   : > { %13416 = vmatprep.subr.bf16.mxu1 %v14805_v0 }
 0x5ba   : > { %v8035_v9 = vor.u32 %v8031_v42, %v17617_v37 }
 0x5bc   : > { %13417 = vmatpush3.bf16.msra.mxu1 %v14805_v0  ;;  %v7888_v0 = vsel %vm2904_vm4, %v7883_v1, %v7887_v34  ;;  %v14812_v1 = vld [vmem:[%s18688_s3 + $0x1b0] sm:$0xff]  }
 0x5bd   : > { %13466 = vmatprep.subr.bf16.mxu1 %v14806_v31 }
 0x5bf   : > { %13371 = vmatmul.mubr.bf16.gmra.mrb[16].mxu1 %v17441_v3  ;;  %v19006_v3 = vld [vmem:[#allocation42_spill] sm:$0xff] }
 0x5c0   : > { %13374 = vmatprep.mubr.bf16.mxu1 %v17446_v27  ;;  %v8023_v27 = vrot.slane %v17613_v40, 1 }
 0x5c7   : > { %13375 = vmatmul.mubr.bf16.gmra.mrb[20].mxu1 %v17469_v4 }
 0x5c8   : > { %13378 = vmatprep.mubr.bf16.mxu1 %v17474_v46 }
 0x5cf   : > { %13379 = vmatmul.mubr.bf16.gmra.mrb[24].mxu1 %v17491_v62  ;;  %v19002_v62 = vld [vmem:[#allocation41_spill] sm:$0xff] }
 0x5d0   : > { %13382 = vmatprep.mubr.bf16.mxu1 %v17501_v25  ;;  %v8007_v46 = vrot.slane %v19002_v62, 1 }
 0x5d7   : > { %13383 = vmatmul.mubr.bf16.gmra.mrb[28].mxu1 %v17519_v36  ;;  %v19001_v36 = vld [vmem:[#allocation39_spill] sm:$0xff] }
 0x5d8   : > { %13386 = vmatprep.mubr.bf16.mxu1 %v17524_v61 }
 0x5df   : > { %13387 = vmatmul.mubr.bf16.gmra.mrb[32].mxu1 %v17541_v44  ;;  %v18998_v44 = vld [vmem:[#allocation35_spill] sm:$0xff] }
 0x5e0   : > { %13390 = vmatprep.mubr.bf16.mxu1 %v17546_v55  ;;  %v7991_v61 = vrot.slane %v18998_v44, 1 }
 0x5e7   : > { %13391 = vmatmul.mubr.bf16.gmra.mrb[36].mxu1 %v17563_v49  ;;  %v18997_v49 = vld [vmem:[#allocation33_spill] sm:$0xff] }
 0x5e8   : > { %13394 = vmatprep.mubr.bf16.mxu1 %v17568_v56 }
 0x5ef   : > { %13395 = vmatmul.mubr.bf16.gmra.mrb[40].mxu1 %v17585_v30  ;;  %v18994_v30 = vld [vmem:[#allocation29_spill] sm:$0xff] }
 0x5f0   : > { %13398 = vmatprep.mubr.bf16.mxu1 %v17590_v21  ;;  %v7975_v56 = vrot.slane %v18994_v30, 1 }
 0x5f7   : > { %13399 = vmatmul.mubr.bf16.gmra.mrb[44].mxu1 %v17607_v28 }
 0x5f8   : > { %13418 = vmatprep.mubr.bf16.mxu1 %v17274_v35  ;;  %v14808_v35 = vld [vmem:[%s18688_s3 + $0x190] sm:$0xff]  }
 0x5ff   : > { %13419 = vmatmul.mubr.bf16.vlgmr.msra.gmra.mrb[0].mxu1 %v7864_v51  ;;  %v14811_v51 = vld [vmem:[%s18688_s3 + $0x1a8] sm:$0xff]  }
 0x600   : > { %13422 = vmatprep.mubr.bf16.mxu1 %v7872_v11  ;;  %13467 = vmatpush3.bf16.msra.mxu1 %v14806_v31  ;;  %v7895_v31 = vrot.slane %v17421_v45, 1 }
 0x601   : > { %13468 = vmatprep.subr.bf16.mxu1 %v14807_v8 }
 0x602   : > { %v7899_v38 = vor.u32 %v7895_v31, %v17404_v7  ;;  %v7896_v11 = vsel %vm2904_vm4, %v7891_v15, %v7895_v31 }
 0x604   : > { %13469 = vmatpush3.bf16.msra.mxu1 %v14807_v8  ;;  %v7903_v8 = vrot.slane %v17444_v39, 1 }
 0x605   : > { %13470 = vmatprep.subr.bf16.mxu1 %v14808_v35 }
 0x606   : > { %v7904_v50 = vsel %vm2904_vm4, %v7899_v38, %v7903_v8  ;;  %v7907_v34 = vor.u32 %v7903_v8, %v17428_v60  ;;  %v7935_v8 = vrot.slane %v17499_v19, 1 }
 0x607   : > { %13423 = vmatmul.mubr.bf16.gmra.mrb[4].mxu1 %v7880_v48  ;;  %v14813_v48 = vld [vmem:[%s18688_s3 + $0x1b8] sm:$0xff]  }
 0x608   : > { %13426 = vmatprep.mubr.bf16.mxu1 %v7888_v0  ;;  %13471 = vmatpush3.bf16.msra.mxu1 %v14808_v35  ;;  %v7911_v35 = vrot.slane %v17449_v14, 1 }
 0x609   : > { %13472 = vmatprep.subr.bf16.mxu1 %v14809_v26 }
 0x60a   : > { %v7915_v54 = vor.u32 %v7911_v35, %v17432_v59  ;;  %v7912_v0 = vsel %vm2904_vm4, %v7907_v34, %v7911_v35  ;;  %v17733_v35 = vld [vmem:[%s18688_s3 + $0x1c0] sm:$0xff]   ;;  %v7951_v34 = vrot.slane %v17522_v17, 1 }
 0x60c   : > { %13473 = vmatpush3.bf16.msra.mxu1 %v14809_v26  ;;  %v7919_v26 = vrot.slane %v17472_v6, 1 }
 0x60d   : > { %13474 = vmatprep.subr.bf16.mxu1 %v14810_v18 }
 0x60e   : > { %v7920_v31 = vsel %vm2904_vm4, %v7915_v54, %v7919_v26  ;;  %v7923_v15 = vor.u32 %v7919_v26, %v17456_v20  ;;  %v7939_v54 = vor.u32 %v7935_v8, %v17481_v43 }
 0x60f   : > { %13427 = vmatmul.mubr.bf16.gmra.mrb[8].mxu1 %v7896_v11 }
 0x610   : > { %13430 = vmatprep.mubr.bf16.mxu1 %v7904_v50  ;;  %13475 = vmatpush3.bf16.msra.mxu1 %v14810_v18  ;;  %v7927_v18 = vrot.slane %v17477_v52, 1  ;;  %v7943_v50 = vrot.slane %v17504_v24, 1 }
 0x611   : > { %13476 = vmatprep.subr.bf16.mxu1 %v14811_v51 }
 0x612   : > { %v7931_v38 = vor.u32 %v7927_v18, %v17460_v29  ;;  %v7944_v26 = vsel %vm2904_vm4, %v7939_v54, %v7943_v50 }
 0x614   : > { %13477 = vmatpush3.bf16.msra.mxu1 %v14811_v51  ;;  %v7928_v51 = vsel %vm2904_vm4, %v7923_v15, %v7927_v18  ;;  %v7936_v11 = vsel %vm2904_vm4, %v7931_v38, %v7935_v8  ;;  %v18991_v18 = vld [vmem:[#allocation20_spill] sm:$0xff]  ;;  %v18992_v15 = vld [vmem:[#allocation6_spill] sm:$0xff] }
 0x615   : > { %13478 = vmatprep.subr.bf16.mxu1 %v14812_v1 }
 0x617   : > { %13431 = vmatmul.mubr.bf16.gmra.mrb[12].mxu1 %v7912_v0  ;;  %v18990_v0 = vld [vmem:[#allocation23_spill] sm:$0xff] }
 0x618   : > { %13434 = vmatprep.mubr.bf16.mxu1 %v7920_v31  ;;  %13479 = vmatpush3.bf16.msra.mxu1 %v14812_v1  ;;  %v7947_v1 = vor.u32 %v7943_v50, %v17485_v10  ;;  %v7959_v31 = vrot.slane %v18990_v0, 1  ;;  %v18995_v50 = vld [vmem:[#allocation25_spill] sm:$0xff] }
 0x619   : > { %13480 = vmatprep.subr.bf16.mxu1 %v14813_v48  ;;  %v7979_v54 = vor.u32 %v7975_v56, %v18995_v50 }
 0x61a   : > { %v7963_v38 = vor.u32 %v7959_v31, %v18991_v18 }
 0x61c   : > { %13481 = vmatpush3.bf16.msra.mxu1 %v14813_v48  ;;  %v7952_v48 = vsel %vm2904_vm4, %v7947_v1, %v7951_v34  ;;  %v18996_v1 = vld [vmem:[#allocation24_spill] sm:$0xff] }
 0x61d   : > { %13530 = vmatprep.subr.bf16.mxu1 %v17733_v35 }
 0x61f   : > { %13435 = vmatmul.mubr.bf16.gmra.mrb[16].mxu1 %v7928_v51  ;;  %v7955_v51 = vor.u32 %v7951_v34, %v18992_v15 }
 0x620   : > { %13438 = vmatprep.mubr.bf16.mxu1 %v7936_v11  ;;  %v18993_v11 = vld [vmem:[#allocation27_spill] sm:$0xff] }
 0x621   : > { %v7967_v28 = vrot.slane %v18993_v11, 1  ;;  %v7960_v21 = vsel %vm2904_vm4, %v7955_v51, %v7959_v31 }
 0x623   : > { %v7968_v8 = vsel %vm2904_vm4, %v7963_v38, %v7967_v28  ;;  %v19000_v38 = vld [vmem:[#allocation30_spill] sm:$0xff] }
 0x627   : > { %13439 = vmatmul.mubr.bf16.gmra.mrb[20].mxu1 %v7944_v26  ;;  %v7971_v26 = vor.u32 %v7967_v28, %v18996_v1 }
 0x628   : > { %13442 = vmatprep.mubr.bf16.mxu1 %v7952_v48  ;;  %v7983_v48 = vrot.slane %v18997_v49, 1 }
 0x629   : > { %v7976_v55 = vsel %vm2904_vm4, %v7971_v26, %v7975_v56  ;;  %v19003_v56 = vld [vmem:[#allocation37_spill] sm:$0xff] }
 0x62a   : > { %v7984_v34 = vsel %vm2904_vm4, %v7979_v54, %v7983_v48  ;;  %v7987_v51 = vor.u32 %v7983_v48, %v19000_v38  ;;  %v19004_v54 = vld [vmem:[#allocation36_spill] sm:$0xff] }
 0x62c   : > { %v7992_v25 = vsel %vm2904_vm4, %v7987_v51, %v7991_v61  ;;  %v7827_v51 = vld [vmem:[#allocation3 + $0xd8] sm:$0x1] }
 0x62d   : > { %v8037_v63 = vshll.u32 %v7827_v51, 16  ;;  %v8457_v51 = vrot.slane %v17376_v23, 3 }
 0x62f   : > { %13443 = vmatmul.mubr.bf16.gmra.mrb[24].mxu1 %v7960_v21  ;;  %v18999_v21 = vld [vmem:[#allocation31_spill] sm:$0xff] }
 0x630   : > { %13446 = vmatprep.mubr.bf16.mxu1 %v7968_v8  ;;  %v7995_v31 = vor.u32 %v7991_v61, %v18999_v21  ;;  %v7999_v8 = vrot.slane %v19001_v36, 1  ;;  %v19005_v61 = vld [vmem:[#allocation43_spill] sm:$0xff] }
 0x632   : > { %v8000_v28 = vsel %vm2904_vm4, %v7995_v31, %v7999_v8  ;;  %v8003_v26 = vor.u32 %v7999_v8, %v19004_v54  ;;  %v8027_v31 = vor.u32 %v8023_v27, %v19005_v61 }
 0x634   : > { %v8008_v4 = vsel %vm2904_vm4, %v8003_v26, %v8007_v46 }
 0x637   : > { %13447 = vmatmul.mubr.bf16.gmra.mrb[28].mxu1 %v7976_v55  ;;  %v8011_v55 = vor.u32 %v8007_v46, %v19003_v56  ;;  %v8439_v46 = vrot.slane %v17354_v41, 3 }
 0x638   : > { %13450 = vmatprep.mubr.bf16.mxu1 %v7984_v34  ;;  %v8015_v34 = vrot.slane %v17610_v13, 1 }
 0x63a   : > { %v8016_v48 = vsel %vm2904_vm4, %v8011_v55, %v8015_v34  ;;  %v8442_v55 = vrot.slane %v17367_v57, 4 }
 0x63c   : > { %v8443_v53 = vor.u32 %v8442_v55, %v8439_v46  ;;  %v8475_v46 = vrot.slane %v17404_v7, 3  ;;  %v8478_v55 = vrot.slane %v17421_v45, 4 }
 0x63f   : > { %13451 = vmatmul.mubr.bf16.gmra.mrb[32].mxu1 %v7992_v25  ;;  %v8386_v25 = vld [vmem:[#allocation3 + $0x20] sm:$0xf8] }
 0x640   : > { %13454 = vmatprep.mubr.bf16.mxu1 %v8000_v28  ;;  %v8019_v28 = vor.u32 %v8015_v34, %v19006_v3  ;;  %v8429_v22 = vshrl.u32 %v8386_v25, 16  ;;  %v8432_v8 = vshll.u32 %v8386_v25, 16  ;;  %v8039_v34 = vrot.slane %v8037_v63, 1  ;;  %v14815_v63 = vld [vmem:[%s18688_s3 + $0x1c8] sm:$0xff]  }
 0x642   : > { %v8024_v33 = vsel %vm2904_vm4, %v8019_v28, %v8023_v27  ;;  %v8431_v26 = vrot.slane %v8429_v22, 3  ;;  %v8040_v25 = vsel %vm2904_vm4, %v8035_v9, %v8039_v34  ;;  %v8448_v27 = vrot.slane %v17372_v2, 3  ;;  %v14817_v34 = vld [vmem:[%s18688_s3 + $0x1d8] sm:$0xff]  }
 0x643   : > { %v8460_v28 = vrot.slane %v17393_v47, 4 }
 0x647   : > { %13455 = vmatmul.mubr.bf16.gmra.mrb[36].mxu1 %v8008_v4  ;;  %v8032_v4 = vsel %vm2904_vm4, %v8027_v31, %v8031_v42  ;;  %v8466_v42 = vrot.slane %v17400_v16, 3 }
 0x648   : > { %13458 = vmatprep.mubr.bf16.mxu1 %v8016_v48  ;;  %v8434_v48 = vrot.slane %v8432_v8, 4  ;;  %v8461_v8 = vor.u32 %v8460_v28, %v8457_v51  ;;  %v8496_v51 = vrot.slane %v17449_v14, 4  ;;  %v14818_v28 = vld [vmem:[%s18688_s3 + $0x1e0] sm:$0xff]  }
 0x64a   : > { %v8435_v12 = vor.u32 %v8434_v48, %v8431_v26  ;;  %v14816_v26 = vld [vmem:[%s18688_s3 + $0x1d0] sm:$0xff]   ;;  %v8479_v48 = vor.u32 %v8478_v55, %v8475_v46  ;;  %v8511_v46 = vrot.slane %v17460_v29, 3  ;;  %v8514_v55 = vrot.slane %v17477_v52, 4 }
 0x64c   : > { %v8444_v31 = vsel %vm945_vm1, %v8435_v12, %v8443_v53 }
 0x64f   : > { %13459 = vmatmul.mubr.bf16.gmra.mrb[40].mxu1 %v8024_v33  ;;  %v8451_v33 = vrot.slane %v17388_v32, 4 }
 0x650   : > { %13462 = vmatprep.mubr.bf16.mxu1 %v8032_v4  ;;  %v8469_v4 = vrot.slane %v17416_v58, 4 }
 0x651   : > { %v8452_v22 = vor.u32 %v8451_v33, %v8448_v27  ;;  %v8484_v27 = vrot.slane %v17428_v60, 3  ;;  %v8487_v33 = vrot.slane %v17444_v39, 4 }
 0x653   : > { %v8453_v9 = vsel %vm945_vm1, %v8443_v53, %v8452_v22  ;;  %v8462_v12 = vsel %vm945_vm1, %v8452_v22, %v8461_v8  ;;  %v8470_v53 = vor.u32 %v8469_v4, %v8466_v42  ;;  %v8488_v22 = vor.u32 %v8487_v33, %v8484_v27 }
 0x654   : > { %v8502_v42 = vrot.slane %v17456_v20, 3  ;;  %v8505_v4 = vrot.slane %v17472_v6, 4  ;;  %v8520_v27 = vrot.slane %v17481_v43, 3  ;;  %v8523_v33 = vrot.slane %v17499_v19, 4 }
 0x657   : > { %13463 = vmatmul.mubr.bf16.gmra.mrb[44].mxu1 %v8040_v25  ;;  %v8471_v25 = vsel %vm945_vm1, %v8461_v8, %v8470_v53 }
 0x658   : > { %13482 = vmatprep.mubr.bf16.mxu1 %v8444_v31  ;;  %v8493_v31 = vrot.slane %v17432_v59, 3 }
 0x65a   : > { %v8497_v8 = vor.u32 %v8496_v51, %v8493_v31  ;;  %v8529_v31 = vrot.slane %v17485_v10, 3  ;;  %v8532_v51 = vrot.slane %v17504_v24, 4 }
 0x65f   : > { %13483 = vmatmul.mubr.bf16.vlgmr.msra.gmra.mrb[0].mxu1 %v8453_v9  ;;  %v8489_v9 = vsel %vm945_vm1, %v8479_v48, %v8488_v22 }
 0x660   : > { %13486 = vmatprep.mubr.bf16.mxu1 %v8462_v12  ;;  %13531 = vmatpush3.bf16.msra.mxu1 %v17733_v35  ;;  %v8480_v35 = vsel %vm945_vm1, %v8470_v53, %v8479_v48  ;;  %v8498_v12 = vsel %vm945_vm1, %v8488_v22, %v8497_v8  ;;  %v8506_v53 = vor.u32 %v8505_v4, %v8502_v42  ;;  %v8547_v4 = vrot.slane %v18991_v18, 3 }
 0x661   : > { %13532 = vmatprep.subr.bf16.mxu1 %v14815_v63  ;;  %v8515_v48 = vor.u32 %v8514_v55, %v8511_v46  ;;  %v8533_v22 = vor.u32 %v8532_v51, %v8529_v31  ;;  %v17835_v46 = vld [vmem:[%s18688_s3 + $0x200] sm:$0xff]  }
 0x664   : > { %13533 = vmatpush3.bf16.msra.mxu1 %v14815_v63  ;;  %v14819_v63 = vld [vmem:[%s18688_s3 + $0x1e8] sm:$0xff]  }
 0x665   : > { %13534 = vmatprep.subr.bf16.mxu1 %v14816_v26 }
 0x667   : > { %13487 = vmatmul.mubr.bf16.gmra.mrb[4].mxu1 %v8471_v25  ;;  %v8507_v25 = vsel %vm945_vm1, %v8497_v8, %v8506_v53  ;;  %v8538_v8 = vrot.slane %v18992_v15, 3 }
 0x668   : > { %13490 = vmatprep.mubr.bf16.mxu1 %v8480_v35  ;;  %13535 = vmatpush3.bf16.msra.mxu1 %v14816_v26  ;;  %v14820_v26 = vld [vmem:[%s18688_s3 + $0x1f0] sm:$0xff]   ;;  %v8516_v35 = vsel %vm945_vm1, %v8506_v53, %v8515_v48 }
 0x669   : > { %13536 = vmatprep.subr.bf16.mxu1 %v14817_v34 }
 0x66c   : > { %13537 = vmatpush3.bf16.msra.mxu1 %v14817_v34  ;;  %v14821_v34 = vld [vmem:[%s18688_s3 + $0x1f8] sm:$0xff]  }
 0x66d   : > { %13538 = vmatprep.subr.bf16.mxu1 %v14818_v28 }
 0x66f   : > { %13491 = vmatmul.mubr.bf16.gmra.mrb[8].mxu1 %v8489_v9  ;;  %v8541_v9 = vrot.slane %v17522_v17, 4 }
 0x670   : > { %13494 = vmatprep.mubr.bf16.mxu1 %v8498_v12  ;;  %13539 = vmatpush3.bf16.msra.mxu1 %v14818_v28  ;;  %v8524_v28 = vor.u32 %v8523_v33, %v8520_v27  ;;  %v8550_v12 = vrot.slane %v18990_v0, 4  ;;  %v8565_v27 = vrot.slane %v18995_v50, 3  ;;  %v8568_v33 = vrot.slane %v18994_v30, 4 }
 0x671   : > { %13540 = vmatprep.subr.bf16.mxu1 %v14819_v63  ;;  %v8542_v55 = vor.u32 %v8541_v9, %v8538_v8  ;;  %v8583_v8 = vrot.slane %v18999_v21, 3  ;;  %v8586_v9 = vrot.slane %v18998_v44, 4 }
 0x672   : > { %v8534_v42 = vsel %vm945_vm1, %v8524_v28, %v8533_v22  ;;  %v8569_v31 = vor.u32 %v8568_v33, %v8565_v27 }
 0x673   : > { %v8543_v53 = vsel %vm945_vm1, %v8533_v22, %v8542_v55  ;;  %v8577_v22 = vrot.slane %v18997_v49, 4 }
 0x674   : > { %13541 = vmatpush3.bf16.msra.mxu1 %v14819_v63  ;;  %v8525_v63 = vsel %vm945_vm1, %v8515_v48, %v8524_v28  ;;  %v8556_v48 = vrot.slane %v18996_v1, 3  ;;  %v8574_v28 = vrot.slane %v19000_v38, 3 }
 0x675   : > { %13542 = vmatprep.subr.bf16.mxu1 %v14820_v26 }
 0x677   : > { %13495 = vmatmul.mubr.bf16.gmra.mrb[12].mxu1 %v8507_v25 }
 0x678   : > { %13498 = vmatprep.mubr.bf16.mxu1 %v8516_v35  ;;  %13543 = vmatpush3.bf16.msra.mxu1 %v14820_v26  ;;  %v8551_v26 = vor.u32 %v8550_v12, %v8547_v4  ;;  %v8587_v4 = vor.u32 %v8586_v9, %v8583_v8  ;;  %v17862_v9 = vld [vmem:[#allocation3 + $0xe0] sm:$0xf] }
 0x679   : > { %13544 = vmatprep.subr.bf16.mxu1 %v14821_v34 }
 0x67a   : > { %v8552_v25 = vsel %vm945_vm1, %v8542_v55, %v8551_v26  ;;  %v8592_v55 = vrot.slane %v19004_v54, 3 }
 0x67c   : > { %13545 = vmatpush3.bf16.msra.mxu1 %v14821_v34  ;;  %v8559_v34 = vrot.slane %v18993_v11, 4 }
 0x67d   : > { %13594 = vmatprep.subr.bf16.mxu1 %v17835_v46 }
 0x67e   : > { %v8560_v35 = vor.u32 %v8559_v34, %v8556_v48  ;;  %v8601_v48 = vrot.slane %v19003_v56, 3  ;;  %v8604_v34 = vrot.slane %v19002_v62, 4 }
 0x67f   : > { %13499 = vmatmul.mubr.bf16.gmra.mrb[16].mxu1 %v8525_v63 }
 0x680   : > { %13502 = vmatprep.mubr.bf16.mxu1 %v8534_v42  ;;  %v8561_v51 = vsel %vm945_vm1, %v8551_v26, %v8560_v35  ;;  %v8570_v63 = vsel %vm945_vm1, %v8560_v35, %v8569_v31  ;;  %v8578_v42 = vor.u32 %v8577_v22, %v8574_v28  ;;  %v8595_v26 = vrot.slane %v19001_v36, 4 }
 0x681   : > { %v8605_v27 = vor.u32 %v8604_v34, %v8601_v48  ;;  %v8610_v35 = vrot.slane %v19006_v3, 3  ;;  %v8619_v28 = vrot.slane %v19005_v61, 3  ;;  %v8622_v22 = vrot.slane %v17613_v40, 4 }
 0x682   : > { %v8579_v12 = vsel %vm945_vm1, %v8569_v31, %v8578_v42  ;;  %v8613_v31 = vrot.slane %v17610_v13, 4 }
 0x683   : > { %v8623_v8 = vor.u32 %v8622_v22, %v8619_v28 }
 0x687   : > { %13503 = vmatmul.mubr.bf16.gmra.mrb[20].mxu1 %v8543_v53  ;;  %v8588_v53 = vsel %vm945_vm1, %v8578_v42, %v8587_v4 }
 0x688   : > { %13506 = vmatprep.mubr.bf16.mxu1 %v8552_v25  ;;  %v8596_v25 = vor.u32 %v8595_v26, %v8592_v55  ;;  %v19007_v26 = vld [vmem:[#allocation11_spill] sm:$0xff] }
 0x689   : > { %v19009_v34 = vshll.u32 %v19007_v26, 16 }
 0x68a   : > { %v8597_v33 = vsel %vm945_vm1, %v8587_v4, %v8596_v25  ;;  %v8628_v4 = vrot.slane %v17617_v37, 3 }
 0x68f   : > { %13507 = vmatmul.mubr.bf16.gmra.mrb[24].mxu1 %v8561_v51  ;;  %v8606_v51 = vsel %vm945_vm1, %v8596_v25, %v8605_v27  ;;  %v8640_v25 = vrot.slane %v19009_v34, 4 }
 0x690   : > { %13510 = vmatprep.mubr.bf16.mxu1 %v8570_v63  ;;  %v8614_v63 = vor.u32 %v8613_v31, %v8610_v35  ;;  %v8647_v35 = vshll.u32 %v17862_v9, 16 }
 0x692   : > { %v8615_v42 = vsel %vm945_vm1, %v8605_v27, %v8614_v63  ;;  %v8624_v55 = vsel %vm945_vm1, %v8614_v63, %v8623_v8  ;;  %v8649_v28 = vrot.slane %v8647_v35, 4 }
 0x697   : > { %13511 = vmatmul.mubr.bf16.gmra.mrb[28].mxu1 %v8579_v12  ;;  %v8631_v12 = vrot.slane %v17624_v5, 4 }
 0x698   : > { %13514 = vmatprep.mubr.bf16.mxu1 %v8588_v53  ;;  %v19008_v53 = vshrl.u32 %v19007_v26, 16  ;;  %v19010_v26 = vld [vmem:[#allocation17_spill] sm:$0xff] }
 0x699   : > { %v8632_v31 = vor.u32 %v8631_v12, %v8628_v4  ;;  %v9041_v34 = vrot.slane %v19010_v26, 4  ;;  %v19011_v12 = vld [vmem:[#allocation14_spill] sm:$0xff]  ;;  %v14826_v26 = vld [vmem:[%s18688_s3 + $0x220] sm:$0xff]  }
 0x69a   : > { %v8637_v48 = vrot.slane %v19008_v53, 3  ;;  %v17876_v53 = vld [vmem:[#allocation3 + $0x20] sm:$0xf0] }
 0x69b   : > { %v8633_v22 = vsel %vm945_vm1, %v8623_v8, %v8632_v31  ;;  %v9040_v5 = vrot.slane %v17876_v53, 4  ;;  %v19012_v8 = vld [vmem:[#allocation15_spill] sm:$0xff] }
 0x69c   : > { %v8641_v27 = vor.u32 %v8640_v25, %v8637_v48  ;;  %v9043_v48 = vrot.slane %v19011_v12, 4  ;;  %v9045_v25 = vrot.slane %v19012_v8, 4 }
 0x69d   : > { %v9042_v4 = vsel %vm598_vm0, %v9040_v5, %v9041_v34  ;;  %v14824_v5 = vld [vmem:[%s18688_s3 + $0x210] sm:$0xff]  }
 0x69e   : > { %v8642_v63 = vsel %vm945_vm1, %v8632_v31, %v8641_v27  ;;  %v9044_v35 = vsel %vm598_vm0, %v9041_v34, %v9043_v48  ;;  %v9046_v31 = vsel %vm598_vm0, %v9043_v48, %v9045_v25  ;;  %v19015_v34 = vld [vmem:[#allocation7_spill] sm:$0xff]  ;;  %v14827_v48 = vld [vmem:[%s18688_s3 + $0x228] sm:$0xff]  }
 0x69f   : > { %13515 = vmatmul.mubr.bf16.gmra.mrb[32].mxu1 %v8597_v33  ;;  %v8644_v33 = vshrl.u32 %v17862_v9, 16 }
 0x6a0   : > { %13518 = vmatprep.mubr.bf16.mxu1 %v8606_v51 }
 0x6a1   : > { %v8646_v51 = vrot.slane %v8644_v33, 3  ;;  %v14823_v33 = vld [vmem:[%s18688_s3 + $0x208] sm:$0xff]  }
 0x6a7   : > { %13519 = vmatmul.mubr.bf16.gmra.mrb[36].mxu1 %v8615_v42  ;;  %v8650_v42 = vor.u32 %v8649_v28, %v8646_v51  ;;  %v19014_v28 = vld [vmem:[#allocation19_spill] sm:$0xff] }
 0x6a8   : > { %13522 = vmatprep.mubr.bf16.mxu1 %v8624_v55 }
 0x6a9   : > { %v8651_v55 = vsel %vm945_vm1, %v8641_v27, %v8650_v42  ;;  %v19013_v27 = vld [vmem:[#allocation18_spill] sm:$0xff] }
 0x6aa   : > { %v9047_v51 = vrot.slane %v19013_v27, 4 }
 0x6ac   : > { %v9048_v42 = vsel %vm598_vm0, %v9045_v25, %v9047_v51 }
 0x6af   : > { %13523 = vmatmul.mubr.bf16.gmra.mrb[40].mxu1 %v8633_v22  ;;  %v9049_v22 = vrot.slane %v19014_v28, 4 }
 0x6b0   : > { %13526 = vmatprep.mubr.bf16.mxu1 %v8642_v63  ;;  %v14825_v63 = vld [vmem:[%s18688_s3 + $0x218] sm:$0xff]  }
 0x6b7   : > { %13527 = vmatmul.mubr.bf16.gmra.mrb[44].mxu1 %v8651_v55  ;;  %v9051_v55 = vrot.slane %v19015_v34, 4 }
 0x6b8   : > { %13546 = vmatprep.mubr.bf16.mxu1 %v9042_v4  ;;  %v19016_v4 = vld [vmem:[#allocation12_spill] sm:$0xff] }
 0x6b9   : > { %v9053_v12 = vrot.slane %v19016_v4, 4  ;;  %v9052_v8 = vsel %vm598_vm0, %v9049_v22, %v9051_v55  ;;  %v19021_v4 = vld [vmem:[#allocation8_spill] sm:$0xff] }
 0x6bb   : > { %v9054_v25 = vsel %vm598_vm0, %v9051_v55, %v9053_v12 }
 0x6bf   : > { %13547 = vmatmul.mubr.bf16.vlgmr.msra.gmra.mrb[0].mxu1 %v9044_v35  ;;  %v19017_v35 = vld [vmem:[#allocation13_spill] sm:$0xff] }
 0x6c0   : > { %13550 = vmatprep.mubr.bf16.mxu1 %v9046_v31  ;;  %13595 = vmatpush3.bf16.msra.mxu1 %v17835_v46  ;;  %v9050_v46 = vsel %vm598_vm0, %v9047_v51, %v9049_v22  ;;  %v9055_v31 = vrot.slane %v19017_v35, 4  ;;  %v14829_v51 = vld [vmem:[%s18688_s3 + $0x238] sm:$0xff]   ;;  %v19023_v35 = vld [vmem:[#allocation21_spill] sm:$0xff] }
 0x6c1   : > { %13596 = vmatprep.subr.bf16.mxu1 %v14823_v33 }
 0x6c2   : > { %v9056_v28 = vsel %vm598_vm0, %v9053_v12, %v9055_v31  ;;  %v19022_v12 = vld [vmem:[#allocation9_spill] sm:$0xff] }
 0x6c4   : > { %13597 = vmatpush3.bf16.msra.mxu1 %v14823_v33  ;;  %v14828_v33 = vld [vmem:[%s18688_s3 + $0x230] sm:$0xff]  }
 0x6c5   : > { %13598 = vmatprep.subr.bf16.mxu1 %v14824_v5 }
 0x6c7   : > { %13551 = vmatmul.mubr.bf16.gmra.mrb[4].mxu1 %v9048_v42 }
 0x6c8   : > { %13554 = vmatprep.mubr.bf16.mxu1 %v9050_v46  ;;  %13599 = vmatpush3.bf16.msra.mxu1 %v14824_v5  ;;  %v19018_v5 = vld [vmem:[#allocation10_spill] sm:$0xff]  ;;  %v19020_v46 = vld [vmem:[#allocation5_spill] sm:$0xff] }
 0x6c9   : > { %13600 = vmatprep.subr.bf16.mxu1 %v14825_v63  ;;  %v9057_v27 = vrot.slane %v19018_v5, 4  ;;  %v19024_v5 = vld [vmem:[#allocation22_spill] sm:$0xff] }
 0x6cb   : > { %v9058_v22 = vsel %vm598_vm0, %v9055_v31, %v9057_v27  ;;  %v9067_v31 = vrot.slane %v19023_v35, 4 }
 0x6cc   : > { %13601 = vmatpush3.bf16.msra.mxu1 %v14825_v63  ;;  %v19019_v63 = vld [vmem:[#allocation4_spill] sm:$0xff] }
 0x6cd   : > { %13602 = vmatprep.subr.bf16.mxu1 %v14826_v26  ;;  %v9059_v42 = vrot.slane %v19019_v63, 4 }
 0x6cf   : > { %13555 = vmatmul.mubr.bf16.gmra.mrb[8].mxu1 %v9052_v8  ;;  %v9060_v34 = vsel %vm598_vm0, %v9057_v27, %v9059_v42  ;;  %v9065_v8 = vrot.slane %v19022_v12, 4 }
 0x6d0   : > { %13558 = vmatprep.mubr.bf16.mxu1 %v9054_v25  ;;  %13603 = vmatpush3.bf16.msra.mxu1 %v14826_v26  ;;  %v9061_v26 = vrot.slane %v19020_v46, 4 }
 0x6d1   : > { %13604 = vmatprep.subr.bf16.mxu1 %v14827_v48  ;;  %v9068_v27 = vsel %vm598_vm0, %v9065_v8, %v9067_v31 }
 0x6d2   : > { %v9062_v55 = vsel %vm598_vm0, %v9059_v42, %v9061_v26  ;;  %v19026_v42 = vld [vmem:[#allocation28_spill] sm:$0xff] }
 0x6d3   : > { %v9073_v46 = vrot.slane %v19026_v42, 4 }
 0x6d4   : > { %13605 = vmatpush3.bf16.msra.mxu1 %v14827_v48  ;;  %v9063_v48 = vrot.slane %v19021_v4, 4 }
 0x6d5   : > { %13606 = vmatprep.subr.bf16.mxu1 %v14828_v33 }
 0x6d6   : > { %v9064_v25 = vsel %vm598_vm0, %v9061_v26, %v9063_v48 }
 0x6d7   : > { %13559 = vmatmul.mubr.bf16.gmra.mrb[12].mxu1 %v9056_v28 }
 0x6d8   : > { %13562 = vmatprep.mubr.bf16.mxu1 %v9058_v22  ;;  %13607 = vmatpush3.bf16.msra.mxu1 %v14828_v33  ;;  %v9066_v33 = vsel %vm598_vm0, %v9063_v48, %v9065_v8  ;;  %v19025_v22 = vld [vmem:[#allocation26_spill] sm:$0xff] }
 0x6d9   : > { %13608 = vmatprep.subr.bf16.mxu1 %v14829_v51  ;;  %v9071_v63 = vrot.slane %v19025_v22, 4  ;;  %v19028_v48 = vld [vmem:[#allocation34_spill] sm:$0xff] }
 0x6da   : > { %v9077_v12 = vrot.slane %v19028_v48, 4  ;;  %v9461_v48 = vrot.slane %v17367_v57, 5  ;;  %v9469_v57 = vrot.slane %v17393_v47, 5 }
 0x6dc   : > { %13609 = vmatpush3.bf16.msra.mxu1 %v14829_v51  ;;  %v9069_v51 = vrot.slane %v19024_v5, 4 }
 0x6de   : > { %v9070_v28 = vsel %vm598_vm0, %v9067_v31, %v9069_v51  ;;  %v9072_v26 = vsel %vm598_vm0, %v9069_v51, %v9071_v63  ;;  %v19030_v31 = vld [vmem:[#allocation40_spill] sm:$0xff] }
 0x6df   : > { %13563 = vmatmul.mubr.bf16.gmra.mrb[16].mxu1 %v9060_v34  ;;  %v9074_v34 = vsel %vm598_vm0, %v9071_v63, %v9073_v46  ;;  %v9081_v5 = vrot.slane %v19030_v31, 4  ;;  %v14891_v63 = vld [vmem:[#allocation3] sm:$0xff] }
 0x6e0   : > { %13566 = vmatprep.mubr.bf16.mxu1 %v9062_v55  ;;  %v19027_v55 = vld [vmem:[#allocation32_spill] sm:$0xff]  ;;  %v9085_v42 = vrot.slane %v14891_v63, 4  ;;  %v9473_v63 = vrot.slane %v17416_v58, 5  ;;  %v9484_v58 = vrot.slane %v17432_v59, 4 }
 0x6e1   : > { %v9075_v4 = vrot.slane %v19027_v55, 4 }
 0x6e3   : > { %v9076_v8 = vsel %vm598_vm0, %v9073_v46, %v9075_v4  ;;  %v9453_v46 = vshrl.u32 %v17876_v53, 16 }
 0x6e7   : > { %13567 = vmatmul.mubr.bf16.gmra.mrb[20].mxu1 %v9064_v25  ;;  %v9078_v25 = vsel %vm598_vm0, %v9075_v4, %v9077_v12  ;;  %v9460_v4 = vrot.slane %v17354_v41, 4  ;;  %v9468_v41 = vrot.slane %v17376_v23, 4 }
 0x6e8   : > { %13570 = vmatprep.mubr.bf16.mxu1 %v9066_v33  ;;  %v19029_v33 = vld [vmem:[#allocation38_spill] sm:$0xff] }
 0x6e9   : > { %v9079_v35 = vrot.slane %v19029_v33, 4  ;;  %v9462_v33 = vor.u32 %v9461_v48, %v9460_v4  ;;  %v9488_v48 = vrot.slane %v17456_v20, 4 }
 0x6eb   : > { %v9080_v51 = vsel %vm598_vm0, %v9077_v12, %v9079_v35  ;;  %v9087_v12 = vrot.slane %v17862_v9, 4  ;;  %v9470_v9 = vor.u32 %v9469_v57, %v9468_v41  ;;  %v9509_v41 = vrot.slane %v18990_v0, 5 }
 0x6ef   : > { %13571 = vmatmul.mubr.bf16.gmra.mrb[24].mxu1 %v9068_v27  ;;  %v9082_v27 = vsel %vm598_vm0, %v9079_v35, %v9081_v5  ;;  %v9088_v35 = vsel %vm598_vm0, %v9085_v42, %v9087_v12  ;;  %v9489_v12 = vrot.slane %v17472_v6, 5  ;;  %v9500_v6 = vrot.slane %v17485_v10, 4 }
 0x6f0   : > { %13574 = vmatprep.mubr.bf16.mxu1 %v9070_v28  ;;  %v19031_v28 = vld [vmem:[#allocation44_spill] sm:$0xff] }
 0x6f1   : > { %v9083_v22 = vrot.slane %v19031_v28, 4  ;;  %v9490_v59 = vor.u32 %v9489_v12, %v9488_v48 }
 0x6f3   : > { %v9086_v55 = vsel %vm598_vm0, %v9083_v22, %v9085_v42  ;;  %v9477_v42 = vrot.slane %v17421_v45, 5 }
 0x6f7   : > { %13575 = vmatmul.mubr.bf16.gmra.mrb[28].mxu1 %v9072_v26  ;;  %v9456_v26 = vshll.u32 %v17876_v53, 16  ;;  %v9464_v53 = vrot.slane %v17372_v2, 4 }
 0x6f8   : > { %13578 = vmatprep.mubr.bf16.mxu1 %v9074_v34  ;;  %v9084_v34 = vsel %vm598_vm0, %v9081_v5, %v9083_v22  ;;  %v9465_v5 = vrot.slane %v17388_v32, 5  ;;  %v9472_v22 = vrot.slane %v17400_v16, 4  ;;  %v9476_v32 = vrot.slane %v17404_v7, 4 }
 0x6fa   : > { %v9474_v23 = vor.u32 %v9473_v63, %v9472_v22  ;;  %v9520_v63 = vrot.slane %v19000_v38, 4 }
 0x6fc   : > { %v9475_v47 = vsel %vm1485_vm2, %v9470_v9, %v9474_v23 }
 0x6ff   : > { %13579 = vmatmul.mubr.bf16.gmra.mrb[32].mxu1 %v9076_v8  ;;  %v9455_v8 = vrot.slane %v9453_v46, 4  ;;  %v9478_v46 = vor.u32 %v9477_v42, %v9476_v32  ;;  %v9525_v32 = vrot.slane %v18998_v44, 5 }
 0x700   : > { %13582 = vmatprep.mubr.bf16.mxu1 %v9078_v25  ;;  %v9458_v25 = vrot.slane %v9456_v26, 5  ;;  %v9480_v26 = vrot.slane %v17428_v60, 4 }
 0x701   : > { %v9479_v16 = vsel %vm1485_vm2, %v9474_v23, %v9478_v46  ;;  %v9528_v23 = vrot.slane %v19004_v54, 4 }
 0x702   : > { %v9459_v31 = vor.u32 %v9458_v25, %v9455_v8  ;;  %v9493_v8 = vrot.slane %v17477_v52, 5 }
 0x707   : > { %13583 = vmatmul.mubr.bf16.gmra.mrb[36].mxu1 %v9080_v51  ;;  %v9463_v51 = vsel %vm1485_vm2, %v9459_v31, %v9462_v33  ;;  %v9501_v31 = vrot.slane %v17504_v24, 5 }
 0x708   : > { %13586 = vmatprep.mubr.bf16.mxu1 %v9082_v27  ;;  %v9466_v27 = vor.u32 %v9465_v5, %v9464_v53  ;;  %v9504_v5 = vrot.slane %v18992_v15, 4 }
 0x709   : > { %v9502_v53 = vor.u32 %v9501_v31, %v9500_v6 }
 0x70a   : > { %v9467_v28 = vsel %vm1485_vm2, %v9462_v33, %v9466_v27  ;;  %v9471_v2 = vsel %vm1485_vm2, %v9466_v27, %v9470_v9  ;;  %v9496_v33 = vrot.slane %v17481_v43, 4  ;;  %v9512_v27 = vrot.slane %v18996_v1, 4 }
 0x70b   : > { %v9513_v9 = vrot.slane %v18993_v11, 5  ;;  %v9524_v11 = vrot.slane %v18999_v21, 4 }
 0x70d   : > { %v9526_v42 = vor.u32 %v9525_v32, %v9524_v11 }
 0x70f   : > { %13587 = vmatmul.mubr.bf16.gmra.mrb[40].mxu1 %v9084_v34  ;;  %v9481_v34 = vrot.slane %v17444_v39, 5  ;;  %v9492_v39 = vrot.slane %v17460_v29, 4 }
 0x710   : > { %13590 = vmatprep.mubr.bf16.mxu1 %v9086_v55  ;;  %v9485_v55 = vrot.slane %v17449_v14, 5 }
 0x711   : > { %v9482_v7 = vor.u32 %v9481_v34, %v9480_v26  ;;  %v9494_v25 = vor.u32 %v9493_v8, %v9492_v39  ;;  %v9536_v34 = vrot.slane %v19006_v3, 4  ;;  %v19033_v8 = vld [vmem:[#allocation16_spill] sm:$0xff] }
 0x712   : > { %v9486_v4 = vor.u32 %v9485_v55, %v9484_v58  ;;  %v9541_v58 = vrot.slane %v17613_v40, 5 }
 0x713   : > { %v9483_v45 = vsel %vm1485_vm2, %v9478_v46, %v9482_v7  ;;  %v9495_v20 = vsel %vm1485_vm2, %v9490_v59, %v9494_v25  ;;  %v9529_v46 = vrot.slane %v19001_v36, 5  ;;  %v9540_v36 = vrot.slane %v19005_v61, 4 }
 0x714   : > { %v9487_v60 = vsel %vm1485_vm2, %v9482_v7, %v9486_v4  ;;  %v9491_v14 = vsel %vm1485_vm2, %v9486_v4, %v9490_v59  ;;  %v9544_v4 = vrot.slane %v17617_v37, 4 }
 0x715   : > { %v9530_v21 = vor.u32 %v9529_v46, %v9528_v23  ;;  %v9542_v55 = vor.u32 %v9541_v58, %v9540_v36 }
 0x717   : > { %13591 = vmatmul.mubr.bf16.gmra.mrb[44].mxu1 %v9088_v35  ;;  %v9497_v35 = vrot.slane %v17499_v19, 5  ;;  %v9508_v19 = vrot.slane %v18991_v18, 4  ;;  %v9514_v18 = vor.u32 %v9513_v9, %v9512_v27  ;;  %v9531_v44 = vsel %vm1485_vm2, %v9526_v42, %v9530_v21 }
 0x718   : > { %13610 = vmatprep.mubr.bf16.mxu1 %v9463_v51  ;;  %v9505_v51 = vrot.slane %v17522_v17, 5  ;;  %v9516_v17 = vrot.slane %v18995_v50, 4 }
 0x719   : > { %v9498_v29 = vor.u32 %v9497_v35, %v9496_v33  ;;  %v9510_v57 = vor.u32 %v9509_v41, %v9508_v19  ;;  %v18030_v33 = vld [vmem:[%s18693_s8 + $0x8] ss:$12 sps:$4 sm:$0xff]  }
 0x71a   : > { %v9506_v10 = vor.u32 %v9505_v51, %v9504_v5 }
 0x71b   : > { %v9499_v52 = vsel %vm1485_vm2, %v9494_v25, %v9498_v29  ;;  %v9503_v43 = vsel %vm1485_vm2, %v9498_v29, %v9502_v53  ;;  %v9515_v0 = vsel %vm1485_vm2, %v9510_v57, %v9514_v18 }
 0x71c   : > { %v9507_v24 = vsel %vm1485_vm2, %v9502_v53, %v9506_v10  ;;  %v9511_v15 = vsel %vm1485_vm2, %v9506_v10, %v9510_v57 }
 0x71f   : > { %13611 = vmatmul.mubr.bf16.vlgmr.msra.gmra.mrb[0].mxu1 %v9467_v28  ;;  %v9517_v28 = vrot.slane %v18994_v30, 5 }
 0x720   : > { %13614 = vmatprep.mubr.bf16.mxu1 %v9471_v2  ;;  %v9521_v2 = vrot.slane %v18997_v49, 5  ;;  %v9532_v49 = vrot.slane %v19003_v56, 4 }
 0x721   : > { %v9518_v22 = vor.u32 %v9517_v28, %v9516_v17 }
 0x722   : > { %v9522_v50 = vor.u32 %v9521_v2, %v9520_v63 }
 0x723   : > { %v9519_v1 = vsel %vm1485_vm2, %v9514_v18, %v9518_v22 }
 0x724   : > { %v9523_v30 = vsel %vm1485_vm2, %v9518_v22, %v9522_v50  ;;  %v9527_v38 = vsel %vm1485_vm2, %v9522_v50, %v9526_v42 }
 0x727   : > { %13615 = vmatmul.mubr.bf16.gmra.mrb[4].mxu1 %v9475_v47  ;;  %v9533_v47 = vrot.slane %v19002_v62, 5  ;;  %v9434_v62 = vld [vmem:[#allocation3 + $0xe0] sm:$0x1f] }
 0x728   : > { %13618 = vmatprep.mubr.bf16.mxu1 %v9479_v16  ;;  %v9537_v16 = vrot.slane %v17610_v13, 5  ;;  %v9553_v13 = vshrl.u32 %v9434_v62, 16  ;;  %v9556_v12 = vshll.u32 %v9434_v62, 16 }
 0x729   : > { %v9534_v26 = vor.u32 %v9533_v47, %v9532_v49 }
 0x72a   : > { %v9538_v56 = vor.u32 %v9537_v16, %v9536_v34  ;;  %v9555_v61 = vrot.slane %v9553_v13, 4  ;;  %v9558_v39 = vrot.slane %v9556_v12, 5 }
 0x72b   : > { %v9535_v54 = vsel %vm1485_vm2, %v9530_v21, %v9534_v26 }
 0x72c   : > { %v9539_v7 = vsel %vm1485_vm2, %v9534_v26, %v9538_v56  ;;  %v9543_v3 = vsel %vm1485_vm2, %v9538_v56, %v9542_v55  ;;  %v9559_v25 = vor.u32 %v9558_v39, %v9555_v61 }
 0x72e   : > { %v9560_v37 = vsel %vm1485_vm2, %v19033_v8, %v9559_v25 }
 0x72f   : > { %13619 = vmatmul.mubr.bf16.gmra.mrb[8].mxu1 %v9483_v45  ;;  %v19032_v45 = vld [vmem:[#allocation45_spill] sm:$0xff] }
 0x730   : > { %13622 = vmatprep.mubr.bf16.mxu1 %v9487_v60  ;;  %v9545_v48 = vrot.slane %v19032_v45, 5 }
 0x732   : > { %v9546_v60 = vor.u32 %v9545_v48, %v9544_v4 }
 0x734   : > { %v9547_v40 = vsel %vm1485_vm2, %v9542_v55, %v9546_v60  ;;  %v9551_v59 = vsel %vm1485_vm2, %v9546_v60, %v19033_v8 }
 0x737   : > { %13623 = vmatmul.mubr.bf16.gmra.mrb[12].mxu1 %v9491_v14  ;;  %v18024_v14 = vld [vmem:[%s18693_s8 + $0x4] ss:$12 sps:$4 sm:$0xff]  }
 0x738   : > { %13626 = vmatprep.mubr.bf16.mxu1 %v9495_v20  ;;  %10162 = vmatprep.mubr.bf16.mxu0 %v18024_v14 }
 0x73f   : > { %13627 = vmatmul.mubr.bf16.gmra.mrb[16].mxu1 %v9499_v52 }
 0x740   : > { %13630 = vmatprep.mubr.bf16.mxu1 %v9503_v43 }
 0x747   : > { %13631 = vmatmul.mubr.bf16.gmra.mrb[20].mxu1 %v9507_v24 }
 0x748   : > { %13634 = vmatprep.mubr.bf16.mxu1 %v9511_v15 }
 0x74f   : > { %13635 = vmatmul.mubr.bf16.gmra.mrb[24].mxu1 %v9515_v0 }
 0x750   : > { %13638 = vmatprep.mubr.bf16.mxu1 %v9519_v1 }
 0x757   : > { %13639 = vmatmul.mubr.bf16.gmra.mrb[28].mxu1 %v9523_v30 }
 0x758   : > { %13642 = vmatprep.mubr.bf16.mxu1 %v9527_v38 }
 0x75f   : > { %13643 = vmatmul.mubr.bf16.gmra.mrb[32].mxu1 %v9531_v44 }
 0x760   : > { %13646 = vmatprep.mubr.bf16.mxu1 %v9535_v54 }
 0x767   : > { %13647 = vmatmul.mubr.bf16.gmra.mrb[36].mxu1 %v9539_v7 }
 0x768   : > { %13650 = vmatprep.mubr.bf16.mxu1 %v9543_v3 }
 0x76f   : > { %13651 = vmatmul.mubr.bf16.gmra.mrb[40].mxu1 %v9547_v40 }
 0x770   : > { %13654 = vmatprep.mubr.bf16.mxu1 %v9551_v59 }
 0x777   : > { %13655 = vmatmul.mubr.bf16.gmra.mrb[44].mxu1 %v9560_v37 }
 0x778   : > { %13674 = vmatprep.mubr.bf16.mxu1 %v18030_v33 }
 0x7f2   : > { %v13612_v35 = vpop.f32.mrb[0].mxu1 }
 0x7f3   : > { %v9667_v20 = vpop.f32.mrb[1].mxu1 }
 0x7f4   : > { %v13613_v6 = vpop.f32.mrb[2].mxu1 }
 0x7f5   : > { %v18033_v31 = vpack.c.bf16 %v13613_v6, %v13612_v35  ;;  %v9670_v29 = vpop.f32.mrb[3].mxu1 }
 0x7f6   : > { %v18035_v53 = vpack.c.bf16 %v9670_v29, %v9667_v20 }
 0x7f7   : > { %v9932_v52 = vunpack.c.l.bf16 %v18033_v31  ;;  %v9933_v5 = vunpack.c.h.bf16 %v18033_v31 }
 0x7f8   : > { %v9930_v51 = vunpack.c.l.bf16 %v18035_v53  ;;  %v9931_v43 = vunpack.c.h.bf16 %v18035_v53 }
 0x7f9   : > { %v18041_v19 = vsub.f32 %v13612_v35, %v9932_v52  ;;  %v18043_v41 = vsub.f32 %v13613_v6, %v9933_v5 }
 0x7fa   : > { %v18045_v10 = vsub.f32 %v9667_v20, %v9930_v51  ;;  %v18047_v57 = vsub.f32 %v9670_v29, %v9931_v43  ;;  %v13616_v24 = vpop.f32.mrb[4].mxu1 }
 0x7fb   : > { %v10027_v27 = vpack.c.bf16 %v18043_v41, %v18041_v19  ;;  %v9683_v9 = vpop.f32.mrb[5].mxu1 }
 0x7fc   : > { %v10026_v15 = vpack.c.bf16 %v18047_v57, %v18045_v10  ;;  %v13617_v17 = vpop.f32.mrb[6].mxu1 }
 0x7fd   : > { %v18053_v28 = vpack.c.bf16 %v13617_v17, %v13616_v24  ;;  %v9686_v18 = vpop.f32.mrb[7].mxu1 }
 0x7fe   : > { %v18055_v22 = vpack.c.bf16 %v9686_v18, %v9683_v9 }
 0x7ff   : > { %v9936_v0 = vunpack.c.l.bf16 %v18053_v28  ;;  %v9937_v63 = vunpack.c.h.bf16 %v18053_v28 }
 0x800   : > { %v9934_v2 = vunpack.c.l.bf16 %v18055_v22  ;;  %v9935_v1 = vunpack.c.h.bf16 %v18055_v22 }
 0x801   : > { %v18061_v11 = vsub.f32 %v13616_v24, %v9936_v0  ;;  %v18063_v32 = vsub.f32 %v13617_v17, %v9937_v63 }
 0x802   : > { %v18065_v50 = vsub.f32 %v9683_v9, %v9934_v2  ;;  %v18067_v42 = vsub.f32 %v9686_v18, %v9935_v1  ;;  %v13620_v30 = vpop.f32.mrb[8].mxu1 }
 0x803   : > { %v10029_v23 = vpack.c.bf16 %v18063_v32, %v18061_v11  ;;  %v9699_v46 = vpop.f32.mrb[9].mxu1 }
 0x804   : > { %v10028_v38 = vpack.c.bf16 %v18067_v42, %v18065_v50  ;;  %v13621_v49 = vpop.f32.mrb[10].mxu1 }
 0x805   : > { %v18073_v47 = vpack.c.bf16 %v13621_v49, %v13620_v30  ;;  %v9702_v21 = vpop.f32.mrb[11].mxu1 }
 0x806   : > { %v18075_v26 = vpack.c.bf16 %v9702_v21, %v9699_v46 }
 0x807   : > { %v9940_v44 = vunpack.c.l.bf16 %v18073_v47  ;;  %v9941_v34 = vunpack.c.h.bf16 %v18073_v47 }
 0x808   : > { %v9938_v16 = vunpack.c.l.bf16 %v18075_v26  ;;  %v9939_v54 = vunpack.c.h.bf16 %v18075_v26 }
 0x809   : > { %v18081_v36 = vsub.f32 %v13620_v30, %v9940_v44  ;;  %v18083_v58 = vsub.f32 %v13621_v49, %v9941_v34 }
 0x80a   : > { %v18085_v56 = vsub.f32 %v9699_v46, %v9938_v16  ;;  %v18087_v55 = vsub.f32 %v9702_v21, %v9939_v54  ;;  %v13624_v62 = vpop.f32.mrb[12].mxu1 }
 0x80b   : > { %v10031_v7 = vpack.c.bf16 %v18083_v58, %v18081_v36  ;;  %v9715_v4 = vpop.f32.mrb[13].mxu1 }
 0x80c   : > { %v10030_v45 = vpack.c.bf16 %v18087_v55, %v18085_v56  ;;  %v13625_v48 = vpop.f32.mrb[14].mxu1 }
 0x80d   : > { %v18093_v3 = vpack.c.bf16 %v13625_v48, %v13624_v62  ;;  %v9718_v13 = vpop.f32.mrb[15].mxu1 }
 0x80e   : > { %v18095_v12 = vpack.c.bf16 %v9718_v13, %v9715_v4 }
 0x80f   : > { %v9944_v60 = vunpack.c.l.bf16 %v18093_v3  ;;  %v9945_v61 = vunpack.c.h.bf16 %v18093_v3 }
 0x810   : > { %v9942_v39 = vunpack.c.l.bf16 %v18095_v12  ;;  %v9943_v40 = vunpack.c.h.bf16 %v18095_v12 }
 0x811   : > { %v18101_v8 = vsub.f32 %v13624_v62, %v9944_v60  ;;  %v18103_v59 = vsub.f32 %v13625_v48, %v9945_v61 }
 0x812   : > { %v18105_v25 = vsub.f32 %v9715_v4, %v9942_v39  ;;  %v18107_v37 = vsub.f32 %v9718_v13, %v9943_v40  ;;  %v13628_v35 = vpop.f32.mrb[16].mxu1 }
 0x813   : > { %v10033_v20 = vpack.c.bf16 %v18103_v59, %v18101_v8  ;;  %v9731_v6 = vpop.f32.mrb[17].mxu1 }
 0x814   : > { %v10032_v29 = vpack.c.bf16 %v18107_v37, %v18105_v25  ;;  %v13629_v52 = vpop.f32.mrb[18].mxu1 }
 0x815   : > { %v18113_v5 = vpack.c.bf16 %v13629_v52, %v13628_v35  ;;  %v9734_v51 = vpop.f32.mrb[19].mxu1 }
 0x816   : > { %v18115_v43 = vpack.c.bf16 %v9734_v51, %v9731_v6 }
 0x817   : > { %v9948_v24 = vunpack.c.l.bf16 %v18113_v5  ;;  %v9949_v9 = vunpack.c.h.bf16 %v18113_v5 }
 0x818   : > { %v9946_v17 = vunpack.c.l.bf16 %v18115_v43  ;;  %v9947_v18 = vunpack.c.h.bf16 %v18115_v43 }
 0x819   : > { %v9996_v0 = vsub.f32 %v13628_v35, %v9948_v24  ;;  %v9997_v63 = vsub.f32 %v13629_v52, %v9949_v9 }
 0x81a   : > { %v9994_v2 = vsub.f32 %v9731_v6, %v9946_v17  ;;  %v9995_v1 = vsub.f32 %v9734_v51, %v9947_v18  ;;  %v13632_v30 = vpop.f32.mrb[20].mxu1 }
 0x81b   : > { %v10035_v46 = vpack.c.bf16 %v9997_v63, %v9996_v0  ;;  %v9747_v49 = vpop.f32.mrb[21].mxu1 }
 0x81c   : > { %v10034_v21 = vpack.c.bf16 %v9995_v1, %v9994_v2  ;;  %v13633_v44 = vpop.f32.mrb[22].mxu1 }
 0x81d   : > { %v18121_v34 = vpack.c.bf16 %v13633_v44, %v13632_v30  ;;  %v9750_v16 = vpop.f32.mrb[23].mxu1 }
 0x81e   : > { %v18123_v54 = vpack.c.bf16 %v9750_v16, %v9747_v49  ;;  %12266 = vmatprep.subr.bf16.mxu0 %v10034_v21 }
 0x81f   : > { %v9952_v62 = vunpack.c.l.bf16 %v18121_v34  ;;  %v9953_v4 = vunpack.c.h.bf16 %v18121_v34  ;;  %12267 = vmatpush3.bf16.msra.mxu0 %v10026_v15 }
 0x820   : > { %v9950_v48 = vunpack.c.l.bf16 %v18123_v54  ;;  %v9951_v13 = vunpack.c.h.bf16 %v18123_v54  ;;  %12268 = vmatprep.subr.bf16.mxu0 %v10035_v46 }
 0x821   : > { %v10000_v60 = vsub.f32 %v13632_v30, %v9952_v62  ;;  %v10001_v61 = vsub.f32 %v13633_v44, %v9953_v4 }
 0x822   : > { %v9998_v39 = vsub.f32 %v9747_v49, %v9950_v48  ;;  %v9999_v40 = vsub.f32 %v9750_v16, %v9951_v13  ;;  %v13636_v35 = vpop.f32.mrb[24].mxu1 }
 0x823   : > { %v10037_v6 = vpack.c.bf16 %v10001_v61, %v10000_v60  ;;  %v9763_v52 = vpop.f32.mrb[25].mxu1  ;;  %12269 = vmatpush3.bf16.msra.mxu0 %v10027_v27 }
 0x824   : > { %v10036_v51 = vpack.c.bf16 %v9999_v40, %v9998_v39  ;;  %v13637_v24 = vpop.f32.mrb[26].mxu1 }
 0x825   : > { %v18135_v10 = vpack.c.bf16 %v13637_v24, %v13636_v35  ;;  %v9766_v57 = vpop.f32.mrb[27].mxu1 }
 0x826   : > { %v18137_v15 = vpack.c.bf16 %v9766_v57, %v9763_v52  ;;  %12270 = vmatprep.subr.bf16.mxu0 %v10036_v51 }
 0x827   : > { %v9956_v9 = vunpack.c.l.bf16 %v18135_v10  ;;  %v9957_v17 = vunpack.c.h.bf16 %v18135_v10  ;;  %12271 = vmatpush3.bf16.msra.mxu0 %v10028_v38 }
 0x828   : > { %v9954_v18 = vunpack.c.l.bf16 %v18137_v15  ;;  %v9955_v19 = vunpack.c.h.bf16 %v18137_v15  ;;  %12272 = vmatprep.subr.bf16.mxu0 %v10037_v6 }
 0x829   : > { %v10004_v41 = vsub.f32 %v13636_v35, %v9956_v9  ;;  %v10005_v27 = vsub.f32 %v13637_v24, %v9957_v17 }
 0x82a   : > { %v10002_v0 = vsub.f32 %v9763_v52, %v9954_v18  ;;  %v10003_v63 = vsub.f32 %v9766_v57, %v9955_v19  ;;  %v13640_v2 = vpop.f32.mrb[28].mxu1  ;;  %v18177_v57 = vld [vmem:[%s18693_s8] ss:$12 sps:$4 sm:$0xff]   ;;  %v18188_v19 = vld [vmem:[%s18693_s8 + $0x1c] ss:$12 sps:$4 sm:$0xff]  }
 0x82b   : > { %v10039_v1 = vpack.c.bf16 %v10005_v27, %v10004_v41  ;;  %v9779_v30 = vpop.f32.mrb[29].mxu1  ;;  %12273 = vmatpush3.bf16.msra.mxu0 %v10029_v23 }
 0x82c   : > { %v10038_v46 = vpack.c.bf16 %v10003_v63, %v10002_v0  ;;  %v13641_v49 = vpop.f32.mrb[30].mxu1 }
 0x82d   : > { %v18149_v50 = vpack.c.bf16 %v13641_v49, %v13640_v2  ;;  %v9782_v42 = vpop.f32.mrb[31].mxu1 }
 0x82e   : > { %v18151_v38 = vpack.c.bf16 %v9782_v42, %v9779_v30  ;;  %12274 = vmatprep.subr.bf16.mxu0 %v10038_v46 }
 0x82f   : > { %v9960_v21 = vunpack.c.l.bf16 %v18149_v50  ;;  %v9961_v44 = vunpack.c.h.bf16 %v18149_v50  ;;  %12275 = vmatpush3.bf16.msra.mxu0 %v10030_v45 }
 0x830   : > { %v9958_v16 = vunpack.c.l.bf16 %v18151_v38  ;;  %v9959_v11 = vunpack.c.h.bf16 %v18151_v38  ;;  %12276 = vmatprep.subr.bf16.mxu0 %v10039_v1 }
 0x831   : > { %v10008_v32 = vsub.f32 %v13640_v2, %v9960_v21  ;;  %v10009_v23 = vsub.f32 %v13641_v49, %v9961_v44  ;;  %v18212_v44 = vld [vmem:[%s18693_s8 + $0x34] ss:$12 sps:$4 sm:$0xff]  }
 0x832   : > { %v10006_v62 = vsub.f32 %v9779_v30, %v9958_v16  ;;  %v10007_v4 = vsub.f32 %v9782_v42, %v9959_v11  ;;  %v13644_v48 = vpop.f32.mrb[32].mxu1  ;;  %v18203_v30 = vld [vmem:[%s18693_s8 + $0x18] ss:$12 sps:$4 sm:$0xff]  }
 0x833   : > { %v10041_v13 = vpack.c.bf16 %v10009_v23, %v10008_v32  ;;  %v9795_v60 = vpop.f32.mrb[33].mxu1  ;;  %12277 = vmatpush3.bf16.msra.mxu0 %v10031_v7 }
 0x834   : > { %v10040_v61 = vpack.c.bf16 %v10007_v4, %v10006_v62  ;;  %v13645_v39 = vpop.f32.mrb[34].mxu1 }
 0x835   : > { %v18163_v56 = vpack.c.bf16 %v13645_v39, %v13644_v48  ;;  %v9798_v55 = vpop.f32.mrb[35].mxu1 }
 0x836   : > { %v18165_v45 = vpack.c.bf16 %v9798_v55, %v9795_v60  ;;  %12278 = vmatprep.subr.bf16.mxu0 %v10040_v61 }
 0x837   : > { %v9964_v40 = vunpack.c.l.bf16 %v18163_v56  ;;  %v9965_v35 = vunpack.c.h.bf16 %v18163_v56  ;;  %12279 = vmatpush3.bf16.msra.mxu0 %v10032_v29 }
 0x838   : > { %v9962_v6 = vunpack.c.l.bf16 %v18165_v45  ;;  %v9963_v36 = vunpack.c.h.bf16 %v18165_v45  ;;  %12280 = vmatprep.subr.bf16.mxu0 %v10041_v13 }
 0x839   : > { %v10012_v58 = vsub.f32 %v13644_v48, %v9964_v40  ;;  %v10013_v7 = vsub.f32 %v13645_v39, %v9965_v35  ;;  %v18236_v35 = vld [vmem:[%s18693_s8 + $0x4c] ss:$12 sps:$4 sm:$0xff]  }
 0x83a   : > { %v10010_v52 = vsub.f32 %v9795_v60, %v9962_v6  ;;  %v10011_v51 = vsub.f32 %v9798_v55, %v9963_v36  ;;  %v13648_v24 = vpop.f32.mrb[36].mxu1  ;;  %v18227_v60 = vld [vmem:[%s18693_s8 + $0x30] ss:$12 sps:$4 sm:$0xff]  }
 0x83b   : > { %v10043_v9 = vpack.c.bf16 %v10013_v7, %v10012_v58  ;;  %v9811_v17 = vpop.f32.mrb[37].mxu1  ;;  %12281 = vmatpush3.bf16.msra.mxu0 %v10033_v20 }
 0x83c   : > { %v10042_v25 = vpack.c.bf16 %v10011_v51, %v10010_v52  ;;  %v13649_v37 = vpop.f32.mrb[38].mxu1  ;;  %12318 = vmatprep.subr.bf16.mxu0 %v18115_v43 }
 0x83d   : > { %v18183_v29 = vpack.c.bf16 %v13649_v37, %v13648_v24  ;;  %v9814_v18 = vpop.f32.mrb[39].mxu1 }
 0x83e   : > { %v18190_v41 = vpack.c.bf16 %v9814_v18, %v9811_v17  ;;  %10163 = vmatmul.mubr.bf16.vlgmr.msra.gmra.mrb[48].mxu0 %v18177_v57  ;;  %13658 = vmatprep.subr.bf16.mxu1 %v10042_v25 }
 0x83f   : > { %v9968_v8 = vunpack.c.l.bf16 %v18183_v29  ;;  %v9969_v59 = vunpack.c.h.bf16 %v18183_v29  ;;  %13659 = vmatpush3.bf16.msra.mxu1 %v10042_v25  ;;  %12319 = vmatpush3.bf16.msra.mxu0 %v18035_v53  ;;  %v10405_v25 = vld [vmem:[%s14983_s20 + $0x30] sm:$0xff] }
 0x840   : > { %v9966_v20 = vunpack.c.l.bf16 %v18190_v41  ;;  %v9967_v43 = vunpack.c.h.bf16 %v18190_v41  ;;  %13660 = vmatprep.subr.bf16.mxu1 %v10043_v9  ;;  %12320 = vmatprep.subr.bf16.mxu0 %v18113_v5 }
 0x841   : > { %v10016_v27 = vsub.f32 %v13648_v24, %v9968_v8  ;;  %v10017_v0 = vsub.f32 %v13649_v37, %v9969_v59  ;;  %10170 = vmatprep.mubr.bf16.mxu0 %v18188_v19  ;;  %v10406_v37 = vld [vmem:[%s14983_s20 + $0x38] sm:$0xff]  ;;  %v10408_v8 = vld [vmem:[%s14983_s20 + $0x48] sm:$0xff]  ;;  %v10409_v59 = vld [vmem:[%s14983_s20 + $0x50] sm:$0xff] }
 0x842   : > { %v10014_v63 = vsub.f32 %v9811_v17, %v9966_v20  ;;  %v10015_v2 = vsub.f32 %v9814_v18, %v9967_v43  ;;  %v13652_v1 = vpop.f32.mrb[40].mxu1  ;;  %v10453_v18 = vpack.c.bf16 %v10406_v37, %v10405_v25  ;;  %v10410_v20 = vld [vmem:[%s14983_s20 + $0x58] sm:$0xff]  ;;  %v10441_v25 = vld [vmem:[%s14983_s20 + $0x150] sm:$0xff] }
 0x843   : > { %v10045_v53 = vpack.c.bf16 %v10017_v0, %v10016_v27  ;;  %v9827_v46 = vpop.f32.mrb[41].mxu1  ;;  %13661 = vmatpush3.bf16.msra.mxu1 %v10043_v9  ;;  %12321 = vmatpush3.bf16.msra.mxu0 %v18033_v31  ;;  %v18251_v9 = vld [vmem:[%s18693_s8 + $0x48] ss:$12 sps:$4 sm:$0xff]   ;;  %v10455_v27 = vpack.c.bf16 %v10410_v20, %v10409_v59  ;;  %v10411_v0 = vld [vmem:[%s14983_s20 + $0x60] sm:$0xff]  ;;  %v10442_v37 = vld [vmem:[%s14983_s20 + $0x158] sm:$0xff] }
 0x844   : > { %v10044_v49 = vpack.c.bf16 %v10015_v2, %v10014_v63  ;;  %v13653_v42 = vpop.f32.mrb[42].mxu1  ;;  %12322 = vmatprep.subr.bf16.mxu0 %v18123_v54  ;;  %v10412_v63 = vld [vmem:[%s14983_s20 + $0x68] sm:$0xff]  ;;  %v10413_v2 = vld [vmem:[%s14983_s20 + $0x70] sm:$0xff]  ;;  %v10446_v20 = vld [vmem:[%s14983_s20 + $0x178] sm:$0xff] }
 0x845   : > { %v18207_v5 = vpack.c.bf16 %v13653_v42, %v13652_v1  ;;  %v9830_v21 = vpop.f32.mrb[43].mxu1  ;;  %v10445_v59 = vld [vmem:[%s14983_s20 + $0x170] sm:$0xff] }
 0x846   : > { %v18214_v16 = vpack.c.bf16 %v9830_v21, %v9827_v46  ;;  %10171 = vmatmul.mubr.bf16.gmra.mrb[52].mxu0 %v18203_v30  ;;  %13662 = vmatprep.subr.bf16.mxu1 %v10044_v49 }
 0x847   : > { %v9972_v11 = vunpack.c.l.bf16 %v18207_v5  ;;  %v9973_v31 = vunpack.c.h.bf16 %v18207_v5  ;;  %13663 = vmatpush3.bf16.msra.mxu1 %v10044_v49  ;;  %12323 = vmatpush3.bf16.msra.mxu0 %v18055_v22  ;;  %v10415_v49 = vld [vmem:[%s14983_s20 + $0x80] sm:$0xff] }
 0x848   : > { %v9970_v54 = vunpack.c.l.bf16 %v18214_v16  ;;  %v9971_v32 = vunpack.c.h.bf16 %v18214_v16  ;;  %13664 = vmatprep.subr.bf16.mxu1 %v10045_v53  ;;  %12324 = vmatprep.subr.bf16.mxu0 %v18121_v34 }
 0x849   : > { %v10020_v23 = vsub.f32 %v13652_v1, %v9972_v11  ;;  %v10021_v62 = vsub.f32 %v13653_v42, %v9973_v31  ;;  %10178 = vmatprep.mubr.bf16.mxu0 %v18212_v44  ;;  %v10414_v1 = vld [vmem:[%s14983_s20 + $0x78] sm:$0xff]  ;;  %v10416_v42 = vld [vmem:[%s14983_s20 + $0x88] sm:$0xff]  ;;  %v10419_v31 = vld [vmem:[%s14983_s20 + $0xa0] sm:$0xff] }
 0x84a   : > { %v10018_v4 = vsub.f32 %v9827_v46, %v9970_v54  ;;  %v10019_v48 = vsub.f32 %v9830_v21, %v9971_v32  ;;  %v13656_v13 = vpop.f32.mrb[44].mxu1  ;;  %v10457_v46 = vpack.c.bf16 %v10414_v1, %v10413_v2  ;;  %v10418_v21 = vld [vmem:[%s14983_s20 + $0x98] sm:$0xff]  ;;  %v10420_v54 = vld [vmem:[%s14983_s20 + $0xa8] sm:$0xff]  ;;  %v10421_v32 = vld [vmem:[%s14983_s20 + $0xb0] sm:$0xff] }
 0x84b   : > { %v10047_v22 = vpack.c.bf16 %v10021_v62, %v10020_v23  ;;  %v9843_v61 = vpop.f32.mrb[45].mxu1  ;;  %13665 = vmatpush3.bf16.msra.mxu1 %v10045_v53  ;;  %12325 = vmatpush3.bf16.msra.mxu0 %v18053_v28  ;;  %v10456_v53 = vpack.c.bf16 %v10412_v63, %v10411_v0  ;;  %v10422_v23 = vld [vmem:[%s14983_s20 + $0xb8] sm:$0xff]  ;;  %v10460_v62 = vpack.c.bf16 %v10420_v54, %v10419_v31  ;;  %v10447_v0 = vld [vmem:[%s14983_s20 + $0x180] sm:$0xff]  ;;  %v10448_v63 = vld [vmem:[%s14983_s20 + $0x188] sm:$0xff] }
 0x84c   : > { %v10046_v39 = vpack.c.bf16 %v10019_v48, %v10018_v4  ;;  %v13657_v55 = vpop.f32.mrb[46].mxu1  ;;  %12326 = vmatprep.subr.bf16.mxu0 %v18137_v15  ;;  %v10461_v4 = vpack.c.bf16 %v10422_v23, %v10421_v32  ;;  %v10423_v48 = vld [vmem:[%s14983_s20 + $0xc0] sm:$0xff]  ;;  %v10449_v2 = vld [vmem:[%s14983_s20 + $0x190] sm:$0xff]  ;;  %v10450_v1 = vld [vmem:[%s14983_s20 + $0x198] sm:$0xff] }
 0x84d   : > { %v18231_v34 = vpack.c.bf16 %v13657_v55, %v13656_v13  ;;  %v9846_v40 = vpop.f32.mrb[47].mxu1 }
 0x84e   : > { %v18238_v6 = vpack.c.bf16 %v9846_v40, %v9843_v61  ;;  %10179 = vmatmul.mubr.bf16.gmra.mrb[56].mxu0 %v18227_v60  ;;  %13666 = vmatprep.subr.bf16.mxu1 %v10046_v39 }
 0x84f   : > { %v9976_v36 = vunpack.c.l.bf16 %v18231_v34  ;;  %v9977_v28 = vunpack.c.h.bf16 %v18231_v34  ;;  %13667 = vmatpush3.bf16.msra.mxu1 %v10046_v39  ;;  %12327 = vmatpush3.bf16.msra.mxu0 %v18075_v26 }
 0x850   : > { %v9974_v15 = vunpack.c.l.bf16 %v18238_v6  ;;  %v9975_v58 = vunpack.c.h.bf16 %v18238_v6  ;;  %13668 = vmatprep.subr.bf16.mxu1 %v10047_v22  ;;  %12328 = vmatprep.subr.bf16.mxu0 %v18135_v10  ;;  %v14843_v10 = vld [vmem:[%s18690_s5] sm:$0xff]  }
 0x851   : > { %v10024_v7 = vsub.f32 %v13656_v13, %v9976_v36  ;;  %v10025_v52 = vsub.f32 %v13657_v55, %v9977_v28  ;;  %10186 = vmatprep.mubr.bf16.mxu0 %v18236_v35  ;;  %v10424_v13 = vld [vmem:[%s14983_s20 + $0xc8] sm:$0xff]  ;;  %v10430_v36 = vld [vmem:[%s14983_s20 + $0xf8] sm:$0xff] }
 0x852   : > { %v10022_v51 = vsub.f32 %v9843_v61, %v9974_v15  ;;  %v10023_v24 = vsub.f32 %v9846_v40, %v9975_v58  ;;  %v10426_v61 = vld [vmem:[%s14983_s20 + $0xd8] sm:$0xff]  ;;  %v10462_v39 = vpack.c.bf16 %v10424_v13, %v10423_v48  ;;  %v10428_v40 = vld [vmem:[%s14983_s20 + $0xe8] sm:$0xff]  ;;  %v10431_v58 = vld [vmem:[%s14983_s20 + $0x100] sm:$0xff] }
 0x853   : > { %v10049_v17 = vpack.c.bf16 %v10025_v52, %v10024_v7  ;;  %13669 = vmatpush3.bf16.msra.mxu1 %v10047_v22  ;;  %12329 = vmatpush3.bf16.msra.mxu0 %v18073_v47  ;;  %v18265_v47 = vld [vmem:[%s18693_s8 + $0x20] ss:$12 sps:$4 sm:$0xff]   ;;  %v10425_v22 = vld [vmem:[%s14983_s20 + $0xd0] sm:$0xff] }
 0x854   : > { %v10048_v26 = vpack.c.bf16 %v10023_v24, %v10022_v51  ;;  %12330 = vmatprep.subr.bf16.mxu0 %v18151_v38  ;;  %v14848_v38 = vld [vmem:[%s18690_s5 + $0x20] sm:$0xff]   ;;  %v10463_v55 = vpack.c.bf16 %v10426_v61, %v10425_v22  ;;  %v10432_v7 = vld [vmem:[%s14983_s20 + $0x108] sm:$0xff]  ;;  %v10433_v52 = vld [vmem:[%s14983_s20 + $0x110] sm:$0xff] }
 0x855   : > { %v10434_v51 = vld [vmem:[%s14983_s20 + $0x118] sm:$0xff]  ;;  %v10466_v24 = vpack.c.bf16 %v10432_v7, %v10431_v58 }
 0x856   : > { %10187 = vmatmul.mubr.bf16.gmra.mrb[60].mxu0 %v18251_v9  ;;  %13670 = vmatprep.subr.bf16.mxu1 %v10048_v26 }
 0x857   : > { %13671 = vmatpush3.bf16.msra.mxu1 %v10048_v26  ;;  %12331 = vmatpush3.bf16.msra.mxu0 %v18095_v12  ;;  %v14845_v12 = vld [vmem:[%s18690_s5 + $0x8] sm:$0xff]   ;;  %v10435_v26 = vld [vmem:[%s14983_s20 + $0x120] sm:$0xff] }
 0x858   : > { %13672 = vmatprep.subr.bf16.mxu1 %v10049_v17  ;;  %12332 = vmatprep.subr.bf16.mxu0 %v18149_v50  ;;  %v14847_v50 = vld [vmem:[%s18690_s5 + $0x18] sm:$0xff]  }
 0x859   : > { %10292 = vmatprep.mubr.bf16.mxu0 %v18024_v14 }
 0x85b   : > { %13673 = vmatpush3.bf16.msra.mxu1 %v10049_v17  ;;  %12333 = vmatpush3.bf16.msra.mxu0 %v18093_v3  ;;  %v14846_v3 = vld [vmem:[%s18690_s5 + $0x10] sm:$0xff]   ;;  %v10467_v17 = vpack.c.bf16 %v10434_v51, %v10433_v52 }
 0x85c   : > { %13682 = vmatprep.subr.bf16.mxu1 %v18165_v45  ;;  %13706 = vmatprep.subr.bf16.mxu0 %v14843_v10 }
 0x85e   : > { %10293 = vmatmul.mubr.bf16.vlgmr.msra.gmra.mrb[64].mxu0 %v18177_v57  ;;  %13675 = vmatmul.mubr.bf16.vlgmr.msra.gmra.mrb[48].mxu1 %v18265_v47 }
 0x85f   : > { %13683 = vmatpush3.bf16.msra.mxu1 %v18165_v45  ;;  %13707 = vmatpush3.bf16.msra.mxu0 %v14843_v10  ;;  %v14850_v45 = vld [vmem:[%s18690_s5 + $0x30] sm:$0xff]   ;;  %v10436_v10 = vld [vmem:[%s14983_s20 + $0x128] sm:$0xff] }
 0x860   : > { %13684 = vmatprep.subr.bf16.mxu1 %v18163_v56  ;;  %13708 = vmatprep.subr.bf16.mxu0 %v14845_v12 }
 0x861   : > { %10300 = vmatprep.mubr.bf16.mxu0 %v18188_v19 }
 0x863   : > { %13685 = vmatpush3.bf16.msra.mxu1 %v18163_v56  ;;  %13709 = vmatpush3.bf16.msra.mxu0 %v14845_v12  ;;  %v14849_v56 = vld [vmem:[%s18690_s5 + $0x28] sm:$0xff]   ;;  %v10437_v12 = vld [vmem:[%s14983_s20 + $0x130] sm:$0xff] }
 0x864   : > { %13686 = vmatprep.subr.bf16.mxu1 %v18190_v41  ;;  %13710 = vmatprep.subr.bf16.mxu0 %v14846_v3 }
 0x866   : > { %10301 = vmatmul.mubr.bf16.gmra.mrb[68].mxu0 %v18203_v30 }
 0x867   : > { %13687 = vmatpush3.bf16.msra.mxu1 %v18190_v41  ;;  %13711 = vmatpush3.bf16.msra.mxu0 %v14846_v3  ;;  %v10407_v41 = vld [vmem:[%s14983_s20 + $0x40] sm:$0xff]  ;;  %v10438_v3 = vld [vmem:[%s14983_s20 + $0x138] sm:$0xff] }
 0x868   : > { %13688 = vmatprep.subr.bf16.mxu1 %v18183_v29  ;;  %13712 = vmatprep.subr.bf16.mxu0 %v14847_v50  ;;  %v10454_v43 = vpack.c.bf16 %v10408_v8, %v10407_v41  ;;  %v10443_v41 = vld [vmem:[%s14983_s20 + $0x160] sm:$0xff]  ;;  %v10444_v8 = vld [vmem:[%s14983_s20 + $0x168] sm:$0xff] }
 0x869   : > { %10308 = vmatprep.mubr.bf16.mxu0 %v18212_v44 }
 0x86b   : > { %13689 = vmatpush3.bf16.msra.mxu1 %v18183_v29  ;;  %13713 = vmatpush3.bf16.msra.mxu0 %v14847_v50  ;;  %v14851_v29 = vld [vmem:[%s18690_s5 + $0x38] sm:$0xff]   ;;  %v10468_v50 = vpack.c.bf16 %v10436_v10, %v10435_v26 }
 0x86c   : > { %13690 = vmatprep.subr.bf16.mxu1 %v18214_v16  ;;  %13714 = vmatprep.subr.bf16.mxu0 %v14848_v38 }
 0x86e   : > { %10309 = vmatmul.mubr.bf16.gmra.mrb[72].mxu0 %v18227_v60 }
 0x86f   : > { %13691 = vmatpush3.bf16.msra.mxu1 %v18214_v16  ;;  %13715 = vmatpush3.bf16.msra.mxu0 %v14848_v38  ;;  %v10458_v16 = vpack.c.bf16 %v10416_v42, %v10415_v49  ;;  %v10469_v38 = vpack.c.bf16 %v10438_v3, %v10437_v12  ;;  %v10451_v49 = vld [vmem:[%s14983_s20 + $0x1a0] sm:$0xff]  ;;  %v10452_v42 = vld [vmem:[%s14983_s20 + $0x1a8] sm:$0xff] }
 0x870   : > { %13692 = vmatprep.subr.bf16.mxu1 %v18207_v5  ;;  %13716 = vmatprep.subr.bf16.mxu0 %v14849_v56 }
 0x871   : > { %10316 = vmatprep.mubr.bf16.mxu0 %v18236_v35 }
 0x873   : > { %13693 = vmatpush3.bf16.msra.mxu1 %v18207_v5  ;;  %13717 = vmatpush3.bf16.msra.mxu0 %v14849_v56  ;;  %v10417_v5 = vld [vmem:[%s14983_s20 + $0x90] sm:$0xff]  ;;  %v10439_v56 = vld [vmem:[%s14983_s20 + $0x140] sm:$0xff] }
 0x874   : > { %13694 = vmatprep.subr.bf16.mxu1 %v18238_v6  ;;  %13718 = vmatprep.subr.bf16.mxu0 %v14850_v45  ;;  %v10459_v11 = vpack.c.bf16 %v10418_v21, %v10417_v5  ;;  %v10476_v5 = vpack.c.bf16 %v10452_v42, %v10451_v49  ;;  %v18365_v21 = vld [vmem:[%s18693_s8 + $0x38] ss:$12 sps:$4 sm:$0xff]  }
 0x875   : > { %13678 = vmatprep.mubr.bf16.mxu1 %v18365_v21 }
 0x876   : > { %10317 = vmatmul.mubr.bf16.gmra.mrb[76].mxu0 %v18251_v9 }
 0x877   : > { %13695 = vmatpush3.bf16.msra.mxu1 %v18238_v6  ;;  %13719 = vmatpush3.bf16.msra.mxu0 %v14850_v45  ;;  %v10429_v6 = vld [vmem:[%s14983_s20 + $0xf0] sm:$0xff]  ;;  %v10440_v45 = vld [vmem:[%s14983_s20 + $0x148] sm:$0xff] }
 0x878   : > { %13696 = vmatprep.subr.bf16.mxu1 %v18231_v34  ;;  %13720 = vmatprep.subr.bf16.mxu0 %v14851_v29  ;;  %v10465_v15 = vpack.c.bf16 %v10430_v36, %v10429_v6 }
 0x879   : > { %13722 = vmatprep.mubr.bf16.mxu0 %v10453_v18  ;;  %v10471_v18 = vpack.c.bf16 %v10442_v37, %v10441_v25 }
 0x87b   : > { %13697 = vmatpush3.bf16.msra.mxu1 %v18231_v34  ;;  %13721 = vmatpush3.bf16.msra.mxu0 %v14851_v29  ;;  %v10427_v34 = vld [vmem:[%s14983_s20 + $0xe0] sm:$0xff]  ;;  %v10470_v29 = vpack.c.bf16 %v10440_v45, %v10439_v56 }
 0x87c   : > { %v10464_v28 = vpack.c.bf16 %v10428_v40, %v10427_v34 }
 0x87e   : > { %13723 = vmatmul.mubr.bf16.vlgmr.msra.gmra.mrb[80].mxu0 %v10454_v43  ;;  %v10472_v43 = vpack.c.bf16 %v10444_v8, %v10443_v41 }
 0x87f   : > { %13726 = vmatprep.mubr.bf16.mxu0 %v10455_v27  ;;  %v10473_v27 = vpack.c.bf16 %v10446_v20, %v10445_v59 }
 0x886   : > { %13727 = vmatmul.mubr.bf16.gmra.mrb[84].mxu0 %v10456_v53  ;;  %v10474_v53 = vpack.c.bf16 %v10448_v63, %v10447_v0 }
 0x887   : > { %13730 = vmatprep.mubr.bf16.mxu0 %v10457_v46  ;;  %v10475_v46 = vpack.c.bf16 %v10450_v1, %v10449_v2 }
 0x88e   : > { %13731 = vmatmul.mubr.bf16.gmra.mrb[88].mxu0 %v10458_v16  ;;  %v18370_v16 = vld [vmem:[%s18693_s8 + $0x50] ss:$12 sps:$4 sm:$0xff]  }
 0x88f   : > { %13734 = vmatprep.mubr.bf16.mxu0 %v10459_v11  ;;  %13679 = vmatmul.mubr.bf16.gmra.mrb[52].mxu1 %v18370_v16 }
 0x890   : > { %13698 = vmatprep.mubr.bf16.mxu1 %v18030_v33 }
 0x896   : > { %13735 = vmatmul.mubr.bf16.gmra.mrb[92].mxu0 %v10460_v62 }
 0x897   : > { %13738 = vmatprep.mubr.bf16.mxu0 %v10461_v4  ;;  %13699 = vmatmul.mubr.bf16.vlgmr.msra.gmra.mrb[48].mxu1 %v18265_v47 }
 0x898   : > { %13702 = vmatprep.mubr.bf16.mxu1 %v18365_v21 }
 0x89e   : > { %13739 = vmatmul.mubr.bf16.gmra.mrb[96].mxu0 %v10462_v39 }
 0x89f   : > { %13742 = vmatprep.mubr.bf16.mxu0 %v10463_v55  ;;  %13703 = vmatmul.mubr.bf16.gmra.mrb[52].mxu1 %v18370_v16 }
 0x8a0   : > { %10942 = vmatprep.mubr.bf16.mxu1 %v18024_v14 }
 0x8a6   : > { %13743 = vmatmul.mubr.bf16.gmra.mrb[100].mxu0 %v10464_v28 }
 0x8a7   : > { %13746 = vmatprep.mubr.bf16.mxu0 %v10465_v15 }
 0x8ae   : > { %13747 = vmatmul.mubr.bf16.gmra.mrb[104].mxu0 %v10466_v24 }
 0x8af   : > { %13750 = vmatprep.mubr.bf16.mxu0 %v10467_v17 }
 0x8b6   : > { %13751 = vmatmul.mubr.bf16.gmra.mrb[108].mxu0 %v10468_v50 }
 0x8b7   : > { %13754 = vmatprep.mubr.bf16.mxu0 %v10469_v38 }
 0x8be   : > { %13755 = vmatmul.mubr.bf16.gmra.mrb[112].mxu0 %v10470_v29 }
 0x8bf   : > { %13758 = vmatprep.mubr.bf16.mxu0 %v10471_v18 }
 0x8c6   : > { %13759 = vmatmul.mubr.bf16.gmra.mrb[116].mxu0 %v10472_v43 }
 0x8c7   : > { %13762 = vmatprep.mubr.bf16.mxu0 %v10473_v27 }
 0x8ce   : > { %13763 = vmatmul.mubr.bf16.gmra.mrb[120].mxu0 %v10474_v53 }
 0x8cf   : > { %13766 = vmatprep.mubr.bf16.mxu0 %v10475_v46 }
 0x8d6   : > { %13767 = vmatmul.mubr.bf16.gmra.mrb[124].mxu0 %v10476_v5 }
 0x8d7   : > { %13810 = vmatprep.mubr.bf16.mxu0 %v18030_v33 }
 0x911   : > { %v12282_v11 = vpop.f32.mrb[48].mxu0 }
 0x912   : > { %v12283_v31 = vpop.f32.mrb[49].mxu0 }
 0x913   : > { %v12284_v54 = vadd.f32 %v12283_v31, %v12282_v11  ;;  %v12285_v32 = vpop.f32.mrb[50].mxu0 }
 0x914   : > { %v12286_v23 = vpop.f32.mrb[51].mxu0 }
 0x915   : > { %v12287_v62 = vadd.f32 %v12286_v23, %v12285_v32 }
 0x919   : > { %v12288_v4 = vpop.f32.mrb[52].mxu0 }
 0x91a   : > { %v12289_v48 = vpop.f32.mrb[53].mxu0 }
 0x91b   : > { %v12290_v13 = vadd.f32 %v12289_v48, %v12288_v4  ;;  %v12291_v22 = vpop.f32.mrb[54].mxu0 }
 0x91c   : > { %v12292_v61 = vpop.f32.mrb[55].mxu0 }
 0x91d   : > { %v12293_v33 = vadd.f32 %v12292_v61, %v12291_v22 }
 0x921   : > { %v12294_v39 = vpop.f32.mrb[56].mxu0 }
 0x922   : > { %v12295_v55 = vpop.f32.mrb[57].mxu0 }
 0x923   : > { %v12296_v34 = vadd.f32 %v12295_v55, %v12294_v39  ;;  %v12297_v40 = vpop.f32.mrb[58].mxu0 }
 0x924   : > { %v12298_v6 = vpop.f32.mrb[59].mxu0 }
 0x925   : > { %v12299_v36 = vadd.f32 %v12298_v6, %v12297_v40 }
 0x929   : > { %v12300_v28 = vpop.f32.mrb[60].mxu0 }
 0x92a   : > { %v12301_v14 = vpop.f32.mrb[61].mxu0 }
 0x92b   : > { %v12302_v15 = vadd.f32 %v12301_v14, %v12300_v28  ;;  %v12303_v58 = vpop.f32.mrb[62].mxu0 }
 0x92c   : > { %v12304_v7 = vpop.f32.mrb[63].mxu0 }
 0x92d   : > { %v12305_v52 = vadd.f32 %v12304_v7, %v12303_v58 }
 0x931   : > { %v12334_v51 = vpop.f32.mrb[64].mxu0 }
 0x932   : > { %v12335_v24 = vpop.f32.mrb[65].mxu0 }
 0x933   : > { %v12336_v17 = vadd.f32 %v12335_v24, %v12334_v51  ;;  %v12337_v26 = vpop.f32.mrb[66].mxu0 }
 0x934   : > { %v12338_v10 = vpop.f32.mrb[67].mxu0 }
 0x935   : > { %v18379_v12 = vadd.f32 %v12336_v17, %v12284_v54  ;;  %v12339_v3 = vadd.f32 %v12338_v10, %v12337_v26 }
 0x937   : > { %v18381_v50 = vadd.f32 %v12339_v3, %v12287_v62 }
 0x939   : > { %v12340_v38 = vpop.f32.mrb[68].mxu0 }
 0x93a   : > { %v12341_v56 = vpop.f32.mrb[69].mxu0 }
 0x93b   : > { %v12342_v45 = vadd.f32 %v12341_v56, %v12340_v38  ;;  %v12343_v25 = vpop.f32.mrb[70].mxu0 }
 0x93c   : > { %v12344_v37 = vpop.f32.mrb[71].mxu0 }
 0x93d   : > { %v18383_v29 = vadd.f32 %v12342_v45, %v12290_v13  ;;  %v12345_v18 = vadd.f32 %v12344_v37, %v12343_v25 }
 0x93f   : > { %v18385_v41 = vadd.f32 %v12345_v18, %v12293_v33 }
 0x941   : > { %v12346_v8 = vpop.f32.mrb[72].mxu0 }
 0x942   : > { %v12347_v59 = vpop.f32.mrb[73].mxu0 }
 0x943   : > { %v12348_v20 = vadd.f32 %v12347_v59, %v12346_v8  ;;  %v12349_v43 = vpop.f32.mrb[74].mxu0 }
 0x944   : > { %v12350_v27 = vpop.f32.mrb[75].mxu0 }
 0x945   : > { %v18387_v0 = vadd.f32 %v12348_v20, %v12296_v34  ;;  %v12351_v63 = vadd.f32 %v12350_v27, %v12349_v43 }
 0x947   : > { %v18389_v2 = vadd.f32 %v12351_v63, %v12299_v36 }
 0x949   : > { %v12352_v1 = vpop.f32.mrb[76].mxu0 }
 0x94a   : > { %v12353_v53 = vpop.f32.mrb[77].mxu0 }
 0x94b   : > { %v12354_v46 = vadd.f32 %v12353_v53, %v12352_v1  ;;  %v12355_v49 = vpop.f32.mrb[78].mxu0 }
 0x94c   : > { %v12356_v42 = vpop.f32.mrb[79].mxu0 }
 0x94d   : > { %v18391_v5 = vadd.f32 %v12354_v46, %v12302_v15  ;;  %v12357_v11 = vadd.f32 %v12356_v42, %v12355_v49 }
 0x94f   : > { %19034 = vst [vmem:[#allocation23_spill] sm:$0xff] %v18391_v5  ;;  %v18393_v31 = vadd.f32 %v12357_v11, %v12305_v52 }
 0x951   : > { %19035 = vst [vmem:[#allocation20_spill] sm:$0xff] %v18393_v31  ;;  %v13724_v54 = vpop.f32.mrb[80].mxu0 }
 0x952   : > { %v10575_v32 = vpop.f32.mrb[81].mxu0 }
 0x953   : > { %v13725_v23 = vpop.f32.mrb[82].mxu0 }
 0x954   : > { %v18395_v62 = vpack.c.bf16 %v13725_v23, %v13724_v54  ;;  %v10578_v4 = vpop.f32.mrb[83].mxu0 }
 0x955   : > { %v18397_v48 = vpack.c.bf16 %v10578_v4, %v10575_v32 }
 0x956   : > { %v10792_v13 = vunpack.c.l.bf16 %v18395_v62  ;;  %v10793_v22 = vunpack.c.h.bf16 %v18395_v62 }
 0x957   : > { %v10790_v61 = vunpack.c.l.bf16 %v18397_v48  ;;  %v10791_v33 = vunpack.c.h.bf16 %v18397_v48 }
 0x958   : > { %v18403_v39 = vsub.f32 %v13724_v54, %v10792_v13  ;;  %v18405_v55 = vsub.f32 %v13725_v23, %v10793_v22 }
 0x959   : > { %v18407_v34 = vsub.f32 %v10575_v32, %v10790_v61  ;;  %v18409_v40 = vsub.f32 %v10578_v4, %v10791_v33  ;;  %v13728_v6 = vpop.f32.mrb[84].mxu0 }
 0x95a   : > { %v10591_v28 = vpop.f32.mrb[85].mxu0 }
 0x95b   : > { %v13729_v15 = vpop.f32.mrb[86].mxu0 }
 0x95c   : > { %v18415_v58 = vpack.c.bf16 %v13729_v15, %v13728_v6  ;;  %v10594_v7 = vpop.f32.mrb[87].mxu0 }
 0x95d   : > { %v18417_v52 = vpack.c.bf16 %v10594_v7, %v10591_v28 }
 0x95e   : > { %v10796_v51 = vunpack.c.l.bf16 %v18415_v58  ;;  %v10797_v24 = vunpack.c.h.bf16 %v18415_v58 }
 0x95f   : > { %v10794_v17 = vunpack.c.l.bf16 %v18417_v52  ;;  %v10795_v26 = vunpack.c.h.bf16 %v18417_v52 }
 0x960   : > { %v18423_v10 = vsub.f32 %v13728_v6, %v10796_v51  ;;  %v18425_v3 = vsub.f32 %v13729_v15, %v10797_v24 }
 0x961   : > { %v18427_v38 = vsub.f32 %v10591_v28, %v10794_v17  ;;  %v18429_v56 = vsub.f32 %v10594_v7, %v10795_v26  ;;  %v13732_v45 = vpop.f32.mrb[88].mxu0 }
 0x962   : > { %v10607_v37 = vpop.f32.mrb[89].mxu0 }
 0x963   : > { %v13733_v8 = vpop.f32.mrb[90].mxu0 }
 0x964   : > { %v18435_v59 = vpack.c.bf16 %v13733_v8, %v13732_v45  ;;  %v10610_v20 = vpop.f32.mrb[91].mxu0 }
 0x965   : > { %v18437_v43 = vpack.c.bf16 %v10610_v20, %v10607_v37 }
 0x966   : > { %v10800_v27 = vunpack.c.l.bf16 %v18435_v59  ;;  %v10801_v63 = vunpack.c.h.bf16 %v18435_v59 }
 0x967   : > { %v10798_v1 = vunpack.c.l.bf16 %v18437_v43  ;;  %v10799_v53 = vunpack.c.h.bf16 %v18437_v43 }
 0x968   : > { %v18443_v46 = vsub.f32 %v13732_v45, %v10800_v27  ;;  %v18445_v49 = vsub.f32 %v13733_v8, %v10801_v63 }
 0x969   : > { %v18447_v42 = vsub.f32 %v10607_v37, %v10798_v1  ;;  %v18449_v11 = vsub.f32 %v10610_v20, %v10799_v53  ;;  %v13736_v54 = vpop.f32.mrb[92].mxu0 }
 0x96a   : > { %v10623_v23 = vpop.f32.mrb[93].mxu0 }
 0x96b   : > { %v13737_v13 = vpop.f32.mrb[94].mxu0 }
 0x96c   : > { %v18455_v22 = vpack.c.bf16 %v13737_v13, %v13736_v54  ;;  %v10626_v61 = vpop.f32.mrb[95].mxu0 }
 0x96d   : > { %v18457_v33 = vpack.c.bf16 %v10626_v61, %v10623_v23 }
 0x96e   : > { %v10804_v6 = vunpack.c.l.bf16 %v18455_v22  ;;  %v10805_v28 = vunpack.c.h.bf16 %v18455_v22 }
 0x96f   : > { %v10802_v15 = vunpack.c.l.bf16 %v18457_v33  ;;  %v10803_v7 = vunpack.c.h.bf16 %v18457_v33 }
 0x970   : > { %v18463_v51 = vsub.f32 %v13736_v54, %v10804_v6  ;;  %v18465_v24 = vsub.f32 %v13737_v13, %v10805_v28 }
 0x971   : > { %v18467_v17 = vsub.f32 %v10623_v23, %v10802_v15  ;;  %v18469_v26 = vsub.f32 %v10626_v61, %v10803_v7  ;;  %v13740_v45 = vpop.f32.mrb[96].mxu0 }
 0x972   : > { %v10639_v8 = vpop.f32.mrb[97].mxu0 }
 0x973   : > { %v13741_v27 = vpop.f32.mrb[98].mxu0 }
 0x974   : > { %v18475_v63 = vpack.c.bf16 %v13741_v27, %v13740_v45  ;;  %v10642_v1 = vpop.f32.mrb[99].mxu0 }
 0x975   : > { %v18477_v53 = vpack.c.bf16 %v10642_v1, %v10639_v8 }
 0x976   : > { %v10808_v54 = vunpack.c.l.bf16 %v18475_v63  ;;  %v10809_v23 = vunpack.c.h.bf16 %v18475_v63 }
 0x977   : > { %v10806_v13 = vunpack.c.l.bf16 %v18477_v53  ;;  %v10807_v61 = vunpack.c.h.bf16 %v18477_v53 }
 0x978   : > { %v10856_v6 = vsub.f32 %v13740_v45, %v10808_v54  ;;  %v10857_v28 = vsub.f32 %v13741_v27, %v10809_v23  ;;  %v19036_v45 = vpack.c.bf16 %v18409_v40, %v18407_v34 }
 0x979   : > { %v10854_v15 = vsub.f32 %v10639_v8, %v10806_v13  ;;  %v10855_v7 = vsub.f32 %v10642_v1, %v10807_v61  ;;  %v13744_v37 = vpop.f32.mrb[100].mxu0 }
 0x97a   : > { %v10895_v20 = vpack.c.bf16 %v10857_v28, %v10856_v6  ;;  %v10655_v32 = vpop.f32.mrb[101].mxu0  ;;  %v19037_v28 = vpack.c.bf16 %v18405_v55, %v18403_v39 }
 0x97b   : > { %v10894_v4 = vpack.c.bf16 %v10855_v7, %v10854_v15  ;;  %v13745_v25 = vpop.f32.mrb[102].mxu0 }
 0x97c   : > { %v18483_v18 = vpack.c.bf16 %v13745_v25, %v13744_v37  ;;  %v10658_v36 = vpop.f32.mrb[103].mxu0 }
 0x97d   : > { %v18485_v14 = vpack.c.bf16 %v10658_v36, %v10655_v32  ;;  %12402 = vmatprep.subr.bf16.mxu1 %v10894_v4 }
 0x97e   : > { %v10812_v31 = vunpack.c.l.bf16 %v18483_v18  ;;  %v10813_v5 = vunpack.c.h.bf16 %v18483_v18  ;;  %12403 = vmatpush3.bf16.msra.mxu1 %v19036_v45 }
 0x97f   : > { %v10810_v8 = vunpack.c.l.bf16 %v18485_v14  ;;  %v10811_v27 = vunpack.c.h.bf16 %v18485_v14  ;;  %12404 = vmatprep.subr.bf16.mxu1 %v10895_v20 }
 0x980   : > { %v10860_v1 = vsub.f32 %v13744_v37, %v10812_v31  ;;  %v10861_v54 = vsub.f32 %v13745_v25, %v10813_v5 }
 0x981   : > { %v10858_v23 = vsub.f32 %v10655_v32, %v10810_v8  ;;  %v10859_v13 = vsub.f32 %v10658_v36, %v10811_v27  ;;  %v13748_v61 = vpop.f32.mrb[104].mxu0  ;;  %v19038_v36 = vpack.c.bf16 %v18429_v56, %v18427_v38 }
 0x982   : > { %v10897_v6 = vpack.c.bf16 %v10861_v54, %v10860_v1  ;;  %v10671_v4 = vpop.f32.mrb[105].mxu0  ;;  %12405 = vmatpush3.bf16.msra.mxu1 %v19037_v28  ;;  %v19039_v54 = vpack.c.bf16 %v18425_v3, %v18423_v10 }
 0x983   : > { %v10896_v15 = vpack.c.bf16 %v10859_v13, %v10858_v23  ;;  %v13749_v7 = vpop.f32.mrb[106].mxu0 }
 0x984   : > { %v18497_v34 = vpack.c.bf16 %v13749_v7, %v13748_v61  ;;  %v10674_v40 = vpop.f32.mrb[107].mxu0 }
 0x985   : > { %v18499_v45 = vpack.c.bf16 %v10674_v40, %v10671_v4  ;;  %12406 = vmatprep.subr.bf16.mxu1 %v10896_v15 }
 0x986   : > { %v10816_v31 = vunpack.c.l.bf16 %v18497_v34  ;;  %v10817_v5 = vunpack.c.h.bf16 %v18497_v34  ;;  %12407 = vmatpush3.bf16.msra.mxu1 %v19038_v36 }
 0x987   : > { %v10814_v25 = vunpack.c.l.bf16 %v18499_v45  ;;  %v10815_v39 = vunpack.c.h.bf16 %v18499_v45  ;;  %12408 = vmatprep.subr.bf16.mxu1 %v10897_v6 }
 0x988   : > { %v10864_v55 = vsub.f32 %v13748_v61, %v10816_v31  ;;  %v10865_v32 = vsub.f32 %v13749_v7, %v10817_v5 }
 0x989   : > { %v10862_v37 = vsub.f32 %v10671_v4, %v10814_v25  ;;  %v10863_v20 = vsub.f32 %v10674_v40, %v10815_v39  ;;  %v13752_v8 = vpop.f32.mrb[108].mxu0  ;;  %v19040_v4 = vpack.c.bf16 %v18449_v11, %v18447_v42  ;;  %v19041_v39 = vpack.c.bf16 %v18445_v49, %v18443_v46 }
 0x98a   : > { %v10899_v27 = vpack.c.bf16 %v10865_v32, %v10864_v55  ;;  %v10687_v1 = vpop.f32.mrb[109].mxu0  ;;  %12409 = vmatpush3.bf16.msra.mxu1 %v19039_v54 }
 0x98b   : > { %v10898_v23 = vpack.c.bf16 %v10863_v20, %v10862_v37  ;;  %v13753_v13 = vpop.f32.mrb[110].mxu0 }
 0x98c   : > { %v18511_v38 = vpack.c.bf16 %v13753_v13, %v13752_v8  ;;  %v10690_v56 = vpop.f32.mrb[111].mxu0 }
 0x98d   : > { %v18513_v28 = vpack.c.bf16 %v10690_v56, %v10687_v1  ;;  %12410 = vmatprep.subr.bf16.mxu1 %v10898_v23 }
 0x98e   : > { %v10820_v61 = vunpack.c.l.bf16 %v18511_v38  ;;  %v10821_v6 = vunpack.c.h.bf16 %v18511_v38  ;;  %12411 = vmatpush3.bf16.msra.mxu1 %v19040_v4 }
 0x98f   : > { %v10818_v15 = vunpack.c.l.bf16 %v18513_v28  ;;  %v10819_v10 = vunpack.c.h.bf16 %v18513_v28  ;;  %12412 = vmatprep.subr.bf16.mxu1 %v10899_v27  ;;  %v19042_v27 = vpack.c.bf16 %v18469_v26, %v18467_v17  ;;  %v19043_v17 = vpack.c.bf16 %v18465_v24, %v18463_v51 }
 0x990   : > { %v10868_v3 = vsub.f32 %v13752_v8, %v10820_v61  ;;  %v10869_v7 = vsub.f32 %v13753_v13, %v10821_v6 }
 0x991   : > { %v10866_v40 = vsub.f32 %v10687_v1, %v10818_v15  ;;  %v10867_v31 = vsub.f32 %v10690_v56, %v10819_v10  ;;  %v13756_v5 = vpop.f32.mrb[112].mxu0 }
 0x992   : > { %v10901_v36 = vpack.c.bf16 %v10869_v7, %v10868_v3  ;;  %v10703_v25 = vpop.f32.mrb[113].mxu0  ;;  %12413 = vmatpush3.bf16.msra.mxu1 %v19041_v39 }
 0x993   : > { %v10900_v55 = vpack.c.bf16 %v10867_v31, %v10866_v40  ;;  %v13757_v32 = vpop.f32.mrb[114].mxu0 }
 0x994   : > { %v18525_v42 = vpack.c.bf16 %v13757_v32, %v13756_v5  ;;  %v10706_v11 = vpop.f32.mrb[115].mxu0 }
 0x995   : > { %v18527_v37 = vpack.c.bf16 %v10706_v11, %v10703_v25  ;;  %12414 = vmatprep.subr.bf16.mxu1 %v10900_v55 }
 0x996   : > { %v10824_v20 = vunpack.c.l.bf16 %v18525_v42  ;;  %v10825_v8 = vunpack.c.h.bf16 %v18525_v42  ;;  %12415 = vmatpush3.bf16.msra.mxu1 %v19042_v27 }
 0x997   : > { %v10822_v1 = vunpack.c.l.bf16 %v18527_v37  ;;  %v10823_v46 = vunpack.c.h.bf16 %v18527_v37  ;;  %12416 = vmatprep.subr.bf16.mxu1 %v10901_v36  ;;  %13794 = vmatprep.subr.bf16.mxu0 %v18527_v37 }
 0x998   : > { %v10872_v49 = vsub.f32 %v13756_v5, %v10824_v20  ;;  %v10873_v54 = vsub.f32 %v13757_v32, %v10825_v8  ;;  %13795 = vmatpush3.bf16.msra.mxu0 %v18527_v37 }
 0x999   : > { %v10870_v23 = vsub.f32 %v10703_v25, %v10822_v1  ;;  %v10871_v13 = vsub.f32 %v10706_v11, %v10823_v46  ;;  %v13760_v56 = vpop.f32.mrb[116].mxu0  ;;  %13796 = vmatprep.subr.bf16.mxu0 %v18525_v42 }
 0x99a   : > { %v10903_v61 = vpack.c.bf16 %v10873_v54, %v10872_v49  ;;  %v10719_v6 = vpop.f32.mrb[117].mxu0  ;;  %12417 = vmatpush3.bf16.msra.mxu1 %v19043_v17 }
 0x99b   : > { %v10902_v26 = vpack.c.bf16 %v10871_v13, %v10870_v23  ;;  %v13761_v4 = vpop.f32.mrb[118].mxu0 }
 0x99c   : > { %v18542_v15 = vpack.c.bf16 %v13761_v4, %v13760_v56  ;;  %v10722_v10 = vpop.f32.mrb[119].mxu0  ;;  %13797 = vmatpush3.bf16.msra.mxu0 %v18525_v42 }
 0x99d   : > { %v18545_v3 = vpack.c.bf16 %v10722_v10, %v10719_v6  ;;  %10943 = vmatmul.mubr.bf16.vlgmr.msra.gmra.mrb[56].mxu1 %v18177_v57  ;;  %13770 = vmatprep.subr.bf16.mxu1 %v10902_v26 }
 0x99e   : > { %v10828_v7 = vunpack.c.l.bf16 %v18542_v15  ;;  %v10829_v40 = vunpack.c.h.bf16 %v18542_v15  ;;  %13771 = vmatpush3.bf16.msra.mxu1 %v10902_v26  ;;  %10950 = vmatprep.mubr.bf16.mxu1 %v18188_v19 }
 0x99f   : > { %v10826_v51 = vunpack.c.l.bf16 %v18545_v3  ;;  %v10827_v24 = vunpack.c.h.bf16 %v18545_v3  ;;  %13772 = vmatprep.subr.bf16.mxu1 %v10903_v61  ;;  %13798 = vmatprep.subr.bf16.mxu0 %v18545_v3 }
 0x9a0   : > { %v10876_v31 = vsub.f32 %v13760_v56, %v10828_v7  ;;  %v10877_v5 = vsub.f32 %v13761_v4, %v10829_v40  ;;  %13799 = vmatpush3.bf16.msra.mxu0 %v18545_v3 }
 0x9a1   : > { %v10874_v57 = vsub.f32 %v10719_v6, %v10826_v51  ;;  %v10875_v36 = vsub.f32 %v10722_v10, %v10827_v24  ;;  %v13764_v25 = vpop.f32.mrb[120].mxu0  ;;  %13800 = vmatprep.subr.bf16.mxu0 %v18542_v15 }
 0x9a2   : > { %v10905_v39 = vpack.c.bf16 %v10877_v5, %v10876_v31  ;;  %v10735_v55 = vpop.f32.mrb[121].mxu0  ;;  %13773 = vmatpush3.bf16.msra.mxu1 %v10903_v61 }
 0x9a3   : > { %v10904_v19 = vpack.c.bf16 %v10875_v36, %v10874_v57  ;;  %v13765_v32 = vpop.f32.mrb[122].mxu0 }
 0x9a4   : > { %v18556_v11 = vpack.c.bf16 %v13765_v32, %v13764_v25  ;;  %v10738_v20 = vpop.f32.mrb[123].mxu0  ;;  %13801 = vmatpush3.bf16.msra.mxu0 %v18542_v15 }
 0x9a5   : > { %v18559_v8 = vpack.c.bf16 %v10738_v20, %v10735_v55  ;;  %10951 = vmatmul.mubr.bf16.gmra.mrb[60].mxu1 %v18203_v30  ;;  %13774 = vmatprep.subr.bf16.mxu1 %v10904_v19 }
 0x9a6   : > { %v10832_v27 = vunpack.c.l.bf16 %v18556_v11  ;;  %v10833_v1 = vunpack.c.h.bf16 %v18556_v11  ;;  %13775 = vmatpush3.bf16.msra.mxu1 %v10904_v19  ;;  %10958 = vmatprep.mubr.bf16.mxu1 %v18212_v44 }
 0x9a7   : > { %v10830_v46 = vunpack.c.l.bf16 %v18559_v8  ;;  %v10831_v49 = vunpack.c.h.bf16 %v18559_v8  ;;  %13776 = vmatprep.subr.bf16.mxu1 %v10905_v39  ;;  %13802 = vmatprep.subr.bf16.mxu0 %v18559_v8 }
 0x9a8   : > { %v10880_v54 = vsub.f32 %v13764_v25, %v10832_v27  ;;  %v10881_v23 = vsub.f32 %v13765_v32, %v10833_v1  ;;  %13803 = vmatpush3.bf16.msra.mxu0 %v18559_v8 }
 0x9a9   : > { %v10878_v30 = vsub.f32 %v10735_v55, %v10830_v46  ;;  %v10879_v13 = vsub.f32 %v10738_v20, %v10831_v49  ;;  %v13768_v56 = vpop.f32.mrb[124].mxu0  ;;  %13804 = vmatprep.subr.bf16.mxu0 %v18556_v11 }
 0x9aa   : > { %v10907_v61 = vpack.c.bf16 %v10881_v23, %v10880_v54  ;;  %v10751_v6 = vpop.f32.mrb[125].mxu0  ;;  %13777 = vmatpush3.bf16.msra.mxu1 %v10905_v39 }
 0x9ab   : > { %v10906_v44 = vpack.c.bf16 %v10879_v13, %v10878_v30  ;;  %v13769_v17 = vpop.f32.mrb[126].mxu0 }
 0x9ac   : > { %v18570_v26 = vpack.c.bf16 %v13769_v17, %v13768_v56  ;;  %v10754_v4 = vpop.f32.mrb[127].mxu0  ;;  %13805 = vmatpush3.bf16.msra.mxu0 %v18556_v11 }
 0x9ad   : > { %v18573_v10 = vpack.c.bf16 %v10754_v4, %v10751_v6  ;;  %10959 = vmatmul.mubr.bf16.gmra.mrb[64].mxu1 %v18227_v60  ;;  %13778 = vmatprep.subr.bf16.mxu1 %v10906_v44 }
 0x9ae   : > { %v10836_v7 = vunpack.c.l.bf16 %v18570_v26  ;;  %v10837_v40 = vunpack.c.h.bf16 %v18570_v26  ;;  %13779 = vmatpush3.bf16.msra.mxu1 %v10906_v44  ;;  %10966 = vmatprep.mubr.bf16.mxu1 %v18236_v35  ;;  %v14892_v35 = vld [vmem:[%s18693_s8 + $0x8] ss:$12 sps:$4 sm:$0xff]  }
 0x9af   : > { %v10834_v51 = vunpack.c.l.bf16 %v18573_v10  ;;  %v10835_v24 = vunpack.c.h.bf16 %v18573_v10  ;;  %13780 = vmatprep.subr.bf16.mxu1 %v10907_v61  ;;  %13806 = vmatprep.subr.bf16.mxu0 %v18573_v10 }
 0x9b0   : > { %v10884_v31 = vsub.f32 %v13768_v56, %v10836_v7  ;;  %v10885_v5 = vsub.f32 %v13769_v17, %v10837_v40  ;;  %13807 = vmatpush3.bf16.msra.mxu0 %v18573_v10  ;;  %v19044_v56 = vld [vmem:[#allocation23_spill] sm:$0xff] }
 0x9b1   : > { %v10882_v60 = vsub.f32 %v10751_v6, %v10834_v51  ;;  %v10883_v57 = vsub.f32 %v10754_v4, %v10835_v24  ;;  %13808 = vmatprep.subr.bf16.mxu0 %v18570_v26 }
 0x9b2   : > { %v10909_v36 = vpack.c.bf16 %v10885_v5, %v10884_v31  ;;  %13781 = vmatpush3.bf16.msra.mxu1 %v10907_v61 }
 0x9b3   : > { %v10908_v25 = vpack.c.bf16 %v10883_v57, %v10882_v60 }
 0x9b4   : > { %13809 = vmatpush3.bf16.msra.mxu0 %v18570_v26 }
 0x9b5   : > { %10967 = vmatmul.mubr.bf16.gmra.mrb[68].mxu1 %v18251_v9  ;;  %13782 = vmatprep.subr.bf16.mxu1 %v10908_v25  ;;  %v14893_v9 = vld [vmem:[%s18693_s8 + $0x4] ss:$12 sps:$4 sm:$0xff]  }
 0x9b6   : > { %13783 = vmatpush3.bf16.msra.mxu1 %v10908_v25  ;;  %13786 = vmatprep.mubr.bf16.mxu1 %v14892_v35 }
 0x9b7   : > { %13784 = vmatprep.subr.bf16.mxu1 %v10909_v36  ;;  %13811 = vmatmul.mubr.bf16.vlgmr.msra.gmra.mrb[128].mxu0 %v18265_v47 }
 0x9ba   : > { %13785 = vmatpush3.bf16.msra.mxu1 %v10909_v36 }
 0x9bb   : > { %12454 = vmatprep.subr.bf16.mxu1 %v18477_v53 }
 0x9bd   : > { %13787 = vmatmul.mubr.bf16.vlgmr.msra.gmra.mrb[48].mxu1 %v18265_v47  ;;  %v14894_v47 = vld [vmem:[%s18693_s8] ss:$12 sps:$4 sm:$0xff]  }
 0x9be   : > { %12455 = vmatpush3.bf16.msra.mxu1 %v18397_v48  ;;  %13790 = vmatprep.mubr.bf16.mxu1 %v18365_v21  ;;  %v14896_v48 = vld [vmem:[%s18693_s8 + $0x18] ss:$12 sps:$4 sm:$0xff]  }
 0x9bf   : > { %12456 = vmatprep.subr.bf16.mxu1 %v18475_v63 }
 0x9c2   : > { %12457 = vmatpush3.bf16.msra.mxu1 %v18395_v62  ;;  %v14895_v62 = vld [vmem:[%s18693_s8 + $0x1c] ss:$12 sps:$4 sm:$0xff]  }
 0x9c3   : > { %12458 = vmatprep.subr.bf16.mxu1 %v18485_v14  ;;  %v14897_v14 = vld [vmem:[%s18693_s8 + $0x34] ss:$12 sps:$4 sm:$0xff]  }
 0x9c5   : > { %13791 = vmatmul.mubr.bf16.gmra.mrb[52].mxu1 %v18370_v16 }
 0x9c6   : > { %12459 = vmatpush3.bf16.msra.mxu1 %v18417_v52  ;;  %11072 = vmatprep.mubr.bf16.mxu1 %v14893_v9  ;;  %v14899_v52 = vld [vmem:[%s18693_s8 + $0x4c] ss:$12 sps:$4 sm:$0xff]  }
 0x9c7   : > { %12460 = vmatprep.subr.bf16.mxu1 %v18483_v18  ;;  %v14900_v18 = vld [vmem:[%s18693_s8 + $0x48] ss:$12 sps:$4 sm:$0xff]  }
 0x9ca   : > { %12461 = vmatpush3.bf16.msra.mxu1 %v18415_v58  ;;  %v14898_v58 = vld [vmem:[%s18693_s8 + $0x30] ss:$12 sps:$4 sm:$0xff]  }
 0x9cb   : > { %12462 = vmatprep.subr.bf16.mxu1 %v18499_v45 }
 0x9ce   : > { %12463 = vmatpush3.bf16.msra.mxu1 %v18437_v43 }
 0x9cf   : > { %12464 = vmatprep.subr.bf16.mxu1 %v18497_v34 }
 0x9d2   : > { %12465 = vmatpush3.bf16.msra.mxu1 %v18435_v59  ;;  %v11677_v59 = vld [vmem:[%s18689_s4] ss:$0 sm:$0xff] }
 0x9d3   : > { %12466 = vmatprep.subr.bf16.mxu1 %v18513_v28  ;;  %v13842_v53 = vadd.f32 %v18379_v12, %v11677_v59  ;;  %v13849_v32 = vadd.f32 %v18385_v41, %v11677_v59  ;;  %v13869_v27 = vadd.f32 %v18387_v0, %v11677_v59  ;;  %v13881_v54 = vadd.f32 %v18389_v2, %v11677_v59  ;;  %v19045_v0 = vld [vmem:[#allocation20_spill] sm:$0xff] }
 0x9d4   : > { %v13863_v61 = vadd.f32 %v19044_v56, %v11677_v59 }
 0x9d6   : > { %12467 = vmatpush3.bf16.msra.mxu1 %v18457_v33 }
 0x9d7   : > { %12468 = vmatprep.subr.bf16.mxu1 %v18511_v38 }
 0x9da   : > { %12469 = vmatpush3.bf16.msra.mxu1 %v18455_v22 }
 0x9db   : > { %13818 = vmatprep.subr.bf16.mxu1 %v18527_v37 }
 0x9dd   : > { %11073 = vmatmul.mubr.bf16.vlgmr.msra.gmra.mrb[72].mxu1 %v14894_v47 }
 0x9de   : > { %13826 = vmatpush3.bf16.msra.mxu1 %v18527_v37  ;;  %11080 = vmatprep.mubr.bf16.mxu1 %v14895_v62 }
 0x9df   : > { %13819 = vmatprep.subr.bf16.mxu1 %v18525_v42 }
 0x9e2   : > { %13827 = vmatpush3.bf16.msra.mxu1 %v18525_v42 }
 0x9e3   : > { %13820 = vmatprep.subr.bf16.mxu1 %v18545_v3 }
 0x9e5   : > { %11081 = vmatmul.mubr.bf16.gmra.mrb[76].mxu1 %v14896_v48 }
 0x9e6   : > { %13828 = vmatpush3.bf16.msra.mxu1 %v18545_v3  ;;  %11088 = vmatprep.mubr.bf16.mxu1 %v14897_v14  ;;  %v13835_v3 = vadd.f32 %v18383_v29, %v11677_v59 }
 0x9e7   : > { %13821 = vmatprep.subr.bf16.mxu1 %v18542_v15 }
 0x9ea   : > { %13829 = vmatpush3.bf16.msra.mxu1 %v18542_v15 }
 0x9eb   : > { %13822 = vmatprep.subr.bf16.mxu1 %v18559_v8 }
 0x9ed   : > { %11089 = vmatmul.mubr.bf16.gmra.mrb[80].mxu1 %v14898_v58 }
 0x9ee   : > { %13830 = vmatpush3.bf16.msra.mxu1 %v18559_v8  ;;  %11096 = vmatprep.mubr.bf16.mxu1 %v14899_v52  ;;  %v11686_v52 = vld [vmem:[%s18691_s6] ss:$0 sm:$0xff] }
 0x9ef   : > { %13823 = vmatprep.subr.bf16.mxu1 %v18556_v11 }
 0x9f2   : > { %13831 = vmatpush3.bf16.msra.mxu1 %v18556_v11 }
 0x9f3   : > { %13824 = vmatprep.subr.bf16.mxu1 %v18573_v10 }
 0x9f5   : > { %11097 = vmatmul.mubr.bf16.gmra.mrb[84].mxu1 %v14900_v18 }
 0x9f6   : > { %13832 = vmatpush3.bf16.msra.mxu1 %v18573_v10  ;;  %13814 = vmatprep.mubr.bf16.mxu1 %v18365_v21  ;;  %v13856_v21 = vadd.f32 %v18381_v50, %v11677_v59  ;;  %v13875_v10 = vadd.f32 %v19045_v0, %v11677_v59 }
 0x9f7   : > { %13825 = vmatprep.subr.bf16.mxu1 %v18570_v26 }
 0x9fa   : > { %13833 = vmatpush3.bf16.msra.mxu1 %v18570_v26 }
 0x9fd   : > { %13815 = vmatmul.mubr.bf16.vlgmr.msra.gmra.mrb[52].mxu1 %v18370_v16 }
 0xa70   : > { %v12418_v43 = vpop.f32.mrb[56].mxu1 }
 0xa71   : > { %v12419_v22 = vpop.f32.mrb[57].mxu1 }
 0xa72   : > { %v12420_v33 = vadd.f32 %v12419_v22, %v12418_v43  ;;  %v12421_v63 = vpop.f32.mrb[58].mxu1 }
 0xa73   : > { %v12422_v34 = vpop.f32.mrb[59].mxu1 }
 0xa74   : > { %v12423_v45 = vadd.f32 %v12422_v34, %v12421_v63  ;;  %v13843_v38 = vadd.f32 %v13842_v53, %v12420_v33 }
 0xa76   : > { %v13857_v28 = vadd.f32 %v13856_v21, %v12423_v45 }
 0xa78   : > { %v12424_v42 = vpop.f32.mrb[60].mxu1 }
 0xa79   : > { %v12425_v37 = vpop.f32.mrb[61].mxu1 }
 0xa7a   : > { %v12426_v15 = vadd.f32 %v12425_v37, %v12424_v42  ;;  %v12427_v16 = vpop.f32.mrb[62].mxu1 }
 0xa7b   : > { %v12428_v39 = vpop.f32.mrb[63].mxu1 }
 0xa7c   : > { %v12429_v55 = vadd.f32 %v12428_v39, %v12427_v16  ;;  %v13836_v19 = vadd.f32 %v13835_v3, %v12426_v15 }
 0xa7e   : > { %v13850_v11 = vadd.f32 %v13849_v32, %v12429_v55 }
 0xa80   : > { %v12430_v20 = vpop.f32.mrb[64].mxu1 }
 0xa81   : > { %v12431_v12 = vpop.f32.mrb[65].mxu1 }
 0xa82   : > { %v12432_v8 = vadd.f32 %v12431_v12, %v12430_v20  ;;  %v12433_v1 = vpop.f32.mrb[66].mxu1 }
 0xa83   : > { %v12434_v50 = vpop.f32.mrb[67].mxu1 }
 0xa84   : > { %v18659_v46 = vadd.f32 %v13869_v27, %v12432_v8  ;;  %v12435_v49 = vadd.f32 %v12434_v50, %v12433_v1 }
 0xa86   : > { %v13882_v23 = vadd.f32 %v13881_v54, %v12435_v49 }
 0xa88   : > { %v12436_v29 = vpop.f32.mrb[68].mxu1 }
 0xa89   : > { %v12437_v30 = vpop.f32.mrb[69].mxu1 }
 0xa8a   : > { %v12438_v13 = vadd.f32 %v12437_v30, %v12436_v29  ;;  %v12439_v41 = vpop.f32.mrb[70].mxu1  ;;  %v13812_v6 = vpop.f32.mrb[128].mxu0 }
 0xa8b   : > { %v12440_v44 = vpop.f32.mrb[71].mxu1  ;;  %v11139_v17 = vpop.f32.mrb[129].mxu0 }
 0xa8c   : > { %v13864_v26 = vadd.f32 %v13863_v61, %v12438_v13  ;;  %v12441_v4 = vadd.f32 %v12440_v44, %v12439_v41  ;;  %v13813_v7 = vpop.f32.mrb[130].mxu0 }
 0xa8d   : > { %v11142_v40 = vpop.f32.mrb[131].mxu0 }
 0xa8e   : > { %v13876_v51 = vadd.f32 %v13875_v10, %v12441_v4 }
 0xa90   : > { %v13788_v24 = vpop.f32.mrb[48].mxu1 }
 0xa91   : > { %v13837_v2 = vadd.f32 %v13836_v19, %v13788_v24  ;;  %v11009_v31 = vpop.f32.mrb[49].mxu1 }
 0xa92   : > { %v13844_v5 = vadd.f32 %v13843_v38, %v11009_v31  ;;  %v13789_v60 = vpop.f32.mrb[50].mxu1 }
 0xa93   : > { %v13851_v57 = vadd.f32 %v13850_v11, %v13789_v60  ;;  %v11012_v36 = vpop.f32.mrb[51].mxu1 }
 0xa94   : > { %v13858_v25 = vadd.f32 %v13857_v28, %v11012_v36 }
 0xab0   : > { %v12470_v35 = vpop.f32.mrb[72].mxu1 }
 0xab1   : > { %v12471_v9 = vpop.f32.mrb[73].mxu1 }
 0xab2   : > { %v12472_v47 = vadd.f32 %v12471_v9, %v12470_v35  ;;  %v12473_v62 = vpop.f32.mrb[74].mxu1 }
 0xab3   : > { %v12474_v48 = vpop.f32.mrb[75].mxu1 }
 0xab4   : > { %v12475_v14 = vadd.f32 %v12474_v48, %v12473_v62  ;;  %v13845_v58 = vadd.f32 %v13844_v5, %v12472_v47 }
 0xab6   : > { %v13846_v18 = vadd.f32 %v13845_v58, %v11139_v17  ;;  %v13859_v59 = vadd.f32 %v13858_v25, %v12475_v14 }
 0xab8   : > { %v13847_v43 = vadd.f32 %v13846_v18, %v11686_v52  ;;  %v13860_v22 = vadd.f32 %v13859_v59, %v11142_v40  ;;  %v12476_v33 = vpop.f32.mrb[76].mxu1 }
 0xab9   : > { %v12477_v63 = vpop.f32.mrb[77].mxu1 }
 0xaba   : > { %11193 = vst [vmem:[%s18671_s13] sm:$0xff] %v13847_v43  ;;  %v13861_v53 = vadd.f32 %v13860_v22, %v11686_v52  ;;  %v12478_v34 = vadd.f32 %v12477_v63, %v12476_v33  ;;  %v12479_v45 = vpop.f32.mrb[78].mxu1 }
 0xabb   : > { %v12480_v38 = vpop.f32.mrb[79].mxu1 }
 0xabc   : > { %11194 = vst [vmem:[%s18671_s13 + $0x8] sm:$0xff] %v13861_v53  ;;  %v13838_v21 = vadd.f32 %v13837_v2, %v12478_v34  ;;  %v12481_v28 = vadd.f32 %v12480_v38, %v12479_v45 }
 0xabe   : > { %v13839_v42 = vadd.f32 %v13838_v21, %v13812_v6  ;;  %v13852_v37 = vadd.f32 %v13851_v57, %v12481_v28 }
 0xac0   : > { %v13840_v15 = vadd.f32 %v13839_v42, %v11686_v52  ;;  %v13853_v16 = vadd.f32 %v13852_v37, %v13813_v7  ;;  %v12482_v3 = vpop.f32.mrb[80].mxu1 }
 0xac1   : > { %v12483_v39 = vpop.f32.mrb[81].mxu1 }
 0xac2   : > { %11195 = vst [vmem:[%s18671_s13 + $0x10] sm:$0xff] %v13840_v15  ;;  %v13854_v55 = vadd.f32 %v13853_v16, %v11686_v52  ;;  %v12484_v19 = vadd.f32 %v12483_v39, %v12482_v3  ;;  %v12485_v32 = vpop.f32.mrb[82].mxu1 }
 0xac3   : > { %v12486_v11 = vpop.f32.mrb[83].mxu1 }
 0xac4   : > { %11196 = vst [vmem:[%s18671_s13 + $0x18] sm:$0xff] %v13854_v55  ;;  %v12487_v20 = vadd.f32 %v12486_v11, %v12485_v32  ;;  %v13871_v12 = vadd.f32 %v18659_v46, %v12484_v19 }
 0xac6   : > { %v13883_v8 = vadd.f32 %v13882_v23, %v12487_v20 }
 0xac8   : > { %v12488_v27 = vpop.f32.mrb[84].mxu1 }
 0xac9   : > { %v12489_v1 = vpop.f32.mrb[85].mxu1 }
 0xaca   : > { %v12490_v50 = vadd.f32 %v12489_v1, %v12488_v27  ;;  %v12491_v49 = vpop.f32.mrb[86].mxu1 }
 0xacb   : > { %v12492_v54 = vpop.f32.mrb[87].mxu1 }
 0xacc   : > { %v12493_v29 = vadd.f32 %v12492_v54, %v12491_v49  ;;  %v13865_v30 = vadd.f32 %v13864_v26, %v12490_v50 }
 0xace   : > { %v13877_v13 = vadd.f32 %v13876_v51, %v12493_v29 }
 0xad0   : > { %v13816_v56 = vpop.f32.mrb[52].mxu1 }
 0xad1   : > { %v13866_v61 = vadd.f32 %v13865_v30, %v13816_v56  ;;  %v11155_v41 = vpop.f32.mrb[53].mxu1 }
 0xad2   : > { %v13872_v6 = vadd.f32 %v13871_v12, %v11155_v41  ;;  %v13817_v44 = vpop.f32.mrb[54].mxu1 }
 0xad3   : > { %v13867_v17 = vadd.f32 %v13866_v61, %v11686_v52  ;;  %v13878_v46 = vadd.f32 %v13877_v13, %v13817_v44  ;;  %v11158_v23 = vpop.f32.mrb[55].mxu1 }
 0xad4   : > { %v13873_v4 = vadd.f32 %v13872_v6, %v11686_v52  ;;  %v13884_v0 = vadd.f32 %v13883_v8, %v11158_v23 }
 0xad5   : > { %11199 = vst [vmem:[%s18671_s13 + $0x30] sm:$0xff] %v13867_v17  ;;  %v13879_v10 = vadd.f32 %v13878_v46, %v11686_v52 }
 0xad6   : > { %11197 = vst [vmem:[%s18671_s13 + $0x20] sm:$0xff] %v13873_v4  ;;  %v13885_v7 = vadd.f32 %v13884_v0, %v11686_v52 }
 0xad7   : > { %11200 = vst [vmem:[%s18671_s13 + $0x38] sm:$0xff] %v13879_v10 }
 0xad8   : > { %11198 = vst [vmem:[%s18671_s13 + $0x28] sm:$0xff] %v13885_v7 }
 0xad9 PF: > { %s19_s30 = sadd.s32 1, %s14907_s30  }
 0xada   : > { %p16_p4 = scmp.ge.s32.totalorder %s19_s30, 4  }
 0xadc   :  { %18 = sbr.rel (!%p16_p4) target bundleno = 1 (0x1), region = 102 }

</bundles_post_ra>
